<compile_context>
chip_gen: v7x
topology: tpu7x:2x2x1
jax: 0.10.0
libtpu: 0.0.40
codegen_flags: <defaults>
</compile_context>

<pallas_src>
import jax
import jax.numpy as jnp
from jax import lax
from jax.experimental import pallas as pl
from jax.experimental.pallas import tpu as pltpu

_BN_EPS = 1e-5
VMEM = pl.BlockSpec(memory_space=pltpu.MemorySpace.VMEM)


def _vmem_params(*operands, out_bytes=0):
    """CompilerParams with an explicit VMEM budget derived from the operands."""
    op_bytes = sum(int(o.size) * o.dtype.itemsize for o in operands) + int(out_bytes)
    # whole-array operands + f32 intermediates + headroom; cap below v7x's
    # 64 MiB physical VMEM, floor at the v5e default.
    limit = min(48 << 20, max(16 << 20, 6 * op_bytes))
    return pltpu.CompilerParams(vmem_limit_bytes=int(limit))


# ---------------------------------------------------------------------------
# Pallas kernels
# ---------------------------------------------------------------------------
def _conv_bn_pool_relu_kernel(w_ref, p_ref, b_ref, g_ref, beta_ref, o_ref):
    """relu(maxpool2x2(batchnorm2d(conv(x) + b))) for one conv layer.

    w:        (Cout, K)   bf16 filter matrix, K ordered (kh, kw, cin)
    p:        (4, K, M)   bf16 im2col patches, one slab per 2x2 pooling phase,
                          M = N * Ho/2 * Wo/2, columns ordered (n, i, j)
    b/g/beta: (Cout, 1)   f32 conv bias, BN gamma, BN beta
    o:        (Cout, M)

    BatchNorm2d uses batch statistics over all 4*M pre-pool output positions
    (single data pass). MaxPool2d(2) == elementwise max over the 4 normalized
    phase slabs; ReLU last (matches conv -> bn -> pool -> relu ordering).
    """
    w = w_ref[...]
    b = b_ref[...]
    ys = [jnp.dot(w, p_ref[i], preferred_element_type=jnp.float32) + b
          for i in range(4)]
    m_total = 4.0 * ys[0].shape[1]

    s = sum(jnp.sum(y, axis=1, keepdims=True) for y in ys)
    ss = sum(jnp.sum(y * y, axis=1, keepdims=True) for y in ys)
    mean = s / m_total
    var = jnp.maximum(ss / m_total - mean * mean, 0.0)     # biased batch variance
    scale = g_ref[...] * lax.rsqrt(var + _BN_EPS)
    shift = beta_ref[...] - mean * scale

    z01 = jnp.maximum(ys[0] * scale + shift, ys[1] * scale + shift)
    z23 = jnp.maximum(ys[2] * scale + shift, ys[3] * scale + shift)
    o_ref[...] = jnp.maximum(jnp.maximum(z01, z23), 0.0).astype(o_ref.dtype)


def _heads_kernel(f_ref,
                  w1_ref, b1_ref, g1_ref, be1_ref,
                  cw2_ref, cb2_ref, cg2_ref, cbe2_ref,
                  cw3_ref, cb3_ref,
                  dw2_ref, db2_ref,
                  class_ref, dom_ref):
    """Fused class_classifier + domain_classifier on the shared (N, 800) features."""
    f = f_ref[...]
    n = f.shape[0]

    def bn1d(h, g, b):
        mean = jnp.sum(h, axis=0, keepdims=True) / n
        var = jnp.maximum(jnp.sum(h * h, axis=0, keepdims=True) / n - mean * mean, 0.0)
        return (h - mean) * lax.rsqrt(var + _BN_EPS) * g + b

    def log_softmax(z):
        z = z - jnp.max(z, axis=1, keepdims=True)
        return z - jnp.log(jnp.sum(jnp.exp(z), axis=1, keepdims=True))

    # Merged fc1 (class = cols 0..99, domain = cols 100..199); BatchNorm1d is
    # per-feature over the batch, so merging the two heads' fc1/bn1 is exact.
    h = jnp.dot(f, w1_ref[...], preferred_element_type=jnp.float32) + b1_ref[...]
    h = jnp.maximum(bn1d(h, g1_ref[...], be1_ref[...]), 0.0)               # (N, 200)

    # class branch: fc2/fc3 weights are zero-padded to 200 input rows so the
    # merged activation feeds them directly (no in-kernel slicing).
    hc = jnp.dot(h, cw2_ref[...], preferred_element_type=jnp.float32) + cb2_ref[...]
    hc = jnp.maximum(bn1d(hc, cg2_ref[...], cbe2_ref[...]), 0.0)
    zc = jnp.dot(hc, cw3_ref[...], preferred_element_type=jnp.float32) + cb3_ref[...]
    class_ref[...] = log_softmax(zc).astype(class_ref.dtype)

    # domain branch (gradient reversal is identity in the forward pass)
    zd = jnp.dot(h, dw2_ref[...], preferred_element_type=jnp.float32) + db2_ref[...]
    dom_ref[...] = log_softmax(zd).astype(dom_ref.dtype)


# ---------------------------------------------------------------------------
# pallas_call wrappers
# ---------------------------------------------------------------------------
def pallas_conv_block(patches4, w_mat, b, g, beta, out_dtype):
    cout = w_mat.shape[0]
    m = patches4.shape[2]
    return pl.pallas_call(
        _conv_bn_pool_relu_kernel,
        out_shape=jax.ShapeDtypeStruct((cout, m), out_dtype),
        in_specs=[VMEM] * 5,
        out_specs=VMEM,
        compiler_params=_vmem_params(w_mat, patches4, b, g, beta,
                                     out_bytes=cout * m * 4),
    )(w_mat, patches4, b, g, beta)


def pallas_heads(feats, prep):
    n = feats.shape[0]
    n_cls = prep["cw3"].shape[1]
    n_dom = prep["dw2"].shape[1]
    args = (feats,
            prep["w1m"], prep["b1m"], prep["g1m"], prep["be1m"],
            prep["cw2"], prep["cb2"], prep["cg2"], prep["cbe2"],
            prep["cw3"], prep["cb3"],
            prep["dw2"], prep["db2"])
    return pl.pallas_call(
        _heads_kernel,
        out_shape=(jax.ShapeDtypeStruct((n, n_cls), jnp.float32),
                   jax.ShapeDtypeStruct((n, n_dom), jnp.float32)),
        in_specs=[VMEM] * len(args),
        out_specs=(VMEM, VMEM),
        compiler_params=_vmem_params(*args, out_bytes=n * (n_cls + n_dom) * 4),
    )(*args)


# ---------------------------------------------------------------------------
# XLA glue (fused inside jax.jit; arrays involved are small)
# ---------------------------------------------------------------------------
def _im2col_pooled(x_nhwc, k):
    """NHWC -> (4, k*k*C, N*(Ho/2)*(Wo/2)) im2col, one slab per 2x2 pool phase.

    Slab (2*dy+dx), column (n, i, j) holds the flattened (kh, kw, cin) patch of
    conv-output position (2i+dy, 2j+dx). The conv kernel max-reduces the 4
    slabs after BatchNorm, which is exactly MaxPool2d(2) of the conv output.
    """
    n, h, w, c = x_nhwc.shape
    ho, wo = h - k + 1, w - k + 1
    hp, wp = ho // 2, wo // 2
    slabs = []
    for dy in range(2):
        for dx in range(2):
            taps = []
            for dh in range(k):
                for dw in range(k):
                    r0, c0 = dy + dh, dx + dw
                    taps.append(x_nhwc[:, r0:r0 + 2 * hp - 1:2,
                                       c0:c0 + 2 * wp - 1:2, :])   # (N, hp, wp, C)
            p = jnp.stack(taps, axis=3)                            # (N, hp, wp, k*k, C)
            slabs.append(p.reshape(n * hp * wp, k * k * c).T)      # (K, M)
    return jnp.stack(slabs, axis=0)                                # (4, K, M)


# ---------------------------------------------------------------------------
# Parameters
# ---------------------------------------------------------------------------
def init_params(key):
    """Torch-layout parameters of DANNMnistModel."""
    ks = jax.random.split(key, 12)
    s = 0.05
    norm = lambda k, shape: s * jax.random.normal(k, shape, jnp.float32)
    return {
        "conv1_w": norm(ks[0], (64, 3, 5, 5)),  "conv1_b": jnp.zeros((64,), jnp.float32),
        "bn1_g": jnp.ones((64,), jnp.float32),  "bn1_b": jnp.zeros((64,), jnp.float32),
        "conv2_w": norm(ks[1], (50, 64, 5, 5)), "conv2_b": jnp.zeros((50,), jnp.float32),
        "bn2_g": jnp.ones((50,), jnp.float32),  "bn2_b": jnp.zeros((50,), jnp.float32),
        "c_fc1_w": norm(ks[2], (100, 800)),     "c_fc1_b": norm(ks[3], (100,)),
        "c_bn1_g": jnp.ones((100,), jnp.float32), "c_bn1_b": jnp.zeros((100,), jnp.float32),
        "c_fc2_w": norm(ks[4], (100, 100)),     "c_fc2_b": norm(ks[5], (100,)),
        "c_bn2_g": jnp.ones((100,), jnp.float32), "c_bn2_b": jnp.zeros((100,), jnp.float32),
        "c_fc3_w": norm(ks[6], (10, 100)),      "c_fc3_b": norm(ks[7], (10,)),
        "d_fc1_w": norm(ks[8], (100, 800)),     "d_fc1_b": norm(ks[9], (100,)),
        "d_bn1_g": jnp.ones((100,), jnp.float32), "d_bn1_b": jnp.zeros((100,), jnp.float32),
        "d_fc2_w": norm(ks[10], (2, 100)),      "d_fc2_b": norm(ks[11], (2,)),
    }


def prepare_params(p):
    """One-time (eager) conversion of torch-layout params to kernel layout."""
    f32 = jnp.float32
    col = lambda v: v.reshape(-1, 1).astype(f32)
    row = lambda v: v.reshape(1, -1).astype(f32)

    # conv filter matrices, (Cout, kh*kw*cin) ordering, bf16 MXU operands
    w1 = p["conv1_w"].transpose(0, 2, 3, 1).reshape(p["conv1_w"].shape[0], -1)
    w2 = p["conv2_w"].transpose(0, 2, 3, 1).reshape(p["conv2_w"].shape[0], -1)

    n_c = p["c_fc1_w"].shape[0]          # 100 (class branch width)
    n_d = p["d_fc1_w"].shape[0]          # 100 (domain branch width)

    # merged fc1 / bn1 of both heads: columns [0:100)=class, [100:200)=domain
    w1m = jnp.concatenate([p["c_fc1_w"], p["d_fc1_w"]], axis=0).T.astype(f32)   # (800, 200)
    b1m = row(jnp.concatenate([p["c_fc1_b"], p["d_fc1_b"]]))
    g1m = row(jnp.concatenate([p["c_bn1_g"], p["d_bn1_g"]]))
    be1m = row(jnp.concatenate([p["c_bn1_b"], p["d_bn1_b"]]))

    # downstream weights zero-padded to 200 input rows (no in-kernel slicing)
    cw2 = jnp.concatenate([p["c_fc2_w"].T.astype(f32),
                           jnp.zeros((n_d, p["c_fc2_w"].shape[0]), f32)], axis=0)  # (200, 100)
    dw2 = jnp.concatenate([jnp.zeros((n_c, p["d_fc2_w"].shape[0]), f32),
                           p["d_fc2_w"].T.astype(f32)], axis=0)                    # (200, 2)

    return {
        "w1": w1.astype(jnp.bfloat16), "b1": col(p["conv1_b"]),
        "g1": col(p["bn1_g"]), "be1": col(p["bn1_b"]),
        "w2": w2.astype(jnp.bfloat16), "b2": col(p["conv2_b"]),
        "g2": col(p["bn2_g"]), "be2": col(p["bn2_b"]),
        "w1m": w1m, "b1m": b1m, "g1m": g1m, "be1m": be1m,
        "cw2": cw2, "cb2": row(p["c_fc2_b"]),
        "cg2": row(p["c_bn2_g"]), "cbe2": row(p["c_bn2_b"]),
        "cw3": p["c_fc3_w"].T.astype(f32), "cb3": row(p["c_fc3_b"]),
        "dw2": dw2, "db2": row(p["d_fc2_b"]),
    }


# ---------------------------------------------------------------------------
# Forward
# ---------------------------------------------------------------------------
def dann_mnist_forward(x, prep, delta=1.0):
    """x: (N, 1|3, 28, 28). Returns (class log-probs (N,10), domain log-probs (N,2))."""
    del delta  # ReverseLayerGrad is identity in the forward pass
    n = x.shape[0]
    x = jnp.broadcast_to(x, (n, 3, 28, 28)).astype(jnp.float32)   # torch .expand
    x = x.transpose(0, 2, 3, 1)                                   # NHWC

    # feature block 1: conv1 -> bn1 -> pool1 -> relu1 (one kernel, pool fused)
    p1 = _im2col_pooled(x, 5).astype(jnp.bfloat16)                # (4, 75, N*144)
    h1 = pallas_conv_block(p1, prep["w1"], prep["b1"], prep["g1"], prep["be1"],
                           out_dtype=jnp.bfloat16)                # (64, N*144)

    # feature block 2: conv2 -> bn2 -> (drop=id) -> pool2 -> relu2 (one kernel)
    # TODO(synk): for large batch, replace this glue im2col with an in-kernel
    # 25-tap loop / gridded M (two-pass BN stats, "parallel" semantics).
    x2 = h1.reshape(64, n, 12, 12).transpose(1, 2, 3, 0)          # (N, 12, 12, 64) bf16
    p2 = _im2col_pooled(x2, 5)                                    # (4, 1600, N*16) bf16
    h2 = pallas_conv_block(p2, prep["w2"], prep["b2"], prep["g2"], prep["be2"],
                           out_dtype=jnp.float32)                 # (50, N*16)

    # torch .view(-1, 50*4*4): channel-major flatten
    feats = h2.reshape(50, n, 16).transpose(1, 0, 2).reshape(n, 800)

    # fused class + domain heads
    class_out, domain_out = pallas_heads(feats, prep)
    return class_out, domain_out


# ---------------------------------------------------------------------------
if __name__ == "__main__":
    key = jax.random.PRNGKey(0)
    k_x, k_p = jax.random.split(key)

    # N multiple of 8 -> conv output lane dims (N*144, N*16) are 128-aligned.
    N = 8
    x = jax.random.normal(k_x, (N, 1, 28, 28), jnp.float32)   # MNIST-like input
    params = init_params(k_p)
    prep = prepare_params(params)   # one-time layout prep (no per-call transposes)

    fwd = jax.jit(dann_mnist_forward)
    class_output, domain_output = fwd(x, prep)
    jax.block_until_ready((class_output, domain_output))

    assert class_output.shape == (N, 10)
    assert domain_output.shape == (N, 2)
    assert bool(jnp.all(jnp.isfinite(class_output)))
    assert bool(jnp.all(jnp.isfinite(domain_output)))
    # log-softmax rows must exp-sum to 1
    assert bool(jnp.allclose(jnp.exp(class_output).sum(-1), 1.0, atol=1e-4))
    assert bool(jnp.allclose(jnp.exp(domain_output).sum(-1), 1.0, atol=1e-4))
    print("KERNEL_OK")
</pallas_src>

<mosaic_0001>
module attributes {stable_mosaic.version = 11 : i64} {
  func.func @_conv_bn_pool_relu_kernel(%arg0: memref<64x75xbf16, #tpu.memory_space<vmem>>, %arg1: memref<4x75x1152xbf16, #tpu.memory_space<vmem>>, %arg2: memref<64x1xf32, #tpu.memory_space<vmem>>, %arg3: memref<64x1xf32, #tpu.memory_space<vmem>>, %arg4: memref<64x1xf32, #tpu.memory_space<vmem>>, %arg5: memref<64x1152xbf16, #tpu.memory_space<vmem>>) attributes {dimension_semantics = [], scalar_prefetch = 0 : i64, scratch_operands = 0 : i64, tpu.core_type = #tpu.core_type<tc>} {
    %c0 = arith.constant 0 : index
    %c0_0 = arith.constant 0 : index
    %0 = vector.load %arg0[%c0, %c0_0] : memref<64x75xbf16, #tpu.memory_space<vmem>>, vector<64x75xbf16>
    %c0_1 = arith.constant 0 : index
    %c0_2 = arith.constant 0 : index
    %1 = vector.load %arg2[%c0_1, %c0_2] : memref<64x1xf32, #tpu.memory_space<vmem>>, vector<64x1xf32>
    %c0_3 = arith.constant 0 : index
    %c0_4 = arith.constant 0 : index
    %c0_5 = arith.constant 0 : index
    %2 = vector.load %arg1[%c0_3, %c0_4, %c0_5] : memref<4x75x1152xbf16, #tpu.memory_space<vmem>>, vector<1x75x1152xbf16>
    %3 = vector.shape_cast %2 : vector<1x75x1152xbf16> to vector<75x1152xbf16>
    %cst = arith.constant dense<0.000000e+00> : vector<64x1152xf32>
    %4 = tpu.matmul %0, %3, %cst {dimension_numbers = #tpu.dot_dimension_numbers<[1], [0], [0], [1], [0, 0, 1, 1], [], []>} : vector<64x75xbf16>, vector<75x1152xbf16>, vector<64x1152xf32> -> vector<64x1152xf32>
    %5 = vector.broadcast %1 : vector<64x1xf32> to vector<64x1152xf32>
    %6 = arith.addf %4, %5 : vector<64x1152xf32>
    %c1 = arith.constant 1 : index
    %c0_6 = arith.constant 0 : index
    %c0_7 = arith.constant 0 : index
    %7 = vector.load %arg1[%c1, %c0_6, %c0_7] : memref<4x75x1152xbf16, #tpu.memory_space<vmem>>, vector<1x75x1152xbf16>
    %8 = vector.shape_cast %7 : vector<1x75x1152xbf16> to vector<75x1152xbf16>
    %cst_8 = arith.constant dense<0.000000e+00> : vector<64x1152xf32>
    %9 = tpu.matmul %0, %8, %cst_8 {dimension_numbers = #tpu.dot_dimension_numbers<[1], [0], [0], [1], [0, 0, 1, 1], [], []>} : vector<64x75xbf16>, vector<75x1152xbf16>, vector<64x1152xf32> -> vector<64x1152xf32>
    %10 = vector.broadcast %1 : vector<64x1xf32> to vector<64x1152xf32>
    %11 = arith.addf %9, %10 : vector<64x1152xf32>
    %c2 = arith.constant 2 : index
    %c0_9 = arith.constant 0 : index
    %c0_10 = arith.constant 0 : index
    %12 = vector.load %arg1[%c2, %c0_9, %c0_10] : memref<4x75x1152xbf16, #tpu.memory_space<vmem>>, vector<1x75x1152xbf16>
    %13 = vector.shape_cast %12 : vector<1x75x1152xbf16> to vector<75x1152xbf16>
    %cst_11 = arith.constant dense<0.000000e+00> : vector<64x1152xf32>
    %14 = tpu.matmul %0, %13, %cst_11 {dimension_numbers = #tpu.dot_dimension_numbers<[1], [0], [0], [1], [0, 0, 1, 1], [], []>} : vector<64x75xbf16>, vector<75x1152xbf16>, vector<64x1152xf32> -> vector<64x1152xf32>
    %15 = vector.broadcast %1 : vector<64x1xf32> to vector<64x1152xf32>
    %16 = arith.addf %14, %15 : vector<64x1152xf32>
    %c3 = arith.constant 3 : index
    %c0_12 = arith.constant 0 : index
    %c0_13 = arith.constant 0 : index
    %17 = vector.load %arg1[%c3, %c0_12, %c0_13] : memref<4x75x1152xbf16, #tpu.memory_space<vmem>>, vector<1x75x1152xbf16>
    %18 = vector.shape_cast %17 : vector<1x75x1152xbf16> to vector<75x1152xbf16>
    %cst_14 = arith.constant dense<0.000000e+00> : vector<64x1152xf32>
    %19 = tpu.matmul %0, %18, %cst_14 {dimension_numbers = #tpu.dot_dimension_numbers<[1], [0], [0], [1], [0, 0, 1, 1], [], []>} : vector<64x75xbf16>, vector<75x1152xbf16>, vector<64x1152xf32> -> vector<64x1152xf32>
    %20 = vector.broadcast %1 : vector<64x1xf32> to vector<64x1152xf32>
    %21 = arith.addf %19, %20 : vector<64x1152xf32>
    %cst_15 = arith.constant dense<0.000000e+00> : vector<64xf32>
    %22 = vector.multi_reduction <add>, %6, %cst_15 [1] : vector<64x1152xf32> to vector<64xf32>
    %23 = vector.shape_cast %22 : vector<64xf32> to vector<64x1xf32>
    %cst_16 = arith.constant 0.000000e+00 : f32
    %24 = vector.broadcast %cst_16 : f32 to vector<64x1xf32>
    %25 = arith.addf %24, %23 : vector<64x1xf32>
    %cst_17 = arith.constant dense<0.000000e+00> : vector<64xf32>
    %26 = vector.multi_reduction <add>, %11, %cst_17 [1] : vector<64x1152xf32> to vector<64xf32>
    %27 = vector.shape_cast %26 : vector<64xf32> to vector<64x1xf32>
    %28 = arith.addf %25, %27 : vector<64x1xf32>
    %cst_18 = arith.constant dense<0.000000e+00> : vector<64xf32>
    %29 = vector.multi_reduction <add>, %16, %cst_18 [1] : vector<64x1152xf32> to vector<64xf32>
    %30 = vector.shape_cast %29 : vector<64xf32> to vector<64x1xf32>
    %31 = arith.addf %28, %30 : vector<64x1xf32>
    %cst_19 = arith.constant dense<0.000000e+00> : vector<64xf32>
    %32 = vector.multi_reduction <add>, %21, %cst_19 [1] : vector<64x1152xf32> to vector<64xf32>
    %33 = vector.shape_cast %32 : vector<64xf32> to vector<64x1xf32>
    %34 = arith.addf %31, %33 : vector<64x1xf32>
    %35 = arith.mulf %6, %6 : vector<64x1152xf32>
    %cst_20 = arith.constant dense<0.000000e+00> : vector<64xf32>
    %36 = vector.multi_reduction <add>, %35, %cst_20 [1] : vector<64x1152xf32> to vector<64xf32>
    %37 = vector.shape_cast %36 : vector<64xf32> to vector<64x1xf32>
    %cst_21 = arith.constant 0.000000e+00 : f32
    %38 = vector.broadcast %cst_21 : f32 to vector<64x1xf32>
    %39 = arith.addf %38, %37 : vector<64x1xf32>
    %40 = arith.mulf %11, %11 : vector<64x1152xf32>
    %cst_22 = arith.constant dense<0.000000e+00> : vector<64xf32>
    %41 = vector.multi_reduction <add>, %40, %cst_22 [1] : vector<64x1152xf32> to vector<64xf32>
    %42 = vector.shape_cast %41 : vector<64xf32> to vector<64x1xf32>
    %43 = arith.addf %39, %42 : vector<64x1xf32>
    %44 = arith.mulf %16, %16 : vector<64x1152xf32>
    %cst_23 = arith.constant dense<0.000000e+00> : vector<64xf32>
    %45 = vector.multi_reduction <add>, %44, %cst_23 [1] : vector<64x1152xf32> to vector<64xf32>
    %46 = vector.shape_cast %45 : vector<64xf32> to vector<64x1xf32>
    %47 = arith.addf %43, %46 : vector<64x1xf32>
    %48 = arith.mulf %21, %21 : vector<64x1152xf32>
    %cst_24 = arith.constant dense<0.000000e+00> : vector<64xf32>
    %49 = vector.multi_reduction <add>, %48, %cst_24 [1] : vector<64x1152xf32> to vector<64xf32>
    %50 = vector.shape_cast %49 : vector<64xf32> to vector<64x1xf32>
    %51 = arith.addf %47, %50 : vector<64x1xf32>
    %cst_25 = arith.constant 4.608000e+03 : f32
    %52 = vector.broadcast %cst_25 : f32 to vector<64x1xf32>
    %53 = arith.divf %34, %52 : vector<64x1xf32>
    %cst_26 = arith.constant 4.608000e+03 : f32
    %54 = vector.broadcast %cst_26 : f32 to vector<64x1xf32>
    %55 = arith.divf %51, %54 : vector<64x1xf32>
    %56 = arith.mulf %53, %53 : vector<64x1xf32>
    %57 = arith.subf %55, %56 : vector<64x1xf32>
    %cst_27 = arith.constant 0.000000e+00 : f32
    %58 = vector.broadcast %cst_27 : f32 to vector<64x1xf32>
    %59 = arith.maximumf %57, %58 : vector<64x1xf32>
    %c0_28 = arith.constant 0 : index
    %c0_29 = arith.constant 0 : index
    %60 = vector.load %arg3[%c0_28, %c0_29] : memref<64x1xf32, #tpu.memory_space<vmem>>, vector<64x1xf32>
    %cst_30 = arith.constant 9.99999974E-6 : f32
    %61 = vector.broadcast %cst_30 : f32 to vector<64x1xf32>
    %62 = arith.addf %59, %61 : vector<64x1xf32>
    %63 = math.rsqrt %62 : vector<64x1xf32>
    %64 = arith.mulf %60, %63 : vector<64x1xf32>
    %c0_31 = arith.constant 0 : index
    %c0_32 = arith.constant 0 : index
    %65 = vector.load %arg4[%c0_31, %c0_32] : memref<64x1xf32, #tpu.memory_space<vmem>>, vector<64x1xf32>
    %66 = arith.mulf %53, %64 : vector<64x1xf32>
    %67 = arith.subf %65, %66 : vector<64x1xf32>
    %68 = vector.broadcast %64 : vector<64x1xf32> to vector<64x1152xf32>
    %69 = arith.mulf %6, %68 : vector<64x1152xf32>
    %70 = vector.broadcast %67 : vector<64x1xf32> to vector<64x1152xf32>
    %71 = arith.addf %69, %70 : vector<64x1152xf32>
    %72 = vector.broadcast %64 : vector<64x1xf32> to vector<64x1152xf32>
    %73 = arith.mulf %11, %72 : vector<64x1152xf32>
    %74 = vector.broadcast %67 : vector<64x1xf32> to vector<64x1152xf32>
    %75 = arith.addf %73, %74 : vector<64x1152xf32>
    %76 = arith.maximumf %71, %75 : vector<64x1152xf32>
    %77 = vector.broadcast %64 : vector<64x1xf32> to vector<64x1152xf32>
    %78 = arith.mulf %16, %77 : vector<64x1152xf32>
    %79 = vector.broadcast %67 : vector<64x1xf32> to vector<64x1152xf32>
    %80 = arith.addf %78, %79 : vector<64x1152xf32>
    %81 = vector.broadcast %64 : vector<64x1xf32> to vector<64x1152xf32>
    %82 = arith.mulf %21, %81 : vector<64x1152xf32>
    %83 = vector.broadcast %67 : vector<64x1xf32> to vector<64x1152xf32>
    %84 = arith.addf %82, %83 : vector<64x1152xf32>
    %85 = arith.maximumf %80, %84 : vector<64x1152xf32>
    %86 = arith.maximumf %76, %85 : vector<64x1152xf32>
    %cst_33 = arith.constant 0.000000e+00 : f32
    %87 = vector.broadcast %cst_33 : f32 to vector<64x1152xf32>
    %88 = arith.maximumf %86, %87 : vector<64x1152xf32>
    %89 = arith.truncf %88 : vector<64x1152xf32> to vector<64x1152xbf16>
    %c0_34 = arith.constant 0 : index
    %c0_35 = arith.constant 0 : index
    %90 = vector.load %arg5[%c0_34, %c0_35] : memref<64x1152xbf16, #tpu.memory_space<vmem>>, vector<64x1152xbf16>
    tpu.vector_store %arg5[%c0_34, %c0_35], %89 {strides = array<i32>} : memref<64x1152xbf16, #tpu.memory_space<vmem>>, vector<64x1152xbf16>,
    return
  }
}

module attributes {stable_mosaic.version = 11 : i64} {
  func.func @_conv_bn_pool_relu_kernel(%arg0: memref<50x1600xbf16, #tpu.memory_space<vmem>>, %arg1: memref<4x1600x128xbf16, #tpu.memory_space<vmem>>, %arg2: memref<50x1xf32, #tpu.memory_space<vmem>>, %arg3: memref<50x1xf32, #tpu.memory_space<vmem>>, %arg4: memref<50x1xf32, #tpu.memory_space<vmem>>, %arg5: memref<50x128xf32, #tpu.memory_space<vmem>>) attributes {dimension_semantics = [], scalar_prefetch = 0 : i64, scratch_operands = 0 : i64, tpu.core_type = #tpu.core_type<tc>} {
    %c0 = arith.constant 0 : index
    %c0_0 = arith.constant 0 : index
    %0 = vector.load %arg0[%c0, %c0_0] : memref<50x1600xbf16, #tpu.memory_space<vmem>>, vector<50x1600xbf16>
    %c0_1 = arith.constant 0 : index
    %c0_2 = arith.constant 0 : index
    %1 = vector.load %arg2[%c0_1, %c0_2] : memref<50x1xf32, #tpu.memory_space<vmem>>, vector<50x1xf32>
    %c0_3 = arith.constant 0 : index
    %c0_4 = arith.constant 0 : index
    %c0_5 = arith.constant 0 : index
    %2 = vector.load %arg1[%c0_3, %c0_4, %c0_5] : memref<4x1600x128xbf16, #tpu.memory_space<vmem>>, vector<1x1600x128xbf16>
    %3 = vector.shape_cast %2 : vector<1x1600x128xbf16> to vector<1600x128xbf16>
    %cst = arith.constant dense<0.000000e+00> : vector<50x128xf32>
    %4 = tpu.matmul %0, %3, %cst {dimension_numbers = #tpu.dot_dimension_numbers<[1], [0], [0], [1], [0, 0, 1, 1], [], []>} : vector<50x1600xbf16>, vector<1600x128xbf16>, vector<50x128xf32> -> vector<50x128xf32>
    %5 = vector.broadcast %1 : vector<50x1xf32> to vector<50x128xf32>
    %6 = arith.addf %4, %5 : vector<50x128xf32>
    %c1 = arith.constant 1 : index
    %c0_6 = arith.constant 0 : index
    %c0_7 = arith.constant 0 : index
    %7 = vector.load %arg1[%c1, %c0_6, %c0_7] : memref<4x1600x128xbf16, #tpu.memory_space<vmem>>, vector<1x1600x128xbf16>
    %8 = vector.shape_cast %7 : vector<1x1600x128xbf16> to vector<1600x128xbf16>
    %cst_8 = arith.constant dense<0.000000e+00> : vector<50x128xf32>
    %9 = tpu.matmul %0, %8, %cst_8 {dimension_numbers = #tpu.dot_dimension_numbers<[1], [0], [0], [1], [0, 0, 1, 1], [], []>} : vector<50x1600xbf16>, vector<1600x128xbf16>, vector<50x128xf32> -> vector<50x128xf32>
    %10 = vector.broadcast %1 : vector<50x1xf32> to vector<50x128xf32>
    %11 = arith.addf %9, %10 : vector<50x128xf32>
    %c2 = arith.constant 2 : index
    %c0_9 = arith.constant 0 : index
    %c0_10 = arith.constant 0 : index
    %12 = vector.load %arg1[%c2, %c0_9, %c0_10] : memref<4x1600x128xbf16, #tpu.memory_space<vmem>>, vector<1x1600x128xbf16>
    %13 = vector.shape_cast %12 : vector<1x1600x128xbf16> to vector<1600x128xbf16>
    %cst_11 = arith.constant dense<0.000000e+00> : vector<50x128xf32>
    %14 = tpu.matmul %0, %13, %cst_11 {dimension_numbers = #tpu.dot_dimension_numbers<[1], [0], [0], [1], [0, 0, 1, 1], [], []>} : vector<50x1600xbf16>, vector<1600x128xbf16>, vector<50x128xf32> -> vector<50x128xf32>
    %15 = vector.broadcast %1 : vector<50x1xf32> to vector<50x128xf32>
    %16 = arith.addf %14, %15 : vector<50x128xf32>
    %c3 = arith.constant 3 : index
    %c0_12 = arith.constant 0 : index
    %c0_13 = arith.constant 0 : index
    %17 = vector.load %arg1[%c3, %c0_12, %c0_13] : memref<4x1600x128xbf16, #tpu.memory_space<vmem>>, vector<1x1600x128xbf16>
    %18 = vector.shape_cast %17 : vector<1x1600x128xbf16> to vector<1600x128xbf16>
    %cst_14 = arith.constant dense<0.000000e+00> : vector<50x128xf32>
    %19 = tpu.matmul %0, %18, %cst_14 {dimension_numbers = #tpu.dot_dimension_numbers<[1], [0], [0], [1], [0, 0, 1, 1], [], []>} : vector<50x1600xbf16>, vector<1600x128xbf16>, vector<50x128xf32> -> vector<50x128xf32>
    %20 = vector.broadcast %1 : vector<50x1xf32> to vector<50x128xf32>
    %21 = arith.addf %19, %20 : vector<50x128xf32>
    %cst_15 = arith.constant dense<0.000000e+00> : vector<50xf32>
    %22 = vector.multi_reduction <add>, %6, %cst_15 [1] : vector<50x128xf32> to vector<50xf32>
    %23 = vector.shape_cast %22 : vector<50xf32> to vector<50x1xf32>
    %cst_16 = arith.constant 0.000000e+00 : f32
    %24 = vector.broadcast %cst_16 : f32 to vector<50x1xf32>
    %25 = arith.addf %24, %23 : vector<50x1xf32>
    %cst_17 = arith.constant dense<0.000000e+00> : vector<50xf32>
    %26 = vector.multi_reduction <add>, %11, %cst_17 [1] : vector<50x128xf32> to vector<50xf32>
    %27 = vector.shape_cast %26 : vector<50xf32> to vector<50x1xf32>
    %28 = arith.addf %25, %27 : vector<50x1xf32>
    %cst_18 = arith.constant dense<0.000000e+00> : vector<50xf32>
    %29 = vector.multi_reduction <add>, %16, %cst_18 [1] : vector<50x128xf32> to vector<50xf32>
    %30 = vector.shape_cast %29 : vector<50xf32> to vector<50x1xf32>
    %31 = arith.addf %28, %30 : vector<50x1xf32>
    %cst_19 = arith.constant dense<0.000000e+00> : vector<50xf32>
    %32 = vector.multi_reduction <add>, %21, %cst_19 [1] : vector<50x128xf32> to vector<50xf32>
    %33 = vector.shape_cast %32 : vector<50xf32> to vector<50x1xf32>
    %34 = arith.addf %31, %33 : vector<50x1xf32>
    %35 = arith.mulf %6, %6 : vector<50x128xf32>
    %cst_20 = arith.constant dense<0.000000e+00> : vector<50xf32>
    %36 = vector.multi_reduction <add>, %35, %cst_20 [1] : vector<50x128xf32> to vector<50xf32>
    %37 = vector.shape_cast %36 : vector<50xf32> to vector<50x1xf32>
    %cst_21 = arith.constant 0.000000e+00 : f32
    %38 = vector.broadcast %cst_21 : f32 to vector<50x1xf32>
    %39 = arith.addf %38, %37 : vector<50x1xf32>
    %40 = arith.mulf %11, %11 : vector<50x128xf32>
    %cst_22 = arith.constant dense<0.000000e+00> : vector<50xf32>
    %41 = vector.multi_reduction <add>, %40, %cst_22 [1] : vector<50x128xf32> to vector<50xf32>
    %42 = vector.shape_cast %41 : vector<50xf32> to vector<50x1xf32>
    %43 = arith.addf %39, %42 : vector<50x1xf32>
    %44 = arith.mulf %16, %16 : vector<50x128xf32>
    %cst_23 = arith.constant dense<0.000000e+00> : vector<50xf32>
    %45 = vector.multi_reduction <add>, %44, %cst_23 [1] : vector<50x128xf32> to vector<50xf32>
    %46 = vector.shape_cast %45 : vector<50xf32> to vector<50x1xf32>
    %47 = arith.addf %43, %46 : vector<50x1xf32>
    %48 = arith.mulf %21, %21 : vector<50x128xf32>
    %cst_24 = arith.constant dense<0.000000e+00> : vector<50xf32>
    %49 = vector.multi_reduction <add>, %48, %cst_24 [1] : vector<50x128xf32> to vector<50xf32>
    %50 = vector.shape_cast %49 : vector<50xf32> to vector<50x1xf32>
    %51 = arith.addf %47, %50 : vector<50x1xf32>
    %cst_25 = arith.constant 5.120000e+02 : f32
    %52 = vector.broadcast %cst_25 : f32 to vector<50x1xf32>
    %53 = arith.divf %34, %52 : vector<50x1xf32>
    %cst_26 = arith.constant 5.120000e+02 : f32
    %54 = vector.broadcast %cst_26 : f32 to vector<50x1xf32>
    %55 = arith.divf %51, %54 : vector<50x1xf32>
    %56 = arith.mulf %53, %53 : vector<50x1xf32>
    %57 = arith.subf %55, %56 : vector<50x1xf32>
    %cst_27 = arith.constant 0.000000e+00 : f32
    %58 = vector.broadcast %cst_27 : f32 to vector<50x1xf32>
    %59 = arith.maximumf %57, %58 : vector<50x1xf32>
    %c0_28 = arith.constant 0 : index
    %c0_29 = arith.constant 0 : index
    %60 = vector.load %arg3[%c0_28, %c0_29] : memref<50x1xf32, #tpu.memory_space<vmem>>, vector<50x1xf32>
    %cst_30 = arith.constant 9.99999974E-6 : f32
    %61 = vector.broadcast %cst_30 : f32 to vector<50x1xf32>
    %62 = arith.addf %59, %61 : vector<50x1xf32>
    %63 = math.rsqrt %62 : vector<50x1xf32>
    %64 = arith.mulf %60, %63 : vector<50x1xf32>
    %c0_31 = arith.constant 0 : index
    %c0_32 = arith.constant 0 : index
    %65 = vector.load %arg4[%c0_31, %c0_32] : memref<50x1xf32, #tpu.memory_space<vmem>>, vector<50x1xf32>
    %66 = arith.mulf %53, %64 : vector<50x1xf32>
    %67 = arith.subf %65, %66 : vector<50x1xf32>
    %68 = vector.broadcast %64 : vector<50x1xf32> to vector<50x128xf32>
    %69 = arith.mulf %6, %68 : vector<50x128xf32>
    %70 = vector.broadcast %67 : vector<50x1xf32> to vector<50x128xf32>
    %71 = arith.addf %69, %70 : vector<50x128xf32>
    %72 = vector.broadcast %64 : vector<50x1xf32> to vector<50x128xf32>
    %73 = arith.mulf %11, %72 : vector<50x128xf32>
    %74 = vector.broadcast %67 : vector<50x1xf32> to vector<50x128xf32>
    %75 = arith.addf %73, %74 : vector<50x128xf32>
    %76 = arith.maximumf %71, %75 : vector<50x128xf32>
    %77 = vector.broadcast %64 : vector<50x1xf32> to vector<50x128xf32>
    %78 = arith.mulf %16, %77 : vector<50x128xf32>
    %79 = vector.broadcast %67 : vector<50x1xf32> to vector<50x128xf32>
    %80 = arith.addf %78, %79 : vector<50x128xf32>
    %81 = vector.broadcast %64 : vector<50x1xf32> to vector<50x128xf32>
    %82 = arith.mulf %21, %81 : vector<50x128xf32>
    %83 = vector.broadcast %67 : vector<50x1xf32> to vector<50x128xf32>
    %84 = arith.addf %82, %83 : vector<50x128xf32>
    %85 = arith.maximumf %80, %84 : vector<50x128xf32>
    %86 = arith.maximumf %76, %85 : vector<50x128xf32>
    %cst_33 = arith.constant 0.000000e+00 : f32
    %87 = vector.broadcast %cst_33 : f32 to vector<50x128xf32>
    %88 = arith.maximumf %86, %87 : vector<50x128xf32>
    %c0_34 = arith.constant 0 : index
    %c0_35 = arith.constant 0 : index
    %89 = vector.load %arg5[%c0_34, %c0_35] : memref<50x128xf32, #tpu.memory_space<vmem>>, vector<50x128xf32>
    tpu.vector_store %arg5[%c0_34, %c0_35], %88 {strides = array<i32>} : memref<50x128xf32, #tpu.memory_space<vmem>>, vector<50x128xf32>,
    return
  }
}

module attributes {stable_mosaic.version = 11 : i64} {
  func.func @_heads_kernel(%arg0: memref<8x800xf32, #tpu.memory_space<vmem>>, %arg1: memref<800x200xf32, #tpu.memory_space<vmem>>, %arg2: memref<1x200xf32, #tpu.memory_space<vmem>>, %arg3: memref<1x200xf32, #tpu.memory_space<vmem>>, %arg4: memref<1x200xf32, #tpu.memory_space<vmem>>, %arg5: memref<200x100xf32, #tpu.memory_space<vmem>>, %arg6: memref<1x100xf32, #tpu.memory_space<vmem>>, %arg7: memref<1x100xf32, #tpu.memory_space<vmem>>, %arg8: memref<1x100xf32, #tpu.memory_space<vmem>>, %arg9: memref<100x10xf32, #tpu.memory_space<vmem>>, %arg10: memref<1x10xf32, #tpu.memory_space<vmem>>, %arg11: memref<200x2xf32, #tpu.memory_space<vmem>>, %arg12: memref<1x2xf32, #tpu.memory_space<vmem>>, %arg13: memref<8x10xf32, #tpu.memory_space<vmem>>, %arg14: memref<8x2xf32, #tpu.memory_space<vmem>>) attributes {dimension_semantics = [], scalar_prefetch = 0 : i64, scratch_operands = 0 : i64, tpu.core_type = #tpu.core_type<tc>} {
    %c0 = arith.constant 0 : index
    %c0_0 = arith.constant 0 : index
    %0 = vector.load %arg0[%c0, %c0_0] : memref<8x800xf32, #tpu.memory_space<vmem>>, vector<8x800xf32>
    %c0_1 = arith.constant 0 : index
    %c0_2 = arith.constant 0 : index
    %1 = vector.load %arg1[%c0_1, %c0_2] : memref<800x200xf32, #tpu.memory_space<vmem>>, vector<800x200xf32>
    %cst = arith.constant dense<0.000000e+00> : vector<8x200xf32>
    %2 = tpu.matmul %0, %1, %cst {dimension_numbers = #tpu.dot_dimension_numbers<[1], [0], [0], [1], [0, 0, 1, 1], [], []>} : vector<8x800xf32>, vector<800x200xf32>, vector<8x200xf32> -> vector<8x200xf32>
    %c0_3 = arith.constant 0 : index
    %c0_4 = arith.constant 0 : index
    %3 = vector.load %arg2[%c0_3, %c0_4] : memref<1x200xf32, #tpu.memory_space<vmem>>, vector<1x200xf32>
    %4 = vector.broadcast %3 : vector<1x200xf32> to vector<8x200xf32>
    %5 = arith.addf %2, %4 : vector<8x200xf32>
    %c0_5 = arith.constant 0 : index
    %c0_6 = arith.constant 0 : index
    %6 = vector.load %arg3[%c0_5, %c0_6] : memref<1x200xf32, #tpu.memory_space<vmem>>, vector<1x200xf32>
    %c0_7 = arith.constant 0 : index
    %c0_8 = arith.constant 0 : index
    %7 = vector.load %arg4[%c0_7, %c0_8] : memref<1x200xf32, #tpu.memory_space<vmem>>, vector<1x200xf32>
    %cst_9 = arith.constant dense<0.000000e+00> : vector<200xf32>
    %8 = vector.multi_reduction <add>, %5, %cst_9 [0] : vector<8x200xf32> to vector<200xf32>
    %9 = vector.shape_cast %8 : vector<200xf32> to vector<1x200xf32>
    %cst_10 = arith.constant 8.000000e+00 : f32
    %10 = vector.broadcast %cst_10 : f32 to vector<1x200xf32>
    %11 = arith.divf %9, %10 : vector<1x200xf32>
    %12 = arith.mulf %5, %5 : vector<8x200xf32>
    %cst_11 = arith.constant dense<0.000000e+00> : vector<200xf32>
    %13 = vector.multi_reduction <add>, %12, %cst_11 [0] : vector<8x200xf32> to vector<200xf32>
    %14 = vector.shape_cast %13 : vector<200xf32> to vector<1x200xf32>
    %cst_12 = arith.constant 8.000000e+00 : f32
    %15 = vector.broadcast %cst_12 : f32 to vector<1x200xf32>
    %16 = arith.divf %14, %15 : vector<1x200xf32>
    %17 = arith.mulf %11, %11 : vector<1x200xf32>
    %18 = arith.subf %16, %17 : vector<1x200xf32>
    %cst_13 = arith.constant 0.000000e+00 : f32
    %19 = vector.broadcast %cst_13 : f32 to vector<1x200xf32>
    %20 = arith.maximumf %18, %19 : vector<1x200xf32>
    %21 = vector.broadcast %11 : vector<1x200xf32> to vector<8x200xf32>
    %22 = arith.subf %5, %21 : vector<8x200xf32>
    %cst_14 = arith.constant 9.99999974E-6 : f32
    %23 = vector.broadcast %cst_14 : f32 to vector<1x200xf32>
    %24 = arith.addf %20, %23 : vector<1x200xf32>
    %25 = math.rsqrt %24 : vector<1x200xf32>
    %26 = vector.broadcast %25 : vector<1x200xf32> to vector<8x200xf32>
    %27 = arith.mulf %22, %26 : vector<8x200xf32>
    %28 = vector.broadcast %6 : vector<1x200xf32> to vector<8x200xf32>
    %29 = arith.mulf %27, %28 : vector<8x200xf32>
    %30 = vector.broadcast %7 : vector<1x200xf32> to vector<8x200xf32>
    %31 = arith.addf %29, %30 : vector<8x200xf32>
    %cst_15 = arith.constant 0.000000e+00 : f32
    %32 = vector.broadcast %cst_15 : f32 to vector<8x200xf32>
    %33 = arith.maximumf %31, %32 : vector<8x200xf32>
    %c0_16 = arith.constant 0 : index
    %c0_17 = arith.constant 0 : index
    %34 = vector.load %arg5[%c0_16, %c0_17] : memref<200x100xf32, #tpu.memory_space<vmem>>, vector<200x100xf32>
    %cst_18 = arith.constant dense<0.000000e+00> : vector<8x100xf32>
    %35 = tpu.matmul %33, %34, %cst_18 {dimension_numbers = #tpu.dot_dimension_numbers<[1], [0], [0], [1], [0, 0, 1, 1], [], []>} : vector<8x200xf32>, vector<200x100xf32>, vector<8x100xf32> -> vector<8x100xf32>
    %c0_19 = arith.constant 0 : index
    %c0_20 = arith.constant 0 : index
    %36 = vector.load %arg6[%c0_19, %c0_20] : memref<1x100xf32, #tpu.memory_space<vmem>>, vector<1x100xf32>
    %37 = vector.broadcast %36 : vector<1x100xf32> to vector<8x100xf32>
    %38 = arith.addf %35, %37 : vector<8x100xf32>
    %c0_21 = arith.constant 0 : index
    %c0_22 = arith.constant 0 : index
    %39 = vector.load %arg7[%c0_21, %c0_22] : memref<1x100xf32, #tpu.memory_space<vmem>>, vector<1x100xf32>
    %c0_23 = arith.constant 0 : index
    %c0_24 = arith.constant 0 : index
    %40 = vector.load %arg8[%c0_23, %c0_24] : memref<1x100xf32, #tpu.memory_space<vmem>>, vector<1x100xf32>
    %cst_25 = arith.constant dense<0.000000e+00> : vector<100xf32>
    %41 = vector.multi_reduction <add>, %38, %cst_25 [0] : vector<8x100xf32> to vector<100xf32>
    %42 = vector.shape_cast %41 : vector<100xf32> to vector<1x100xf32>
    %cst_26 = arith.constant 8.000000e+00 : f32
    %43 = vector.broadcast %cst_26 : f32 to vector<1x100xf32>
    %44 = arith.divf %42, %43 : vector<1x100xf32>
    %45 = arith.mulf %38, %38 : vector<8x100xf32>
    %cst_27 = arith.constant dense<0.000000e+00> : vector<100xf32>
    %46 = vector.multi_reduction <add>, %45, %cst_27 [0] : vector<8x100xf32> to vector<100xf32>
    %47 = vector.shape_cast %46 : vector<100xf32> to vector<1x100xf32>
    %cst_28 = arith.constant 8.000000e+00 : f32
    %48 = vector.broadcast %cst_28 : f32 to vector<1x100xf32>
    %49 = arith.divf %47, %48 : vector<1x100xf32>
    %50 = arith.mulf %44, %44 : vector<1x100xf32>
    %51 = arith.subf %49, %50 : vector<1x100xf32>
    %cst_29 = arith.constant 0.000000e+00 : f32
    %52 = vector.broadcast %cst_29 : f32 to vector<1x100xf32>
    %53 = arith.maximumf %51, %52 : vector<1x100xf32>
    %54 = vector.broadcast %44 : vector<1x100xf32> to vector<8x100xf32>
    %55 = arith.subf %38, %54 : vector<8x100xf32>
    %cst_30 = arith.constant 9.99999974E-6 : f32
    %56 = vector.broadcast %cst_30 : f32 to vector<1x100xf32>
    %57 = arith.addf %53, %56 : vector<1x100xf32>
    %58 = math.rsqrt %57 : vector<1x100xf32>
    %59 = vector.broadcast %58 : vector<1x100xf32> to vector<8x100xf32>
    %60 = arith.mulf %55, %59 : vector<8x100xf32>
    %61 = vector.broadcast %39 : vector<1x100xf32> to vector<8x100xf32>
    %62 = arith.mulf %60, %61 : vector<8x100xf32>
    %63 = vector.broadcast %40 : vector<1x100xf32> to vector<8x100xf32>
    %64 = arith.addf %62, %63 : vector<8x100xf32>
    %cst_31 = arith.constant 0.000000e+00 : f32
    %65 = vector.broadcast %cst_31 : f32 to vector<8x100xf32>
    %66 = arith.maximumf %64, %65 : vector<8x100xf32>
    %c0_32 = arith.constant 0 : index
    %c0_33 = arith.constant 0 : index
    %67 = vector.load %arg9[%c0_32, %c0_33] : memref<100x10xf32, #tpu.memory_space<vmem>>, vector<100x10xf32>
    %cst_34 = arith.constant dense<0.000000e+00> : vector<8x10xf32>
    %68 = tpu.matmul %66, %67, %cst_34 {dimension_numbers = #tpu.dot_dimension_numbers<[1], [0], [0], [1], [0, 0, 1, 1], [], []>} : vector<8x100xf32>, vector<100x10xf32>, vector<8x10xf32> -> vector<8x10xf32>
    %c0_35 = arith.constant 0 : index
    %c0_36 = arith.constant 0 : index
    %69 = vector.load %arg10[%c0_35, %c0_36] : memref<1x10xf32, #tpu.memory_space<vmem>>, vector<1x10xf32>
    %70 = vector.broadcast %69 : vector<1x10xf32> to vector<8x10xf32>
    %71 = arith.addf %68, %70 : vector<8x10xf32>
    %cst_37 = arith.constant dense<0xFF800000> : vector<8xf32>
    %72 = vector.multi_reduction <maximumf>, %71, %cst_37 [1] : vector<8x10xf32> to vector<8xf32>
    %73 = vector.shape_cast %72 : vector<8xf32> to vector<8x1xf32>
    %74 = vector.broadcast %73 : vector<8x1xf32> to vector<8x10xf32>
    %75 = arith.subf %71, %74 : vector<8x10xf32>
    %76 = math.exp %75 : vector<8x10xf32>
    %cst_38 = arith.constant dense<0.000000e+00> : vector<8xf32>
    %77 = vector.multi_reduction <add>, %76, %cst_38 [1] : vector<8x10xf32> to vector<8xf32>
    %78 = vector.shape_cast %77 : vector<8xf32> to vector<8x1xf32>
    %79 = math.log %78 : vector<8x1xf32>
    %80 = vector.broadcast %79 : vector<8x1xf32> to vector<8x10xf32>
    %81 = arith.subf %75, %80 : vector<8x10xf32>
    %c0_39 = arith.constant 0 : index
    %c0_40 = arith.constant 0 : index
    %82 = vector.load %arg13[%c0_39, %c0_40] : memref<8x10xf32, #tpu.memory_space<vmem>>, vector<8x10xf32>
    tpu.vector_store %arg13[%c0_39, %c0_40], %81 {strides = array<i32>} : memref<8x10xf32, #tpu.memory_space<vmem>>, vector<8x10xf32>,
    %c0_41 = arith.constant 0 : index
    %c0_42 = arith.constant 0 : index
    %83 = vector.load %arg11[%c0_41, %c0_42] : memref<200x2xf32, #tpu.memory_space<vmem>>, vector<200x2xf32>
    %cst_43 = arith.constant dense<0.000000e+00> : vector<8x2xf32>
    %84 = tpu.matmul %33, %83, %cst_43 {dimension_numbers = #tpu.dot_dimension_numbers<[1], [0], [0], [1], [0, 0, 1, 1], [], []>} : vector<8x200xf32>, vector<200x2xf32>, vector<8x2xf32> -> vector<8x2xf32>
    %c0_44 = arith.constant 0 : index
    %c0_45 = arith.constant 0 : index
    %85 = vector.load %arg12[%c0_44, %c0_45] : memref<1x2xf32, #tpu.memory_space<vmem>>, vector<1x2xf32>
    %86 = vector.broadcast %85 : vector<1x2xf32> to vector<8x2xf32>
    %87 = arith.addf %84, %86 : vector<8x2xf32>
    %cst_46 = arith.constant dense<0xFF800000> : vector<8xf32>
    %88 = vector.multi_reduction <maximumf>, %87, %cst_46 [1] : vector<8x2xf32> to vector<8xf32>
    %89 = vector.shape_cast %88 : vector<8xf32> to vector<8x1xf32>
    %90 = vector.broadcast %89 : vector<8x1xf32> to vector<8x2xf32>
    %91 = arith.subf %87, %90 : vector<8x2xf32>
    %92 = math.exp %91 : vector<8x2xf32>
    %cst_47 = arith.constant dense<0.000000e+00> : vector<8xf32>
    %93 = vector.multi_reduction <add>, %92, %cst_47 [1] : vector<8x2xf32> to vector<8xf32>
    %94 = vector.shape_cast %93 : vector<8xf32> to vector<8x1xf32>
    %95 = math.log %94 : vector<8x1xf32>
    %96 = vector.broadcast %95 : vector<8x1xf32> to vector<8x2xf32>
    %97 = arith.subf %91, %96 : vector<8x2xf32>
    %c0_48 = arith.constant 0 : index
    %c0_49 = arith.constant 0 : index
    %98 = vector.load %arg14[%c0_48, %c0_49] : memref<8x2xf32, #tpu.memory_space<vmem>>, vector<8x2xf32>
    tpu.vector_store %arg14[%c0_48, %c0_49], %97 {strides = array<i32>} : memref<8x2xf32, #tpu.memory_space<vmem>>, vector<8x2xf32>,
    return
  }
}

</mosaic_0001>

<bundles_post_ra>
// kernel: dann_mnist_forward.3
= control target key start
LH: loop header
LB: loop body
LE: loop exit
PB: predicated region body
PF: predicated region fallthrough
CT: control target
= control target key end

     0   :  { %v10586_v1 = vmov 0   ;;  %vm381_vm0 = vcmask 1044480   ;;  %vm382_vm1 = vcmask 1045504   ;;  %v5929_v10 = vmov 65535   ;;  %s10578_s1 = inlined_call_operand.vmem [shape: bf16[4,75,1152], index: 1, kind: input, shape index: {}]   ;;  %s10579_s0 = inlined_call_operand.vmem [shape: bf16[64,75], index: 0, kind: input, shape index: {}]   ;;  %s10580_s2 = inlined_call_operand.vmem [shape: f32[64,1], index: 2, kind: input, shape index: {}]   ;;  %s10581_s3 = inlined_call_operand.vmem [shape: f32[64,1], index: 3, kind: input, shape index: {}]   ;;  %s10582_s4 = inlined_call_operand.vmem [shape: f32[64,1], index: 4, kind: input, shape index: {}]   ;;  %s10583_s5 = inlined_call_operand.vmem [shape: bf16[64,1152], index: 5, kind: output, shape index: {}]  }
   0x1   :  { %v5644_v0 = vld [vmem:[%s10578_s1 + $0x4] ss:$36 sps:$4 sm:$0xff]   ;;  %444 = vmatprep.mubr.bf16.mxu0 %v10586_v1  ;;  %517 = vmatprep.mubr.bf16.mxu1 %v10586_v1  ;;  %v5646_v2 = vld [vmem:[%s10578_s1 + $0xc] ss:$36 sps:$4 sm:$0xff]   ;;  %v5652_v6 = vld [vmem:[%s10578_s1 + $0x54] ss:$36 sps:$4 sm:$0xff]  }
   0x2   :  { %5642 = vset.pattern.permute.xlu0 %v10586_v1  ;;  %5643 = vset.pattern.permute.xlu1 %v10586_v1  ;;  %v5648_v3 = vld [vmem:[%s10578_s1] ss:$36 sps:$4 sm:$0xff]   ;;  %v5649_v4 = vld [vmem:[%s10578_s1 + $0x8] ss:$36 sps:$4 sm:$0xff]   ;;  %v5655_v8 = vld [vmem:[%s10578_s1 + $0x50] ss:$36 sps:$4 sm:$0xff]  }
   0x3   :  { %412 = vmatprep.subr.bf16.mxu0 %v5644_v0  ;;  %485 = vmatprep.subr.bf16.mxu1 %v5646_v2  ;;  %v5650_v5 = vld [vmem:[%s10578_s1 + $0x4c] ss:$36 sps:$4 sm:$0xff]   ;;  %v5656_v9 = vld [vmem:[%s10578_s1 + $0x94] ss:$36 sps:$4 sm:$0xff]   ;;  %v383_v11 = vsel %vm381_vm0, 4294967295, %v5929_v10  ;;  %v6039_v30 = vld [vmem:[%s10579_s0] sm:$0xff]  }
   0x4   :  { %413 = vmatpush1.bf16.msra.mxu0 %v5648_v3  ;;  %486 = vmatpush1.bf16.msra.mxu1 %v5649_v4  ;;  %v5654_v7 = vld [vmem:[%s10578_s1 + $0x48] ss:$36 sps:$4 sm:$0xff]   ;;  %v5658_v12 = vld [vmem:[%s10578_s1 + $0x9c] ss:$36 sps:$4 sm:$0xff]   ;;  %v5660_v13 = vld [vmem:[%s10578_s1 + $0x90] ss:$36 sps:$4 sm:$0xff]  }
   0x5   :  { %414 = vmatprep.subr.bf16.mxu0 %v5650_v5  ;;  %487 = vmatprep.subr.bf16.mxu1 %v5652_v6  ;;  %v5661_v14 = vld [vmem:[%s10578_s1 + $0x98] ss:$36 sps:$4 sm:$0xff]   ;;  %v5664_v16 = vld [vmem:[%s10578_s1 + $0xe4] ss:$36 sps:$4 sm:$0xff]   ;;  %v6012_v19 = vsel %vm382_vm1, %v383_v11, 0  ;;  %vm368_vm2 = vcmask 613376  }
   0x6   :  { %v5662_v15 = vld [vmem:[%s10578_s1 + $0xdc] ss:$36 sps:$4 sm:$0xff]   ;;  %v5668_v20 = vld [vmem:[%s10578_s1 + $0x124] ss:$36 sps:$4 sm:$0x3f]   ;;  %v6117_v52 = vld [vmem:[%s10579_s0 + $0x10] sm:$0xff]  }
   0x7   :  { %v5666_v17 = vld [vmem:[%s10578_s1 + $0xd8] ss:$36 sps:$4 sm:$0xff]   ;;  %v5667_v18 = vld [vmem:[%s10578_s1 + $0xe0] ss:$36 sps:$4 sm:$0xff]   ;;  %v389_v22 = vand.u32 %v5668_v20, %v6012_v19  ;;  %v5678_v32 = vld [vmem:[%s10578_s1 + $0x10] ss:$36 sps:$4 sm:$0xff]  }
   0x8   :  { %415 = vmatpush1.bf16.msra.mxu0 %v5654_v7  ;;  %488 = vmatpush1.bf16.msra.mxu1 %v5655_v8  ;;  %v5670_v21 = vld [vmem:[%s10578_s1 + $0x12c] ss:$36 sps:$4 sm:$0x3f]   ;;  %v5672_v23 = vld [vmem:[%s10578_s1 + $0x120] ss:$36 sps:$4 sm:$0x3f]  }
   0x9   :  { %416 = vmatprep.subr.bf16.mxu0 %v5656_v9  ;;  %489 = vmatprep.subr.bf16.mxu1 %v5658_v12  ;;  %v5673_v24 = vld [vmem:[%s10578_s1 + $0x128] ss:$36 sps:$4 sm:$0x3f]   ;;  %v395_v25 = vand.u32 %v5670_v21, %v6012_v19  ;;  %v386_v26 = vand.u32 %v5672_v23, %v6012_v19  ;;  %v5677_v28 = vld [vmem:[%s10578_s1 + $0x1c] ss:$36 sps:$4 sm:$0xff]   ;;  %v31_v2 = vld [vmem:[%s10580_s2 + $0x10] sm:$0xff] }
   0xa   :  { %v392_v27 = vand.u32 %v5673_v24, %v6012_v19  ;;  %v5680_v29 = vld [vmem:[%s10578_s1 + $0x14] ss:$36 sps:$4 sm:$0xff]   ;;  %v5683_v33 = vld [vmem:[%s10578_s1 + $0x64] ss:$36 sps:$4 sm:$0xff]   ;;  %v5687_v34 = vld [vmem:[%s10578_s1 + $0x5c] ss:$36 sps:$4 sm:$0xff]   ;;  %99 = vperm.xlu1 %5643, %v31_v2  }
   0xb   :  { %v5675_v31 = vld [vmem:[%s10578_s1 + $0x18] ss:$36 sps:$4 sm:$0xff]   ;;  %v5681_v35 = vld [vmem:[%s10578_s1 + $0x60] ss:$36 sps:$4 sm:$0xff]   ;;  %v5690_v37 = vld [vmem:[%s10578_s1 + $0xac] ss:$36 sps:$4 sm:$0xff]  }
   0xc   :  { %417 = vmatpush1.bf16.msra.mxu0 %v5660_v13  ;;  %490 = vmatpush1.bf16.msra.mxu1 %v5661_v14  ;;  %v5685_v36 = vld [vmem:[%s10578_s1 + $0x58] ss:$36 sps:$4 sm:$0xff]   ;;  %v5693_v38 = vld [vmem:[%s10578_s1 + $0xa4] ss:$36 sps:$4 sm:$0xff]   ;;  %v5695_v44 = vld [vmem:[%s10578_s1 + $0xf0] ss:$36 sps:$4 sm:$0xff]  }
   0xd   :  { %418 = vmatprep.subr.bf16.mxu0 %v5662_v15  ;;  %491 = vmatprep.subr.bf16.mxu1 %v5664_v16  ;;  %v6074_v39 = vld [vmem:[%s10579_s0 + $0x8] sm:$0xff]   ;;  %v5691_v41 = vld [vmem:[%s10578_s1 + $0xa0] ss:$36 sps:$4 sm:$0xff]   ;;  %v5697_v42 = vld [vmem:[%s10578_s1 + $0xf4] ss:$36 sps:$4 sm:$0xff]  }
   0xe   :  { %v5688_v40 = vld [vmem:[%s10578_s1 + $0xa8] ss:$36 sps:$4 sm:$0xff]   ;;  %v5704_v43 = vld [vmem:[%s10578_s1 + $0x13c] ss:$36 sps:$4 sm:$0x3f]   ;;  %v35_v20 = vld [vmem:[%s10580_s2 + $0x30] sm:$0xff] }
   0xf   :  { %v5700_v45 = vld [vmem:[%s10578_s1 + $0xec] ss:$36 sps:$4 sm:$0xff]   ;;  %v5707_v47 = vld [vmem:[%s10578_s1 + $0x134] ss:$36 sps:$4 sm:$0x3f]   ;;  %v407_v49 = vand.u32 %v5704_v43, %v6012_v19  ;;  %v29_v63 = vld [vmem:[%s10580_s2] sm:$0xff] }
  0x10   :  { %419 = vmatpush1.bf16.msra.mxu0 %v5666_v17  ;;  %492 = vmatpush1.bf16.msra.mxu1 %v5667_v18  ;;  %v5698_v46 = vld [vmem:[%s10578_s1 + $0xe8] ss:$36 sps:$4 sm:$0xff]   ;;  %v5702_v48 = vld [vmem:[%s10578_s1 + $0x138] ss:$36 sps:$4 sm:$0x3f]   ;;  %v401_v51 = vand.u32 %v5707_v47, %v6012_v19  ;;  %v33_v17 = vld [vmem:[%s10580_s2 + $0x20] sm:$0xff] }
  0x11   :  { %420 = vmatprep.subr.bf16.mxu0 %v389_v22  ;;  %493 = vmatprep.subr.bf16.mxu1 %v395_v25  ;;  %v5705_v50 = vld [vmem:[%s10578_s1 + $0x130] ss:$36 sps:$4 sm:$0x3f]   ;;  %v404_v53 = vand.u32 %v5702_v48, %v6012_v19  ;;  %v5711_v56 = vld [vmem:[%s10578_s1 + $0x20] ss:$36 sps:$4 sm:$0xff]   ;;  %v6136_v57 = vld [vmem:[%s10579_s0 + $0x18] sm:$0xff]  }
  0x12   :  { %v398_v54 = vand.u32 %v5705_v50, %v6012_v19  ;;  %v5710_v55 = vld [vmem:[%s10578_s1 + $0x16c] ss:$36 sps:$4 sm:$0xff]   ;;  %v5714_v59 = vld [vmem:[%s10578_s1 + $0x1b4] ss:$36 sps:$4 sm:$0xff]   ;;  %v5718_v62 = vld [vmem:[%s10578_s1 + $0x1fc] ss:$36 sps:$4 sm:$0xff]   ;;  %89 = vperm.xlu0 %5642, %v29_v63  }
  0x13   :  { %v5708_v58 = vld [vmem:[%s10578_s1 + $0x168] ss:$36 sps:$4 sm:$0xff]   ;;  %v5712_v61 = vld [vmem:[%s10578_s1 + $0x1b0] ss:$36 sps:$4 sm:$0xff]   ;;  %v5716_v3 = vld [vmem:[%s10578_s1 + $0x1f8] ss:$36 sps:$4 sm:$0xff]  }
  0x14   :  { %421 = vmatpush1.bf16.msra.mxu0 %v386_v26  ;;  %494 = vmatpush1.bf16.msra.mxu1 %v392_v27  ;;  %v5715_v60 = vld [vmem:[%s10578_s1 + $0x68] ss:$36 sps:$4 sm:$0xff]   ;;  %v5719_v0 = vld [vmem:[%s10578_s1 + $0xb0] ss:$36 sps:$4 sm:$0xff]   ;;  %v5723_v6 = vld [vmem:[%s10578_s1 + $0xf8] ss:$36 sps:$4 sm:$0xff]  }
  0x15   :  { %631 = vmatprep.subr.bf16.mxu1 %v5677_v28  ;;  %558 = vmatprep.subr.bf16.mxu0 %v5680_v29  ;;  %v5722_v4 = vld [vmem:[%s10578_s1 + $0x244] ss:$36 sps:$4 sm:$0xff]   ;;  %v5726_v5 = vld [vmem:[%s10578_s1 + $0x28c] ss:$36 sps:$4 sm:$0x3f]   ;;  %v32_v10 = vld [vmem:[%s10580_s2 + $0x18] sm:$0xff] }
  0x16   :  { %v5727_v7 = vld [vmem:[%s10578_s1 + $0x140] ss:$36 sps:$4 sm:$0x3f]   ;;  %v30_v9 = vld [vmem:[%s10580_s2 + $0x8] sm:$0xff]  ;;  %v1045_v12 = vand.u32 %v5726_v5, %v6012_v19  ;;  %104 = vperm.xlu1 %5643, %v32_v10   ;;  %v5730_v15 = vld [vmem:[%s10578_s1 + $0x174] ss:$36 sps:$4 sm:$0xff]  }
  0x17   :  { %5087 = vmatmul.mubr.msk.bf16.vlgmr.msra.gmra.mrb[0].mxu0 %vm368_vm2, %v6039_v30  ;;  %5091 = vmatmul.mubr.msk.bf16.vlgmr.msra.gmra.mrb[0].mxu1 %vm368_vm2, %v6039_v30  ;;  %v5720_v8 = vld [vmem:[%s10578_s1 + $0x240] ss:$36 sps:$4 sm:$0xff]   ;;  %v5724_v11 = vld [vmem:[%s10578_s1 + $0x288] ss:$36 sps:$4 sm:$0x3f]   ;;  %v410_v13 = vand.u32 %v5727_v7, %v6012_v19  ;;  %v36_v21 = vld [vmem:[%s10580_s2 + $0x38] sm:$0xff] }
  0x18   :  { %632 = vmatpush1.bf16.msra.mxu1 %v5675_v31  ;;  %559 = vmatpush1.bf16.msra.mxu0 %v5678_v32  ;;  %v1042_v14 = vand.u32 %v5724_v11, %v6012_v19  ;;  %v5733_v16 = vld [vmem:[%s10578_s1 + $0x17c] ss:$36 sps:$4 sm:$0xff]   ;;  %v34_v18 = vld [vmem:[%s10580_s2 + $0x28] sm:$0xff]  ;;  %v5728_v22 = vld [vmem:[%s10578_s1 + $0x170] ss:$36 sps:$4 sm:$0xff]  }
  0x19   :  { %454 = vmatprep.mubr.bf16.mxu0 %v10586_v1  ;;  %527 = vmatprep.mubr.bf16.mxu1 %v10586_v1  ;;  %v5731_v23 = vld [vmem:[%s10578_s1 + $0x178] ss:$36 sps:$4 sm:$0xff]   ;;  %v5742_v25 = vld [vmem:[%s10578_s1 + $0x1c4] ss:$36 sps:$4 sm:$0xff]   ;;  %v5748_v29 = vld [vmem:[%s10578_s1 + $0x20c] ss:$36 sps:$4 sm:$0xff]  }
  0x1a   :  { %633 = vmatprep.subr.bf16.mxu1 %v5683_v33  ;;  %560 = vmatprep.subr.bf16.mxu0 %v5687_v34  ;;  %v5736_v24 = vld [vmem:[%s10578_s1 + $0x1bc] ss:$36 sps:$4 sm:$0xff]   ;;  %v5739_v28 = vld [vmem:[%s10578_s1 + $0x204] ss:$36 sps:$4 sm:$0xff]   ;;  %v5745_v34 = vld [vmem:[%s10578_s1 + $0x24c] ss:$36 sps:$4 sm:$0xff]  }
  0x1b   :  { %94 = vperm.xlu0 %5642, %v30_v9   ;;  %114 = vperm.xlu1 %5643, %v34_v18   ;;  %v5734_v26 = vld [vmem:[%s10578_s1 + $0x1b8] ss:$36 sps:$4 sm:$0xff]   ;;  %v5740_v27 = vld [vmem:[%s10578_s1 + $0x1c0] ss:$36 sps:$4 sm:$0xff]   ;;  %v5746_v32 = vld [vmem:[%s10578_s1 + $0x208] ss:$36 sps:$4 sm:$0xff]  }
  0x1c   :  { %634 = vmatpush1.bf16.msra.mxu1 %v5681_v35  ;;  %561 = vmatpush1.bf16.msra.mxu0 %v5685_v36  ;;  %v5737_v31 = vld [vmem:[%s10578_s1 + $0x200] ss:$36 sps:$4 sm:$0xff]   ;;  %v5751_v33 = vld [vmem:[%s10578_s1 + $0x294] ss:$36 sps:$4 sm:$0x3f]  }
  0x1d   :  { %635 = vmatprep.subr.bf16.mxu1 %v5690_v37  ;;  %562 = vmatprep.subr.bf16.mxu0 %v5693_v38  ;;  %v5760_v35 = vld [vmem:[%s10578_s1 + $0x29c] ss:$36 sps:$4 sm:$0x3f]   ;;  %v5754_v36 = vld [vmem:[%s10578_s1 + $0x254] ss:$36 sps:$4 sm:$0xff]  }
  0x1e   :  { %v5743_v37 = vld [vmem:[%s10578_s1 + $0x248] ss:$36 sps:$4 sm:$0xff]   ;;  %v5749_v38 = vld [vmem:[%s10578_s1 + $0x290] ss:$36 sps:$4 sm:$0x3f]   ;;  %v1057_v43 = vand.u32 %v5760_v35, %v6012_v19 }
  0x1f   :  { %5088 = vmatmul.mubr.msk.bf16.gmra.mrb[4].mxu0 %vm368_vm2, %v6074_v39  ;;  %5092 = vmatmul.mubr.msk.bf16.gmra.mrb[4].mxu1 %vm368_vm2, %v6074_v39  ;;  %v5764_v47 = vld [vmem:[%s10578_s1 + $0x188] ss:$36 sps:$4 sm:$0xff]   ;;  %v5755_v48 = vld [vmem:[%s10578_s1 + $0x180] ss:$36 sps:$4 sm:$0xff]   ;;  %v5777_v5 = vld [vmem:[%s10578_s1 + $0x2d0] ss:$36 sps:$4 sm:$0xff]  }
  0x20   :  { %636 = vmatpush1.bf16.msra.mxu1 %v5688_v40  ;;  %464 = vmatprep.mubr.bf16.mxu0 %v10586_v1  ;;  %v5752_v40 = vld [vmem:[%s10578_s1 + $0x250] ss:$36 sps:$4 sm:$0xff]   ;;  %v5761_v50 = vld [vmem:[%s10578_s1 + $0x1c8] ss:$36 sps:$4 sm:$0xff]   ;;  %v5781_v7 = vld [vmem:[%s10578_s1 + $0x318] ss:$36 sps:$4 sm:$0xff]  }
  0x21   :  { %537 = vmatprep.mubr.bf16.mxu1 %v10586_v1  ;;  %563 = vmatpush1.bf16.msra.mxu0 %v5691_v41  ;;  %v1051_v41 = vand.u32 %v5751_v33, %v6012_v19  ;;  %v5780_v2 = vld [vmem:[%s10578_s1 + $0x2a8] ss:$36 sps:$4 sm:$0x3f]   ;;  %v5787_v9 = vld [vmem:[%s10578_s1 + $0x360] ss:$36 sps:$4 sm:$0xff]  }
  0x22   :  { %637 = vmatprep.subr.bf16.mxu1 %v5697_v42  ;;  %564 = vmatprep.subr.bf16.mxu0 %v5700_v45  ;;  %v5758_v42 = vld [vmem:[%s10578_s1 + $0x298] ss:$36 sps:$4 sm:$0x3f]   ;;  %v5757_v45 = vld [vmem:[%s10578_s1 + $0x184] ss:$36 sps:$4 sm:$0xff]  }
  0x23   :  { %109 = vperm.xlu0 %5642, %v33_v17   ;;  %124 = vperm.xlu1 %5643, %v36_v21   ;;  %v5798_v10 = vld [vmem:[%s10578_s1 + $0x3ac] ss:$36 sps:$4 sm:$0xff]   ;;  %v5804_v11 = vld [vmem:[%s10578_s1 + $0x3f4] ss:$36 sps:$4 sm:$0x3f]  }
  0x24   :  { %638 = vmatpush1.bf16.msra.mxu1 %v5695_v44  ;;  %v1048_v44 = vand.u32 %v5749_v38, %v6012_v19  ;;  %v5790_v17 = vld [vmem:[%s10578_s1 + $0x320] ss:$36 sps:$4 sm:$0xff]   ;;  %v5795_v18 = vld [vmem:[%s10578_s1 + $0x36c] ss:$36 sps:$4 sm:$0xff]   ;;  %v5816_v33 = vld [vmem:[%s10578_s1 + $0x334] ss:$36 sps:$4 sm:$0xff]  }
  0x25   :  { %565 = vmatpush1.bf16.msra.mxu0 %v5698_v46  ;;  %639 = vmatprep.subr.bf16.mxu1 %v407_v49  ;;  %v1054_v46 = vand.u32 %v5758_v42, %v6012_v19  ;;  %v5763_v49 = vld [vmem:[%s10578_s1 + $0x1cc] ss:$36 sps:$4 sm:$0xff]   ;;  %v5813_v21 = vld [vmem:[%s10578_s1 + $0x2e4] ss:$36 sps:$4 sm:$0xff]   ;;  %v5820_v38 = vld [vmem:[%s10578_s1 + $0x378] ss:$36 sps:$4 sm:$0xff]  }
  0x26   :  { %566 = vmatprep.subr.bf16.mxu0 %v401_v51  ;;  %v5767_v51 = vld [vmem:[%s10578_s1 + $0x214] ss:$36 sps:$4 sm:$0xff]   ;;  %v5834_v42 = vld [vmem:[%s10578_s1 + $0x40c] ss:$36 sps:$4 sm:$0x3f]  }
  0x27   :  { %5089 = vmatmul.mubr.msk.bf16.gmra.mrb[8].mxu0 %vm368_vm2, %v6117_v52  ;;  %5093 = vmatmul.mubr.msk.bf16.gmra.mrb[8].mxu1 %vm368_vm2, %v6117_v52  ;;  %v5814_v35 = vld [vmem:[%s10578_s1 + $0x330] ss:$36 sps:$4 sm:$0xff]  }
  0x28   :  { %474 = vmatprep.mubr.bf16.mxu0 %v10586_v1  ;;  %547 = vmatprep.mubr.bf16.mxu1 %v10586_v1 }
  0x29   :  { %640 = vmatpush1.bf16.msra.mxu1 %v404_v53  ;;  %567 = vmatpush1.bf16.msra.mxu0 %v398_v54  ;;  %v5765_v53 = vld [vmem:[%s10578_s1 + $0x210] ss:$36 sps:$4 sm:$0xff]   ;;  %v5771_v54 = vld [vmem:[%s10578_s1 + $0x25c] ss:$36 sps:$4 sm:$0xff]  }
  0x2a   :  { %1068 = vmatprep.subr.bf16.mxu1 %v5710_v55  ;;  %5568 = vmatprep.subr.bf16.mxu0 %v5711_v56  ;;  %v5775_v55 = vld [vmem:[%s10578_s1 + $0x2a4] ss:$36 sps:$4 sm:$0x3f]  }
  0x2b   :  { %119 = vperm.xlu0 %5642, %v35_v20  }
  0x2f   :  { %5090 = vmatmul.mubr.msk.bf16.gmra.mrb[12].mxu0 %vm368_vm2, %v6136_v57  ;;  %5094 = vmatmul.mubr.msk.bf16.gmra.mrb[12].mxu1 %vm368_vm2, %v6136_v57 }
  0x30   :  { %590 = vmatprep.mubr.bf16.mxu0 %v10586_v1  ;;  %663 = vmatprep.mubr.bf16.mxu1 %v10586_v1 }
  0x37   :  { %5095 = vmatmul.mubr.msk.bf16.vlgmr.msra.gmra.mrb[16].mxu0 %vm368_vm2, %v6039_v30  ;;  %5099 = vmatmul.mubr.msk.bf16.vlgmr.msra.gmra.mrb[16].mxu1 %vm368_vm2, %v6039_v30 }
  0x38   :  { %1069 = vmatpush1.bf16.msra.mxu1 %v5708_v58  ;;  %5569 = vmatpush3.bf16.msra.mxu0 %v5711_v56  ;;  %v5768_v56 = vld [vmem:[%s10578_s1 + $0x1d0] ss:$36 sps:$4 sm:$0xff]   ;;  %v5769_v58 = vld [vmem:[%s10578_s1 + $0x258] ss:$36 sps:$4 sm:$0xff]  }
  0x39   :  { %600 = vmatprep.mubr.bf16.mxu0 %v10586_v1  ;;  %673 = vmatprep.mubr.bf16.mxu1 %v10586_v1 }
  0x3a   :  { %1070 = vmatprep.subr.bf16.mxu1 %v5714_v59  ;;  %5570 = vmatprep.subr.bf16.mxu0 %v5715_v60  ;;  %v5773_v59 = vld [vmem:[%s10578_s1 + $0x2a0] ss:$36 sps:$4 sm:$0x3f]  }
  0x3b   :  { %v1060_v63 = vand.u32 %v5773_v59, %v6012_v19  ;;  %v5842_v59 = vld [vmem:[%s10578_s1 + $0x480] ss:$36 sps:$4 sm:$0xff]  }
  0x3c   :  { %1071 = vmatpush1.bf16.msra.mxu1 %v5712_v61  ;;  %5571 = vmatpush3.bf16.msra.mxu0 %v5715_v60  ;;  %v1063_v60 = vand.u32 %v5775_v55, %v6012_v19  ;;  %v5772_v61 = vld [vmem:[%s10578_s1 + $0x218] ss:$36 sps:$4 sm:$0xff]   ;;  %v5844_v55 = vld [vmem:[%s10578_s1 + $0x484] ss:$36 sps:$4 sm:$0xff]  }
  0x3d   :  { %1072 = vmatprep.subr.bf16.mxu1 %v5718_v62  ;;  %5572 = vmatprep.subr.bf16.mxu0 %v5719_v0  ;;  %v5779_v62 = vld [vmem:[%s10578_s1 + $0x2d4] ss:$36 sps:$4 sm:$0xff]  }
  0x3f   :  { %5096 = vmatmul.mubr.msk.bf16.gmra.mrb[20].mxu0 %vm368_vm2, %v6074_v39  ;;  %5100 = vmatmul.mubr.msk.bf16.gmra.mrb[20].mxu1 %vm368_vm2, %v6074_v39 }
  0x40   :  { %1073 = vmatpush1.bf16.msra.mxu1 %v5716_v3  ;;  %610 = vmatprep.mubr.bf16.mxu0 %v10586_v1  ;;  %v1066_v3 = vand.u32 %v5780_v2, %v6012_v19  ;;  %v5853_v2 = vld [vmem:[%s10578_s1 + $0x3c8] ss:$36 sps:$4 sm:$0xff]  }
  0x41   :  { %683 = vmatprep.mubr.bf16.mxu1 %v10586_v1  ;;  %5573 = vmatpush3.bf16.msra.mxu0 %v5719_v0  ;;  %v5776_v0 = vld [vmem:[%s10578_s1 + $0x260] ss:$36 sps:$4 sm:$0xff]  }
  0x42   :  { %1074 = vmatprep.subr.bf16.mxu1 %v5722_v4  ;;  %5574 = vmatprep.subr.bf16.mxu0 %v5723_v6  ;;  %v5786_v4 = vld [vmem:[%s10578_s1 + $0x2dc] ss:$36 sps:$4 sm:$0xff]  }
  0x44   :  { %1075 = vmatpush1.bf16.msra.mxu1 %v5720_v8  ;;  %v5789_v8 = vld [vmem:[%s10578_s1 + $0x364] ss:$36 sps:$4 sm:$0xff]  }
  0x45   :  { %5575 = vmatpush3.bf16.msra.mxu0 %v5723_v6  ;;  %1076 = vmatprep.subr.bf16.mxu1 %v1045_v12  ;;  %v5783_v6 = vld [vmem:[%s10578_s1 + $0x31c] ss:$36 sps:$4 sm:$0xff]  }
  0x46   :  { %5576 = vmatprep.subr.bf16.mxu0 %v410_v13  ;;  %v5784_v12 = vld [vmem:[%s10578_s1 + $0x2d8] ss:$36 sps:$4 sm:$0xff]  }
  0x47   :  { %5097 = vmatmul.mubr.msk.bf16.gmra.mrb[24].mxu0 %vm368_vm2, %v6117_v52  ;;  %5101 = vmatmul.mubr.msk.bf16.gmra.mrb[24].mxu1 %vm368_vm2, %v6117_v52 }
  0x48   :  { %620 = vmatprep.mubr.bf16.mxu0 %v10586_v1  ;;  %693 = vmatprep.mubr.bf16.mxu1 %v10586_v1 }
  0x49   :  { %1077 = vmatpush1.bf16.msra.mxu1 %v1042_v14  ;;  %5577 = vmatpush3.bf16.msra.mxu0 %v410_v13  ;;  %v5792_v13 = vld [vmem:[%s10578_s1 + $0x324] ss:$36 sps:$4 sm:$0xff]  }
  0x4a   :  { %1141 = vmatprep.subr.bf16.mxu0 %v5730_v15  ;;  %1214 = vmatprep.subr.bf16.mxu1 %v5733_v16  ;;  %v5796_v14 = vld [vmem:[%s10578_s1 + $0x3a8] ss:$36 sps:$4 sm:$0xff]   ;;  %v5802_v15 = vld [vmem:[%s10578_s1 + $0x3f0] ss:$36 sps:$4 sm:$0x3f]   ;;  %v1701_v16 = vand.u32 %v5804_v11, %v6012_v19 }
  0x4b   :  { %v1698_v20 = vand.u32 %v5802_v15, %v6012_v19  ;;  %v5863_v11 = vld [vmem:[%s10578_s1 + $0x44c] ss:$36 sps:$4 sm:$0xff]  }
  0x4f   :  { %5098 = vmatmul.mubr.msk.bf16.gmra.mrb[28].mxu0 %vm368_vm2, %v6136_v57  ;;  %5102 = vmatmul.mubr.msk.bf16.gmra.mrb[28].mxu1 %vm368_vm2, %v6136_v57 }
  0x50   :  { %5578 = vmatprep.mubr.msk.bf16.mxu0 %vm368_vm2, %v6039_v30  ;;  %1100 = vmatprep.mubr.bf16.mxu1 %v10586_v1 }
  0x57   :  { %5579 = vmatmul.mubr.msk.bf16.vlgmr.msra.gmra.mrb[32].mxu0 %vm368_vm2, %v6074_v39  ;;  %5202 = vmatmul.mubr.msk.bf16.vlgmr.msra.gmra.mrb[32].mxu1 %vm368_vm2, %v6039_v30 }
  0x58   :  { %1142 = vmatpush1.bf16.msra.mxu0 %v5728_v22  ;;  %1215 = vmatpush1.bf16.msra.mxu1 %v5731_v23  ;;  %v5793_v22 = vld [vmem:[%s10578_s1 + $0x368] ss:$36 sps:$4 sm:$0xff]   ;;  %v5801_v23 = vld [vmem:[%s10578_s1 + $0x3b4] ss:$36 sps:$4 sm:$0xff]  }
  0x59   :  { %1143 = vmatprep.subr.bf16.mxu0 %v5736_v24  ;;  %5582 = vmatprep.mubr.msk.bf16.mxu0 %vm368_vm2, %v6117_v52  ;;  %v5807_v24 = vld [vmem:[%s10578_s1 + $0x3fc] ss:$36 sps:$4 sm:$0x3f]  }
  0x5a   :  { %1110 = vmatprep.mubr.bf16.mxu1 %v10586_v1  ;;  %1216 = vmatprep.subr.bf16.mxu1 %v5742_v25  ;;  %v5799_v25 = vld [vmem:[%s10578_s1 + $0x3b0] ss:$36 sps:$4 sm:$0xff]  }
  0x5c   :  { %1144 = vmatpush1.bf16.msra.mxu0 %v5734_v26  ;;  %1217 = vmatpush1.bf16.msra.mxu1 %v5740_v27  ;;  %v5805_v26 = vld [vmem:[%s10578_s1 + $0x3f8] ss:$36 sps:$4 sm:$0x3f]   ;;  %v1707_v27 = vand.u32 %v5807_v24, %v6012_v19  ;;  %v5864_v24 = vld [vmem:[%s10578_s1 + $0x488] ss:$36 sps:$4 sm:$0xff]  }
  0x5d   :  { %1145 = vmatprep.subr.bf16.mxu0 %v5739_v28  ;;  %1218 = vmatprep.subr.bf16.mxu1 %v5748_v29  ;;  %v1704_v28 = vand.u32 %v5805_v26, %v6012_v19  ;;  %v5810_v29 = vld [vmem:[%s10578_s1 + $0x2ec] ss:$36 sps:$4 sm:$0xff]  }
  0x5f   :  { %5583 = vmatmul.mubr.msk.bf16.gmra.mrb[36].mxu0 %vm368_vm2, %v6136_v57  ;;  %5203 = vmatmul.mubr.msk.bf16.gmra.mrb[36].mxu1 %vm368_vm2, %v6074_v39 }
  0x60   :  { %1146 = vmatpush1.bf16.msra.mxu0 %v5737_v31  ;;  %1219 = vmatpush1.bf16.msra.mxu1 %v5746_v32  ;;  %v5808_v31 = vld [vmem:[%s10578_s1 + $0x2e8] ss:$36 sps:$4 sm:$0xff]   ;;  %v5811_v32 = vld [vmem:[%s10578_s1 + $0x2e0] ss:$36 sps:$4 sm:$0xff]  }
  0x61   :  { %1147 = vmatprep.subr.bf16.mxu0 %v5745_v34  ;;  %1120 = vmatprep.mubr.bf16.mxu1 %v10586_v1  ;;  %v5819_v34 = vld [vmem:[%s10578_s1 + $0x32c] ss:$36 sps:$4 sm:$0xff]  }
  0x62   :  { %1173 = vmatprep.mubr.bf16.mxu0 %v10586_v1  ;;  %1220 = vmatprep.subr.bf16.mxu1 %v5754_v36  ;;  %v5817_v36 = vld [vmem:[%s10578_s1 + $0x328] ss:$36 sps:$4 sm:$0xff]  }
  0x64   :  { %1148 = vmatpush1.bf16.msra.mxu0 %v5743_v37  ;;  %1221 = vmatpush1.bf16.msra.mxu1 %v5752_v40  ;;  %v5822_v37 = vld [vmem:[%s10578_s1 + $0x37c] ss:$36 sps:$4 sm:$0xff]   ;;  %v5823_v40 = vld [vmem:[%s10578_s1 + $0x370] ss:$36 sps:$4 sm:$0xff]  }
  0x65   :  { %1149 = vmatprep.subr.bf16.mxu0 %v1051_v41  ;;  %1222 = vmatprep.subr.bf16.mxu1 %v1057_v43  ;;  %v5828_v41 = vld [vmem:[%s10578_s1 + $0x3c4] ss:$36 sps:$4 sm:$0xff]   ;;  %v5831_v43 = vld [vmem:[%s10578_s1 + $0x3bc] ss:$36 sps:$4 sm:$0xff]  }
  0x67   :  { %5204 = vmatmul.mubr.msk.bf16.gmra.mrb[40].mxu1 %vm368_vm2, %v6117_v52 }
  0x68   :  { %1150 = vmatpush1.bf16.msra.mxu0 %v1048_v44  ;;  %1130 = vmatprep.mubr.bf16.mxu1 %v10586_v1  ;;  %v5837_v44 = vld [vmem:[%s10578_s1 + $0x404] ss:$36 sps:$4 sm:$0x3f]  }
  0x69   :  { %1287 = vmatprep.subr.bf16.mxu0 %v5757_v45  ;;  %1223 = vmatpush1.bf16.msra.mxu1 %v1054_v46  ;;  %v5826_v45 = vld [vmem:[%s10578_s1 + $0x3c0] ss:$36 sps:$4 sm:$0xff]   ;;  %v5829_v46 = vld [vmem:[%s10578_s1 + $0x3b8] ss:$36 sps:$4 sm:$0xff]  }
  0x6a   :  { %5586 = vmatprep.subr.bf16.mxu1 %v5764_v47 }
  0x6b   :  { %5206 = vmatmul.mubr.msk.bf16.vlgmr.msra.gmra.mrb[40].mxu0 %vm368_vm2, %v6039_v30 }
  0x6c   :  { %1288 = vmatpush1.bf16.msra.mxu0 %v5755_v48  ;;  %1183 = vmatprep.mubr.bf16.mxu0 %v10586_v1  ;;  %v5835_v48 = vld [vmem:[%s10578_s1 + $0x400] ss:$36 sps:$4 sm:$0x3f]  }
  0x6d   :  { %1289 = vmatprep.subr.bf16.mxu0 %v5763_v49  ;;  %v1713_v49 = vand.u32 %v5837_v44, %v6012_v19 }
  0x6f   :  { %5205 = vmatmul.mubr.msk.bf16.gmra.mrb[44].mxu1 %vm368_vm2, %v6136_v57 }
  0x70   :  { %1290 = vmatpush1.bf16.msra.mxu0 %v5761_v50  ;;  %1246 = vmatprep.mubr.bf16.mxu1 %v10586_v1 }
  0x71   :  { %1291 = vmatprep.subr.bf16.mxu0 %v5767_v51  ;;  %v1710_v51 = vand.u32 %v5835_v48, %v6012_v19 }
  0x73   :  { %5207 = vmatmul.mubr.msk.bf16.gmra.mrb[44].mxu0 %vm368_vm2, %v6074_v39 }
  0x74   :  { %1193 = vmatprep.mubr.bf16.mxu0 %v10586_v1  ;;  %1292 = vmatpush1.bf16.msra.mxu0 %v5765_v53  ;;  %v5840_v53 = vld [vmem:[%s10578_s1 + $0x43c] ss:$36 sps:$4 sm:$0xff]  }
  0x75   :  { %1293 = vmatprep.subr.bf16.mxu0 %v5771_v54  ;;  %v5841_v54 = vld [vmem:[%s10578_s1 + $0x2f0] ss:$36 sps:$4 sm:$0xff]  }
  0x77   :  { %5210 = vmatmul.mubr.msk.bf16.vlgmr.msra.gmra.mrb[48].mxu1 %vm368_vm2, %v6039_v30 }
  0x78   :  { %5587 = vmatpush3.bf16.msra.mxu1 %v5764_v47  ;;  %1256 = vmatprep.mubr.bf16.mxu1 %v10586_v1  ;;  %v5832_v47 = vld [vmem:[%s10578_s1 + $0x408] ss:$36 sps:$4 sm:$0x3f]  }
  0x79   :  { %5588 = vmatprep.subr.bf16.mxu1 %v5768_v56  ;;  %1294 = vmatpush1.bf16.msra.mxu0 %v5769_v58  ;;  %v1716_v50 = vand.u32 %v5832_v47, %v6012_v19  ;;  %v6580_v58 = vld [vmem:[%s10579_s0] sm:$0xff]  }
  0x7a   :  { %1295 = vmatprep.subr.bf16.mxu0 %v1063_v60  ;;  %v5848_v60 = vld [vmem:[%s10578_s1 + $0x4cc] ss:$36 sps:$4 sm:$0xff]  }
  0x7b   :  { %5208 = vmatmul.mubr.msk.bf16.gmra.mrb[48].mxu0 %vm368_vm2, %v6117_v52 }
  0x7c   :  { %5589 = vmatpush3.bf16.msra.mxu1 %v5768_v56  ;;  %1203 = vmatprep.mubr.bf16.mxu0 %v10586_v1  ;;  %v5845_v56 = vld [vmem:[%s10578_s1 + $0x338] ss:$36 sps:$4 sm:$0xff]  }
  0x7d   :  { %5590 = vmatprep.subr.bf16.mxu1 %v5772_v61  ;;  %1296 = vmatpush1.bf16.msra.mxu0 %v1060_v63  ;;  %v5852_v63 = vld [vmem:[%s10578_s1 + $0x514] ss:$36 sps:$4 sm:$0xff]  }
  0x7e   :  { %1724 = vmatprep.subr.bf16.mxu0 %v5779_v62  ;;  %v5846_v62 = vld [vmem:[%s10578_s1 + $0x4c8] ss:$36 sps:$4 sm:$0xff]  }
  0x7f   :  { %5211 = vmatmul.mubr.msk.bf16.gmra.mrb[52].mxu1 %vm368_vm2, %v6074_v39 }
  0x80   :  { %5591 = vmatpush3.bf16.msra.mxu1 %v5772_v61  ;;  %1266 = vmatprep.mubr.bf16.mxu1 %v10586_v1  ;;  %v5849_v61 = vld [vmem:[%s10578_s1 + $0x380] ss:$36 sps:$4 sm:$0xff]  }
  0x81   :  { %5592 = vmatprep.subr.bf16.mxu1 %v5776_v0 }
  0x83   :  { %5209 = vmatmul.mubr.msk.bf16.gmra.mrb[52].mxu0 %vm368_vm2, %v6136_v57 }
  0x84   :  { %1319 = vmatprep.mubr.bf16.mxu0 %v10586_v1  ;;  %5593 = vmatpush3.bf16.msra.mxu1 %v5776_v0  ;;  %v5856_v0 = vld [vmem:[%s10578_s1 + $0x55c] ss:$36 sps:$4 sm:$0x3f]  }
  0x85   :  { %5594 = vmatprep.subr.bf16.mxu1 %v1066_v3 }
  0x87   :  { %5212 = vmatmul.mubr.msk.bf16.gmra.mrb[56].mxu1 %vm368_vm2, %v6117_v52 }
  0x88   :  { %1276 = vmatprep.mubr.bf16.mxu1 %v10586_v1  ;;  %5595 = vmatpush3.bf16.msra.mxu1 %v1066_v3  ;;  %v5857_v3 = vld [vmem:[%s10578_s1 + $0x410] ss:$36 sps:$4 sm:$0x3f]  }
  0x89   :  { %1797 = vmatprep.subr.bf16.mxu1 %v5786_v4  ;;  %v6615_v4 = vld [vmem:[%s10579_s0 + $0x8] sm:$0xff]  }
  0x8b   :  { %5214 = vmatmul.mubr.msk.bf16.vlgmr.msra.gmra.mrb[56].mxu0 %vm368_vm2, %v6039_v30 }
  0x8c   :  { %1725 = vmatpush1.bf16.msra.mxu0 %v5777_v5  ;;  %1329 = vmatprep.mubr.bf16.mxu0 %v10586_v1  ;;  %v5850_v5 = vld [vmem:[%s10578_s1 + $0x510] ss:$36 sps:$4 sm:$0xff]  }
  0x8d   :  { %1726 = vmatprep.subr.bf16.mxu0 %v5783_v6  ;;  %v5854_v6 = vld [vmem:[%s10578_s1 + $0x558] ss:$36 sps:$4 sm:$0x3f]  }
  0x8f   :  { %5213 = vmatmul.mubr.msk.bf16.gmra.mrb[60].mxu1 %vm368_vm2, %v6136_v57 }
  0x90   :  { %1727 = vmatpush1.bf16.msra.mxu0 %v5781_v7  ;;  %5596 = vmatprep.mubr.msk.bf16.mxu1 %vm368_vm2, %v6039_v30  ;;  %v2357_v7 = vand.u32 %v5856_v0, %v6012_v19 }
  0x91   :  { %1728 = vmatprep.subr.bf16.mxu0 %v5789_v8  ;;  %v1722_v8 = vand.u32 %v5857_v3, %v6012_v19  ;;  %v6662_v15 = vpop.permute.xlu0 %89 }
  0x93   :  { %5215 = vmatmul.mubr.msk.bf16.gmra.mrb[60].mxu0 %vm368_vm2, %v6074_v39 }
  0x94   :  { %1339 = vmatprep.mubr.bf16.mxu0 %v10586_v1  ;;  %1729 = vmatpush1.bf16.msra.mxu0 %v5787_v9  ;;  %v2354_v9 = vand.u32 %v5854_v6, %v6012_v19 }
  0x95   :  { %1730 = vmatprep.subr.bf16.mxu0 %v5798_v10  ;;  %v5860_v10 = vld [vmem:[%s10578_s1 + $0x444] ss:$36 sps:$4 sm:$0xff]  }
  0x97   :  { %5597 = vmatmul.mubr.msk.bf16.vlgmr.msra.gmra.mrb[64].mxu1 %vm368_vm2, %v6074_v39 }
  0x98   :  { %1798 = vmatpush1.bf16.msra.mxu1 %v5784_v12  ;;  %5600 = vmatprep.mubr.msk.bf16.mxu1 %vm368_vm2, %v6117_v52  ;;  %v6641_v12 = vld [vmem:[%s10579_s0 + $0x10] sm:$0xff]  }
  0x99   :  { %1799 = vmatprep.subr.bf16.mxu1 %v5792_v13  ;;  %1731 = vmatpush1.bf16.msra.mxu0 %v5796_v14  ;;  %v5858_v13 = vld [vmem:[%s10578_s1 + $0x440] ss:$36 sps:$4 sm:$0xff]   ;;  %v5861_v14 = vld [vmem:[%s10578_s1 + $0x448] ss:$36 sps:$4 sm:$0xff]  }
  0x9a   :  { %1732 = vmatprep.subr.bf16.mxu0 %v1701_v16  ;;  %v5866_v16 = vld [vmem:[%s10578_s1 + $0x48c] ss:$36 sps:$4 sm:$0xff]  }
  0x9b   :  { %5216 = vmatmul.mubr.msk.bf16.gmra.mrb[64].mxu0 %vm368_vm2, %v6117_v52 }
  0x9c   :  { %1800 = vmatpush1.bf16.msra.mxu1 %v5790_v17  ;;  %1349 = vmatprep.mubr.bf16.mxu0 %v10586_v1 }
  0x9d   :  { %1801 = vmatprep.subr.bf16.mxu1 %v5795_v18  ;;  %1733 = vmatpush1.bf16.msra.mxu0 %v1698_v20 }
  0x9e   :  { %1870 = vmatprep.subr.bf16.mxu0 %v5813_v21  ;;  %v5872_v21 = vld [vmem:[%s10578_s1 + $0x494] ss:$36 sps:$4 sm:$0xff]  }
  0x9f   :  { %5601 = vmatmul.mubr.msk.bf16.gmra.mrb[68].mxu1 %vm368_vm2, %v6136_v57 }
  0xa0   :  { %1802 = vmatpush1.bf16.msra.mxu1 %v5793_v22  ;;  %1829 = vmatprep.mubr.bf16.mxu1 %v10586_v1 }
  0xa1   :  { %1803 = vmatprep.subr.bf16.mxu1 %v5801_v23 }
  0xa3   :  { %5217 = vmatmul.mubr.msk.bf16.gmra.mrb[68].mxu0 %vm368_vm2, %v6136_v57 }
  0xa4   :  { %1804 = vmatpush1.bf16.msra.mxu1 %v5799_v25  ;;  %1756 = vmatprep.mubr.bf16.mxu0 %v10586_v1 }
  0xa5   :  { %1805 = vmatprep.subr.bf16.mxu1 %v1707_v27  ;;  %v5869_v27 = vld [vmem:[%s10578_s1 + $0x4d4] ss:$36 sps:$4 sm:$0xff]  }
  0xa8   :  { %1806 = vmatpush1.bf16.msra.mxu1 %v1704_v28  ;;  %v5870_v28 = vld [vmem:[%s10578_s1 + $0x490] ss:$36 sps:$4 sm:$0xff]  }
  0xa9   :  { %1943 = vmatprep.subr.bf16.mxu1 %v5810_v29  ;;  %v5878_v29 = vld [vmem:[%s10578_s1 + $0x4dc] ss:$36 sps:$4 sm:$0xff]  }
  0xab   :  { %5317 = vmatmul.mubr.msk.bf16.vlgmr.msra.gmra.mrb[72].mxu0 %vm368_vm2, %v6039_v30  ;;  %5321 = vmatmul.mubr.msk.bf16.vlgmr.msra.gmra.mrb[72].mxu1 %vm368_vm2, %v6039_v30  ;;  %v5825_v30 = vld [vmem:[%s10578_s1 + $0x374] ss:$36 sps:$4 sm:$0xff]  }
  0xac   :  { %1944 = vmatpush1.bf16.msra.mxu1 %v5808_v31  ;;  %1871 = vmatpush1.bf16.msra.mxu0 %v5811_v32  ;;  %v5867_v31 = vld [vmem:[%s10578_s1 + $0x4d0] ss:$36 sps:$4 sm:$0xff]   ;;  %v6700_v32 = vpop.permute.xlu0 %94 }
  0xad   :  { %1766 = vmatprep.mubr.bf16.mxu0 %v10586_v1  ;;  %1839 = vmatprep.mubr.bf16.mxu1 %v10586_v1 }
  0xae   :  { %1945 = vmatprep.subr.bf16.mxu1 %v5816_v33  ;;  %1872 = vmatprep.subr.bf16.mxu0 %v5819_v34  ;;  %v6702_v33 = vpop.permute.xlu1 %99  ;;  %v5875_v34 = vld [vmem:[%s10578_s1 + $0x51c] ss:$36 sps:$4 sm:$0xff]  }
  0xb0   :  { %1946 = vmatpush1.bf16.msra.mxu1 %v5814_v35  ;;  %1873 = vmatpush1.bf16.msra.mxu0 %v5817_v36  ;;  %v5881_v35 = vld [vmem:[%s10578_s1 + $0x564] ss:$36 sps:$4 sm:$0x3f]  }
  0xb1   :  { %1947 = vmatprep.subr.bf16.mxu1 %v5822_v37  ;;  %1874 = vmatprep.subr.bf16.mxu0 %v5825_v30  ;;  %v5876_v30 = vld [vmem:[%s10578_s1 + $0x4d8] ss:$36 sps:$4 sm:$0xff]  }
  0xb3   :  { %5318 = vmatmul.mubr.msk.bf16.gmra.mrb[76].mxu0 %vm368_vm2, %v6074_v39  ;;  %5322 = vmatmul.mubr.msk.bf16.gmra.mrb[76].mxu1 %vm368_vm2, %v6074_v39  ;;  %v1719_v39 = vand.u32 %v5834_v42, %v6012_v19  ;;  %v5879_v42 = vld [vmem:[%s10578_s1 + $0x560] ss:$36 sps:$4 sm:$0x3f]  }
  0xb4   :  { %1948 = vmatpush1.bf16.msra.mxu1 %v5820_v38  ;;  %1776 = vmatprep.mubr.bf16.mxu0 %v10586_v1  ;;  %v6718_v38 = vld [vmem:[%s10579_s0 + $0x18] sm:$0xff]  }
  0xb5   :  { %1849 = vmatprep.mubr.bf16.mxu1 %v10586_v1  ;;  %1875 = vmatpush1.bf16.msra.mxu0 %v5823_v40 }
  0xb6   :  { %1949 = vmatprep.subr.bf16.mxu1 %v5828_v41  ;;  %1876 = vmatprep.subr.bf16.mxu0 %v5831_v43 }
  0xb8   :  { %1950 = vmatpush1.bf16.msra.mxu1 %v5826_v45  ;;  %v5873_v45 = vld [vmem:[%s10578_s1 + $0x518] ss:$36 sps:$4 sm:$0xff]  }
  0xb9   :  { %1877 = vmatpush1.bf16.msra.mxu0 %v5829_v46  ;;  %1951 = vmatprep.subr.bf16.mxu1 %v1719_v39  ;;  %v5884_v46 = vld [vmem:[%s10578_s1 + $0x524] ss:$36 sps:$4 sm:$0xff]  }
  0xba   :  { %1878 = vmatprep.subr.bf16.mxu0 %v1713_v49 }
  0xbb   :  { %5319 = vmatmul.mubr.msk.bf16.gmra.mrb[80].mxu0 %vm368_vm2, %v6117_v52  ;;  %5323 = vmatmul.mubr.msk.bf16.gmra.mrb[80].mxu1 %vm368_vm2, %v6117_v52  ;;  %v5838_v52 = vld [vmem:[%s10578_s1 + $0x438] ss:$36 sps:$4 sm:$0xff]  }
  0xbc   :  { %1786 = vmatprep.mubr.bf16.mxu0 %v10586_v1  ;;  %1859 = vmatprep.mubr.bf16.mxu1 %v10586_v1 }
  0xbd   :  { %1952 = vmatpush1.bf16.msra.mxu1 %v1716_v50  ;;  %1879 = vmatpush1.bf16.msra.mxu0 %v1710_v51  ;;  %v2363_v50 = vand.u32 %v5881_v35, %v6012_v19  ;;  %v5890_v51 = vld [vmem:[%s10578_s1 + $0x56c] ss:$36 sps:$4 sm:$0x3f]  }
  0xbe   :  { %2380 = vmatprep.subr.bf16.mxu1 %v5840_v53  ;;  %5604 = vmatprep.subr.bf16.mxu0 %v5841_v54  ;;  %v2369_v0 = vand.u32 %v5890_v51, %v6012_v19 }
  0xc3   :  { %5320 = vmatmul.mubr.msk.bf16.gmra.mrb[84].mxu0 %vm368_vm2, %v6136_v57  ;;  %5324 = vmatmul.mubr.msk.bf16.gmra.mrb[84].mxu1 %vm368_vm2, %v6136_v57 }
  0xc4   :  { %1902 = vmatprep.mubr.bf16.mxu0 %v10586_v1  ;;  %1975 = vmatprep.mubr.bf16.mxu1 %v10586_v1 }
  0xcb   :  { %5325 = vmatmul.mubr.msk.bf16.vlgmr.msra.gmra.mrb[88].mxu0 %vm368_vm2, %v6580_v58  ;;  %5329 = vmatmul.mubr.msk.bf16.vlgmr.msra.gmra.mrb[88].mxu1 %vm368_vm2, %v6580_v58 }
  0xcc   :  { %2381 = vmatpush1.bf16.msra.mxu1 %v5838_v52  ;;  %5605 = vmatpush3.bf16.msra.mxu0 %v5841_v54  ;;  %v5882_v52 = vld [vmem:[%s10578_s1 + $0x520] ss:$36 sps:$4 sm:$0xff]  }
  0xcd   :  { %1912 = vmatprep.mubr.bf16.mxu0 %v10586_v1  ;;  %1985 = vmatprep.mubr.bf16.mxu1 %v10586_v1 }
  0xce   :  { %2382 = vmatprep.subr.bf16.mxu1 %v5844_v55  ;;  %5606 = vmatprep.subr.bf16.mxu0 %v5845_v56  ;;  %v2360_v55 = vand.u32 %v5879_v42, %v6012_v19 }
  0xd0   :  { %2383 = vmatpush1.bf16.msra.mxu1 %v5842_v59  ;;  %5607 = vmatpush3.bf16.msra.mxu0 %v5845_v56  ;;  %v5888_v56 = vld [vmem:[%s10578_s1 + $0x568] ss:$36 sps:$4 sm:$0x3f]   ;;  %v6769_v59 = vld [vmem:[%s10578_s1 + $0x574] ss:$36 sps:$4 sm:$0x3f]  }
  0xd1   :  { %2384 = vmatprep.subr.bf16.mxu1 %v5848_v60  ;;  %5608 = vmatprep.subr.bf16.mxu0 %v5849_v61 }
  0xd3   :  { %5326 = vmatmul.mubr.msk.bf16.gmra.mrb[92].mxu0 %vm368_vm2, %v6615_v4  ;;  %5330 = vmatmul.mubr.msk.bf16.gmra.mrb[92].mxu1 %vm368_vm2, %v6615_v4 }
  0xd4   :  { %2385 = vmatpush1.bf16.msra.mxu1 %v5846_v62  ;;  %1922 = vmatprep.mubr.bf16.mxu0 %v10586_v1  ;;  %v6775_v62 = vpop.permute.xlu1 %104 }
  0xd5   :  { %1995 = vmatprep.mubr.bf16.mxu1 %v10586_v1  ;;  %5609 = vmatpush3.bf16.msra.mxu0 %v5849_v61 }
  0xd6   :  { %2386 = vmatprep.subr.bf16.mxu1 %v5852_v63  ;;  %5610 = vmatprep.subr.bf16.mxu0 %v5853_v2  ;;  %v5887_v63 = vld [vmem:[%s10578_s1 + $0x454] ss:$36 sps:$4 sm:$0xff]  }
  0xd8   :  { %2387 = vmatpush1.bf16.msra.mxu1 %v5850_v5 }
  0xd9   :  { %5611 = vmatpush3.bf16.msra.mxu0 %v5853_v2  ;;  %2388 = vmatprep.subr.bf16.mxu1 %v2357_v7  ;;  %v6784_v2 = vld [vmem:[%s10578_s1 + $0x570] ss:$36 sps:$4 sm:$0x3f]  }
  0xda   :  { %5612 = vmatprep.subr.bf16.mxu0 %v1722_v8 }
  0xdb   :  { %5327 = vmatmul.mubr.msk.bf16.gmra.mrb[96].mxu0 %vm368_vm2, %v6641_v12  ;;  %5331 = vmatmul.mubr.msk.bf16.gmra.mrb[96].mxu1 %vm368_vm2, %v6641_v12 }
  0xdc   :  { %1932 = vmatprep.mubr.bf16.mxu0 %v10586_v1  ;;  %2005 = vmatprep.mubr.bf16.mxu1 %v10586_v1 }
  0xdd   :  { %2389 = vmatpush1.bf16.msra.mxu1 %v2354_v9  ;;  %5613 = vmatpush3.bf16.msra.mxu0 %v1722_v8 }
  0xde   :  { %2453 = vmatprep.subr.bf16.mxu0 %v5860_v10  ;;  %2526 = vmatprep.subr.bf16.mxu1 %v5863_v11  ;;  %v5907_v10 = vld [vmem:[%s10578_s1 + $0x578] ss:$36 sps:$4 sm:$0x3f]  }
  0xe3   :  { %5328 = vmatmul.mubr.msk.bf16.gmra.mrb[100].mxu0 %vm368_vm2, %v6136_v57  ;;  %5332 = vmatmul.mubr.msk.bf16.gmra.mrb[100].mxu1 %vm368_vm2, %v6136_v57 }
  0xe4   :  { %5614 = vmatprep.mubr.msk.bf16.mxu0 %vm368_vm2, %v6580_v58  ;;  %2412 = vmatprep.mubr.bf16.mxu1 %v10586_v1 }
  0xea   :  { %v446_v57 = vpop.f32.mrb[0].mxu0  ;;  %v6667_v17 = vpop.f32.mrb[0].mxu1 }
  0xeb   :  { %5615 = vmatmul.mubr.msk.bf16.vlgmr.msra.gmra.mrb[104].mxu0 %vm368_vm2, %v6615_v4  ;;  %5432 = vmatmul.mubr.msk.bf16.vlgmr.msra.gmra.mrb[104].mxu1 %vm368_vm2, %v6580_v58  ;;  %v448_v18 = vpop.f32.mrb[1].mxu0  ;;  %v6673_v20 = vpop.f32.mrb[1].mxu1  ;;  %v6740_v47 = vadd.f32 %v446_v57, %v6662_v15  ;;  %v6803_v11 = vadd.f32 %v6667_v17, %v6662_v15  ;;  %v5885_v17 = vld [vmem:[%s10578_s1 + $0x450] ss:$36 sps:$4 sm:$0xff]  }
  0xec   :  { %2454 = vmatpush1.bf16.msra.mxu0 %v5858_v13  ;;  %2527 = vmatpush1.bf16.msra.mxu1 %v5861_v14  ;;  %v450_v22 = vpop.f32.mrb[2].mxu0  ;;  %v6678_v23 = vpop.f32.mrb[2].mxu1  ;;  %v6743_v39 = vadd.f32 %v448_v18, %v6662_v15  ;;  %v6807_v13 = vadd.f32 %v6673_v20, %v6662_v15  ;;  %v2366_v20 = vand.u32 %v5888_v56, %v6012_v19 }
  0xed   :  { %v452_v25 = vpop.f32.mrb[3].mxu0  ;;  %v6683_v26 = vpop.f32.mrb[3].mxu1  ;;  %2455 = vmatprep.subr.bf16.mxu0 %v5866_v16  ;;  %5618 = vmatprep.mubr.msk.bf16.mxu0 %vm368_vm2, %v6641_v12  ;;  %10873 = vst [vmem:[#allocation2_spill] sm:$0xff] %v6740_v47  ;;  %v6752_v53 = vadd.f32 %v450_v22, %v6700_v32  ;;  %v3089_v60 = vmul.f32 %v6740_v47, %v6740_v47  ;;  %10879 = vst [vmem:[#allocation8_spill] sm:$0xff] %v6803_v11 }
  0xee   :  { %2422 = vmatprep.mubr.bf16.mxu1 %v10586_v1  ;;  %2528 = vmatprep.subr.bf16.mxu1 %v5872_v21  ;;  %10874 = vst [vmem:[#allocation3_spill] sm:$0xff] %v6743_v39  ;;  %v6755_v54 = vadd.f32 %v452_v25, %v6700_v32  ;;  %v3090_v61 = vmul.f32 %v6743_v39, %v6743_v39  ;;  %10880 = vst [vmem:[#allocation9_spill] sm:$0xff] %v6807_v13  ;;  %v6876_v56 = vpop.permute.xlu0 %109 }
  0xef   :  { %10875 = vst [vmem:[#allocation4_spill] sm:$0xff] %v6752_v53  ;;  %v3098_v3 = vmul.f32 %v6752_v53, %v6752_v53  ;;  %v6815_v57 = vadd.f32 %v6678_v23, %v6700_v32  ;;  %v2737_v23 = vadd.f32 %v6743_v39, %v6740_v47  ;;  %v3091_v42 = vmul.f32 %v6803_v11, %v6803_v11 }
  0xf0   :  { %2456 = vmatpush1.bf16.msra.mxu0 %v5864_v24  ;;  %2529 = vmatpush1.bf16.msra.mxu1 %v5870_v28  ;;  %10876 = vst [vmem:[#allocation5_spill] sm:$0xff] %v6755_v54  ;;  %v3099_v5 = vmul.f32 %v6755_v54, %v6755_v54  ;;  %v3161_v24 = vadd.f32 %v3090_v61, %v3089_v60 }
  0xf1   :  { %2457 = vmatprep.subr.bf16.mxu0 %v5869_v27  ;;  %2530 = vmatprep.subr.bf16.mxu1 %v5878_v29  ;;  %10881 = vst [vmem:[#allocation10_spill] sm:$0xff] %v6815_v57  ;;  %v2747_v25 = vadd.f32 %v6755_v54, %v6752_v53  ;;  %v3100_v51 = vmul.f32 %v6815_v57, %v6815_v57 }
  0xf2   :  { %v456_v36 = vpop.f32.mrb[4].mxu0  ;;  %v6710_v37 = vpop.f32.mrb[4].mxu1  ;;  %v3162_v60 = vadd.f32 %v3161_v24, %v3091_v42 }
  0xf3   :  { %5619 = vmatmul.mubr.msk.bf16.gmra.mrb[108].mxu0 %vm368_vm2, %v6718_v38  ;;  %5433 = vmatmul.mubr.msk.bf16.gmra.mrb[108].mxu1 %vm368_vm2, %v6615_v4  ;;  %v458_v40 = vpop.f32.mrb[5].mxu0  ;;  %v6724_v41 = vpop.f32.mrb[5].mxu1  ;;  %v6791_v6 = vadd.f32 %v456_v36, %v6702_v33  ;;  %v5893_v36 = vld [vmem:[%s10578_s1 + $0x49c] ss:$36 sps:$4 sm:$0xff]   ;;  %v2748_v61 = vadd.f32 %v2747_v25, %v6815_v57 }
  0xf4   :  { %2458 = vmatpush1.bf16.msra.mxu0 %v5867_v31  ;;  %v6729_v43 = vpop.f32.mrb[6].mxu0  ;;  %v6731_v44 = vpop.f32.mrb[6].mxu1  ;;  %2531 = vmatpush1.bf16.msra.mxu1 %v5876_v30  ;;  %v6794_v7 = vadd.f32 %v458_v40, %v6702_v33  ;;  %v3171_v31 = vadd.f32 %v3099_v5, %v3098_v3  ;;  %v6848_v30 = vld [vmem:[%s10578_s1 + $0x458] ss:$36 sps:$4 sm:$0xff]   ;;  %v6851_v40 = vand.u32 %v5907_v10, %v6012_v19 }
  0xf5   :  { %v462_v48 = vpop.f32.mrb[7].mxu0  ;;  %v6745_v49 = vpop.f32.mrb[7].mxu1  ;;  %2459 = vmatprep.subr.bf16.mxu0 %v5875_v34  ;;  %2432 = vmatprep.mubr.bf16.mxu1 %v10586_v1  ;;  %10877 = vst [vmem:[#allocation6_spill] sm:$0xff] %v6791_v6  ;;  %v3107_v34 = vmul.f32 %v6791_v6, %v6791_v6  ;;  %v6893_v5 = vadd.f32 %v6724_v41, %v6702_v33 }
  0xf6   :  { %2485 = vmatprep.mubr.bf16.mxu0 %v10586_v1  ;;  %2532 = vmatprep.subr.bf16.mxu1 %v5884_v46  ;;  %10878 = vst [vmem:[#allocation7_spill] sm:$0xff] %v6794_v7  ;;  %v3108_v35 = vmul.f32 %v6794_v7, %v6794_v7  ;;  %v6859_v46 = vadd.f32 %v6729_v43, %v6775_v62  ;;  %v5891_v43 = vld [vmem:[%s10578_s1 + $0x498] ss:$36 sps:$4 sm:$0xff]  }
  0xf7   :  { %10886 = vst [vmem:[#allocation15_spill] sm:$0xff] %v6893_v5 }
  0xf8   :  { %2460 = vmatpush1.bf16.msra.mxu0 %v5873_v45  ;;  %2533 = vmatpush1.bf16.msra.mxu1 %v5882_v52  ;;  %v3092_v45 = vmul.f32 %v6807_v13, %v6807_v13  ;;  %10882 = vst [vmem:[#allocation11_spill] sm:$0xff] %v6859_v46  ;;  %v6870_v52 = vadd.f32 %v6683_v26, %v6700_v32 }
  0xf9   :  { %2461 = vmatprep.subr.bf16.mxu0 %v2363_v50  ;;  %2534 = vmatprep.subr.bf16.mxu1 %v2369_v0  ;;  %v6862_v50 = vadd.f32 %v462_v48, %v6775_v62  ;;  %v2738_v48 = vadd.f32 %v2737_v23, %v6803_v11  ;;  %v2757_v26 = vadd.f32 %v6794_v7, %v6791_v6  ;;  %v5899_v11 = vld [vmem:[%s10578_s1 + $0x528] ss:$36 sps:$4 sm:$0xff]  }
  0xfa   :  { %v466_v8 = vpop.f32.mrb[8].mxu0  ;;  %v6796_v9 = vpop.f32.mrb[8].mxu1  ;;  %10884 = vst [vmem:[#allocation13_spill] sm:$0xff] %v6870_v52  ;;  %v3172_v0 = vadd.f32 %v3171_v31, %v3100_v51  ;;  %v3181_v3 = vadd.f32 %v3108_v35, %v3107_v34  ;;  %v3116_v23 = vmul.f32 %v6859_v46, %v6859_v46  ;;  %v3101_v34 = vmul.f32 %v6870_v52, %v6870_v52 }
  0xfb   :  { %5434 = vmatmul.mubr.msk.bf16.gmra.mrb[112].mxu1 %vm368_vm2, %v6641_v12  ;;  %v468_v14 = vpop.f32.mrb[9].mxu0  ;;  %v6811_v16 = vpop.f32.mrb[9].mxu1  ;;  %10883 = vst [vmem:[#allocation12_spill] sm:$0xff] %v6862_v50  ;;  %v6903_v24 = vadd.f32 %v466_v8, %v6876_v56  ;;  %v6927_v51 = vadd.f32 %v2738_v48, %v6807_v13  ;;  %v6929_v29 = vadd.f32 %v3162_v60, %v3092_v45 }
  0xfc   :  { %2462 = vmatpush1.bf16.msra.mxu0 %v2360_v55  ;;  %v6817_v18 = vpop.f32.mrb[10].mxu0  ;;  %v6819_v21 = vpop.f32.mrb[10].mxu1  ;;  %2442 = vmatprep.mubr.bf16.mxu1 %v10586_v1  ;;  %v6874_v55 = vadd.f32 %v6710_v37, %v6702_v33  ;;  %v5897_v37 = vld [vmem:[%s10578_s1 + $0x4e4] ss:$36 sps:$4 sm:$0xff]   ;;  %v6906_v25 = vadd.f32 %v468_v14, %v6876_v56  ;;  %v6944_v48 = vadd.f32 %v3172_v0, %v3101_v34 }
  0xfd   :  { %v6832_v27 = vpop.f32.mrb[11].mxu0  ;;  %v6834_v28 = vpop.f32.mrb[11].mxu1  ;;  %2599 = vmatprep.subr.bf16.mxu0 %v5887_v63  ;;  %2535 = vmatpush1.bf16.msra.mxu1 %v2366_v20  ;;  %v3117_v20 = vmul.f32 %v6862_v50, %v6862_v50  ;;  %10887 = vst [vmem:[#allocation16_spill] sm:$0xff] %v6903_v24  ;;  %v5895_v14 = vld [vmem:[%s10578_s1 + $0x4e0] ss:$36 sps:$4 sm:$0xff]   ;;  %v2767_v60 = vadd.f32 %v6862_v50, %v6859_v46 }
  0xfe   :  { %10885 = vst [vmem:[#allocation14_spill] sm:$0xff] %v6874_v55  ;;  %v6886_v63 = vpop.permute.xlu1 %114  ;;  %5622 = vmatprep.subr.bf16.mxu1 %v6848_v30  ;;  %10888 = vst [vmem:[#allocation17_spill] sm:$0xff] %v6906_v25  ;;  %v3109_v35 = vmul.f32 %v6874_v55, %v6874_v55  ;;  %v2758_v22 = vadd.f32 %v2757_v26, %v6874_v55  ;;  %v6948_v26 = vpop.permute.xlu0 %119  ;;  %v3126_v13 = vmul.f32 %v6906_v25, %v6906_v25 }
  0xff   :  { %5436 = vmatmul.mubr.msk.bf16.vlgmr.msra.gmra.mrb[112].mxu0 %vm368_vm2, %v6580_v58  ;;  %10891 = vst [vmem:[#allocation20_spill] sm:$0xff] %v6948_v26  ;;  %v3191_v53 = vadd.f32 %v3117_v20, %v3116_v23  ;;  %v6962_v0 = vadd.f32 %v6817_v18, %v6886_v63  ;;  %v10894_v23 = vmov 0   ;;  %v6990_v46 = vadd.f32 %v6796_v9, %v6876_v56 }
 0x100   :  { %2600 = vmatpush1.bf16.msra.mxu0 %v5885_v17  ;;  %2495 = vmatprep.mubr.bf16.mxu0 %v10586_v1  ;;  %v3182_v45 = vadd.f32 %v3181_v3, %v3109_v35  ;;  %v6966_v3 = vadd.f32 %v6832_v27, %v6886_v63  ;;  %v6970_v20 = vadd.f32 %v2758_v22, %v6893_v5  ;;  %v5898_v27 = vld [vmem:[%s10578_s1 + $0x4a0] ss:$36 sps:$4 sm:$0xff]  }
 0x101   :  { %2601 = vmatprep.subr.bf16.mxu0 %v5893_v36  ;;  %v6918_v36 = vadd.f32 %v6731_v44, %v6775_v62  ;;  %v6934_v44 = vadd.f32 %v6745_v49, %v6775_v62  ;;  %v3110_v49 = vmul.f32 %v6893_v5, %v6893_v5  ;;  %10892 = vst [vmem:[#allocation21_spill] sm:$0xff] %v6962_v0  ;;  %10897 = vst [vmem:[#allocation25_spill] sm:$0xff] %v6990_v46 }
 0x102   :  { %v476_v10 = vpop.f32.mrb[12].mxu0  ;;  %v6895_v17 = vpop.f32.mrb[12].mxu1  ;;  %10893 = vst [vmem:[#allocation22_spill] sm:$0xff] %v6966_v3  ;;  %v7005_v9 = vadd.f32 %v6819_v21, %v6886_v63  ;;  %v3127_v5 = vmul.f32 %v6990_v46, %v6990_v46 }
 0x103   :  { %5435 = vmatmul.mubr.msk.bf16.gmra.mrb[116].mxu1 %vm368_vm2, %v6718_v38  ;;  %v478_v41 = vpop.f32.mrb[13].mxu0  ;;  %v6910_v31 = vpop.f32.mrb[13].mxu1  ;;  %10889 = vst [vmem:[#allocation18_spill] sm:$0xff] %v6918_v36  ;;  %10890 = vst [vmem:[#allocation19_spill] sm:$0xff] %v6934_v44  ;;  %v3119_v34 = vmul.f32 %v6934_v44, %v6934_v44  ;;  %v6975_v35 = vadd.f32 %v476_v10, %v6948_v26  ;;  %v2768_v22 = vadd.f32 %v2767_v60, %v6918_v36 }
 0x104   :  { %v480_v8 = vpop.f32.mrb[14].mxu0  ;;  %v6920_v42 = vpop.f32.mrb[14].mxu1  ;;  %2602 = vmatpush1.bf16.msra.mxu0 %v5891_v43  ;;  %2558 = vmatprep.mubr.bf16.mxu1 %v10586_v1  ;;  %v5901_v43 = vld [vmem:[%s10578_s1 + $0x52c] ss:$36 sps:$4 sm:$0xff]   ;;  %v6942_v1 = vadd.f32 %v2748_v61, %v6870_v52  ;;  %v3118_v61 = vmul.f32 %v6918_v36, %v6918_v36  ;;  %v6978_v50 = vadd.f32 %v478_v41, %v6948_v26 }
 0x105   :  { %v482_v57 = vpop.f32.mrb[15].mxu0  ;;  %v6936_v54 = vpop.f32.mrb[15].mxu1  ;;  %2603 = vmatprep.subr.bf16.mxu0 %v5897_v37  ;;  %v3125_v37 = vmul.f32 %v6903_v24, %v6903_v24  ;;  %10895 = vst [vmem:[#allocation23_spill] sm:$0xff] %v6975_v35  ;;  %v2777_v10 = vadd.f32 %v6906_v25, %v6903_v24  ;;  %10899 = vst [vmem:[#allocation27_spill] sm:$0xff] %v7005_v9  ;;  %v3134_v25 = vmul.f32 %v6962_v0, %v6962_v0  ;;  %v5902_v36 = vld [vmem:[%s10578_s1 + $0x4e8] ss:$36 sps:$4 sm:$0xff]  }
 0x106   :  { %10896 = vst [vmem:[#allocation24_spill] sm:$0xff] %v6978_v50  ;;  %v6980_v18 = vpop.permute.xlu1 %124  ;;  %v3192_v39 = vadd.f32 %v3191_v53, %v3118_v61  ;;  %v2787_v53 = vadd.f32 %v6966_v3, %v6962_v0  ;;  %v3144_v61 = vmul.f32 %v6978_v50, %v6978_v50  ;;  %v7043_v47 = vadd.f32 %v2768_v22, %v6934_v44 }
 0x107   :  { %5437 = vmatmul.mubr.msk.bf16.gmra.mrb[116].mxu0 %vm368_vm2, %v6615_v4  ;;  %v7030_v24 = vadd.f32 %v480_v8, %v6980_v18  ;;  %v7033_v0 = vadd.f32 %v482_v57, %v6980_v18  ;;  %v2778_v8 = vadd.f32 %v2777_v10, %v6990_v46  ;;  %v7050_v57 = vadd.f32 %v6834_v28, %v6886_v63 }
 0x108   :  { %2505 = vmatprep.mubr.bf16.mxu0 %v10894_v23  ;;  %2604 = vmatpush1.bf16.msra.mxu0 %v5895_v14  ;;  %v6985_v14 = vadd.f32 %v3182_v45, %v3110_v49  ;;  %v7001_v45 = vadd.f32 %v6811_v16, %v6876_v56  ;;  %v7052_v55 = vadd.f32 %v3192_v39, %v3119_v34 }
 0x109   :  { %2605 = vmatprep.subr.bf16.mxu0 %v5901_v43  ;;  %v3201_v43 = vadd.f32 %v3126_v13, %v3125_v37  ;;  %v3135_v13 = vmul.f32 %v6966_v3, %v6966_v3  ;;  %v3143_v37 = vmul.f32 %v6975_v35, %v6975_v35  ;;  %10900 = vst [vmem:[#allocation28_spill] sm:$0xff] %v7030_v24  ;;  %10901 = vst [vmem:[#allocation29_spill] sm:$0xff] %v7033_v0 }
 0x10a   :  { %v592_v41 = vpop.f32.mrb[16].mxu0  ;;  %v6994_v52 = vpop.f32.mrb[16].mxu1  ;;  %10898 = vst [vmem:[#allocation26_spill] sm:$0xff] %v7001_v45  ;;  %10902 = vst [vmem:[#allocation30_spill] sm:$0xff] %v7050_v57  ;;  %v3128_v7 = vmul.f32 %v7001_v45, %v7001_v45  ;;  %v3136_v6 = vmul.f32 %v7005_v9, %v7005_v9  ;;  %v7060_v22 = vadd.f32 %v6895_v17, %v6948_v26 }
 0x10b   :  { %5440 = vmatmul.mubr.msk.bf16.vlgmr.msra.gmra.mrb[120].mxu1 %vm368_vm2, %v6580_v58  ;;  %v7009_v60 = vpop.f32.mrb[17].mxu0  ;;  %v7011_v49 = vpop.f32.mrb[17].mxu1  ;;  %v3202_v10 = vadd.f32 %v3201_v43, %v3127_v5  ;;  %v3211_v46 = vadd.f32 %v3135_v13, %v3134_v25  ;;  %v2788_v28 = vadd.f32 %v2787_v53, %v7005_v9  ;;  %v2797_v39 = vadd.f32 %v6978_v50, %v6975_v35  ;;  %v5906_v5 = vld [vmem:[%s10578_s1 + $0x530] ss:$36 sps:$4 sm:$0xff]  }
 0x10c   :  { %5623 = vmatpush3.bf16.msra.mxu1 %v6848_v30  ;;  %v7020_v16 = vpop.f32.mrb[18].mxu0  ;;  %v7022_v21 = vpop.f32.mrb[18].mxu1  ;;  %2568 = vmatprep.mubr.bf16.mxu1 %v10894_v23  ;;  %10903 = vst [vmem:[#allocation31_spill] sm:$0xff] %v7060_v22  ;;  %v3152_v34 = vmul.f32 %v7030_v24, %v7030_v24  ;;  %v3153_v44 = vmul.f32 %v7033_v0, %v7033_v0 }
 0x10d   :  { %v7035_v3 = vpop.f32.mrb[19].mxu0  ;;  %v7037_v30 = vpop.f32.mrb[19].mxu1  ;;  %5624 = vmatprep.subr.bf16.mxu1 %v5898_v27  ;;  %2606 = vmatpush1.bf16.msra.mxu0 %v5899_v11  ;;  %v3221_v11 = vadd.f32 %v3144_v61, %v3143_v37  ;;  %v7076_v17 = vadd.f32 %v2778_v8, %v7001_v45  ;;  %v3137_v25 = vmul.f32 %v7050_v57, %v7050_v57 }
 0x10e   :  { %v7083_v43 = vadd.f32 %v592_v41, %v6662_v15  ;;  %v10905_v37 = vand.u32 %v6769_v59, %v6012_v19  ;;  %v3145_v61 = vmul.f32 %v7060_v22, %v7060_v22  ;;  %v7094_v8 = vadd.f32 %v6910_v31, %v6948_v26 }
 0x10f   :  { %5438 = vmatmul.mubr.msk.bf16.gmra.mrb[120].mxu0 %vm368_vm2, %v6641_v12  ;;  %v10908_v59 = vand.u32 %v6784_v2, %v6012_v19  ;;  %v7110_v50 = vadd.f32 %v2788_v28, %v7050_v57  ;;  %v3212_v31 = vadd.f32 %v3211_v46, %v3136_v6  ;;  %v3231_v26 = vadd.f32 %v3153_v44, %v3152_v34 }
 0x110   :  { %5625 = vmatpush3.bf16.msra.mxu1 %v5898_v27  ;;  %2515 = vmatprep.mubr.bf16.mxu0 %v10894_v23  ;;  %v2807_v27 = vadd.f32 %v7033_v0, %v7030_v24  ;;  %10904 = vst [vmem:[#allocation32_spill] sm:$0xff] %v7083_v43  ;;  %10906 = vst [vmem:[#allocation33_spill] sm:$0xff] %v7094_v8  ;;  %v7098_v0 = vadd.f32 %v6920_v42, %v6980_v18 }
 0x111   :  { %5626 = vmatprep.subr.bf16.mxu1 %v5902_v36  ;;  %2607 = vmatprep.subr.bf16.mxu0 %v10905_v37  ;;  %v7107_v37 = vadd.f32 %v3202_v10, %v3128_v7  ;;  %v2798_v42 = vadd.f32 %v2797_v39, %v7060_v22  ;;  %v3222_v45 = vadd.f32 %v3221_v11, %v3145_v61 }
 0x112   :  { %v602_v53 = vpop.f32.mrb[20].mxu0  ;;  %v7085_v13 = vpop.f32.mrb[20].mxu1  ;;  %10907 = vst [vmem:[#allocation34_spill] sm:$0xff] %v7098_v0  ;;  %2608 = vmatpush1.bf16.msra.mxu0 %v10908_v59  ;;  %v7118_v19 = vadd.f32 %v6936_v54, %v6980_v18  ;;  %v2808_v6 = vadd.f32 %v2807_v27, %v7098_v0  ;;  %v2740_v46 = vadd.f32 %v6927_v51, %v7083_v43 }
 0x113   :  { %5441 = vmatmul.mubr.msk.bf16.gmra.mrb[124].mxu1 %vm368_vm2, %v6615_v4  ;;  %v604_v41 = vpop.f32.mrb[21].mxu0  ;;  %v7102_v24 = vpop.f32.mrb[21].mxu1  ;;  %v7133_v44 = vadd.f32 %v7020_v16, %v6700_v32  ;;  %v3146_v54 = vmul.f32 %v7094_v8, %v7094_v8  ;;  %v3154_v10 = vmul.f32 %v7098_v0, %v7098_v0  ;;  %v7141_v28 = vadd.f32 %v6994_v52, %v6662_v15 }
 0x114   :  { %v606_v35 = vpop.f32.mrb[22].mxu0  ;;  %v7112_v9 = vpop.f32.mrb[22].mxu1  ;;  %5627 = vmatpush3.bf16.msra.mxu1 %v5902_v36  ;;  %2578 = vmatprep.mubr.bf16.mxu1 %v10894_v23  ;;  %10909 = vst [vmem:[#allocation35_spill] sm:$0xff] %v7118_v19  ;;  %v7129_v36 = vadd.f32 %v7009_v60, %v6662_v15  ;;  %v7144_v51 = vadd.f32 %v602_v53, %v6702_v33 }
 0x115   :  { %v7120_v2 = vpop.f32.mrb[23].mxu0  ;;  %v7122_v7 = vpop.f32.mrb[23].mxu1  ;;  %5628 = vmatprep.subr.bf16.mxu1 %v5906_v5  ;;  %10911 = vst [vmem:[#allocation37_spill] sm:$0xff] %v7133_v44  ;;  %10912 = vst [vmem:[#allocation38_spill] sm:$0xff] %v7141_v28  ;;  %v7148_v60 = vadd.f32 %v3212_v31, %v3137_v25  ;;  %v3093_v16 = vmul.f32 %v7083_v43, %v7083_v43  ;;  %v7154_v39 = vadd.f32 %v7011_v49, %v6662_v15 }
 0x116   :  { %10910 = vst [vmem:[#allocation36_spill] sm:$0xff] %v7129_v36  ;;  %10913 = vst [vmem:[#allocation39_spill] sm:$0xff] %v7144_v51  ;;  %v7158_v52 = vadd.f32 %v2798_v42, %v7094_v8  ;;  %v7160_v11 = vadd.f32 %v3222_v45, %v3146_v54  ;;  %v3155_v34 = vmul.f32 %v7118_v19, %v7118_v19 }
 0x117   :  { %5439 = vmatmul.mubr.msk.bf16.gmra.mrb[124].mxu0 %vm368_vm2, %v6718_v38  ;;  %10914 = vst [vmem:[#allocation40_spill] sm:$0xff] %v7154_v39  ;;  %v3232_v25 = vadd.f32 %v3231_v26, %v3154_v10  ;;  %v7166_v27 = vadd.f32 %v2808_v6, %v7118_v19  ;;  %v2741_v49 = vadd.f32 %v2740_v46, %v7129_v36 }
 0x118   :  { %2631 = vmatprep.mubr.bf16.mxu0 %v10894_v23  ;;  %5629 = vmatpush3.bf16.msra.mxu1 %v5906_v5  ;;  %v3102_v53 = vmul.f32 %v7133_v44, %v7133_v44  ;;  %v7173_v5 = vadd.f32 %v7035_v3, %v6700_v32  ;;  %v7179_v26 = vmul.f32 %v7141_v28, %v7141_v28 }
 0x119   :  { %5630 = vmatprep.subr.bf16.mxu1 %v6851_v40  ;;  %v3094_v59 = vmul.f32 %v7129_v36, %v7129_v36  ;;  %v3111_v31 = vmul.f32 %v7144_v51, %v7144_v51  ;;  %v7186_v42 = vadd.f32 %v604_v41, %v6702_v33  ;;  %v3164_v46 = vadd.f32 %v6929_v29, %v3093_v16 }
 0x11a   :  { %10915 = vst [vmem:[#allocation41_spill] sm:$0xff] %v7173_v5  ;;  %v612_v45 = vpop.f32.mrb[24].mxu0  ;;  %v7175_v61 = vpop.f32.mrb[24].mxu1  ;;  %v7193_v54 = vmul.f32 %v7154_v39, %v7154_v39  ;;  %v7197_v10 = vadd.f32 %v7022_v21, %v6700_v32  ;;  %v7201_v41 = vadd.f32 %v3232_v25, %v3155_v34  ;;  %v2750_v8 = vadd.f32 %v6942_v1, %v7133_v44 }
 0x11b   :  { %10916 = vst [vmem:[#allocation42_spill] sm:$0xff] %v7186_v42  ;;  %5442 = vmatmul.mubr.msk.bf16.gmra.mrb[128].mxu1 %vm368_vm2, %v6641_v12  ;;  %v614_v3 = vpop.f32.mrb[25].mxu0  ;;  %v687_v6 = vpop.f32.mrb[25].mxu1  ;;  %v2760_v29 = vadd.f32 %v6970_v20, %v7144_v51  ;;  %v7208_v16 = vadd.f32 %v606_v35, %v6775_v62  ;;  %v3174_v57 = vadd.f32 %v6944_v48, %v3102_v53 }
 0x11c   :  { %10917 = vst [vmem:[#allocation43_spill] sm:$0xff] %v7197_v10  ;;  %v616_v19 = vpop.f32.mrb[26].mxu0  ;;  %v689_v0 = vpop.f32.mrb[26].mxu1  ;;  %2588 = vmatprep.mubr.bf16.mxu1 %v10894_v23  ;;  %5631 = vmatpush3.bf16.msra.mxu1 %v6851_v40  ;;  %10918 = vst [vmem:[#allocation44_spill] sm:$0xff] %v7201_v41  ;;  %v3103_v36 = vmul.f32 %v7173_v5, %v7173_v5  ;;  %v7215_v40 = vadd.f32 %v7037_v30, %v6700_v32 }
 0x11d   :  { %10919 = vst [vmem:[#allocation45_spill] sm:$0xff] %v7208_v16  ;;  %v618_v22 = vpop.f32.mrb[27].mxu0  ;;  %v691_v21 = vpop.f32.mrb[27].mxu1  ;;  %v2742_v34 = vadd.f32 %v2741_v49, %v7141_v28  ;;  %v3184_v1 = vadd.f32 %v6985_v14, %v3111_v31  ;;  %v7221_v20 = vadd.f32 %v7085_v13, %v6702_v33  ;;  %v3112_v35 = vmul.f32 %v7186_v42, %v7186_v42 }
 0x11e   :  { %10920 = vst [vmem:[#allocation46_spill] sm:$0xff] %v7215_v40  ;;  %v7227_v48 = vadd.f32 %v7102_v24, %v6702_v33  ;;  %v3165_v30 = vadd.f32 %v3164_v46, %v3094_v59  ;;  %v3104_v25 = vmul.f32 %v7197_v10, %v7197_v10  ;;  %v7235_v14 = vadd.f32 %v7112_v9, %v6775_v62 }
 0x11f   :  { %10921 = vst [vmem:[#allocation47_spill] sm:$0xff] %v7221_v20  ;;  %5444 = vmatmul.mubr.msk.bf16.vlgmr.msra.gmra.mrb[128].mxu0 %vm368_vm2, %v6580_v58  ;;  %v7238_v13 = vadd.f32 %v612_v45, %v6876_v56  ;;  %v2761_v49 = vadd.f32 %v2760_v29, %v7186_v42  ;;  %v2770_v24 = vadd.f32 %v7043_v47, %v7208_v16 }
 0x120   :  { %10922 = vst [vmem:[#allocation48_spill] sm:$0xff] %v7227_v48  ;;  %10923 = vst [vmem:[#allocation49_spill] sm:$0xff] %v7235_v14  ;;  %2641 = vmatprep.mubr.bf16.mxu0 %v10894_v23  ;;  %v3120_v53 = vmul.f32 %v7208_v16, %v7208_v16  ;;  %v7248_v59 = vadd.f32 %v7120_v2, %v6775_v62  ;;  %v2751_v9 = vadd.f32 %v2750_v8, %v7173_v5 }
 0x121   :  { %10924 = vst [vmem:[#allocation50_spill] sm:$0xff] %v7238_v13  ;;  %v7253_v45 = vmul.f32 %v7215_v40, %v7215_v40  ;;  %v7257_v31 = vadd.f32 %v7122_v7, %v6775_v62  ;;  %v7262_v47 = vadd.f32 %v2742_v34, %v7154_v39  ;;  %v3175_v16 = vadd.f32 %v3174_v57, %v3103_v36 }
 0x122   :  { %10925 = vst [vmem:[#allocation51_spill] sm:$0xff] %v7248_v59  ;;  %v622_v46 = vpop.f32.mrb[28].mxu0  ;;  %v7259_v29 = vpop.f32.mrb[28].mxu1  ;;  %v3113_v2 = vmul.f32 %v7221_v20, %v7221_v20  ;;  %v3185_v44 = vadd.f32 %v3184_v1, %v3112_v35  ;;  %v3114_v8 = vmul.f32 %v7227_v48, %v7227_v48  ;;  %v3122_v28 = vmul.f32 %v7235_v14, %v7235_v14 }
 0x123   :  { %10926 = vst [vmem:[#allocation52_spill] sm:$0xff] %v7257_v31  ;;  %5443 = vmatmul.mubr.msk.bf16.gmra.mrb[132].mxu1 %vm368_vm2, %v6718_v38  ;;  %v624_v5 = vpop.f32.mrb[29].mxu0  ;;  %v7270_v7 = vpop.f32.mrb[29].mxu1  ;;  %v3129_v34 = vmul.f32 %v7238_v13, %v7238_v13  ;;  %v7277_v57 = vadd.f32 %v614_v3, %v6876_v56  ;;  %v7280_v36 = vadd.f32 %v616_v19, %v6886_v63 }
 0x124   :  { %v7282_v1 = vpop.f32.mrb[30].mxu0  ;;  %v7284_v35 = vpop.f32.mrb[30].mxu1  ;;  %5632 = vmatprep.mubr.msk.bf16.mxu1 %vm368_vm2, %v6580_v58  ;;  %v3194_v39 = vadd.f32 %v7052_v55, %v3120_v53  ;;  %v2771_v43 = vadd.f32 %v2770_v24, %v7248_v59  ;;  %v3121_v42 = vmul.f32 %v7248_v59, %v7248_v59  ;;  %v2762_v19 = vadd.f32 %v2761_v49, %v7221_v20 }
 0x125   :  { %10927 = vst [vmem:[#allocation53_spill] sm:$0xff] %v7277_v57  ;;  %10928 = vst [vmem:[#allocation54_spill] sm:$0xff] %v7280_v36  ;;  %v7292_v51 = vpop.f32.mrb[31].mxu0  ;;  %v7294_v3 = vpop.f32.mrb[31].mxu1  ;;  %v7299_v41 = vmul.f32 %v7257_v31, %v7257_v31  ;;  %v2780_v58 = vadd.f32 %v7076_v17, %v7238_v13  ;;  %v7305_v55 = vadd.f32 %v7175_v61, %v6876_v56 }
 0x126   :  { %v7308_v24 = vadd.f32 %v687_v6, %v6876_v56  ;;  %v7311_v53 = vadd.f32 %v689_v0, %v6886_v63  ;;  %v7314_v59 = vadd.f32 %v618_v22, %v6886_v63  ;;  %v3186_v49 = vadd.f32 %v3185_v44, %v3113_v2 }
 0x127   :  { %10929 = vst [vmem:[#allocation55_spill] sm:$0xff] %v7305_v55  ;;  %5445 = vmatmul.mubr.msk.bf16.gmra.mrb[132].mxu0 %vm368_vm2, %v6615_v4  ;;  %v2752_v20 = vadd.f32 %v2751_v9, %v7197_v10  ;;  %v3204_v17 = vadd.f32 %v7107_v37, %v3129_v34  ;;  %v3130_v61 = vmul.f32 %v7277_v57, %v7277_v57 }
 0x128   :  { %10930 = vst [vmem:[#allocation56_spill] sm:$0xff] %v7308_v24  ;;  %10931 = vst [vmem:[#allocation57_spill] sm:$0xff] %v7311_v53  ;;  %v2790_v6 = vadd.f32 %v7110_v50, %v7280_v36  ;;  %v3138_v0 = vmul.f32 %v7280_v36, %v7280_v36  ;;  %2651 = vmatprep.mubr.bf16.mxu0 %v10894_v23  ;;  %v3195_v22 = vadd.f32 %v3194_v39, %v3121_v42 }
 0x129   :  { %10932 = vst [vmem:[#allocation58_spill] sm:$0xff] %v7314_v59  ;;  %v7328_v13 = vadd.f32 %v691_v21, %v6886_v63  ;;  %v3166_v44 = vadd.f32 %v3165_v30, %v7179_v26  ;;  %v3176_v9 = vadd.f32 %v3175_v16, %v3104_v25  ;;  %v7333_v37 = vmul.f32 %v7305_v55, %v7305_v55  ;;  %v10936_v16 = vld [vmem:[#allocation20_spill] sm:$0xff] }
 0x12a   :  { %v7336_v2 = vadd.f32 %v2780_v58, %v7277_v57  ;;  %v7340_v50 = vmul.f32 %v7308_v24, %v7308_v24  ;;  %v5580_v34 = vpop.f32.mrb[32].mxu0  ;;  %v7342_v36 = vpop.f32.mrb[32].mxu1  ;;  %v2763_v39 = vadd.f32 %v2762_v19, %v7227_v48  ;;  %v7347_v26 = vmul.f32 %v7311_v53, %v7311_v53 }
 0x12b   :  { %10933 = vst [vmem:[#allocation59_spill] sm:$0xff] %v7328_v13  ;;  %v3139_v42 = vmul.f32 %v7314_v59, %v7314_v59  ;;  %v7352_v21 = vadd.f32 %v622_v46, %v10936_v16  ;;  %v7355_v30 = vadd.f32 %v5580_v34, %v6702_v33  ;;  %5633 = vmatmul.mubr.msk.bf16.vlgmr.msra.gmra.mrb[136].mxu1 %vm368_vm2, %v6615_v4  ;;  %v738_v25 = vpop.f32.mrb[33].mxu0  ;;  %v7359_v58 = vpop.f32.mrb[33].mxu1 }
 0x12c   :  { %10934 = vst [vmem:[#allocation60_spill] sm:$0xff] %v7340_v50  ;;  %10935 = vst [vmem:[#allocation61_spill] sm:$0xff] %v7347_v26  ;;  %v7361_v19 = vadd.f32 %v3204_v17, %v3130_v61  ;;  %v3214_v57 = vadd.f32 %v7148_v60, %v3138_v0  ;;  %v7365_v10 = vadd.f32 %v2790_v6, %v7314_v59  ;;  %v5581_v48 = vpop.f32.mrb[34].mxu0  ;;  %v7367_v26 = vpop.f32.mrb[34].mxu1  ;;  %5636 = vmatprep.mubr.msk.bf16.mxu1 %vm368_vm2, %v6641_v12 }
 0x12d   :  { %10937 = vst [vmem:[#allocation20_spill] sm:$0xff] %v7352_v21  ;;  %10938 = vst [vmem:[#allocation62_spill] sm:$0xff] %v7355_v30  ;;  %v3187_v46 = vadd.f32 %v3186_v49, %v3114_v8  ;;  %v7373_v4 = vmul.f32 %v7328_v13, %v7328_v13  ;;  %v741_v34 = vpop.f32.mrb[35].mxu0  ;;  %v7375_v50 = vpop.f32.mrb[35].mxu1  ;;  %v2764_v17 = vadd.f32 %v2763_v39, %v7355_v30 }
 0x12e   :  { %v2753_v60 = vadd.f32 %v2752_v20, %v7215_v40  ;;  %v2772_v61 = vadd.f32 %v2771_v43, %v7235_v14  ;;  %v7381_v6 = vadd.f32 %v624_v5, %v10936_v16  ;;  %v7384_v0 = vadd.f32 %v738_v25, %v6662_v15 }
 0x12f   :  { %10939 = vst [vmem:[#allocation63_spill] sm:$0xff] %v7373_v4  ;;  %v3167_v8 = vadd.f32 %v3166_v44, %v7193_v54  ;;  %v3196_v49 = vadd.f32 %v3195_v22, %v3122_v28  ;;  %v2800_v59 = vadd.f32 %v7158_v52, %v7352_v21  ;;  %v3147_v4 = vmul.f32 %v7352_v21, %v7352_v21 }
 0x130   :  { %10940 = vst [vmem:[#allocation64_spill] sm:$0xff] %v7381_v6  ;;  %10941 = vst [vmem:[#allocation65_spill] sm:$0xff] %v7384_v0  ;;  %5446 = vmatmul.mubr.msk.bf16.gmra.mrb[136].mxu0 %vm368_vm2, %v6641_v12  ;;  %2765 = vadd.xlane.f32.xlu0 %v2764_v17  ;;  %v3115_v43 = vmul.f32 %v7355_v30, %v7355_v30  ;;  %v7395_v5 = vadd.f32 %v3214_v57, %v3139_v42 }
 0x131   :  { %v7399_v20 = vadd.f32 %v7259_v29, %v10936_v16  ;;  %v7403_v28 = vadd.f32 %v7282_v1, %v6980_v18  ;;  %2661 = vmatprep.mubr.bf16.mxu0 %v10894_v23  ;;  %v7407_v52 = vadd.f32 %v3176_v9, %v7253_v45  ;;  %v7411_v12 = vadd.f32 %v7270_v7, %v10936_v16 }
 0x132   :  { %v7415_v54 = vadd.f32 %v7284_v35, %v6980_v18  ;;  %v7418_v29 = vadd.f32 %v741_v34, %v6700_v32  ;;  %v3188_v57 = vadd.f32 %v3187_v46, %v3115_v43  ;;  %v3148_v1 = vmul.f32 %v7381_v6, %v7381_v6  ;;  %v5584_v45 = vpop.f32.mrb[36].mxu0  ;;  %v1112_v22 = vpop.f32.mrb[36].mxu1 }
 0x133   :  { %10942 = vst [vmem:[#allocation66_spill] sm:$0xff] %v7399_v20  ;;  %10943 = vst [vmem:[#allocation67_spill] sm:$0xff] %v7403_v28  ;;  %v7423_v23 = vadd.f32 %v5581_v48, %v6775_v62  ;;  %v2744_v7 = vadd.f32 %v7262_v47, %v7384_v0  ;;  %v2773_v44 = vadd.f32 %v2772_v61, %v7257_v31  ;;  %5637 = vmatmul.mubr.msk.bf16.gmra.mrb[140].mxu1 %vm368_vm2, %v6718_v38  ;;  %v754_v48 = vpop.f32.mrb[37].mxu0  ;;  %v1114_v42 = vpop.f32.mrb[37].mxu1 }
 0x134   :  { %10944 = vst [vmem:[#allocation68_spill] sm:$0xff] %v7411_v12  ;;  %10945 = vst [vmem:[#allocation69_spill] sm:$0xff] %v7415_v54  ;;  %v3224_v35 = vadd.f32 %v7160_v11, %v3147_v4  ;;  %v2801_v9 = vadd.f32 %v2800_v59, %v7381_v6  ;;  %v7432_v39 = vadd.f32 %v7292_v51, %v6980_v18  ;;  %3189 = vadd.xlane.f32.xlu1 %v3188_v57  ;;  %v5585_v59 = vpop.f32.mrb[38].mxu0  ;;  %v1116_v46 = vpop.f32.mrb[38].mxu1 }
 0x135   :  { %10946 = vst [vmem:[#allocation70_spill] sm:$0xff] %v7418_v29  ;;  %10947 = vst [vmem:[#allocation71_spill] sm:$0xff] %v7423_v23  ;;  %v3149_v25 = vmul.f32 %v7399_v20, %v7399_v20  ;;  %v2810_v47 = vadd.f32 %v7166_v27, %v7403_v28  ;;  %v3156_v11 = vmul.f32 %v7403_v28, %v7403_v28  ;;  %2745 = vadd.xlane.f32.xlu0 %v2744_v7  ;;  %v7451_v17 = vpop.f32.mrb[39].mxu0  ;;  %v1118_v61 = vpop.f32.mrb[39].mxu1 }
 0x136   :  { %10948 = vst [vmem:[#allocation72_spill] sm:$0xff] %v7432_v39  ;;  %v3197_v51 = vadd.f32 %v3196_v49, %v7299_v41  ;;  %v7445_v4 = vmul.f32 %v7411_v12, %v7411_v12  ;;  %v7449_v34 = vmul.f32 %v7415_v54, %v7415_v54  ;;  %v2754_v27 = vadd.f32 %v2753_v60, %v7418_v29 }
 0x137   :  { %v3097_v43 = vmul.f32 %v7384_v0, %v7384_v0  ;;  %v7458_v57 = vadd.f32 %v7294_v3, %v6980_v18  ;;  %v2774_v41 = vadd.f32 %v2773_v44, %v7423_v23  ;;  %v3124_v49 = vmul.f32 %v7423_v23, %v7423_v23  ;;  %v10950_v3 = vld [vmem:[#allocation44_spill] sm:$0xff] }
 0x138   :  { %v2782_v7 = vadd.f32 %v7336_v2, %v7305_v55  ;;  %v3225_v28 = vadd.f32 %v3224_v35, %v3148_v1  ;;  %v3157_v6 = vmul.f32 %v7432_v39, %v7432_v39  ;;  %5447 = vmatmul.mubr.msk.bf16.gmra.mrb[140].mxu0 %vm368_vm2, %v6718_v38  ;;  %2755 = vadd.xlane.f32.xlu1 %v2754_v27 }
 0x139   :  { %10949 = vst [vmem:[#allocation73_spill] sm:$0xff] %v7458_v57  ;;  %v2802_v60 = vadd.f32 %v2801_v9, %v7399_v20  ;;  %v3234_v21 = vadd.f32 %v10950_v3, %v3156_v11  ;;  %v2811_v44 = vadd.f32 %v2810_v47, %v7432_v39  ;;  %v7474_v23 = vadd.f32 %v7342_v36, %v6662_v15 }
 0x13a   :  { %v7478_v2 = vadd.f32 %v7359_v58, %v6662_v15  ;;  %2775 = vadd.xlane.f32.xlu0 %v2774_v41  ;;  %v7482_v1 = vadd.f32 %v7367_v26, %v6700_v32  ;;  %v7486_v38 = vadd.f32 %v7375_v50, %v6700_v32  ;;  %v7489_v35 = vadd.f32 %v5584_v45, %v10936_v16  ;;  %v1122_v47 = vpop.f32.mrb[40].mxu1 }
 0x13b   :  { %10951 = vst [vmem:[#allocation44_spill] sm:$0xff] %v7474_v23  ;;  %v3168_v9 = vadd.f32 %v3167_v8, %v3097_v43  ;;  %v7493_v36 = vmul.f32 %v7458_v57, %v7458_v57  ;;  %v3198_v58 = vadd.f32 %v3197_v51, %v3124_v49  ;;  %v3106_v11 = vmul.f32 %v7418_v29, %v7418_v29  ;;  %v1124_v45 = vpop.f32.mrb[41].mxu1 }
 0x13c   :  { %10952 = vst [vmem:[#allocation74_spill] sm:$0xff] %v7478_v2  ;;  %10953 = vst [vmem:[#allocation75_spill] sm:$0xff] %v7482_v1  ;;  %v2783_v26 = vadd.f32 %v2782_v7, %v7308_v24  ;;  %v7499_v27 = vadd.f32 %v1112_v22, %v6702_v33  ;;  %v7502_v50 = vadd.f32 %v1114_v42, %v6702_v33  ;;  %v1126_v49 = vpop.f32.mrb[42].mxu1 }
 0x13d   :  { %10954 = vst [vmem:[#allocation76_spill] sm:$0xff] %v7486_v38  ;;  %10955 = vst [vmem:[#allocation77_spill] sm:$0xff] %v7489_v35  ;;  %3169 = vadd.xlane.f32.xlu1 %v3168_v9  ;;  %v2803_v8 = vadd.f32 %v2802_v60, %v7411_v12  ;;  %v2792_v43 = vadd.f32 %v7365_v10, %v7311_v53  ;;  %v3249_v51 = vmul.f32 %v7474_v23, %v7474_v23  ;;  %v1128_v10 = vpop.f32.mrb[43].mxu1 }
 0x13e   :  { %10956 = vst [vmem:[#allocation78_spill] sm:$0xff] %v7499_v27  ;;  %10957 = vst [vmem:[#allocation79_spill] sm:$0xff] %v7502_v50  ;;  %v3250_v41 = vmul.f32 %v7478_v2, %v7478_v2  ;;  %3199 = vadd.xlane.f32.xlu0 %v3198_v58  ;;  %v2812_v22 = vadd.f32 %v2811_v44, %v7415_v54  ;;  %v3226_v7 = vadd.f32 %v3225_v28, %v3149_v25  ;;  %v1175_v44 = vpop.f32.mrb[40].mxu0 }
 0x13f   :  { %v3258_v42 = vmul.f32 %v7482_v1, %v7482_v1  ;;  %v3259_v60 = vmul.f32 %v7486_v38, %v7486_v38  ;;  %v7517_v3 = vadd.f32 %v754_v48, %v6876_v56  ;;  %v2804_v9 = vadd.f32 %v2803_v8, %v7489_v35 }
 0x140   :  { %v7521_v39 = vadd.f32 %v5585_v59, %v6980_v18  ;;  %v7524_v58 = vadd.f32 %v1116_v46, %v6775_v62  ;;  %v3178_v28 = vadd.f32 %v7407_v52, %v3106_v11  ;;  %v3206_v25 = vadd.f32 %v7361_v19, %v7333_v37  ;;  %v1177_v59 = vpop.f32.mrb[41].mxu0 }
 0x141   :  { %10958 = vst [vmem:[#allocation80_spill] sm:$0xff] %v7517_v3  ;;  %v3235_v54 = vadd.f32 %v3234_v21, %v3157_v6  ;;  %v3267_v48 = vmul.f32 %v7499_v27, %v7499_v27  ;;  %v3268_v12 = vmul.f32 %v7502_v50, %v7502_v50  ;;  %v7534_v8 = vadd.f32 %v1118_v61, %v6775_v62  ;;  %v1179_v37 = vpop.f32.mrb[42].mxu0 }
 0x142   :  { %10959 = vst [vmem:[#allocation81_spill] sm:$0xff] %v7521_v39  ;;  %10960 = vst [vmem:[#allocation82_spill] sm:$0xff] %v7524_v58  ;;  %2805 = vadd.xlane.f32.xlu1 %v2804_v9  ;;  %v2825_v46 = vadd.f32 %v7478_v2, %v7474_v23  ;;  %v3321_v20 = vadd.f32 %v3250_v41, %v3249_v51  ;;  %v7540_v52 = vadd.f32 %v7486_v38, %v7482_v1  ;;  %v1181_v6 = vpop.f32.mrb[43].mxu0 }
 0x143   :  { %10961 = vst [vmem:[#allocation83_spill] sm:$0xff] %v7534_v8  ;;  %3179 = vadd.xlane.f32.xlu0 %v3178_v28  ;;  %v2813_v21 = vadd.f32 %v2812_v22, %v7458_v57  ;;  %v7543_v19 = vadd.f32 %v3259_v60, %v3258_v42  ;;  %v2784_v61 = vadd.f32 %v2783_v26, %v7517_v3  ;;  %v1132_v42 = vpop.f32.mrb[44].mxu1 }
 0x144   :  { %v3151_v11 = vmul.f32 %v7489_v35, %v7489_v35  ;;  %v3227_v9 = vadd.f32 %v3226_v7, %v7445_v4  ;;  %v7551_v51 = vadd.f32 %v7502_v50, %v7499_v27  ;;  %v3276_v41 = vmul.f32 %v7524_v58, %v7524_v58  ;;  %v1134_v7 = vpop.f32.mrb[45].mxu1 }
 0x145   :  { %v7557_v22 = vadd.f32 %v7451_v17, %v6886_v63  ;;  %v2814_v60 = vadd.f32 %v2813_v21, %v7521_v39  ;;  %v7560_v26 = vadd.f32 %v3268_v12, %v3267_v48  ;;  %v3277_v28 = vmul.f32 %v7534_v8, %v7534_v8  ;;  %v1136_v17 = vpop.f32.mrb[46].mxu1  ;;  %v10965_v48 = vld [vmem:[#allocation60_spill] sm:$0xff] }
 0x146   :  { %v7565_v4 = vadd.f32 %v1175_v44, %v6662_v15  ;;  %2785 = vadd.xlane.f32.xlu1 %v2784_v61  ;;  %v3236_v57 = vadd.f32 %v3235_v54, %v7449_v34  ;;  %v7569_v35 = vadd.f32 %v1122_v47, %v6876_v56  ;;  %v2793_v53 = vadd.f32 %v2792_v43, %v7328_v13  ;;  %v1138_v44 = vpop.f32.mrb[47].mxu1  ;;  %v10967_v34 = vld [vmem:[#allocation61_spill] sm:$0xff] }
 0x147   :  { %10962 = vst [vmem:[#allocation84_spill] sm:$0xff] %v7557_v22  ;;  %2815 = vadd.xlane.f32.xlu0 %v2814_v60  ;;  %v3133_v12 = vmul.f32 %v7517_v3, %v7517_v3  ;;  %v3207_v21 = vadd.f32 %v3206_v25, %v10965_v48  ;;  %v7576_v24 = vadd.f32 %v1124_v45, %v6876_v56  ;;  %v1185_v25 = vpop.f32.mrb[44].mxu0 }
 0x148   :  { %10963 = vst [vmem:[#allocation85_spill] sm:$0xff] %v7565_v4  ;;  %10964 = vst [vmem:[#allocation86_spill] sm:$0xff] %v7569_v35  ;;  %v3228_v61 = vadd.f32 %v3227_v9, %v3151_v11  ;;  %v3160_v54 = vmul.f32 %v7521_v39, %v7521_v39  ;;  %v3216_v47 = vadd.f32 %v7395_v5, %v10967_v34 }
 0x149   :  { %10966 = vst [vmem:[#allocation60_spill] sm:$0xff] %v7576_v24  ;;  %v7583_v60 = vadd.f32 %v1126_v49, %v6886_v63  ;;  %v7586_v43 = vadd.f32 %v1128_v10, %v6886_v63  ;;  %v7589_v13 = vadd.f32 %v1179_v37, %v6700_v32  ;;  %v2794_v45 = vadd.f32 %v2793_v53, %v7557_v22  ;;  %v1187_v49 = vpop.f32.mrb[45].mxu0 }
 0x14a   :  { %v7594_v11 = vadd.f32 %v7534_v8, %v7524_v58  ;;  %v3251_v9 = vmul.f32 %v7565_v4, %v7565_v4  ;;  %v7599_v5 = vadd.f32 %v1177_v59, %v6662_v15  ;;  %3229 = vadd.xlane.f32.xlu1 %v3228_v61  ;;  %v3237_v10 = vadd.f32 %v3236_v57, %v7493_v36  ;;  %v1189_v53 = vpop.f32.mrb[46].mxu0  ;;  %v10972_v36 = vld [vmem:[#allocation63_spill] sm:$0xff] }
 0x14b   :  { %10968 = vst [vmem:[#allocation61_spill] sm:$0xff] %v7583_v60  ;;  %10969 = vst [vmem:[#allocation87_spill] sm:$0xff] %v7586_v43  ;;  %v7602_v48 = vadd.f32 %v3277_v28, %v3276_v41  ;;  %v3285_v37 = vmul.f32 %v7569_v35, %v7569_v35  ;;  %2795 = vadd.xlane.f32.xlu0 %v2794_v45  ;;  %v3208_v34 = vadd.f32 %v3207_v21, %v3133_v12  ;;  %v1191_v61 = vpop.f32.mrb[47].mxu0 }
 0x14c   :  { %10970 = vst [vmem:[#allocation88_spill] sm:$0xff] %v7589_v13  ;;  %10971 = vst [vmem:[#allocation89_spill] sm:$0xff] %v7599_v5  ;;  %v3142_v39 = vmul.f32 %v7557_v22, %v7557_v22  ;;  %v7610_v3 = vadd.f32 %v7576_v24, %v7569_v35  ;;  %v3286_v59 = vmul.f32 %v7576_v24, %v7576_v24  ;;  %v1248_v22 = vpop.f32.mrb[48].mxu1 }
 0x14d   :  { %v3238_v57 = vadd.f32 %v3237_v10, %v3160_v54  ;;  %v3217_v41 = vadd.f32 %v3216_v47, %v10972_v36  ;;  %v3294_v28 = vmul.f32 %v7583_v60, %v7583_v60  ;;  %v3295_v12 = vmul.f32 %v7586_v43, %v7586_v43  ;;  %v1250_v10 = vpop.f32.mrb[49].mxu1 }
 0x14e   :  { %v3260_v21 = vmul.f32 %v7589_v13, %v7589_v13  ;;  %v7622_v45 = vadd.f32 %v1181_v6, %v6700_v32  ;;  %v2826_v35 = vadd.f32 %v2825_v46, %v7565_v4  ;;  %v3322_v24 = vadd.f32 %v3321_v20, %v3251_v9  ;;  %3209 = vadd.xlane.f32.xlu1 %v3208_v34  ;;  %v1252_v46 = vpop.f32.mrb[50].mxu1 }
 0x14f   :  { %v3252_v54 = vmul.f32 %v7599_v5, %v7599_v5  ;;  %v7628_v47 = vadd.f32 %v1185_v25, %v6702_v33  ;;  %v2836_v36 = vadd.f32 %v7540_v52, %v7589_v13  ;;  %v7633_v55 = vadd.f32 %v1132_v42, %v10936_v16  ;;  %3239 = vadd.xlane.f32.xlu0 %v3238_v57  ;;  %v1254_v42 = vpop.f32.mrb[51].mxu1 }
 0x150   :  { %10973 = vst [vmem:[#allocation63_spill] sm:$0xff] %v7622_v45  ;;  %v7636_v6 = vadd.f32 %v1134_v7, %v10936_v16  ;;  %v3218_v20 = vadd.f32 %v3217_v41, %v3142_v39  ;;  %v7638_v9 = vadd.f32 %v3286_v59, %v3285_v37  ;;  %v7642_v25 = vadd.f32 %v7586_v43, %v7583_v60  ;;  %v1195_v59 = vpop.f32.mrb[48].mxu0 }
 0x151   :  { %10974 = vst [vmem:[#allocation90_spill] sm:$0xff] %v7628_v47  ;;  %10975 = vst [vmem:[#allocation91_spill] sm:$0xff] %v7633_v55  ;;  %v7645_v34 = vadd.f32 %v1136_v17, %v6980_v18  ;;  %v7648_v52 = vadd.f32 %v1138_v44, %v6980_v18  ;;  %v7650_v8 = vadd.f32 %v3295_v12, %v3294_v28  ;;  %v1197_v28 = vpop.f32.mrb[49].mxu0 }
 0x152   :  { %10976 = vst [vmem:[#allocation92_spill] sm:$0xff] %v7636_v6  ;;  %v3332_v7 = vadd.f32 %v7543_v19, %v3260_v21  ;;  %v3261_v39 = vmul.f32 %v7622_v45, %v7622_v45  ;;  %v7656_v37 = vadd.f32 %v1189_v53, %v6775_v62  ;;  %v2827_v57 = vadd.f32 %v2826_v35, %v7599_v5  ;;  %v1199_v35 = vpop.f32.mrb[50].mxu0  ;;  %v1258_v31 = vpop.f32.mrb[52].mxu1 }
 0x153   :  { %10977 = vst [vmem:[#allocation93_spill] sm:$0xff] %v7645_v34  ;;  %10978 = vst [vmem:[#allocation94_spill] sm:$0xff] %v7648_v52  ;;  %v3323_v41 = vadd.f32 %v3322_v24, %v3252_v54  ;;  %v3269_v17 = vmul.f32 %v7628_v47, %v7628_v47  ;;  %v7662_v44 = vadd.f32 %v1187_v49, %v6702_v33  ;;  %3219 = vadd.xlane.f32.xlu0 %v3218_v20  ;;  %v1201_v43 = vpop.f32.mrb[51].mxu0 }
 0x154   :  { %10979 = vst [vmem:[#allocation95_spill] sm:$0xff] %v7656_v37  ;;  %v2837_v12 = vadd.f32 %v2836_v36, %v7622_v45  ;;  %v3303_v19 = vmul.f32 %v7633_v55, %v7633_v55  ;;  %v3304_v53 = vmul.f32 %v7636_v6, %v7636_v6  ;;  %v7670_v21 = vadd.f32 %v1248_v22, %v6662_v15 }
 0x155   :  { %10980 = vst [vmem:[#allocation96_spill] sm:$0xff] %v7662_v44  ;;  %v3312_v24 = vmul.f32 %v7645_v34, %v7645_v34  ;;  %v3313_v49 = vmul.f32 %v7648_v52, %v7648_v52  ;;  %v2846_v54 = vadd.f32 %v7551_v51, %v7628_v47  ;;  %v7679_v36 = vadd.f32 %v1252_v46, %v6700_v32 }
 0x156   :  { %10981 = vst [vmem:[#allocation97_spill] sm:$0xff] %v7670_v21  ;;  %v3333_v60 = vadd.f32 %v3332_v7, %v3261_v39  ;;  %v7683_v22 = vadd.f32 %v7636_v6, %v7633_v55  ;;  %v3278_v20 = vmul.f32 %v7656_v37, %v7656_v37  ;;  %v7688_v58 = vadd.f32 %v1191_v61, %v6775_v62  ;;  %v1260_v39 = vpop.f32.mrb[53].mxu1 }
 0x157   :  { %10982 = vst [vmem:[#allocation98_spill] sm:$0xff] %v7679_v36  ;;  %v3342_v14 = vadd.f32 %v7560_v26, %v3269_v17  ;;  %v3270_v51 = vmul.f32 %v7662_v44, %v7662_v44  ;;  %v2856_v46 = vadd.f32 %v7594_v11, %v7656_v37  ;;  %v7696_v7 = vadd.f32 %v1195_v59, %v6876_v56  ;;  %v1262_v17 = vpop.f32.mrb[54].mxu1 }
 0x158   :  { %10983 = vst [vmem:[#allocation99_spill] sm:$0xff] %v7688_v58  ;;  %v7698_v6 = vadd.f32 %v3304_v53, %v3303_v19  ;;  %v7702_v55 = vadd.f32 %v7648_v52, %v7645_v34  ;;  %v3253_v61 = vmul.f32 %v7670_v21, %v7670_v21  ;;  %v7707_v26 = vadd.f32 %v1250_v10, %v6662_v15  ;;  %v1264_v53 = vpop.f32.mrb[55].mxu1 }
 0x159   :  { %10984 = vst [vmem:[#allocation100_spill] sm:$0xff] %v7696_v7  ;;  %v7709_v45 = vadd.f32 %v3313_v49, %v3312_v24  ;;  %v2847_v11 = vadd.f32 %v2846_v54, %v7662_v44  ;;  %v3262_v59 = vmul.f32 %v7679_v36, %v7679_v36  ;;  %v7715_v19 = vadd.f32 %v1254_v42, %v6700_v32  ;;  %v1205_v24 = vpop.f32.mrb[52].mxu0 }
 0x15a   :  { %10985 = vst [vmem:[#allocation101_spill] sm:$0xff] %v7707_v26  ;;  %v3352_v52 = vadd.f32 %v7602_v48, %v3278_v20  ;;  %v3279_v34 = vmul.f32 %v7688_v58, %v7688_v58  ;;  %v2828_v10 = vadd.f32 %v2827_v57, %v7670_v21  ;;  %v2838_v37 = vadd.f32 %v2837_v12, %v7679_v36  ;;  %v1207_v38 = vpop.f32.mrb[53].mxu0 }
 0x15b   :  { %10986 = vst [vmem:[#allocation102_spill] sm:$0xff] %v7715_v19  ;;  %v3343_v49 = vadd.f32 %v3342_v14, %v3270_v51  ;;  %v2857_v54 = vadd.f32 %v2856_v46, %v7688_v58  ;;  %v3287_v13 = vmul.f32 %v7696_v7, %v7696_v7  ;;  %v7726_v42 = vadd.f32 %v1197_v28, %v6876_v56  ;;  %v1209_v14 = vpop.f32.mrb[54].mxu0 }
 0x15c   :  { %v3324_v1 = vadd.f32 %v3323_v41, %v3253_v61  ;;  %v3254_v48 = vmul.f32 %v7707_v26, %v7707_v26  ;;  %v7731_v20 = vadd.f32 %v1199_v35, %v6886_v63  ;;  %v7734_v57 = vadd.f32 %v1258_v31, %v6702_v33  ;;  %v1211_v41 = vpop.f32.mrb[55].mxu0 }
 0x15d   :  { %10987 = vst [vmem:[#allocation103_spill] sm:$0xff] %v7726_v42  ;;  %v3334_v12 = vadd.f32 %v3333_v60, %v3262_v59  ;;  %v2866_v51 = vadd.f32 %v7610_v3, %v7696_v7  ;;  %v3263_v28 = vmul.f32 %v7715_v19, %v7715_v19  ;;  %v7741_v46 = vadd.f32 %v1262_v17, %v6775_v62  ;;  %v1268_v60 = vpop.f32.mrb[56].mxu1 }
 0x15e   :  { %10988 = vst [vmem:[#allocation104_spill] sm:$0xff] %v7731_v20  ;;  %10989 = vst [vmem:[#allocation105_spill] sm:$0xff] %v7734_v57  ;;  %v3353_v61 = vadd.f32 %v3352_v52, %v3279_v34  ;;  %v7744_v58 = vadd.f32 %v2828_v10, %v7707_v26  ;;  %v7747_v35 = vadd.f32 %v2838_v37, %v7715_v19  ;;  %v1270_v52 = vpop.f32.mrb[57].mxu1 }
 0x15f   :  { %10990 = vst [vmem:[#allocation106_spill] sm:$0xff] %v7741_v46  ;;  %v7750_v31 = vadd.f32 %v1201_v43, %v6886_v63  ;;  %v3362_v3 = vadd.f32 %v7638_v9, %v3287_v13  ;;  %v3288_v59 = vmul.f32 %v7726_v42, %v7726_v42  ;;  %v7756_v17 = vadd.f32 %v1205_v24, %v10936_v16  ;;  %v1272_v9 = vpop.f32.mrb[58].mxu1 }
 0x160   :  { %v7759_v34 = vadd.f32 %v1209_v14, %v6980_v18  ;;  %v7761_v10 = vadd.f32 %v3324_v1, %v3254_v48  ;;  %v3296_v37 = vmul.f32 %v7731_v20, %v7731_v20  ;;  %v3271_v43 = vmul.f32 %v7734_v57, %v7734_v57  ;;  %v1274_v48 = vpop.f32.mrb[59].mxu1 }
 0x161   :  { %10991 = vst [vmem:[#allocation107_spill] sm:$0xff] %v7750_v31  ;;  %10992 = vst [vmem:[#allocation108_spill] sm:$0xff] %v7756_v17  ;;  %v7768_v13 = vadd.f32 %v1260_v39, %v6702_v33  ;;  %v7770_v7 = vadd.f32 %v3334_v12, %v3263_v28  ;;  %v2867_v24 = vadd.f32 %v2866_v51, %v7726_v42  ;;  %v1321_v51 = vpop.f32.mrb[56].mxu0 }
 0x162   :  { %10993 = vst [vmem:[#allocation109_spill] sm:$0xff] %v7759_v34  ;;  %v3280_v14 = vmul.f32 %v7741_v46, %v7741_v46  ;;  %v7776_v1 = vadd.f32 %v1264_v53, %v6775_v62  ;;  %v2876_v19 = vadd.f32 %v7642_v25, %v7731_v20  ;;  %v3297_v36 = vmul.f32 %v7750_v31, %v7750_v31  ;;  %v1323_v25 = vpop.f32.mrb[57].mxu0 }
 0x163   :  { %10994 = vst [vmem:[#allocation110_spill] sm:$0xff] %v7768_v13  ;;  %v7783_v39 = vadd.f32 %v1207_v38, %v10936_v16  ;;  %v7786_v12 = vadd.f32 %v1268_v60, %v6876_v56  ;;  %v3363_v28 = vadd.f32 %v3362_v3, %v3288_v59  ;;  %v3305_v42 = vmul.f32 %v7756_v17, %v7756_v17  ;;  %v1325_v26 = vpop.f32.mrb[58].mxu0 }
 0x164   :  { %10995 = vst [vmem:[#allocation111_spill] sm:$0xff] %v7776_v1  ;;  %v3314_v53 = vmul.f32 %v7759_v34, %v7759_v34  ;;  %v7793_v29 = vadd.f32 %v1211_v41, %v6980_v18  ;;  %v3372_v20 = vadd.f32 %v7650_v8, %v3296_v37  ;;  %v2848_v38 = vadd.f32 %v2847_v11, %v7734_v57  ;;  %v1327_v5 = vpop.f32.mrb[59].mxu0 }
 0x165   :  { %10996 = vst [vmem:[#allocation112_spill] sm:$0xff] %v7783_v39  ;;  %10997 = vst [vmem:[#allocation113_spill] sm:$0xff] %v7786_v12  ;;  %v3344_v40 = vadd.f32 %v3343_v49, %v3271_v43  ;;  %v3272_v60 = vmul.f32 %v7768_v13, %v7768_v13  ;;  %v2858_v3 = vadd.f32 %v2857_v54, %v7741_v46  ;;  %v1278_v54 = vpop.f32.mrb[60].mxu1 }
 0x166   :  { %10998 = vst [vmem:[#allocation114_spill] sm:$0xff] %v7793_v29  ;;  %v3354_v59 = vadd.f32 %v3353_v61, %v3280_v14  ;;  %v2886_v21 = vadd.f32 %v7683_v22, %v7756_v17  ;;  %v3281_v41 = vmul.f32 %v7776_v1, %v7776_v1  ;;  %v3306_v8 = vmul.f32 %v7783_v39, %v7783_v39  ;;  %v7818_v17 = vpop.f32.mrb[61].mxu1 }
 0x167   :  { %v2896_v11 = vadd.f32 %v7702_v55, %v7759_v34  ;;  %v3289_v49 = vmul.f32 %v7786_v12, %v7786_v12  ;;  %v7811_v37 = vadd.f32 %v1270_v52, %v6876_v56  ;;  %v3382_v61 = vadd.f32 %v7698_v6, %v3305_v42  ;;  %v7825_v4 = vpop.f32.mrb[62].mxu1 }
 0x168   :  { %v3392_v22 = vadd.f32 %v7709_v45, %v3314_v53  ;;  %v3315_v43 = vmul.f32 %v7793_v29, %v7793_v29  ;;  %v2868_v14 = vadd.f32 %v2867_v24, %v7786_v12  ;;  %v2877_v55 = vadd.f32 %v2876_v19, %v7750_v31  ;;  %v7831_v24 = vpop.f32.mrb[63].mxu1 }
 0x169   :  { %10999 = vst [vmem:[#allocation115_spill] sm:$0xff] %v7811_v37  ;;  %v3373_v34 = vadd.f32 %v3372_v20, %v3297_v36  ;;  %v2849_v46 = vadd.f32 %v2848_v38, %v7768_v13  ;;  %v7823_v52 = vadd.f32 %v1272_v9, %v6886_v63  ;;  %v3345_v6 = vadd.f32 %v3344_v40, %v3272_v60  ;;  %v1331_v9 = vpop.f32.mrb[60].mxu0 }
 0x16a   :  { %v2859_v45 = vadd.f32 %v2858_v3, %v7776_v1  ;;  %v3355_v42 = vadd.f32 %v3354_v59, %v3281_v41  ;;  %v7829_v53 = vadd.f32 %v1274_v48, %v6886_v63  ;;  %v7834_v12 = vadd.f32 %v2886_v21, %v7783_v39  ;;  %v1333_v21 = vpop.f32.mrb[61].mxu0 }
 0x16b   :  { %11000 = vst [vmem:[#allocation116_spill] sm:$0xff] %v7823_v52  ;;  %v7837_v36 = vadd.f32 %v2896_v11, %v7793_v29  ;;  %v3364_v19 = vadd.f32 %v3363_v28, %v3289_v49  ;;  %v3290_v20 = vmul.f32 %v7811_v37, %v7811_v37  ;;  %v7841_v40 = vadd.f32 %v3382_v61, %v3306_v8  ;;  %v1335_v8 = vpop.f32.mrb[62].mxu0 }
 0x16c   :  { %11001 = vst [vmem:[#allocation117_spill] sm:$0xff] %v7829_v53  ;;  %v7843_v38 = vadd.f32 %v3392_v22, %v3315_v43  ;;  %v7846_v48 = vadd.f32 %v2868_v14, %v7811_v37  ;;  %v7849_v60 = vadd.f32 %v1321_v51, %v6662_v15  ;;  %v2878_v3 = vadd.f32 %v2877_v55, %v7823_v52  ;;  %v1337_v22 = vpop.f32.mrb[63].mxu0 }
 0x16d   :  { %v3298_v28 = vmul.f32 %v7823_v52, %v7823_v52  ;;  %v7855_v59 = vadd.f32 %v1331_v9, %v6702_v33  ;;  %v7858_v41 = vadd.f32 %v1333_v21, %v6702_v33  ;;  %v3299_v11 = vmul.f32 %v7829_v53, %v7829_v53  ;;  %v5598_v21 = vpop.f32.mrb[64].mxu1 }
 0x16e   :  { %11002 = vst [vmem:[#allocation118_spill] sm:$0xff] %v7849_v60  ;;  %v7863_v49 = vadd.f32 %v1323_v25, %v6662_v15  ;;  %v7866_v51 = vadd.f32 %v1325_v26, %v6700_v32  ;;  %v7869_v61 = vadd.f32 %v1335_v8, %v6775_v62  ;;  %v7871_v43 = vadd.f32 %v3364_v19, %v3290_v20  ;;  %v1394_v20 = vpop.f32.mrb[65].mxu1  ;;  %v1341_v37 = vpop.f32.mrb[64].mxu0 }
 0x16f   :  { %11003 = vst [vmem:[#allocation119_spill] sm:$0xff] %v7855_v59  ;;  %11004 = vst [vmem:[#allocation120_spill] sm:$0xff] %v7858_v41  ;;  %v2850_v14 = vadd.f32 %v2849_v46, %v7855_v59  ;;  %v3273_v55 = vmul.f32 %v7855_v59, %v7855_v59  ;;  %v7877_v9 = vadd.f32 %v1337_v22, %v6775_v62  ;;  %v5599_v39 = vpop.f32.mrb[66].mxu1 }
 0x170   :  { %11005 = vst [vmem:[#allocation121_spill] sm:$0xff] %v7863_v49  ;;  %11006 = vst [vmem:[#allocation122_spill] sm:$0xff] %v7866_v51  ;;  %v2830_v25 = vadd.f32 %v7744_v58, %v7849_v60  ;;  %v2860_v26 = vadd.f32 %v2859_v45, %v7869_v61  ;;  %v3282_v8 = vmul.f32 %v7869_v61, %v7869_v61  ;;  %v1397_v31 = vpop.f32.mrb[67].mxu1 }
 0x171   :  { %11007 = vst [vmem:[#allocation123_spill] sm:$0xff] %v7869_v61  ;;  %11008 = vst [vmem:[#allocation124_spill] sm:$0xff] %v7877_v9  ;;  %v7885_v19 = vadd.f32 %v5598_v21, %v6702_v33  ;;  %v3374_v46 = vadd.f32 %v3373_v34, %v3298_v28  ;;  %v3255_v29 = vmul.f32 %v7849_v60, %v7849_v60 }
 0x172   :  { %v7890_v22 = vadd.f32 %v1327_v5, %v6700_v32  ;;  %v2851_v52 = vadd.f32 %v2850_v14, %v7858_v41  ;;  %v2840_v58 = vadd.f32 %v7747_v35, %v7866_v51  ;;  %v7896_v45 = vadd.f32 %v1278_v54, %v10936_v16 }
 0x173   :  { %11009 = vst [vmem:[#allocation125_spill] sm:$0xff] %v7885_v19  ;;  %v7899_v21 = vadd.f32 %v5599_v39, %v6775_v62  ;;  %v2861_v34 = vadd.f32 %v2860_v26, %v7877_v9  ;;  %v3274_v28 = vmul.f32 %v7858_v41, %v7858_v41  ;;  %v7905_v5 = vadd.f32 %v1394_v20, %v6662_v15  ;;  %v1343_v39 = vpop.f32.mrb[65].mxu0 }
 0x174   :  { %11010 = vst [vmem:[#allocation126_spill] sm:$0xff] %v7890_v22  ;;  %11011 = vst [vmem:[#allocation127_spill] sm:$0xff] %v7896_v45  ;;  %v2852_v14 = vadd.f32 %v2851_v52, %v7885_v19  ;;  %v3346_v61 = vadd.f32 %v3345_v6, %v3273_v55  ;;  %v3283_v35 = vmul.f32 %v7877_v9, %v7877_v9  ;;  %v1345_v52 = vpop.f32.mrb[66].mxu0 }
 0x175   :  { %11012 = vst [vmem:[#allocation128_spill] sm:$0xff] %v7899_v21  ;;  %11013 = vst [vmem:[#allocation129_spill] sm:$0xff] %v7905_v5  ;;  %v7911_v54 = vadd.f32 %v1397_v31, %v6700_v32  ;;  %v2862_v1 = vadd.f32 %v2861_v34, %v7899_v21  ;;  %v3356_v26 = vadd.f32 %v3355_v42, %v3282_v8  ;;  %v1347_v42 = vpop.f32.mrb[67].mxu0 }
 0x176   :  { %v2879_v60 = vadd.f32 %v2878_v3, %v7829_v53  ;;  %v3256_v20 = vmul.f32 %v7863_v49, %v7863_v49  ;;  %v3264_v2 = vmul.f32 %v7866_v51, %v7866_v51  ;;  %2853 = vadd.xlane.f32.xlu1 %v2852_v14  ;;  %v2831_v6 = vadd.f32 %v2830_v25, %v7863_v49  ;;  %v7932_v14 = vpop.f32.mrb[68].mxu1 }
 0x177   :  { %11014 = vst [vmem:[#allocation130_spill] sm:$0xff] %v7911_v54  ;;  %v3307_v31 = vmul.f32 %v7896_v45, %v7896_v45  ;;  %v7924_v55 = vadd.f32 %v7818_v17, %v10936_v16  ;;  %2863 = vadd.xlane.f32.xlu0 %v2862_v1  ;;  %v2841_v3 = vadd.f32 %v2840_v58, %v7890_v22  ;;  %v1410_v1 = vpop.f32.mrb[69].mxu1 }
 0x178   :  { %v3326_v8 = vadd.f32 %v7761_v10, %v3255_v29  ;;  %v7930_v34 = vadd.f32 %v7825_v4, %v6980_v18  ;;  %v2832_v25 = vadd.f32 %v2831_v6, %v7905_v5  ;;  %v3275_v53 = vmul.f32 %v7885_v19, %v7885_v19 }
 0x179   :  { %11015 = vst [vmem:[#allocation131_spill] sm:$0xff] %v7924_v55  ;;  %v3347_v9 = vadd.f32 %v3346_v61, %v3274_v28  ;;  %v7938_v17 = vadd.f32 %v1341_v37, %v6876_v56  ;;  %v2842_v58 = vadd.f32 %v2841_v3, %v7911_v54  ;;  %v3284_v29 = vmul.f32 %v7899_v21, %v7899_v21  ;;  %v7950_v37 = vpop.f32.mrb[70].mxu1 }
 0x17a   :  { %11016 = vst [vmem:[#allocation132_spill] sm:$0xff] %v7930_v34  ;;  %v3357_v10 = vadd.f32 %v3356_v26, %v3283_v35  ;;  %v3375_v4 = vadd.f32 %v3374_v46, %v3299_v11  ;;  %v3265_v51 = vmul.f32 %v7890_v22, %v7890_v22  ;;  %v2888_v6 = vadd.f32 %v7834_v12, %v7896_v45  ;;  %v1413_v11 = vpop.f32.mrb[71].mxu1 }
 0x17b   :  { %11017 = vst [vmem:[#allocation133_spill] sm:$0xff] %v7938_v17  ;;  %v7948_v49 = vadd.f32 %v1345_v52, %v6886_v63  ;;  %2833 = vadd.xlane.f32.xlu1 %v2832_v25  ;;  %v3308_v61 = vmul.f32 %v7924_v55, %v7924_v55  ;;  %v7956_v28 = vadd.f32 %v7831_v24, %v6980_v18  ;;  %v1351_v52 = vpop.f32.mrb[68].mxu0 }
 0x17c   :  { %2843 = vadd.xlane.f32.xlu0 %v2842_v58  ;;  %v3327_v46 = vadd.f32 %v3326_v8, %v3256_v20  ;;  %v3336_v35 = vadd.f32 %v7770_v7, %v3264_v2  ;;  %v3384_v12 = vadd.f32 %v7841_v40, %v3307_v31  ;;  %v3316_v26 = vmul.f32 %v7930_v34, %v7930_v34  ;;  %v1353_v58 = vpop.f32.mrb[69].mxu0 }
 0x17d   :  { %11018 = vst [vmem:[#allocation134_spill] sm:$0xff] %v7948_v49  ;;  %11019 = vst [vmem:[#allocation135_spill] sm:$0xff] %v7956_v28  ;;  %v3348_v3 = vadd.f32 %v3347_v9, %v3275_v53  ;;  %v3257_v25 = vmul.f32 %v7905_v5, %v7905_v5  ;;  %v2870_v45 = vadd.f32 %v7846_v48, %v7938_v17  ;;  %v1355_v48 = vpop.f32.mrb[70].mxu0 }
 0x17e   :  { %v7967_v24 = vadd.f32 %v1343_v39, %v6876_v56  ;;  %v3358_v20 = vadd.f32 %v3357_v10, %v3284_v29  ;;  %v3266_v2 = vmul.f32 %v7911_v54, %v7911_v54  ;;  %v2898_v7 = vadd.f32 %v7837_v36, %v7930_v34  ;;  %v1357_v29 = vpop.f32.mrb[71].mxu0 }
 0x17f   :  { %v3291_v53 = vmul.f32 %v7938_v17, %v7938_v17  ;;  %v2880_v40 = vadd.f32 %v2879_v60, %v7948_v49  ;;  %v7977_v9 = vadd.f32 %v1347_v42, %v6886_v63  ;;  %3349 = vadd.xlane.f32.xlu1 %v3348_v3  ;;  %v2889_v39 = vadd.f32 %v2888_v6, %v7924_v55 }
 0x180   :  { %11020 = vst [vmem:[#allocation136_spill] sm:$0xff] %v7967_v24  ;;  %v3300_v31 = vmul.f32 %v7948_v49, %v7948_v49  ;;  %v7983_v8 = vadd.f32 %v1410_v1, %v6876_v56  ;;  %3359 = vadd.xlane.f32.xlu0 %v3358_v20  ;;  %v3337_v36 = vadd.f32 %v3336_v35, %v3265_v51 }
 0x181   :  { %11021 = vst [vmem:[#allocation137_spill] sm:$0xff] %v7977_v9  ;;  %v3317_v10 = vmul.f32 %v7956_v28, %v7956_v28  ;;  %v7988_v60 = vadd.f32 %v1351_v52, %v10936_v16  ;;  %v7991_v42 = vadd.f32 %v1413_v11, %v6886_v63  ;;  %v3328_v3 = vadd.f32 %v3327_v46, %v3257_v25 }
 0x182   :  { %11022 = vst [vmem:[#allocation138_spill] sm:$0xff] %v7983_v8  ;;  %v3394_v6 = vadd.f32 %v7843_v38, %v3316_v26  ;;  %v7995_v34 = vadd.f32 %v1355_v48, %v6980_v18  ;;  %v3338_v1 = vadd.f32 %v3337_v36, %v3266_v2  ;;  %v2871_v55 = vadd.f32 %v2870_v45, %v7967_v24 }
 0x183   :  { %11023 = vst [vmem:[#allocation139_spill] sm:$0xff] %v7988_v60  ;;  %11024 = vst [vmem:[#allocation140_spill] sm:$0xff] %v7991_v42  ;;  %v2899_v51 = vadd.f32 %v2898_v7, %v7956_v28  ;;  %v3292_v35 = vmul.f32 %v7967_v24, %v7967_v24  ;;  %3329 = vadd.xlane.f32.xlu1 %v3328_v3  ;;  %v2881_v52 = vadd.f32 %v2880_v40, %v7977_v9  ;;  %v1758_v7 = vpop.f32.mrb[72].mxu0 }
 0x184   :  { %11025 = vst [vmem:[#allocation141_spill] sm:$0xff] %v7995_v34  ;;  %v3366_v11 = vadd.f32 %v7871_v43, %v3291_v53  ;;  %v3301_v46 = vmul.f32 %v7977_v9, %v7977_v9  ;;  %3339 = vadd.xlane.f32.xlu0 %v3338_v1  ;;  %v2872_v38 = vadd.f32 %v2871_v55, %v7983_v8  ;;  %v1831_v43 = vpop.f32.mrb[72].mxu1 }
 0x185   :  { %v3293_v26 = vmul.f32 %v7983_v8, %v7983_v8  ;;  %v3376_v45 = vadd.f32 %v3375_v4, %v3300_v31  ;;  %v2890_v25 = vadd.f32 %v2889_v39, %v7988_v60  ;;  %v3309_v20 = vmul.f32 %v7988_v60, %v7988_v60  ;;  %v1760_v4 = vpop.f32.mrb[73].mxu0  ;;  %v8021_v39 = vpop.f32.mrb[73].mxu1 }
 0x186   :  { %v8012_v2 = vadd.f32 %v1353_v58, %v10936_v16  ;;  %v2882_v53 = vadd.f32 %v2881_v52, %v7991_v42  ;;  %v2900_v40 = vadd.f32 %v2899_v51, %v7995_v34  ;;  %v3318_v55 = vmul.f32 %v7995_v34, %v7995_v34  ;;  %v1762_v36 = vpop.f32.mrb[74].mxu0  ;;  %v1835_v3 = vpop.f32.mrb[74].mxu1 }
 0x187   :  { %v8019_v48 = vadd.f32 %v1357_v29, %v6980_v18  ;;  %v3302_v31 = vmul.f32 %v7991_v42, %v7991_v42  ;;  %v3385_v58 = vadd.f32 %v3384_v12, %v3308_v61  ;;  %2873 = vadd.xlane.f32.xlu1 %v2872_v38  ;;  %v3367_v1 = vadd.f32 %v3366_v11, %v3292_v35  ;;  %v1764_v28 = vpop.f32.mrb[75].mxu0  ;;  %v1837_v51 = vpop.f32.mrb[75].mxu1 }
 0x188   :  { %11026 = vst [vmem:[#allocation142_spill] sm:$0xff] %v8012_v2  ;;  %v3395_v52 = vadd.f32 %v3394_v6, %v3317_v10  ;;  %2883 = vadd.xlane.f32.xlu0 %v2882_v53  ;;  %v3377_v60 = vadd.f32 %v3376_v45, %v3301_v46  ;;  %v3310_v29 = vmul.f32 %v8012_v2, %v8012_v2  ;;  %v1768_v35 = vpop.f32.mrb[76].mxu0  ;;  %v1841_v11 = vpop.f32.mrb[76].mxu1 }
 0x189   :  { %11027 = vst [vmem:[#allocation143_spill] sm:$0xff] %v8019_v48  ;;  %v3368_v34 = vadd.f32 %v3367_v1, %v3293_v26  ;;  %v2891_v9 = vadd.f32 %v2890_v25, %v8012_v2  ;;  %v3386_v49 = vadd.f32 %v3385_v58, %v3309_v20  ;;  %v3319_v42 = vmul.f32 %v8019_v48, %v8019_v48  ;;  %v1770_v45 = vpop.f32.mrb[77].mxu0 }
 0x18a   :  { %v3378_v61 = vadd.f32 %v3377_v60, %v3302_v31  ;;  %v2901_v12 = vadd.f32 %v2900_v40, %v8019_v48  ;;  %v3396_v38 = vadd.f32 %v3395_v52, %v3318_v55  ;;  %v8033_v10 = vadd.f32 %v7932_v14, %v10936_v16  ;;  %v1843_v60 = vpop.f32.mrb[77].mxu1  ;;  %v1772_v53 = vpop.f32.mrb[78].mxu0 }
 0x18b   :  { %3369 = vadd.xlane.f32.xlu1 %v3368_v34  ;;  %v8037_v6 = vadd.f32 %v7950_v37, %v6980_v18  ;;  %v3387_v26 = vadd.f32 %v3386_v49, %v3310_v29  ;;  %v1845_v40 = vpop.f32.mrb[78].mxu1  ;;  %v1774_v14 = vpop.f32.mrb[79].mxu0  ;;  %v8049_v49 = vadd.f32 %v1760_v4, %v6662_v15  ;;  %v8055_v58 = vadd.f32 %v1764_v28, %v6700_v32 }
 0x18c   :  { %11028 = vst [vmem:[#allocation144_spill] sm:$0xff] %v8033_v10  ;;  %3379 = vadd.xlane.f32.xlu0 %v3378_v61  ;;  %v2892_v46 = vadd.f32 %v2891_v9, %v8033_v10  ;;  %v3397_v20 = vadd.f32 %v3396_v38, %v3319_v42  ;;  %v3311_v34 = vmul.f32 %v8033_v10, %v8033_v10  ;;  %v1847_v37 = vpop.f32.mrb[79].mxu1 }
 0x18d   :  { %11029 = vst [vmem:[#allocation145_spill] sm:$0xff] %v8037_v6  ;;  %v2902_v25 = vadd.f32 %v2901_v12, %v8037_v6  ;;  %v3320_v55 = vmul.f32 %v8037_v6, %v8037_v6  ;;  %v8046_v9 = vadd.f32 %v1758_v7, %v6662_v15  ;;  %11031 = vst [vmem:[#allocation147_spill] sm:$0xff] %v8049_v49 }
 0x18e   :  { %v3388_v31 = vadd.f32 %v3387_v26, %v3311_v34  ;;  %v8052_v42 = vadd.f32 %v1762_v36, %v6700_v32  ;;  %11033 = vst [vmem:[#allocation149_spill] sm:$0xff] %v8055_v58  ;;  %v3410_v7 = vmul.f32 %v8049_v49, %v8049_v49  ;;  %v1778_v29 = vpop.f32.mrb[80].mxu0  ;;  %v8061_v61 = vpop.f32.mrb[80].mxu1  ;;  %v8064_v4 = vadd.f32 %v1831_v43, %v6662_v15 }
 0x18f   :  { %2893 = vadd.xlane.f32.xlu1 %v2892_v46  ;;  %11030 = vst [vmem:[#allocation146_spill] sm:$0xff] %v8046_v9  ;;  %v3398_v1 = vadd.f32 %v3397_v20, %v3320_v55  ;;  %v3409_v52 = vmul.f32 %v8046_v9, %v8046_v9  ;;  %v3419_v28 = vmul.f32 %v8055_v58, %v8055_v58  ;;  %v1780_v12 = vpop.f32.mrb[81].mxu0  ;;  %v8070_v38 = vpop.f32.mrb[81].mxu1 }
 0x190   :  { %2903 = vadd.xlane.f32.xlu0 %v2902_v25  ;;  %11032 = vst [vmem:[#allocation148_spill] sm:$0xff] %v8052_v42  ;;  %11034 = vst [vmem:[#allocation150_spill] sm:$0xff] %v8064_v4  ;;  %v3418_v36 = vmul.f32 %v8052_v42, %v8052_v42  ;;  %v8073_v46 = vadd.f32 %v1768_v35, %v6702_v33  ;;  %v8076_v26 = vadd.f32 %v1770_v45, %v6702_v33  ;;  %v1782_v25 = vpop.f32.mrb[82].mxu0  ;;  %v8078_v20 = vpop.f32.mrb[82].mxu1 }
 0x191   :  { %v8081_v43 = vadd.f32 %v1835_v3, %v6700_v32  ;;  %v1784_v34 = vpop.f32.mrb[83].mxu0  ;;  %v8083_v55 = vpop.f32.mrb[83].mxu1  ;;  %v8089_v35 = vadd.f32 %v8021_v39, %v6662_v15  ;;  %v3411_v45 = vmul.f32 %v8064_v4, %v8064_v4  ;;  %v2923_v6 = vadd.f32 %v8055_v58, %v8052_v42 }
 0x192   :  { %11035 = vst [vmem:[#allocation151_spill] sm:$0xff] %v8073_v46  ;;  %11036 = vst [vmem:[#allocation152_spill] sm:$0xff] %v8076_v26  ;;  %v3491_v48 = vadd.f32 %v3419_v28, %v3418_v36  ;;  %v8096_v3 = vadd.f32 %v1837_v51, %v6700_v32  ;;  %v3427_v10 = vmul.f32 %v8073_v46, %v8073_v46 }
 0x193   :  { %3389 = vadd.xlane.f32.xlu1 %v3388_v31  ;;  %11037 = vst [vmem:[#allocation153_spill] sm:$0xff] %v8081_v43  ;;  %v2913_v31 = vadd.f32 %v8049_v49, %v8046_v9  ;;  %11038 = vst [vmem:[#allocation154_spill] sm:$0xff] %v8089_v35  ;;  %v8106_v39 = vadd.f32 %v1774_v14, %v6775_v62  ;;  %v3420_v2 = vmul.f32 %v8081_v43, %v8081_v43 }
 0x194   :  { %3399 = vadd.xlane.f32.xlu0 %v3398_v1  ;;  %v3481_v1 = vadd.f32 %v3410_v7, %v3409_v52  ;;  %11039 = vst [vmem:[#allocation155_spill] sm:$0xff] %v8096_v3  ;;  %v3428_v52 = vmul.f32 %v8076_v26, %v8076_v26  ;;  %v8103_v7 = vadd.f32 %v1772_v53, %v6775_v62 }
 0x195   :  { %11041 = vst [vmem:[#allocation157_spill] sm:$0xff] %v8106_v39  ;;  %v2933_v36 = vadd.f32 %v8076_v26, %v8073_v46  ;;  %v2914_v51 = vadd.f32 %v2913_v31, %v8064_v4  ;;  %v3412_v28 = vmul.f32 %v8089_v35, %v8089_v35  ;;  %v8116_v24 = vadd.f32 %v1841_v11, %v6702_v33 }
 0x196   :  { %11040 = vst [vmem:[#allocation156_spill] sm:$0xff] %v8103_v7  ;;  %v3482_v8 = vadd.f32 %v3481_v1, %v3411_v45  ;;  %v1788_v53 = vpop.f32.mrb[84].mxu0  ;;  %v8118_v17 = vpop.f32.mrb[84].mxu1  ;;  %v2924_v14 = vadd.f32 %v2923_v6, %v8081_v43  ;;  %v3421_v21 = vmul.f32 %v8096_v3, %v8096_v3  ;;  %v3492_v58 = vadd.f32 %v3491_v48, %v3420_v2 }
 0x197   :  { %11042 = vst [vmem:[#allocation158_spill] sm:$0xff] %v8116_v24  ;;  %v8124_v42 = vadd.f32 %v1843_v60, %v6702_v33  ;;  %v1790_v31 = vpop.f32.mrb[85].mxu0  ;;  %v8126_v54 = vpop.f32.mrb[85].mxu1  ;;  %v3501_v22 = vadd.f32 %v3428_v52, %v3427_v10  ;;  %v3436_v11 = vmul.f32 %v8103_v7, %v8103_v7  ;;  %v8131_v1 = vadd.f32 %v1845_v40, %v6775_v62 }
 0x198   :  { %v3437_v6 = vmul.f32 %v8106_v39, %v8106_v39  ;;  %v1792_v45 = vpop.f32.mrb[86].mxu0  ;;  %v8135_v43 = vpop.f32.mrb[86].mxu1  ;;  %v2934_v2 = vadd.f32 %v2933_v36, %v8116_v24  ;;  %v8139_v48 = vadd.f32 %v1847_v37, %v6775_v62  ;;  %v8142_v60 = vadd.f32 %v1778_v29, %v6876_v56 }
 0x199   :  { %11043 = vst [vmem:[#allocation159_spill] sm:$0xff] %v8124_v42  ;;  %11044 = vst [vmem:[#allocation160_spill] sm:$0xff] %v8131_v1  ;;  %v8145_v10 = vadd.f32 %v1780_v12, %v6876_v56  ;;  %v1794_v52 = vpop.f32.mrb[87].mxu0  ;;  %v8147_v40 = vpop.f32.mrb[87].mxu1  ;;  %v8150_v4 = vadd.f32 %v2914_v51, %v8089_v35  ;;  %v8152_v49 = vadd.f32 %v3482_v8, %v3412_v28 }
 0x19a   :  { %11045 = vst [vmem:[#allocation161_spill] sm:$0xff] %v8139_v48  ;;  %11046 = vst [vmem:[#allocation162_spill] sm:$0xff] %v8142_v60  ;;  %v3429_v36 = vmul.f32 %v8116_v24, %v8116_v24  ;;  %v2943_v37 = vadd.f32 %v8106_v39, %v8103_v7  ;;  %v8159_v29 = vadd.f32 %v2924_v14, %v8096_v3 }
 0x19b   :  { %11047 = vst [vmem:[#allocation163_spill] sm:$0xff] %v8145_v10  ;;  %v8161_v9 = vadd.f32 %v3492_v58, %v3421_v21  ;;  %v8164_v12 = vadd.f32 %v1782_v25, %v6886_v63  ;;  %v8167_v5 = vadd.f32 %v1784_v34, %v6886_v63  ;;  %v3430_v8 = vmul.f32 %v8124_v42, %v8124_v42 }
 0x19c   :  { %v3502_v51 = vadd.f32 %v3501_v22, %v3429_v36  ;;  %v3438_v28 = vmul.f32 %v8131_v1, %v8131_v1  ;;  %v3511_v35 = vadd.f32 %v3437_v6, %v3436_v11  ;;  %v8174_v39 = vadd.f32 %v2934_v2, %v8124_v42 }
 0x19d   :  { %11048 = vst [vmem:[#allocation164_spill] sm:$0xff] %v8164_v12  ;;  %11049 = vst [vmem:[#allocation165_spill] sm:$0xff] %v8167_v5  ;;  %v3439_v21 = vmul.f32 %v8139_v48, %v8139_v48  ;;  %v3445_v58 = vmul.f32 %v8142_v60, %v8142_v60  ;;  %v3446_v25 = vmul.f32 %v8145_v10, %v8145_v10 }
 0x19e   :  { %v2944_v34 = vadd.f32 %v2943_v37, %v8131_v1  ;;  %v8185_v22 = vadd.f32 %v8061_v61, %v6876_v56  ;;  %v8188_v14 = vadd.f32 %v1788_v53, %v10936_v16  ;;  %v8191_v11 = vadd.f32 %v1790_v31, %v10936_v16  ;;  %v1904_v6 = vpop.f32.mrb[88].mxu0  ;;  %v8193_v2 = vpop.f32.mrb[88].mxu1 }
 0x19f   :  { %v2953_v36 = vadd.f32 %v8145_v10, %v8142_v60  ;;  %v8199_v7 = vadd.f32 %v8070_v38, %v6876_v56  ;;  %v3454_v61 = vmul.f32 %v8164_v12, %v8164_v12  ;;  %v3455_v53 = vmul.f32 %v8167_v5, %v8167_v5  ;;  %v1906_v37 = vpop.f32.mrb[89].mxu0  ;;  %v1979_v1 = vpop.f32.mrb[89].mxu1 }
 0x1a0   :  { %11050 = vst [vmem:[#allocation166_spill] sm:$0xff] %v8185_v22  ;;  %11051 = vst [vmem:[#allocation167_spill] sm:$0xff] %v8188_v14  ;;  %v8205_v31 = vadd.f32 %v3502_v51, %v3430_v8  ;;  %v3512_v3 = vadd.f32 %v3511_v35, %v3438_v28  ;;  %v8208_v23 = vadd.f32 %v1792_v45, %v6980_v18  ;;  %v1908_v60 = vpop.f32.mrb[90].mxu0  ;;  %v8213_v38 = vpop.f32.mrb[90].mxu1 }
 0x1a1   :  { %11052 = vst [vmem:[#allocation168_spill] sm:$0xff] %v8191_v11  ;;  %11053 = vst [vmem:[#allocation169_spill] sm:$0xff] %v8199_v7  ;;  %v8211_v10 = vadd.f32 %v1794_v52, %v6980_v18  ;;  %v3521_v0 = vadd.f32 %v3446_v25, %v3445_v58  ;;  %v8217_v42 = vadd.f32 %v8078_v20, %v6886_v63  ;;  %v1910_v45 = vpop.f32.mrb[91].mxu0  ;;  %v8225_v8 = vpop.f32.mrb[91].mxu1 }
 0x1a2   :  { %11054 = vst [vmem:[#allocation170_spill] sm:$0xff] %v8208_v23  ;;  %v2963_v24 = vadd.f32 %v8167_v5, %v8164_v12  ;;  %v8223_v35 = vadd.f32 %v8083_v55, %v6886_v63  ;;  %v8228_v52 = vadd.f32 %v2944_v34, %v8139_v48  ;;  %v3447_v51 = vmul.f32 %v8185_v22, %v8185_v22 }
 0x1a3   :  { %11055 = vst [vmem:[#allocation171_spill] sm:$0xff] %v8211_v10  ;;  %11056 = vst [vmem:[#allocation172_spill] sm:$0xff] %v8217_v42  ;;  %v3463_v20 = vmul.f32 %v8188_v14, %v8188_v14  ;;  %v3464_v28 = vmul.f32 %v8191_v11, %v8191_v11  ;;  %v2954_v58 = vadd.f32 %v2953_v36, %v8185_v22 }
 0x1a4   :  { %11057 = vst [vmem:[#allocation173_spill] sm:$0xff] %v8223_v35  ;;  %v3448_v55 = vmul.f32 %v8199_v7, %v8199_v7  ;;  %v3531_v25 = vadd.f32 %v3455_v53, %v3454_v61  ;;  %v8241_v5 = vadd.f32 %v8118_v17, %v10936_v16  ;;  %v8243_v34 = vadd.f32 %v3512_v3, %v3439_v21 }
 0x1a5   :  { %v3472_v12 = vmul.f32 %v8208_v23, %v8208_v23  ;;  %v3473_v48 = vmul.f32 %v8211_v10, %v8211_v10  ;;  %v8250_v26 = vadd.f32 %v1904_v6, %v6662_v15  ;;  %v3522_v36 = vadd.f32 %v3521_v0, %v3447_v51 }
 0x1a6   :  { %11058 = vst [vmem:[#allocation174_spill] sm:$0xff] %v8241_v5  ;;  %v3456_v22 = vmul.f32 %v8217_v42, %v8217_v42  ;;  %v2964_v61 = vadd.f32 %v2963_v24, %v8217_v42  ;;  %v3457_v17 = vmul.f32 %v8223_v35, %v8223_v35  ;;  %v2973_v3 = vadd.f32 %v8191_v11, %v8188_v14  ;;  %v1914_v0 = vpop.f32.mrb[92].mxu0  ;;  %v1987_v51 = vpop.f32.mrb[92].mxu1 }
 0x1a7   :  { %11059 = vst [vmem:[#allocation175_spill] sm:$0xff] %v8250_v26  ;;  %v3541_v21 = vadd.f32 %v3464_v28, %v3463_v20  ;;  %v8261_v53 = vadd.f32 %v8126_v54, %v10936_v16  ;;  %v8265_v6 = vadd.f32 %v8135_v43, %v6980_v18  ;;  %v8268_v46 = vadd.f32 %v2954_v58, %v8199_v7  ;;  %v1916_v28 = vpop.f32.mrb[93].mxu0  ;;  %v1989_v11 = vpop.f32.mrb[93].mxu1 }
 0x1a8   :  { %v3532_v24 = vadd.f32 %v3531_v25, %v3456_v22  ;;  %v3465_v42 = vmul.f32 %v8241_v5, %v8241_v5  ;;  %v2983_v20 = vadd.f32 %v8211_v10, %v8208_v23  ;;  %v3551_v54 = vadd.f32 %v3473_v48, %v3472_v12  ;;  %v1918_v58 = vpop.f32.mrb[94].mxu0  ;;  %v1991_v22 = vpop.f32.mrb[94].mxu1 }
 0x1a9   :  { %11060 = vst [vmem:[#allocation176_spill] sm:$0xff] %v8261_v53  ;;  %11061 = vst [vmem:[#allocation177_spill] sm:$0xff] %v8265_v6  ;;  %v2916_v14 = vadd.f32 %v8150_v4, %v8250_v26  ;;  %v8277_v43 = vadd.f32 %v1906_v37, %v6662_v15  ;;  %v8280_v19 = vadd.f32 %v1908_v60, %v6700_v32  ;;  %v1920_v48 = vpop.f32.mrb[95].mxu0  ;;  %v1993_v12 = vpop.f32.mrb[95].mxu1 }
 0x1aa   :  { %v8282_v25 = vadd.f32 %v3522_v36, %v3448_v55  ;;  %v8285_v7 = vadd.f32 %v2964_v61, %v8223_v35  ;;  %v8289_v10 = vadd.f32 %v8147_v40, %v6980_v18  ;;  %v3413_v4 = vmul.f32 %v8250_v26, %v8250_v26 }
 0x1ab   :  { %11062 = vst [vmem:[#allocation178_spill] sm:$0xff] %v8277_v43  ;;  %11063 = vst [vmem:[#allocation179_spill] sm:$0xff] %v8280_v19  ;;  %v2974_v37 = vadd.f32 %v2973_v3, %v8241_v5  ;;  %v3466_v60 = vmul.f32 %v8261_v53, %v8261_v53  ;;  %v3542_v23 = vadd.f32 %v3541_v21, %v3465_v42 }
 0x1ac   :  { %11064 = vst [vmem:[#allocation180_spill] sm:$0xff] %v8289_v10  ;;  %v3474_v55 = vmul.f32 %v8265_v6, %v8265_v6  ;;  %v8298_v36 = vadd.f32 %v3532_v24, %v3457_v17  ;;  %v2984_v61 = vadd.f32 %v2983_v20, %v8265_v6  ;;  %v8303_v40 = vadd.f32 %v8193_v2, %v6662_v15 }
 0x1ad   :  { %v8306_v35 = vadd.f32 %v1979_v1, %v6662_v15  ;;  %v2917_v3 = vadd.f32 %v2916_v14, %v8277_v43  ;;  %v2926_v42 = vadd.f32 %v8159_v29, %v8280_v19  ;;  %v8312_v21 = vadd.f32 %v1910_v45, %v6700_v32 }
 0x1ae   :  { %11065 = vst [vmem:[#allocation181_spill] sm:$0xff] %v8303_v40  ;;  %v3552_v26 = vadd.f32 %v3551_v54, %v3474_v55  ;;  %v3475_v17 = vmul.f32 %v8289_v10, %v8289_v10  ;;  %v3484_v24 = vadd.f32 %v8152_v49, %v3413_v4  ;;  %v3414_v2 = vmul.f32 %v8277_v43, %v8277_v43  ;;  %v1924_v54 = vpop.f32.mrb[96].mxu0  ;;  %v1997_v49 = vpop.f32.mrb[96].mxu1 }
 0x1af   :  { %11066 = vst [vmem:[#allocation182_spill] sm:$0xff] %v8306_v35  ;;  %11067 = vst [vmem:[#allocation183_spill] sm:$0xff] %v8312_v21  ;;  %v8320_v1 = vadd.f32 %v1914_v0, %v6702_v33  ;;  %v8323_v20 = vadd.f32 %v2974_v37, %v8261_v53  ;;  %v8325_v14 = vadd.f32 %v3542_v23, %v3466_v60  ;;  %v1926_v60 = vpop.f32.mrb[97].mxu0  ;;  %v1999_v55 = vpop.f32.mrb[97].mxu1 }
 0x1b0   :  { %v3422_v29 = vmul.f32 %v8280_v19, %v8280_v19  ;;  %v8331_v45 = vadd.f32 %v8213_v38, %v6700_v32  ;;  %v8334_v4 = vadd.f32 %v2984_v61, %v8289_v10  ;;  %v3415_v0 = vmul.f32 %v8303_v40, %v8303_v40  ;;  %v1928_v61 = vpop.f32.mrb[98].mxu0  ;;  %v2001_v10 = vpop.f32.mrb[98].mxu1 }
 0x1b1   :  { %11068 = vst [vmem:[#allocation184_spill] sm:$0xff] %v8320_v1  ;;  %v3416_v37 = vmul.f32 %v8306_v35, %v8306_v35  ;;  %v8341_v23 = vadd.f32 %v1918_v58, %v6775_v62  ;;  %v8343_v6 = vadd.f32 %v3552_v26, %v3475_v17  ;;  %v2927_v38 = vadd.f32 %v2926_v42, %v8312_v21  ;;  %v1930_v17 = vpop.f32.mrb[99].mxu0  ;;  %v2003_v42 = vpop.f32.mrb[99].mxu1 }
 0x1b2   :  { %11069 = vst [vmem:[#allocation185_spill] sm:$0xff] %v8331_v45  ;;  %v8348_v53 = vadd.f32 %v8225_v8, %v6700_v32  ;;  %v2918_v5 = vadd.f32 %v2917_v3, %v8303_v40  ;;  %v3485_v19 = vadd.f32 %v3484_v24, %v3414_v2  ;;  %v2936_v43 = vadd.f32 %v8174_v39, %v8320_v1 }
 0x1b3   :  { %11070 = vst [vmem:[#allocation186_spill] sm:$0xff] %v8341_v23  ;;  %v3431_v58 = vmul.f32 %v8320_v1, %v8320_v1  ;;  %v8356_v26 = vadd.f32 %v1916_v28, %v6702_v33  ;;  %v3494_v41 = vadd.f32 %v8161_v9, %v3422_v29  ;;  %v3424_v8 = vmul.f32 %v8331_v45, %v8331_v45 }
 0x1b4   :  { %11071 = vst [vmem:[#allocation187_spill] sm:$0xff] %v8348_v53  ;;  %v3423_v3 = vmul.f32 %v8312_v21, %v8312_v21  ;;  %v8364_v24 = vadd.f32 %v1987_v51, %v6702_v33  ;;  %v8367_v39 = vadd.f32 %v1989_v11, %v6702_v33  ;;  %v2946_v28 = vadd.f32 %v8228_v52, %v8341_v23 }
 0x1b5   :  { %11072 = vst [vmem:[#allocation188_spill] sm:$0xff] %v8356_v26  ;;  %v8372_v2 = vadd.f32 %v1991_v22, %v6775_v62  ;;  %v8375_v9 = vadd.f32 %v1920_v48, %v6775_v62  ;;  %v8379_v29 = vmul.f32 %v8348_v53, %v8348_v53  ;;  %v8382_v21 = vadd.f32 %v1924_v54, %v6876_v56 }
 0x1b6   :  { %11073 = vst [vmem:[#allocation189_spill] sm:$0xff] %v8364_v24  ;;  %11074 = vst [vmem:[#allocation190_spill] sm:$0xff] %v8367_v39  ;;  %v8385_v51 = vadd.f32 %v2918_v5, %v8306_v35  ;;  %v2928_v11 = vadd.f32 %v2927_v38, %v8331_v45  ;;  %v3504_v52 = vadd.f32 %v8205_v31, %v3431_v58  ;;  %v1934_v5 = vpop.f32.mrb[100].mxu0  ;;  %v8399_v35 = vpop.f32.mrb[100].mxu1 }
 0x1b7   :  { %11075 = vst [vmem:[#allocation191_spill] sm:$0xff] %v8372_v2  ;;  %11076 = vst [vmem:[#allocation192_spill] sm:$0xff] %v8375_v9  ;;  %v2937_v22 = vadd.f32 %v2936_v43, %v8356_v26  ;;  %v3432_v48 = vmul.f32 %v8356_v26, %v8356_v26  ;;  %v3440_v40 = vmul.f32 %v8341_v23, %v8341_v23  ;;  %v8410_v23 = vpop.f32.mrb[101].mxu1 }
 0x1b8   :  { %11077 = vst [vmem:[#allocation193_spill] sm:$0xff] %v8382_v21  ;;  %v3495_v1 = vadd.f32 %v3494_v41, %v3423_v3  ;;  %v3433_v54 = vmul.f32 %v8364_v24, %v8364_v24  ;;  %v8397_v59 = vadd.f32 %v1993_v12, %v6775_v62  ;;  %v3486_v38 = vadd.f32 %v3485_v19, %v3415_v0  ;;  %v1936_v3 = vpop.f32.mrb[101].mxu0  ;;  %v8420_v26 = vpop.f32.mrb[102].mxu1 }
 0x1b9   :  { %v3434_v31 = vmul.f32 %v8367_v39, %v8367_v39  ;;  %v8405_v43 = vmul.f32 %v8372_v2, %v8372_v2  ;;  %v2947_v58 = vadd.f32 %v2946_v28, %v8375_v9  ;;  %v3441_v41 = vmul.f32 %v8375_v9, %v8375_v9  ;;  %v1938_v45 = vpop.f32.mrb[102].mxu0  ;;  %v8429_v47 = vpop.f32.mrb[103].mxu1 }
 0x1ba   :  { %11078 = vst [vmem:[#allocation194_spill] sm:$0xff] %v8397_v59  ;;  %v3449_v12 = vmul.f32 %v8382_v21, %v8382_v21  ;;  %v8415_v19 = vadd.f32 %v1926_v60, %v6876_v56  ;;  %v8418_v0 = vadd.f32 %v1928_v61, %v6886_v63  ;;  %v8423_v28 = vadd.f32 %v2928_v11, %v8348_v53  ;;  %v1940_v44 = vpop.f32.mrb[103].mxu0 }
 0x1bb   :  { %v3505_v13 = vadd.f32 %v3504_v52, %v3432_v48  ;;  %v3514_v9 = vadd.f32 %v8243_v34, %v3440_v40  ;;  %v8427_v57 = vadd.f32 %v1997_v49, %v6876_v56  ;;  %v2938_v60 = vadd.f32 %v2937_v22, %v8364_v24 }
 0x1bc   :  { %11079 = vst [vmem:[#allocation195_spill] sm:$0xff] %v8415_v19  ;;  %11080 = vst [vmem:[#allocation196_spill] sm:$0xff] %v8418_v0  ;;  %v8434_v61 = vmul.f32 %v8397_v59, %v8397_v59  ;;  %v2956_v50 = vadd.f32 %v8268_v46, %v8382_v21  ;;  %v8439_v11 = vadd.f32 %v1999_v55, %v6876_v56 }
 0x1bd   :  { %11081 = vst [vmem:[#allocation197_spill] sm:$0xff] %v8427_v57  ;;  %v8441_v52 = vadd.f32 %v3486_v38, %v3416_v37  ;;  %v8444_v34 = vadd.f32 %v2001_v10, %v6886_v63  ;;  %v8447_v40 = vadd.f32 %v1930_v17, %v6886_v63  ;;  %v2948_v49 = vadd.f32 %v2947_v58, %v8372_v2 }
 0x1be   :  { %11082 = vst [vmem:[#allocation198_spill] sm:$0xff] %v8439_v11  ;;  %v3496_v22 = vadd.f32 %v3495_v1, %v3424_v8  ;;  %v3524_v48 = vadd.f32 %v8282_v25, %v3449_v12  ;;  %v3450_v53 = vmul.f32 %v8415_v19, %v8415_v19  ;;  %v2966_v46 = vadd.f32 %v8285_v7, %v8418_v0  ;;  %v8473_v58 = vpop.f32.mrb[104].mxu1 }
 0x1bf   :  { %11083 = vst [vmem:[#allocation199_spill] sm:$0xff] %v8444_v34  ;;  %11084 = vst [vmem:[#allocation200_spill] sm:$0xff] %v8447_v40  ;;  %v3458_v37 = vmul.f32 %v8418_v0, %v8418_v0  ;;  %v3515_v55 = vadd.f32 %v3514_v9, %v3441_v41  ;;  %v8459_v10 = vmul.f32 %v8427_v57, %v8427_v57  ;;  %v5616_v9 = vpop.f32.mrb[104].mxu0  ;;  %v8484_v12 = vpop.f32.mrb[105].mxu1 }
 0x1c0   :  { %v2939_v17 = vadd.f32 %v2938_v60, %v8367_v39  ;;  %v3506_v38 = vadd.f32 %v3505_v13, %v3433_v54  ;;  %v2957_v1 = vadd.f32 %v2956_v50, %v8415_v19  ;;  %v8465_v25 = vmul.f32 %v8439_v11, %v8439_v11  ;;  %v2050_v54 = vpop.f32.mrb[105].mxu0  ;;  %v2418_v39 = vpop.f32.mrb[106].mxu1 }
 0x1c1   :  { %v8468_v8 = vadd.f32 %v2003_v42, %v6886_v63  ;;  %v8471_v7 = vadd.f32 %v1934_v5, %v10936_v16  ;;  %v8477_v41 = vmul.f32 %v8444_v34, %v8444_v34  ;;  %v3459_v50 = vmul.f32 %v8447_v40, %v8447_v40  ;;  %v5617_v21 = vpop.f32.mrb[106].mxu0 }
 0x1c2   :  { %v8482_v13 = vadd.f32 %v5616_v9, %v6702_v33  ;;  %v2949_v42 = vadd.f32 %v2948_v49, %v8397_v59  ;;  %v8487_v5 = vadd.f32 %v3524_v48, %v3450_v53  ;;  %v3534_v60 = vadd.f32 %v8298_v36, %v3458_v37  ;;  %v2053_v24 = vpop.f32.mrb[107].mxu0 }
 0x1c3   :  { %11085 = vst [vmem:[#allocation201_spill] sm:$0xff] %v8468_v8  ;;  %11086 = vst [vmem:[#allocation202_spill] sm:$0xff] %v8471_v7  ;;  %v2967_v0 = vadd.f32 %v2966_v46, %v8447_v40  ;;  %v8492_v19 = vadd.f32 %v1938_v45, %v6980_v18  ;;  %v8495_v2 = vadd.f32 %v2050_v54, %v6662_v15 }
 0x1c4   :  { %11087 = vst [vmem:[#allocation203_spill] sm:$0xff] %v8482_v13  ;;  %v8498_v9 = vadd.f32 %v5617_v21, %v6775_v62  ;;  %v2940_v49 = vadd.f32 %v2939_v17, %v8482_v13  ;;  %v3507_v53 = vadd.f32 %v3506_v38, %v3434_v31  ;;  %v8503_v36 = vmul.f32 %v8468_v8, %v8468_v8  ;;  %v2420_v21 = vpop.f32.mrb[107].mxu1 }
 0x1c5   :  { %11088 = vst [vmem:[#allocation204_spill] sm:$0xff] %v8492_v19  ;;  %11089 = vst [vmem:[#allocation205_spill] sm:$0xff] %v8495_v2  ;;  %v2976_v45 = vadd.f32 %v8323_v20, %v8471_v7  ;;  %v3467_v48 = vmul.f32 %v8471_v7, %v8471_v7  ;;  %v8510_v46 = vadd.f32 %v1936_v3, %v10936_v16 }
 0x1c6   :  { %11090 = vst [vmem:[#allocation206_spill] sm:$0xff] %v8498_v9  ;;  %v8513_v37 = vadd.f32 %v2053_v24, %v6700_v32  ;;  %2941 = vadd.xlane.f32.xlu1 %v2940_v49  ;;  %v2950_v31 = vadd.f32 %v2949_v42, %v8498_v9  ;;  %v3516_v17 = vadd.f32 %v3515_v55, %v8405_v43 }
 0x1c7   :  { %11091 = vst [vmem:[#allocation207_spill] sm:$0xff] %v8510_v46  ;;  %v8518_v38 = vadd.f32 %v3496_v22, %v8379_v29  ;;  %v2986_v20 = vadd.f32 %v8334_v4, %v8492_v19  ;;  %v3476_v54 = vmul.f32 %v8492_v19, %v8492_v19  ;;  %v8525_v3 = vadd.f32 %v1940_v44, %v6980_v18 }
 0x1c8   :  { %11092 = vst [vmem:[#allocation208_spill] sm:$0xff] %v8513_v37  ;;  %v2958_v24 = vadd.f32 %v2957_v1, %v8427_v57  ;;  %v8528_v7 = vadd.f32 %v3534_v60, %v3459_v50  ;;  %v8532_v42 = vadd.f32 %v8399_v35, %v10936_v16  ;;  %2951 = vadd.xlane.f32.xlu0 %v2950_v31  ;;  %v5620_v35 = vpop.f32.mrb[108].mxu0  ;;  %v2424_v1 = vpop.f32.mrb[108].mxu1 }
 0x1c9   :  { %11093 = vst [vmem:[#allocation209_spill] sm:$0xff] %v8525_v3  ;;  %v2920_v29 = vadd.f32 %v8385_v51, %v8495_v2  ;;  %v3435_v4 = vmul.f32 %v8482_v13, %v8482_v13  ;;  %v3544_v43 = vadd.f32 %v8325_v14, %v3467_v48  ;;  %v2977_v44 = vadd.f32 %v2976_v45, %v8510_v46  ;;  %v2066_v50 = vpop.f32.mrb[109].mxu0  ;;  %v8556_v31 = vpop.xlane.xlu0 %2765 }
 0x1ca   :  { %11094 = vst [vmem:[#allocation210_spill] sm:$0xff] %v8532_v42  ;;  %v3468_v22 = vmul.f32 %v8510_v46, %v8510_v46  ;;  %v8544_v55 = vadd.f32 %v8410_v23, %v10936_v16  ;;  %v2930_v51 = vadd.f32 %v8423_v28, %v8513_v37  ;;  %v3444_v60 = vmul.f32 %v8498_v9, %v8498_v9 }
 0x1cb   :  { %2921 = vadd.xlane.f32.xlu1 %v2920_v29  ;;  %v3517_v14 = vadd.f32 %v3516_v17, %v8434_v61  ;;  %v2968_v49 = vadd.f32 %v2967_v0, %v8444_v34  ;;  %v3554_v45 = vadd.f32 %v8343_v6, %v3476_v54  ;;  %v2987_v48 = vadd.f32 %v2986_v20, %v8525_v3  ;;  %v2426_v29 = vpop.f32.mrb[109].mxu1  ;;  %v5621_v0 = vpop.f32.mrb[110].mxu0 }
 0x1cc   :  { %11095 = vst [vmem:[#allocation211_spill] sm:$0xff] %v8544_v55  ;;  %v3477_v23 = vmul.f32 %v8525_v3, %v8525_v3  ;;  %v8559_v19 = vadd.f32 %v2958_v24, %v8439_v11  ;;  %v3469_v28 = vmul.f32 %v8532_v42, %v8532_v42  ;;  %v8565_v61 = vadd.f32 %v8420_v26, %v6980_v18  ;;  %v2428_v6 = vpop.f32.mrb[110].mxu1  ;;  %v2069_v46 = vpop.f32.mrb[111].mxu0 }
 0x1cd   :  { %2931 = vadd.xlane.f32.xlu0 %v2930_v51  ;;  %v3508_v17 = vadd.f32 %v3507_v53, %v3435_v4  ;;  %v3417_v20 = vmul.f32 %v8495_v2, %v8495_v2  ;;  %v3545_v54 = vadd.f32 %v3544_v43, %v3468_v22  ;;  %v3470_v3 = vmul.f32 %v8544_v55, %v8544_v55  ;;  %v2430_v34 = vpop.f32.mrb[111].mxu1 }
 0x1ce   :  { %11096 = vst [vmem:[#allocation212_spill] sm:$0xff] %v8565_v61  ;;  %v8573_v24 = vadd.f32 %v8429_v47, %v6980_v18  ;;  %v2978_v26 = vadd.f32 %v2977_v44, %v8532_v42  ;;  %v8578_v40 = vadd.f32 %v8473_v58, %v6662_v15  ;;  %v8582_v53 = vadd.f32 %v8484_v12, %v6662_v15 }
 0x1cf   :  { %3509 = vadd.xlane.f32.xlu1 %v3508_v17  ;;  %v3518_v4 = vadd.f32 %v3517_v14, %v3444_v60  ;;  %v3426_v43 = vmul.f32 %v8513_v37, %v8513_v37  ;;  %v3555_v22 = vadd.f32 %v3554_v45, %v3477_v23  ;;  %v8587_v47 = vadd.f32 %v2418_v39, %v6700_v32  ;;  %v2434_v45 = vpop.f32.mrb[112].mxu1 }
 0x1d0   :  { %11097 = vst [vmem:[#allocation213_spill] sm:$0xff] %v8573_v24  ;;  %11098 = vst [vmem:[#allocation214_spill] sm:$0xff] %v8578_v40  ;;  %v8590_v51 = vadd.f32 %v2420_v21, %v6700_v32  ;;  %v2988_v44 = vadd.f32 %v2987_v48, %v8565_v61  ;;  %v3478_v58 = vmul.f32 %v8565_v61, %v8565_v61 }
 0x1d1   :  { %11099 = vst [vmem:[#allocation215_spill] sm:$0xff] %v8582_v53  ;;  %11100 = vst [vmem:[#allocation216_spill] sm:$0xff] %v8587_v47  ;;  %v8596_v12 = vadd.f32 %v5620_v35, %v10936_v16  ;;  %3519 = vadd.xlane.f32.xlu0 %v3518_v4  ;;  %v3488_v60 = vadd.f32 %v8441_v52, %v3417_v20  ;;  %v2969_v14 = vadd.f32 %v2968_v49, %v8468_v8  ;;  %v2436_v49 = vpop.f32.mrb[113].mxu1 }
 0x1d2   :  { %11101 = vst [vmem:[#allocation217_spill] sm:$0xff] %v8590_v51  ;;  %v3479_v39 = vmul.f32 %v8573_v24, %v8573_v24  ;;  %v2979_v21 = vadd.f32 %v2978_v26, %v8544_v55  ;;  %v3546_v23 = vadd.f32 %v3545_v54, %v3469_v28  ;;  %v3526_v48 = vadd.f32 %v8487_v5, %v8459_v10  ;;  %v8617_v10 = vpop.xlane.xlu0 %2745  ;;  %v2438_v5 = vpop.f32.mrb[114].mxu1 }
 0x1d3   :  { %11102 = vst [vmem:[#allocation218_spill] sm:$0xff] %v8596_v12  ;;  %v3569_v17 = vmul.f32 %v8578_v40, %v8578_v40  ;;  %v3570_v35 = vmul.f32 %v8582_v53, %v8582_v53  ;;  %v8610_v52 = vadd.f32 %v5621_v0, %v6980_v18  ;;  %3489 = vadd.xlane.f32.xlu1 %v3488_v60 }
 0x1d4   :  { %v3498_v20 = vadd.f32 %v8518_v38, %v3426_v43  ;;  %v3578_v26 = vmul.f32 %v8587_v47, %v8587_v47  ;;  %v3579_v28 = vmul.f32 %v8590_v51, %v8590_v51  ;;  %v2989_v54 = vadd.f32 %v2988_v44, %v8573_v24  ;;  %v2440_v43 = vpop.f32.mrb[115].mxu1 }
 0x1d5   :  { %11103 = vst [vmem:[#allocation219_spill] sm:$0xff] %v8610_v52  ;;  %v3556_v4 = vadd.f32 %v3555_v22, %v3478_v58  ;;  %v8621_v61 = vadd.f32 %v2424_v1, %v6702_v33  ;;  %v8624_v0 = vadd.f32 %v2066_v50, %v6876_v56  ;;  %v8627_v38 = vadd.f32 %v2426_v29, %v6702_v33  ;;  %v2487_v22 = vpop.f32.mrb[112].mxu0 }
 0x1d6   :  { %3499 = vadd.xlane.f32.xlu0 %v3498_v20  ;;  %v2980_v60 = vadd.f32 %v2979_v21, %v8596_v12  ;;  %v8632_v55 = vadd.f32 %v8582_v53, %v8578_v40  ;;  %v8635_v44 = vadd.f32 %v2428_v6, %v6775_v62  ;;  %v8638_v1 = vadd.f32 %v2430_v34, %v6775_v62  ;;  %v2489_v20 = vpop.f32.mrb[113].mxu0 }
 0x1d7   :  { %11104 = vst [vmem:[#allocation220_spill] sm:$0xff] %v8621_v61  ;;  %11105 = vst [vmem:[#allocation221_spill] sm:$0xff] %v8624_v0  ;;  %v3536_v50 = vadd.f32 %v8528_v7, %v8477_v41  ;;  %v8642_v29 = vadd.f32 %v3570_v35, %v3569_v17  ;;  %v8646_v58 = vadd.f32 %v8590_v51, %v8587_v47  ;;  %v2491_v34 = vpop.f32.mrb[114].mxu0  ;;  %v8655_v41 = vpop.xlane.xlu1 %3189 }
 0x1d8   :  { %11106 = vst [vmem:[#allocation222_spill] sm:$0xff] %v8627_v38  ;;  %11107 = vst [vmem:[#allocation223_spill] sm:$0xff] %v8635_v44  ;;  %v8649_v21 = vadd.f32 %v2069_v46, %v6886_v63  ;;  %2981 = vadd.xlane.f32.xlu1 %v2980_v60  ;;  %v2990_v6 = vadd.f32 %v2989_v54, %v8610_v52  ;;  %v8652_v24 = vadd.f32 %v3579_v28, %v3578_v26  ;;  %v2493_v35 = vpop.f32.mrb[115].mxu0 }
 0x1d9   :  { %11108 = vst [vmem:[#allocation224_spill] sm:$0xff] %v8638_v1  ;;  %v3547_v42 = vadd.f32 %v3546_v23, %v3470_v3  ;;  %v3557_v8 = vadd.f32 %v3556_v4, %v3479_v39  ;;  %v3527_v7 = vadd.f32 %v3526_v48, %v8465_v25  ;;  %v3587_v17 = vmul.f32 %v8621_v61, %v8621_v61  ;;  %v8665_v3 = vpop.xlane.xlu0 %2775  ;;  %v2444_v48 = vpop.f32.mrb[116].mxu1 }
 0x1da   :  { %11109 = vst [vmem:[#allocation225_spill] sm:$0xff] %v8649_v21  ;;  %v3588_v46 = vmul.f32 %v8627_v38, %v8627_v38  ;;  %2991 = vadd.xlane.f32.xlu0 %v2990_v6  ;;  %v2960_v54 = vadd.f32 %v8559_v19, %v8624_v0  ;;  %v3471_v26 = vmul.f32 %v8596_v12, %v8596_v12  ;;  %v2446_v60 = vpop.f32.mrb[117].mxu1 }
 0x1db   :  { %v3596_v25 = vmul.f32 %v8635_v44, %v8635_v44  ;;  %v3597_v39 = vmul.f32 %v8638_v1, %v8638_v1  ;;  %v8672_v23 = vadd.f32 %v2487_v22, %v6662_v15  ;;  %v3480_v28 = vmul.f32 %v8610_v52, %v8610_v52  ;;  %v2448_v52 = vpop.f32.mrb[118].mxu1 }
 0x1dc   :  { %v8677_v19 = vadd.f32 %v2434_v45, %v6876_v56  ;;  %v8680_v4 = vadd.f32 %v2436_v49, %v6876_v56  ;;  %2961 = vadd.xlane.f32.xlu1 %v2960_v54  ;;  %v2970_v6 = vadd.f32 %v2969_v14, %v8649_v21  ;;  %v3453_v12 = vmul.f32 %v8624_v0, %v8624_v0  ;;  %v2450_v0 = vpop.f32.mrb[119].mxu1 }
 0x1dd   :  { %11110 = vst [vmem:[#allocation226_spill] sm:$0xff] %v8672_v23  ;;  %v8687_v22 = vadd.f32 %v8627_v38, %v8621_v61  ;;  %v8690_v11 = vadd.f32 %v2491_v34, %v6700_v32  ;;  %v3462_v45 = vmul.f32 %v8649_v21, %v8649_v21  ;;  %v3537_v49 = vadd.f32 %v3536_v50, %v8503_v36  ;;  %v2497_v50 = vpop.f32.mrb[116].mxu0 }
 0x1de   :  { %11111 = vst [vmem:[#allocation227_spill] sm:$0xff] %v8677_v19  ;;  %11112 = vst [vmem:[#allocation228_spill] sm:$0xff] %v8680_v4  ;;  %v8695_v57 = vadd.f32 %v3588_v46, %v3587_v17  ;;  %v8698_v14 = vadd.f32 %v2438_v5, %v6886_v63  ;;  %v8701_v54 = vadd.f32 %v2440_v43, %v6886_v63  ;;  %2971 = vadd.xlane.f32.xlu0 %v2970_v6  ;;  %v8712_v5 = vpop.xlane.xlu1 %2755  ;;  %v2560_v59 = vpop.f32.mrb[120].mxu1 }
 0x1df   :  { %11113 = vst [vmem:[#allocation229_spill] sm:$0xff] %v8690_v11  ;;  %v3548_v9 = vadd.f32 %v3547_v42, %v3471_v26  ;;  %v8705_v34 = vadd.f32 %v8638_v1, %v8635_v44  ;;  %v3571_v21 = vmul.f32 %v8672_v23, %v8672_v23  ;;  %v8710_v36 = vadd.f32 %v2489_v20, %v6662_v15  ;;  %v2499_v26 = vpop.f32.mrb[117].mxu0  ;;  %v8720_v1 = vpop.xlane.xlu0 %3199 }
 0x1e0   :  { %11114 = vst [vmem:[#allocation230_spill] sm:$0xff] %v8698_v14  ;;  %11115 = vst [vmem:[#allocation231_spill] sm:$0xff] %v8701_v54  ;;  %v3558_v17 = vadd.f32 %v3557_v8, %v3480_v28  ;;  %v8714_v46 = vadd.f32 %v3597_v39, %v3596_v25  ;;  %v3605_v43 = vmul.f32 %v8677_v19, %v8677_v19  ;;  %v2501_v39 = vpop.f32.mrb[118].mxu0 }
 0x1e1   :  { %11116 = vst [vmem:[#allocation232_spill] sm:$0xff] %v8710_v36  ;;  %v3606_v42 = vmul.f32 %v8680_v4, %v8680_v4  ;;  %3549 = vadd.xlane.f32.xlu1 %v3548_v9  ;;  %v3528_v6 = vadd.f32 %v3527_v7, %v3453_v12  ;;  %v8724_v20 = vadd.f32 %v8680_v4, %v8677_v19  ;;  %v2503_v4 = vpop.f32.mrb[119].mxu0 }
 0x1e2   :  { %v3580_v8 = vmul.f32 %v8690_v11, %v8690_v11  ;;  %v8729_v25 = vadd.f32 %v2493_v35, %v6700_v32  ;;  %v3538_v28 = vadd.f32 %v3537_v49, %v3462_v45  ;;  %v3614_v44 = vmul.f32 %v8698_v14, %v8698_v14  ;;  %3559 = vadd.xlane.f32.xlu0 %v3558_v17 }
 0x1e3   :  { %v3615_v9 = vmul.f32 %v8701_v54, %v8701_v54  ;;  %v8736_v12 = vadd.f32 %v2444_v48, %v10936_v16  ;;  %v8739_v7 = vadd.f32 %v2446_v60, %v10936_v16  ;;  %v3002_v35 = vadd.f32 %v8632_v55, %v8672_v23 }
 0x1e4   :  { %11117 = vst [vmem:[#allocation233_spill] sm:$0xff] %v8729_v25  ;;  %v3642_v19 = vadd.f32 %v8642_v29, %v3571_v21  ;;  %v3572_v45 = vmul.f32 %v8710_v36, %v8710_v36  ;;  %v8747_v49 = vadd.f32 %v2497_v50, %v6702_v33  ;;  %v8749_v51 = vadd.f32 %v3606_v42, %v3605_v43  ;;  %v2562_v29 = vpop.f32.mrb[121].mxu1 }
 0x1e5   :  { %11118 = vst [vmem:[#allocation234_spill] sm:$0xff] %v8736_v12  ;;  %11119 = vst [vmem:[#allocation235_spill] sm:$0xff] %v8739_v7  ;;  %v8753_v48 = vadd.f32 %v8701_v54, %v8698_v14  ;;  %v3012_v60 = vadd.f32 %v8646_v58, %v8690_v11  ;;  %v8758_v55 = vadd.f32 %v2501_v39, %v6775_v62  ;;  %3529 = vadd.xlane.f32.xlu1 %v3528_v6  ;;  %v2564_v42 = vpop.f32.mrb[122].mxu1  ;;  %v8769_v54 = vpop.xlane.xlu1 %3169 }
 0x1e6   :  { %11120 = vst [vmem:[#allocation236_spill] sm:$0xff] %v8747_v49  ;;  %v3652_v21 = vadd.f32 %v8652_v24, %v3580_v8  ;;  %v3581_v50 = vmul.f32 %v8729_v25, %v8729_v25  ;;  %v8764_v17 = vadd.f32 %v2448_v52, %v6980_v18  ;;  %v8767_v43 = vadd.f32 %v2450_v0, %v6980_v18  ;;  %v2566_v8 = vpop.f32.mrb[123].mxu1  ;;  %v8780_v52 = vpop.xlane.xlu0 %3179 }
 0x1e7   :  { %11121 = vst [vmem:[#allocation237_spill] sm:$0xff] %v8758_v55  ;;  %v8771_v58 = vadd.f32 %v3615_v9, %v3614_v44  ;;  %v3623_v39 = vmul.f32 %v8736_v12, %v8736_v12  ;;  %v3624_v24 = vmul.f32 %v8739_v7, %v8739_v7  ;;  %v8778_v6 = vadd.f32 %v2499_v26, %v6702_v33  ;;  %v2507_v11 = vpop.f32.mrb[120].mxu0 }
 0x1e8   :  { %11122 = vst [vmem:[#allocation238_spill] sm:$0xff] %v8764_v17  ;;  %11123 = vst [vmem:[#allocation239_spill] sm:$0xff] %v8767_v43  ;;  %3539 = vadd.xlane.f32.xlu0 %v3538_v28  ;;  %v3003_v0 = vadd.f32 %v3002_v35, %v8710_v36  ;;  %v3643_v14 = vadd.f32 %v3642_v19, %v3572_v45  ;;  %v3589_v44 = vmul.f32 %v8747_v49, %v8747_v49  ;;  %v2509_v35 = vpop.f32.mrb[121].mxu0 }
 0x1e9   :  { %11124 = vst [vmem:[#allocation240_spill] sm:$0xff] %v8778_v6  ;;  %v8786_v9 = vadd.f32 %v2560_v59, %v6662_v15  ;;  %v3013_v47 = vadd.f32 %v3012_v60, %v8729_v25  ;;  %v3598_v26 = vmul.f32 %v8758_v55, %v8758_v55  ;;  %v8792_v37 = vadd.f32 %v2503_v4, %v6775_v62  ;;  %v2511_v25 = vpop.f32.mrb[122].mxu0 }
 0x1ea   :  { %v8795_v28 = vadd.f32 %v2564_v42, %v6700_v32  ;;  %v3653_v19 = vadd.f32 %v3652_v21, %v3581_v50  ;;  %v8799_v45 = vadd.f32 %v8739_v7, %v8736_v12  ;;  %v3632_v59 = vmul.f32 %v8764_v17, %v8764_v17  ;;  %v2513_v50 = vpop.f32.mrb[123].mxu0 }
 0x1eb   :  { %11125 = vst [vmem:[#allocation241_spill] sm:$0xff] %v8786_v9  ;;  %11126 = vst [vmem:[#allocation242_spill] sm:$0xff] %v8792_v37  ;;  %v3633_v60 = vmul.f32 %v8767_v43, %v8767_v43  ;;  %v8805_v36 = vadd.f32 %v3624_v24, %v3623_v39  ;;  %v3022_v4 = vadd.f32 %v8687_v22, %v8747_v49  ;;  %v2570_v24 = vpop.f32.mrb[124].mxu1  ;;  %v8822_v22 = vpop.xlane.xlu1 %2805 }
 0x1ec   :  { %11127 = vst [vmem:[#allocation243_spill] sm:$0xff] %v8795_v28  ;;  %v3590_v42 = vmul.f32 %v8778_v6, %v8778_v6  ;;  %v8812_v21 = vadd.f32 %v2507_v11, %v6876_v56  ;;  %v3662_v7 = vadd.f32 %v8695_v57, %v3589_v44  ;;  %v3032_v12 = vadd.f32 %v8705_v34, %v8758_v55  ;;  %v2572_v34 = vpop.f32.mrb[125].mxu1  ;;  %v8832_v55 = vpop.xlane.xlu0 %2815 }
 0x1ed   :  { %v3573_v23 = vmul.f32 %v8786_v9, %v8786_v9  ;;  %v8820_v39 = vadd.f32 %v2562_v29, %v6662_v15  ;;  %11130 = vst [vmem:[#allocation246_spill] sm:$0xff] %v8822_v22  ;;  %v3672_v53 = vadd.f32 %v8714_v46, %v3598_v26  ;;  %v3599_v11 = vmul.f32 %v8792_v37, %v8792_v37  ;;  %v2574_v2 = vpop.f32.mrb[126].mxu1 }
 0x1ee   :  { %11128 = vst [vmem:[#allocation244_spill] sm:$0xff] %v8812_v21  ;;  %v3582_v57 = vmul.f32 %v8795_v28, %v8795_v28  ;;  %v8830_v44 = vadd.f32 %v2566_v8, %v6700_v32  ;;  %v8836_v29 = vadd.f32 %v8767_v43, %v8764_v17  ;;  %v8838_v40 = vadd.f32 %v3633_v60, %v3632_v59  ;;  %v2576_v43 = vpop.f32.mrb[127].mxu1 }
 0x1ef   :  { %11129 = vst [vmem:[#allocation245_spill] sm:$0xff] %v8820_v39  ;;  %v3004_v46 = vadd.f32 %v3003_v0, %v8786_v9  ;;  %v3014_v26 = vadd.f32 %v3013_v47, %v8795_v28  ;;  %v3023_v49 = vadd.f32 %v3022_v4, %v8778_v6  ;;  %v3607_v8 = vmul.f32 %v8812_v21, %v8812_v21  ;;  %v2517_v0 = vpop.f32.mrb[124].mxu0 }
 0x1f0   :  { %11131 = vst [vmem:[#allocation247_spill] sm:$0xff] %v8830_v44  ;;  %v8846_v38 = vadd.f32 %v2509_v35, %v6876_v56  ;;  %v8849_v61 = vadd.f32 %v2511_v25, %v6886_v63  ;;  %v3663_v17 = vadd.f32 %v3662_v7, %v3590_v42  ;;  %v3033_v59 = vadd.f32 %v3032_v12, %v8792_v37  ;;  %v2519_v6 = vpop.f32.mrb[125].mxu0  ;;  %v8870_v7 = vpop.xlane.xlu1 %2785 }
 0x1f1   :  { %v3644_v60 = vadd.f32 %v3643_v14, %v3573_v23  ;;  %v3574_v47 = vmul.f32 %v8820_v39, %v8820_v39  ;;  %v3673_v28 = vadd.f32 %v3672_v53, %v3599_v11  ;;  %v3654_v4 = vadd.f32 %v3653_v19, %v3582_v57  ;;  %v2521_v53 = vpop.f32.mrb[126].mxu0  ;;  %v8880_v57 = vpop.xlane.xlu0 %2795 }
 0x1f2   :  { %11132 = vst [vmem:[#allocation248_spill] sm:$0xff] %v8846_v38  ;;  %11133 = vst [vmem:[#allocation249_spill] sm:$0xff] %v8849_v61  ;;  %v3583_v9 = vmul.f32 %v8830_v44, %v8830_v44  ;;  %v8857_v35 = vadd.f32 %v2570_v24, %v6702_v33  ;;  %v8860_v25 = vadd.f32 %v3004_v46, %v8820_v39 }
 0x1f3   :  { %v3042_v12 = vadd.f32 %v8724_v20, %v8812_v21  ;;  %v8865_v23 = vadd.f32 %v3014_v26, %v8830_v44  ;;  %v8868_v14 = vadd.f32 %v2513_v50, %v6886_v63  ;;  %v3682_v19 = vadd.f32 %v8749_v51, %v3607_v8  ;;  %v2523_v20 = vpop.f32.mrb[127].mxu0  ;;  %v2580_v8 = vpop.f32.mrb[128].mxu1 }
 0x1f4   :  { %11134 = vst [vmem:[#allocation250_spill] sm:$0xff] %v8857_v35  ;;  %v3608_v42 = vmul.f32 %v8846_v38, %v8846_v38  ;;  %v3616_v24 = vmul.f32 %v8849_v61, %v8849_v61  ;;  %v8878_v11 = vadd.f32 %v2574_v2, %v6775_v62  ;;  %v8882_v46 = vadd.f32 %v3644_v60, %v3574_v47  ;;  %v2582_v47 = vpop.f32.mrb[129].mxu1 }
 0x1f5   :  { %11135 = vst [vmem:[#allocation251_spill] sm:$0xff] %v8868_v14  ;;  %v3052_v50 = vadd.f32 %v8753_v48, %v8849_v61  ;;  %v8887_v26 = vadd.f32 %v2517_v0, %v10936_v16  ;;  %v8890_v51 = vadd.f32 %v2521_v53, %v6980_v18  ;;  %v8892_v21 = vadd.f32 %v3654_v4, %v3583_v9  ;;  %v2584_v4 = vpop.f32.mrb[130].mxu1 }
 0x1f6   :  { %11136 = vst [vmem:[#allocation252_spill] sm:$0xff] %v8878_v11  ;;  %v3591_v2 = vmul.f32 %v8857_v35, %v8857_v35  ;;  %v8897_v37 = vadd.f32 %v2572_v34, %v6702_v33  ;;  %v8900_v60 = vadd.f32 %v2580_v8, %v6876_v56  ;;  %v3043_v48 = vadd.f32 %v3042_v12, %v8846_v38  ;;  %v2586_v39 = vpop.f32.mrb[131].mxu1 }
 0x1f7   :  { %11137 = vst [vmem:[#allocation253_spill] sm:$0xff] %v8887_v26  ;;  %11138 = vst [vmem:[#allocation254_spill] sm:$0xff] %v8890_v51  ;;  %v3617_v0 = vmul.f32 %v8868_v14, %v8868_v14  ;;  %v3024_v53 = vadd.f32 %v3023_v49, %v8857_v35  ;;  %v8907_v9 = vadd.f32 %v2576_v43, %v6775_v62  ;;  %v8932_v35 = vpop.xlane.xlu0 %3239 }
 0x1f8   :  { %11139 = vst [vmem:[#allocation255_spill] sm:$0xff] %v8897_v37  ;;  %11140 = vst [vmem:[#allocation256_spill] sm:$0xff] %v8900_v60  ;;  %v3683_v61 = vadd.f32 %v3682_v19, %v3608_v42  ;;  %v3692_v44 = vadd.f32 %v8771_v58, %v3616_v24  ;;  %v3600_v34 = vmul.f32 %v8878_v11, %v8878_v11  ;;  %v2633_v19 = vpop.f32.mrb[128].mxu0  ;;  %v8923_v58 = vpop.xlane.xlu1 %3229 }
 0x1f9   :  { %11141 = vst [vmem:[#allocation257_spill] sm:$0xff] %v8907_v9  ;;  %v8913_v8 = vadd.f32 %v2519_v6, %v10936_v16  ;;  %v3053_v12 = vadd.f32 %v3052_v50, %v8868_v14  ;;  %v3625_v38 = vmul.f32 %v8887_v26, %v8887_v26  ;;  %v3634_v49 = vmul.f32 %v8890_v51, %v8890_v51  ;;  %v2635_v14 = vpop.f32.mrb[129].mxu0 }
 0x1fa   :  { %v8921_v43 = vadd.f32 %v2523_v20, %v6980_v18  ;;  %11144 = vst [vmem:[#allocation260_spill] sm:$0xff] %v8923_v58  ;;  %v3664_v42 = vadd.f32 %v3663_v17, %v3591_v2  ;;  %v3592_v6 = vmul.f32 %v8897_v37, %v8897_v37  ;;  %v3609_v24 = vmul.f32 %v8900_v60, %v8900_v60  ;;  %v2637_v2 = vpop.f32.mrb[130].mxu0 }
 0x1fb   :  { %11142 = vst [vmem:[#allocation258_spill] sm:$0xff] %v8913_v8  ;;  %v8930_v50 = vadd.f32 %v2582_v47, %v6876_v56  ;;  %v3025_v13 = vadd.f32 %v3024_v53, %v8897_v37  ;;  %v3034_v20 = vadd.f32 %v3033_v59, %v8878_v11  ;;  %v3601_v27 = vmul.f32 %v8907_v9, %v8907_v9  ;;  %v2639_v53 = vpop.f32.mrb[131].mxu0 }
 0x1fc   :  { %11143 = vst [vmem:[#allocation259_spill] sm:$0xff] %v8921_v43  ;;  %v8939_v17 = vadd.f32 %v2584_v4, %v6886_v63  ;;  %v3674_v30 = vadd.f32 %v3673_v28, %v3600_v34  ;;  %v3062_v58 = vadd.f32 %v8799_v45, %v8887_v26  ;;  %v3626_v47 = vmul.f32 %v8913_v8, %v8913_v8  ;;  %v2590_v28 = vpop.f32.mrb[132].mxu1 }
 0x1fd   :  { %11145 = vst [vmem:[#allocation261_spill] sm:$0xff] %v8930_v50  ;;  %v3072_v22 = vadd.f32 %v8836_v29, %v8890_v51  ;;  %v3702_v59 = vadd.f32 %v8805_v36, %v3625_v38  ;;  %v3712_v11 = vadd.f32 %v8838_v40, %v3634_v49  ;;  %v3635_v4 = vmul.f32 %v8921_v43, %v8921_v43  ;;  %v2592_v51 = vpop.f32.mrb[133].mxu1 }
 0x1fe   :  { %11146 = vst [vmem:[#allocation262_spill] sm:$0xff] %v8939_v17  ;;  %v3044_v37 = vadd.f32 %v3043_v48, %v8900_v60  ;;  %v3684_v34 = vadd.f32 %v3683_v61, %v3609_v24  ;;  %v3610_v45 = vmul.f32 %v8930_v50, %v8930_v50  ;;  %v8955_v26 = vadd.f32 %v2586_v39, %v6886_v63  ;;  %v8963_v48 = vpop.f32.mrb[134].mxu1  ;;  %v8965_v61 = vpop.xlane.xlu1 %3209 }
 0x1ff   :  { %v8958_v29 = vadd.f32 %v2633_v19, %v6662_v15  ;;  %v3693_v38 = vadd.f32 %v3692_v44, %v3617_v0  ;;  %v3665_v36 = vadd.f32 %v3664_v42, %v3592_v6  ;;  %v3054_v40 = vadd.f32 %v3053_v12, %v8939_v17  ;;  %v8974_v44 = vpop.f32.mrb[135].mxu1  ;;  %v8976_v0 = vpop.xlane.xlu0 %3219 }
 0x200   :  { %11147 = vst [vmem:[#allocation263_spill] sm:$0xff] %v8955_v26  ;;  %v3618_v49 = vmul.f32 %v8939_v17, %v8939_v17  ;;  %v3035_v24 = vadd.f32 %v3034_v20, %v8907_v9  ;;  %v8968_v60 = vadd.f32 %v3674_v30, %v3601_v27  ;;  %v3063_v39 = vadd.f32 %v3062_v58, %v8913_v8  ;;  %v2643_v30 = vpop.f32.mrb[132].mxu0 }
 0x201   :  { %11148 = vst [vmem:[#allocation264_spill] sm:$0xff] %v8958_v29  ;;  %v8972_v19 = vadd.f32 %v2635_v14, %v6662_v15  ;;  %v8978_v12 = vadd.f32 %v3702_v59, %v3626_v47  ;;  %v8981_v42 = vadd.f32 %v3072_v22, %v8921_v43  ;;  %v8983_v6 = vadd.f32 %v3712_v11, %v3635_v4  ;;  %v2645_v59 = vpop.f32.mrb[133].mxu0 }
 0x202   :  { %v8986_v20 = vadd.f32 %v2637_v2, %v6700_v32  ;;  %v8989_v27 = vadd.f32 %v3044_v37, %v8930_v50  ;;  %v8991_v14 = vadd.f32 %v3684_v34, %v3610_v45  ;;  %v3619_v58 = vmul.f32 %v8955_v26, %v8955_v26  ;;  %v2647_v37 = vpop.f32.mrb[134].mxu0 }
 0x203   :  { %11149 = vst [vmem:[#allocation265_spill] sm:$0xff] %v8972_v19  ;;  %v3006_v47 = vadd.f32 %v8860_v25, %v8958_v29  ;;  %v3694_v22 = vadd.f32 %v3693_v38, %v3618_v49  ;;  %v8998_v11 = vadd.f32 %v3054_v40, %v8955_v26  ;;  %v3575_v2 = vmul.f32 %v8958_v29, %v8958_v29  ;;  %v2649_v40 = vpop.f32.mrb[135].mxu0  ;;  %v2854_v49 = vpop.xlane.xlu1 %2853 }
 0x204   :  { %11150 = vst [vmem:[#allocation266_spill] sm:$0xff] %v8986_v20  ;;  %v9003_v4 = vadd.f32 %v2643_v30, %v6702_v33  ;;  %v9007_v34 = vmul.f32 %v8972_v19, %v8972_v19  ;;  %v9010_v45 = vadd.f32 %v2639_v53, %v6700_v32  ;;  %v9013_v25 = vadd.f32 %v2645_v59, %v6702_v33  ;;  %v5634_v53 = vpop.f32.mrb[136].mxu1  ;;  %v2864_v17 = vpop.xlane.xlu0 %2863 }
 0x205   :  { %v9016_v38 = vadd.f32 %v2647_v37, %v6775_v62  ;;  %v3016_v30 = vadd.f32 %v8865_v23, %v8986_v20  ;;  %v9024_v26 = vadd.f32 %v2649_v40, %v6775_v62  ;;  %v3584_v59 = vmul.f32 %v8986_v20, %v8986_v20 }
 0x206   :  { %11151 = vst [vmem:[#allocation267_spill] sm:$0xff] %v9003_v4  ;;  %11152 = vst [vmem:[#allocation268_spill] sm:$0xff] %v9010_v45  ;;  %v3026_v43 = vadd.f32 %v3025_v13, %v9003_v4  ;;  %v3593_v8 = vmul.f32 %v9003_v4, %v9003_v4  ;;  %v9029_v37 = vadd.f32 %v2590_v28, %v10936_v16  ;;  %v2706_v13 = vpop.f32.mrb[137].mxu1 }
 0x207   :  { %11153 = vst [vmem:[#allocation269_spill] sm:$0xff] %v9013_v25  ;;  %11154 = vst [vmem:[#allocation270_spill] sm:$0xff] %v9016_v38  ;;  %v3036_v50 = vadd.f32 %v3035_v24, %v9016_v38  ;;  %v9033_v23 = vadd.f32 %v2854_v49, %v8556_v31  ;;  %v9035_v9 = vadd.f32 %v3694_v22, %v3619_v58  ;;  %v5635_v4 = vpop.f32.mrb[138].mxu1 }
 0x208   :  { %11155 = vst [vmem:[#allocation271_spill] sm:$0xff] %v9024_v26  ;;  %11156 = vst [vmem:[#allocation272_spill] sm:$0xff] %v9029_v37  ;;  %v9038_v29 = vadd.f32 %v5634_v53, %v6702_v33  ;;  %v9041_v40 = vadd.f32 %v2864_v17, %v8665_v3  ;;  %v3007_v20 = vadd.f32 %v3006_v47, %v8972_v19  ;;  %v2709_v31 = vpop.f32.mrb[139].mxu1  ;;  %v2834_v49 = vpop.xlane.xlu1 %2833 }
 0x209   :  { %v9045_v28 = vadd.f32 %v2592_v51, %v10936_v16  ;;  %v9048_v24 = vadd.f32 %v5635_v4, %v6775_v62  ;;  %v3027_v58 = vadd.f32 %v3026_v43, %v9013_v25  ;;  %v3037_v22 = vadd.f32 %v3036_v50, %v9024_v26  ;;  %v2653_v17 = vpop.f32.mrb[136].mxu0  ;;  %v2844_v51 = vpop.xlane.xlu0 %2843 }
 0x20a   :  { %11157 = vst [vmem:[#allocation273_spill] sm:$0xff] %v9038_v29  ;;  %v3594_v33 = vmul.f32 %v9013_v25, %v9013_v25  ;;  %v9055_v3 = vadd.f32 %v2706_v13, %v6662_v15  ;;  %v9058_v47 = vadd.f32 %v2834_v49, %v8617_v10  ;;  %v3666_v53 = vadd.f32 %v3665_v36, %v3593_v8  ;;  %v2655_v4 = vpop.f32.mrb[137].mxu0 }
 0x20b   :  { %11158 = vst [vmem:[#allocation274_spill] sm:$0xff] %v9045_v28  ;;  %v9061_v62 = vadd.f32 %v2709_v31, %v6700_v32  ;;  %v3028_v43 = vadd.f32 %v3027_v58, %v9038_v29  ;;  %v9065_v50 = vadd.f32 %v2844_v51, %v8712_v5  ;;  %v3038_v19 = vadd.f32 %v3037_v22, %v9048_v24  ;;  %v2657_v8 = vpop.f32.mrb[138].mxu0 }
 0x20c   :  { %v3585_v15 = vmul.f32 %v9010_v45, %v9010_v45  ;;  %v3064_v13 = vadd.f32 %v3063_v39, %v9029_v37  ;;  %v3602_v10 = vmul.f32 %v9016_v38, %v9016_v38  ;;  %v3646_v32 = vadd.f32 %v8882_v46, %v3575_v2  ;;  %v2659_v31 = vpop.f32.mrb[139].mxu0  ;;  %v9080_v49 = vpop.xlane.xlu1 %3349 }
 0x20d   :  { %v3627_v36 = vmul.f32 %v9029_v37, %v9029_v37  ;;  %v9078_v5 = vadd.f32 %v8963_v48, %v6980_v18  ;;  %3029 = vadd.xlane.f32.xlu1 %v3028_v43  ;;  %3039 = vadd.xlane.f32.xlu0 %v3038_v19  ;;  %v3017_v39 = vadd.f32 %v3016_v30, %v9010_v45  ;;  %v9089_v2 = vpop.f32.mrb[140].mxu1  ;;  %v3360_v48 = vpop.xlane.xlu0 %3359 }
 0x20e   :  { %v9085_v58 = vmul.f32 %v9045_v28, %v9045_v28  ;;  %v3603_v46 = vmul.f32 %v9024_v26, %v9024_v26  ;;  %v3008_v22 = vadd.f32 %v3007_v20, %v9055_v3  ;;  %v3595_v51 = vmul.f32 %v9038_v29, %v9038_v29  ;;  %v2722_v19 = vpop.f32.mrb[141].mxu1 }
 0x20f   :  { %11159 = vst [vmem:[#allocation275_spill] sm:$0xff] %v9078_v5  ;;  %v9095_v43 = vadd.f32 %v2653_v17, %v6876_v56  ;;  %v9098_v30 = vadd.f32 %v3360_v48, %v8720_v1  ;;  %v3018_v37 = vadd.f32 %v3017_v39, %v9061_v62  ;;  %v3667_v38 = vadd.f32 %v3666_v53, %v3594_v33  ;;  %v9105_v45 = vpop.f32.mrb[142].mxu1 }
 0x210   :  { %v9103_v26 = vadd.f32 %v8974_v44, %v6980_v18  ;;  %v3604_v20 = vmul.f32 %v9048_v24, %v9048_v24  ;;  %v3676_v29 = vadd.f32 %v8968_v60, %v3602_v10  ;;  %v3656_v17 = vadd.f32 %v8892_v21, %v3584_v59  ;;  %v2725_v33 = vpop.f32.mrb[143].mxu1  ;;  %v9116_v53 = vpop.xlane.xlu1 %3329 }
 0x211   :  { %11160 = vst [vmem:[#allocation276_spill] sm:$0xff] %v9095_v43  ;;  %v9112_v25 = vadd.f32 %v8978_v12, %v3627_v36  ;;  %v3636_v1 = vmul.f32 %v9078_v5, %v9078_v5  ;;  %3009 = vadd.xlane.f32.xlu1 %v3008_v22  ;;  %3019 = vadd.xlane.f32.xlu0 %v3018_v37  ;;  %v2663_v12 = vpop.f32.mrb[140].mxu0  ;;  %v9125_v59 = vpop.xlane.xlu0 %3339 }
 0x212   :  { %11161 = vst [vmem:[#allocation277_spill] sm:$0xff] %v9103_v26  ;;  %v3647_v44 = vadd.f32 %v3646_v32, %v9007_v34  ;;  %v3065_v39 = vadd.f32 %v3064_v13, %v9045_v28  ;;  %v3074_v60 = vadd.f32 %v8981_v42, %v9078_v5  ;;  %v9123_v21 = vadd.f32 %v2657_v8, %v6886_v63  ;;  %v2665_v37 = vpop.f32.mrb[141].mxu0 }
 0x213   :  { %v3677_v10 = vadd.f32 %v3676_v29, %v3603_v46  ;;  %v3046_v36 = vadd.f32 %v8989_v27, %v9095_v43  ;;  %v9130_v22 = vadd.f32 %v2655_v4, %v6876_v56  ;;  %v3668_v34 = vadd.f32 %v3667_v38, %v3595_v51  ;;  %v2667_v8 = vpop.f32.mrb[142].mxu0 }
 0x214   :  { %11162 = vst [vmem:[#allocation278_spill] sm:$0xff] %v9123_v21  ;;  %v3577_v13 = vmul.f32 %v9055_v3, %v9055_v3  ;;  %v3637_v42 = vmul.f32 %v9103_v26, %v9103_v26  ;;  %v3586_v48 = vmul.f32 %v9061_v62, %v9061_v62  ;;  %v3657_v29 = vadd.f32 %v3656_v17, %v3585_v15  ;;  %v2669_v51 = vpop.f32.mrb[143].mxu0  ;;  %v2874_v5 = vpop.xlane.xlu1 %2873 }
 0x215   :  { %11163 = vst [vmem:[#allocation279_spill] sm:$0xff] %v9130_v22  ;;  %v3678_v32 = vadd.f32 %v3677_v10, %v3604_v20  ;;  %v3714_v46 = vadd.f32 %v8983_v6, %v3636_v1  ;;  %v3611_v27 = vmul.f32 %v9095_v43, %v9095_v43  ;;  %v9142_v4 = vadd.f32 %v2659_v31, %v6886_v63  ;;  %v2884_v31 = vpop.xlane.xlu0 %2883 }
 0x216   :  { %v9145_v38 = vadd.f32 %v2722_v19, %v6876_v56  ;;  %3669 = vadd.xlane.f32.xlu1 %v3668_v34  ;;  %v3075_v20 = vadd.f32 %v3074_v60, %v9103_v26  ;;  %v3056_v10 = vadd.f32 %v8998_v11, %v9123_v21  ;;  %v3620_v6 = vmul.f32 %v9123_v21, %v9123_v21 }
 0x217   :  { %11164 = vst [vmem:[#allocation280_spill] sm:$0xff] %v9142_v4  ;;  %v9153_v15 = vadd.f32 %v2874_v5, %v8870_v7  ;;  %3679 = vadd.xlane.f32.xlu0 %v3678_v32  ;;  %v9156_v17 = vadd.f32 %v2663_v12, %v10936_v16  ;;  %v3648_v56 = vadd.f32 %v3647_v44, %v3577_v13 }
 0x218   :  { %11165 = vst [vmem:[#allocation281_spill] sm:$0xff] %v9145_v38  ;;  %v9159_v19 = vadd.f32 %v2884_v31, %v8880_v57  ;;  %v3047_v1 = vadd.f32 %v3046_v36, %v9130_v22  ;;  %v3612_v11 = vmul.f32 %v9130_v22, %v9130_v22  ;;  %v9165_v60 = vadd.f32 %v2725_v33, %v6886_v63  ;;  %v3370_v57 = vpop.xlane.xlu1 %3369 }
 0x219   :  { %11166 = vst [vmem:[#allocation282_spill] sm:$0xff] %v9156_v17  ;;  %v9168_v7 = vadd.f32 %v2667_v8, %v6980_v18  ;;  %v3658_v5 = vadd.f32 %v3657_v29, %v3586_v48  ;;  %v3621_v12 = vmul.f32 %v9142_v4, %v9142_v4  ;;  %v9173_v44 = vadd.f32 %v2665_v37, %v10936_v16  ;;  %v3380_v63 = vpop.xlane.xlu0 %3379 }
 0x21a   :  { %11167 = vst [vmem:[#allocation283_spill] sm:$0xff] %v9165_v60  ;;  %3649 = vadd.xlane.f32.xlu1 %v3648_v56  ;;  %v3048_v36 = vadd.f32 %v3047_v1, %v9145_v38  ;;  %v3686_v34 = vadd.f32 %v8991_v14, %v3611_v27  ;;  %v9178_v13 = vadd.f32 %v3370_v57, %v8965_v61 }
 0x21b   :  { %11168 = vst [vmem:[#allocation284_spill] sm:$0xff] %v9168_v7  ;;  %11169 = vst [vmem:[#allocation285_spill] sm:$0xff] %v9173_v44  ;;  %3659 = vadd.xlane.f32.xlu0 %v3658_v5  ;;  %v3057_v33 = vadd.f32 %v3056_v10, %v9142_v4  ;;  %v3613_v8 = vmul.f32 %v9145_v38, %v9145_v38  ;;  %v3696_v32 = vadd.f32 %v9035_v9, %v3620_v6 }
 0x21c   :  { %v3066_v37 = vadd.f32 %v3065_v39, %v9156_v17  ;;  %v3629_v48 = vmul.f32 %v9156_v17, %v9156_v17  ;;  %v9188_v29 = vadd.f32 %v2669_v51, %v6980_v18  ;;  %v9191_v61 = vadd.f32 %v3380_v63, %v8976_v0 }
 0x21d   :  { %v3076_v14 = vadd.f32 %v3075_v20, %v9168_v7  ;;  %v3638_v27 = vmul.f32 %v9168_v7, %v9168_v7  ;;  %v3058_v10 = vadd.f32 %v3057_v33, %v9165_v60  ;;  %v3622_v9 = vmul.f32 %v9165_v60, %v9165_v60  ;;  %v2904_v31 = vpop.xlane.xlu0 %2903 }
 0x21e   :  { %11170 = vst [vmem:[#allocation286_spill] sm:$0xff] %v9188_v29  ;;  %v3705_v39 = vadd.f32 %v9112_v25, %v9085_v58  ;;  %3049 = vadd.xlane.f32.xlu1 %v3048_v36  ;;  %v3687_v6 = vadd.f32 %v3686_v34, %v3612_v11  ;;  %v3715_v51 = vadd.f32 %v3714_v46, %v3637_v42 }
 0x21f   :  { %v3630_v0 = vmul.f32 %v9173_v44, %v9173_v44  ;;  %3059 = vadd.xlane.f32.xlu0 %v3058_v10  ;;  %v3697_v20 = vadd.f32 %v3696_v32, %v3621_v12  ;;  %v9204_v1 = vadd.f32 %v2904_v31, %v8832_v55  ;;  %v3067_v5 = vadd.f32 %v3066_v37, %v9173_v44  ;;  %v9227_v32 = vpop.xlane.xlu1 %2893 }
 0x220   :  { %v3688_v56 = vadd.f32 %v3687_v6, %v3613_v8  ;;  %v3706_v57 = vadd.f32 %v3705_v39, %v3629_v48  ;;  %v3639_v63 = vmul.f32 %v9188_v29, %v9188_v29  ;;  %v3077_v58 = vadd.f32 %v3076_v14, %v9188_v29 }
 0x221   :  { %v3698_v25 = vadd.f32 %v3697_v20, %v3622_v9  ;;  %v3716_v42 = vadd.f32 %v3715_v51, %v3638_v27  ;;  %v9212_v46 = vadd.f32 %v9089_v2, %v10936_v16  ;;  %v9216_v11 = vadd.f32 %v9105_v45, %v6980_v18  ;;  %v3400_v55 = vpop.xlane.xlu0 %3399 }
 0x222   :  { %3689 = vadd.xlane.f32.xlu1 %v3688_v56  ;;  %v9220_v36 = vadd.f32 %v3400_v55, %v8932_v35  ;;  %v3707_v34 = vadd.f32 %v3706_v57, %v3630_v0 }
 0x223   :  { %11171 = vst [vmem:[#allocation287_spill] sm:$0xff] %v9212_v46  ;;  %11172 = vst [vmem:[#allocation288_spill] sm:$0xff] %v9216_v11  ;;  %3699 = vadd.xlane.f32.xlu0 %v3698_v25  ;;  %v3068_v12 = vadd.f32 %v3067_v5, %v9212_v46  ;;  %v3078_v33 = vadd.f32 %v3077_v58, %v9216_v11  ;;  %v3717_v8 = vadd.f32 %v3716_v42, %v3639_v63  ;;  %v9229_v35 = vpop.xlane.xlu1 %3389 }
 0x224   :  { %v3631_v16 = vmul.f32 %v9212_v46, %v9212_v46  ;;  %v3640_v18 = vmul.f32 %v9216_v11, %v9216_v11 }
 0x226   :  { %3069 = vadd.xlane.f32.xlu1 %v3068_v12  ;;  %v3708_v45 = vadd.f32 %v3707_v34, %v3631_v16  ;;  %v3718_v2 = vadd.f32 %v3717_v8, %v3640_v18  ;;  %v3403_v16 = vadd.f32 %v9080_v49, %v8655_v41  ;;  %v3402_v41 = vadd.f32 %v9125_v59, %v8780_v52 }
 0x227   :  { %3079 = vadd.xlane.f32.xlu0 %v3078_v33 }
 0x22a   :  { %3709 = vadd.xlane.f32.xlu1 %v3708_v45 }
 0x22b   :  { %3719 = vadd.xlane.f32.xlu0 %v3718_v2 }
 0x253   :  { %v2942_v37 = vpop.xlane.xlu1 %2941 }
 0x254   :  { %v2995_v42 = vadd.f32 %v2942_v37, %v9033_v23 }
 0x255   :  { %v2952_v48 = vpop.xlane.xlu0 %2951 }
 0x256   :  { %v2996_v55 = vadd.f32 %v2952_v48, %v9041_v40  ;;  %v3401_v48 = vadd.f32 %v9116_v53, %v8769_v54 }
 0x258   :  { %v2922_v14 = vpop.xlane.xlu1 %2921 }
 0x259   :  { %v2993_v18 = vadd.f32 %v2922_v14, %v9058_v47 }
 0x25a   :  { %v2932_v27 = vpop.xlane.xlu0 %2931 }
 0x25b   :  { %v2994_v45 = vadd.f32 %v2932_v27, %v9065_v50 }
 0x25c   :  { %v3510_v10 = vpop.xlane.xlu1 %3509 }
 0x25d   :  { %v3563_v2 = vadd.f32 %v3510_v10, %v3403_v16 }
 0x25e   :  { %v3520_v9 = vpop.xlane.xlu0 %3519 }
 0x25f   :  { %v3564_v7 = vadd.f32 %v3520_v9, %v9098_v30 }
 0x260   :  { %v3490_v39 = vpop.xlane.xlu1 %3489 }
 0x261   :  { %v3561_v50 = vadd.f32 %v3490_v39, %v3401_v48 }
 0x263   :  { %v3500_v6 = vpop.xlane.xlu0 %3499 }
 0x264   :  { %v3562_v27 = vadd.f32 %v3500_v6, %v3402_v41 }
 0x265   :  { %v9231_v51 = vpop.xlane.xlu1 %2981 }
 0x267   :  { %v9233_v0 = vpop.xlane.xlu0 %2991 }
 0x269   :  { %v2962_v31 = vpop.xlane.xlu1 %2961 }
 0x26b   :  { %v2972_v20 = vpop.xlane.xlu0 %2971 }
 0x26c   :  { %v2998_v6 = vadd.f32 %v2972_v20, %v9159_v19 }
 0x26e   :  { %v9235_v56 = vpop.xlane.xlu1 %3549 }
 0x26f   :  { %v9237_v5 = vpop.xlane.xlu0 %3559 }
 0x272   :  { %v3530_v57 = vpop.xlane.xlu1 %3529 }
 0x275   :  { %v3540_v63 = vpop.xlane.xlu0 %3539 }
 0x276   :  { %v3566_v19 = vadd.f32 %v3540_v63, %v9191_v61  ;;  %v3000_v63 = vadd.f32 %v9233_v0, %v9204_v1  ;;  %v3772_v1 = vld [vmem:[%s10581_s3 + $0x10] sm:$0xff]  ;;  %v3568_v0 = vadd.f32 %v9237_v5, %v9220_v36 }
 0x29a   :  { %v3030_v25 = vpop.xlane.xlu1 %3029  ;;  %v3040_v58 = vpop.xlane.xlu0 %3039 }
 0x29b   :  { %v3083_v12 = vadd.f32 %v3030_v25, %v2995_v42  ;;  %v3084_v34 = vadd.f32 %v3040_v58, %v2996_v55 }
 0x29d   :  { %v9245_v11 = vmul.f32 0.00021701389, %v3083_v12  ;;  %v9248_v23 = vmul.f32 0.00021701389, %v3084_v34 }
 0x29e   :  { %v3010_v33 = vpop.xlane.xlu1 %3009  ;;  %v3020_v8 = vpop.xlane.xlu0 %3019 }
 0x29f   :  { %v3081_v29 = vadd.f32 %v3010_v33, %v2993_v18  ;;  %v3082_v40 = vadd.f32 %v3020_v8, %v2994_v45  ;;  %v3748_v49 = vmul.f32 %v9245_v11, %v9245_v11  ;;  %v3749_v10 = vmul.f32 %v9248_v23, %v9248_v23 }
 0x2a1   :  { %v9256_v14 = vmul.f32 0.00021701389, %v3081_v29  ;;  %v9260_v9 = vmul.f32 0.00021701389, %v3082_v40 }
 0x2a3   :  { %v3670_v37 = vpop.xlane.xlu1 %3669  ;;  %v3746_v29 = vmul.f32 %v9256_v14, %v9256_v14  ;;  %v3747_v33 = vmul.f32 %v9260_v9, %v9260_v9 }
 0x2a4   :  { %v3723_v25 = vadd.f32 %v3670_v37, %v3563_v2  ;;  %v3680_v58 = vpop.xlane.xlu0 %3679 }
 0x2a5   :  { %v3724_v47 = vadd.f32 %v3680_v58, %v3564_v7  ;;  %v2997_v7 = vadd.f32 %v2962_v31, %v9153_v15  ;;  %v3565_v31 = vadd.f32 %v3530_v57, %v9178_v13 }
 0x2a6   :  { %v3740_v30 = vmul.f32 0.00021701389, %v3723_v25 }
 0x2a7   :  { %v3741_v54 = vmul.f32 0.00021701389, %v3724_v47  ;;  %v3650_v53 = vpop.xlane.xlu1 %3649 }
 0x2a8   :  { %v3756_v42 = vsub.f32 %v3740_v30, %v3748_v49  ;;  %v3721_v55 = vadd.f32 %v3650_v53, %v3561_v50  ;;  %v3660_v12 = vpop.xlane.xlu0 %3659  ;;  %v11173_v49 = vld [vmem:[#allocation246_spill] sm:$0xff] }
 0x2a9   :  { %v3757_v52 = vsub.f32 %v3741_v54, %v3749_v10  ;;  %v3722_v59 = vadd.f32 %v3660_v12, %v3562_v27  ;;  %v2911_v30 = vadd.f32 %v9227_v32, %v11173_v49  ;;  %v3771_v49 = vld [vmem:[%s10581_s3 + $0x8] sm:$0xff] }
 0x2aa   :  { %v3764_v39 = vmax.f32 %v3756_v42, 0.0  ;;  %v3738_v34 = vmul.f32 0.00021701389, %v3721_v55 }
 0x2ab   :  { %v3765_v8 = vmax.f32 %v3757_v52, 0.0  ;;  %v3739_v16 = vmul.f32 0.00021701389, %v3722_v59  ;;  %v3050_v18 = vpop.xlane.xlu1 %3049  ;;  %v2999_v13 = vadd.f32 %v9231_v51, %v2911_v30  ;;  %v11174_v52 = vld [vmem:[#allocation260_spill] sm:$0xff] }
 0x2ac   :  { %v3780_v45 = vadd.f32 1e-05, %v3764_v39  ;;  %v3754_v2 = vsub.f32 %v3738_v34, %v3746_v29  ;;  %v3085_v40 = vadd.f32 %v3050_v18, %v2997_v7  ;;  %v3060_v37 = vpop.xlane.xlu0 %3059  ;;  %v3407_v59 = vadd.f32 %v9229_v35, %v11174_v52 }
 0x2ad   :  { %v3781_v48 = vadd.f32 1e-05, %v3765_v8  ;;  %v3755_v25 = vsub.f32 %v3739_v16, %v3747_v33  ;;  %v3086_v15 = vadd.f32 %v3060_v37, %v2998_v6 }
 0x2ae   :  { %5908 = vrsqrt.f32 %v3780_v45  ;;  %v3762_v58 = vmax.f32 %v3754_v2, 0.0  ;;  %v9269_v41 = vmul.f32 0.00021701389, %v3085_v40  ;;  %v3567_v6 = vadd.f32 %v9235_v56, %v3407_v59  ;;  %v3773_v45 = vld [vmem:[%s10581_s3 + $0x18] sm:$0xff] }
 0x2af   :  { %5910 = vrsqrt.f32 %v3781_v48  ;;  %v3763_v20 = vmax.f32 %v3755_v25, 0.0  ;;  %v9272_v47 = vmul.f32 0.00021701389, %v3086_v15  ;;  %v3690_v50 = vpop.xlane.xlu1 %3689 }
 0x2b0   :  { %v3778_v27 = vadd.f32 1e-05, %v3762_v58  ;;  %v3725_v10 = vadd.f32 %v3690_v50, %v3565_v31  ;;  %v3700_v54 = vpop.xlane.xlu0 %3699  ;;  %v3750_v57 = vmul.f32 %v9269_v41, %v9269_v41  ;;  %v3770_v58 = vld [vmem:[%s10581_s3] sm:$0xff] }
 0x2b1   :  { %v3779_v53 = vadd.f32 1e-05, %v3763_v20  ;;  %v3726_v42 = vadd.f32 %v3700_v54, %v3566_v19  ;;  %v3751_v55 = vmul.f32 %v9272_v47, %v9272_v47 }
 0x2b2   :  { %5912 = vrsqrt.f32 %v3778_v27  ;;  %v3742_v61 = vmul.f32 0.00021701389, %v3725_v10 }
 0x2b3   :  { %5914 = vrsqrt.f32 %v3779_v53  ;;  %v3743_v32 = vmul.f32 0.00021701389, %v3726_v42  ;;  %v3070_v12 = vpop.xlane.xlu1 %3069 }
 0x2b4   :  { %v3758_v7 = vsub.f32 %v3742_v61, %v3750_v57  ;;  %v3087_v29 = vadd.f32 %v3070_v12, %v2999_v13  ;;  %v3080_v51 = vpop.xlane.xlu0 %3079 }
 0x2b5   :  { %v3759_v39 = vsub.f32 %v3743_v32, %v3751_v55  ;;  %v3088_v34 = vadd.f32 %v3080_v51, %v3000_v63  ;;  %v3804_v55 = vld [vmem:[%s10582_s4 + $0x10] sm:$0xff] }
 0x2b6   :  { %v3766_v33 = vmax.f32 %v3758_v7, 0.0  ;;  %v9286_v8 = vmul.f32 0.00021701389, %v3087_v29  ;;  %v3805_v7 = vld [vmem:[%s10582_s4 + $0x18] sm:$0xff] }
 0x2b7   :  { %v3767_v16 = vmax.f32 %v3759_v39, 0.0  ;;  %v9293_v18 = vmul.f32 0.00021701389, %v3088_v34  ;;  %v3710_v35 = vpop.xlane.xlu1 %3709 }
 0x2b8   :  { %v5909_v2 = vpop.eup %5908  ;;  %v3782_v56 = vadd.f32 1e-05, %v3766_v33  ;;  %v3727_v40 = vadd.f32 %v3710_v35, %v3567_v6  ;;  %v3720_v37 = vpop.xlane.xlu0 %3719  ;;  %v3752_v36 = vmul.f32 %v9286_v8, %v9286_v8  ;;  %v3803_v33 = vld [vmem:[%s10582_s4 + $0x8] sm:$0xff] }
 0x2b9   :  { %v5911_v48 = vpop.eup %5910  ;;  %v3783_v25 = vadd.f32 1e-05, %v3767_v16  ;;  %v3728_v15 = vadd.f32 %v3720_v37, %v3568_v0  ;;  %v3796_v31 = vmul.f32 %v5909_v2, %v3772_v1  ;;  %v3753_v20 = vmul.f32 %v9293_v18, %v9293_v18  ;;  %v3806_v2 = vld [vmem:[%s10582_s4 + $0x20] sm:$0xff] }
 0x2ba   :  { %5916 = vrsqrt.f32 %v3782_v56  ;;  %v3744_v5 = vmul.f32 0.00021701389, %v3727_v40  ;;  %v3797_v19 = vmul.f32 %v5911_v48, %v3773_v45  ;;  %v3776_v45 = vld [vmem:[%s10581_s3 + $0x30] sm:$0xff]  ;;  %v3777_v56 = vld [vmem:[%s10581_s3 + $0x38] sm:$0xff] }
 0x2bb   :  { %5918 = vrsqrt.f32 %v3783_v25  ;;  %v3745_v50 = vmul.f32 0.00021701389, %v3728_v15  ;;  %3838 = vperm.xlu1 %5643, %v3796_v31   ;;  %v3812_v61 = vmul.f32 %v3796_v31, %v9245_v11  ;;  %v3774_v11 = vld [vmem:[%s10581_s3 + $0x20] sm:$0xff] }
 0x2bc   :  { %v5913_v30 = vpop.eup %5912  ;;  %v3760_v27 = vsub.f32 %v3744_v5, %v3752_v36  ;;  %v3813_v10 = vmul.f32 %v3797_v19, %v9248_v23  ;;  %v3808_v5 = vld [vmem:[%s10582_s4 + $0x30] sm:$0xff] }
 0x2bd   :  { %v5915_v54 = vpop.eup %5914  ;;  %v3761_v53 = vsub.f32 %v3745_v50, %v3753_v20  ;;  %v3794_v42 = vmul.f32 %v5913_v30, %v3770_v58  ;;  %v3820_v59 = vsub.f32 %v3804_v55, %v3812_v61  ;;  %v11175_v50 = vld [vmem:[#allocation6_spill] sm:$0xff] }
 0x2be   :  { %v3768_v13 = vmax.f32 %v3760_v27, 0.0  ;;  %v3795_v57 = vmul.f32 %v5915_v54, %v3771_v49  ;;  %v3821_v39 = vsub.f32 %v3805_v7, %v3813_v10  ;;  %v11177_v27 = vld [vmem:[#allocation14_spill] sm:$0xff]  ;;  %v11178_v54 = vld [vmem:[#allocation15_spill] sm:$0xff] }
 0x2bf   :  { %v3769_v63 = vmax.f32 %v3761_v53, 0.0  ;;  %3828 = vperm.xlu1 %5643, %v3794_v42   ;;  %v3810_v32 = vmul.f32 %v3794_v42, %v9256_v14  ;;  %v3802_v14 = vld [vmem:[%s10582_s4] sm:$0xff]  ;;  %v11179_v42 = vld [vmem:[#allocation39_spill] sm:$0xff] }
 0x2c0   :  { %v3784_v12 = vadd.f32 1e-05, %v3768_v13  ;;  %3833 = vperm.xlu0 %5642, %v3795_v57   ;;  %v3811_v52 = vmul.f32 %v3795_v57, %v9260_v9  ;;  %v3775_v9 = vld [vmem:[%s10581_s3 + $0x28] sm:$0xff]  ;;  %v11180_v57 = vld [vmem:[#allocation42_spill] sm:$0xff] }
 0x2c1   :  { %v3785_v23 = vadd.f32 1e-05, %v3769_v63  ;;  %v3818_v6 = vsub.f32 %v3802_v14, %v3810_v32  ;;  %v11181_v63 = vld [vmem:[#allocation47_spill] sm:$0xff]  ;;  %v11182_v32 = vld [vmem:[#allocation48_spill] sm:$0xff] }
 0x2c2   :  { %5920 = vrsqrt.f32 %v3784_v12  ;;  %v3819_v35 = vsub.f32 %v3803_v33, %v3811_v52  ;;  %v11183_v52 = vld [vmem:[#allocation62_spill] sm:$0xff] }
 0x2c3   :  { %5922 = vrsqrt.f32 %v3785_v23  ;;  %3843 = vperm.xlu1 %5643, %v3797_v19   ;;  %v3809_v19 = vld [vmem:[%s10582_s4 + $0x38] sm:$0xff]  ;;  %v11189_v33 = vld [vmem:[#allocation110_spill] sm:$0xff] }
 0x2c4   :  { %v5917_v29 = vpop.eup %5916  ;;  %3950 = vperm.xlu0 %5642, %v3820_v59   ;;  %v11184_v59 = vld [vmem:[#allocation78_spill] sm:$0xff] }
 0x2c5   :  { %v5919_v51 = vpop.eup %5918  ;;  %v3798_v34 = vmul.f32 %v5917_v29, %v3774_v11  ;;  %v11185_v11 = vld [vmem:[#allocation79_spill] sm:$0xff] }
 0x2c6   :  { %v3799_v1 = vmul.f32 %v5919_v51, %v3775_v9  ;;  %v11186_v9 = vld [vmem:[#allocation90_spill] sm:$0xff]  ;;  %v11187_v51 = vld [vmem:[#allocation96_spill] sm:$0xff] }
 0x2c7   :  { %3955 = vperm.xlu1 %5643, %v3821_v39   ;;  %v3814_v0 = vmul.f32 %v3798_v34, %v9269_v41 }
 0x2c8   :  { %3940 = vperm.xlu0 %5642, %v3818_v6   ;;  %v3815_v16 = vmul.f32 %v3799_v1, %v9272_v47  ;;  %v3807_v47 = vld [vmem:[%s10582_s4 + $0x28] sm:$0xff] }
 0x2c9   :  { %v3822_v48 = vsub.f32 %v3806_v2, %v3814_v0  ;;  %v11190_v0 = vld [vmem:[#allocation119_spill] sm:$0xff]  ;;  %v11192_v2 = vld [vmem:[#allocation125_spill] sm:$0xff] }
 0x2ca   :  { %v3823_v36 = vsub.f32 %v3807_v47, %v3815_v16  ;;  %v11195_v47 = vld [vmem:[#allocation158_spill] sm:$0xff] }
 0x2cb   :  { %3945 = vperm.xlu1 %5643, %v3819_v35   ;;  %v11191_v35 = vld [vmem:[#allocation120_spill] sm:$0xff] }
 0x2cc   :  { %v5921_v40 = vpop.eup %5920  ;;  %3848 = vperm.xlu0 %5642, %v3798_v34   ;;  %v11188_v34 = vld [vmem:[#allocation105_spill] sm:$0xff] }
 0x2cd   :  { %v5923_v41 = vpop.eup %5922  ;;  %v3800_v37 = vmul.f32 %v5921_v40, %v3776_v45  ;;  %v11193_v40 = vld [vmem:[#allocation151_spill] sm:$0xff] }
 0x2ce   :  { %v3801_v25 = vmul.f32 %v5923_v41, %v3777_v56 }
 0x2cf   :  { %3853 = vperm.xlu1 %5643, %v3799_v1   ;;  %v3816_v15 = vmul.f32 %v3800_v37, %v9286_v8 }
 0x2d0   :  { %3960 = vperm.xlu0 %5642, %v3822_v48   ;;  %v3817_v31 = vmul.f32 %v3801_v25, %v9293_v18  ;;  %v11176_v18 = vld [vmem:[#allocation7_spill] sm:$0xff] }
 0x2d1   :  { %v3824_v58 = vsub.f32 %v3808_v5, %v3816_v15  ;;  %v11196_v15 = vld [vmem:[#allocation159_spill] sm:$0xff] }
 0x2d2   :  { %v3825_v20 = vsub.f32 %v3809_v19, %v3817_v31 }
 0x2d3   :  { %3965 = vperm.xlu1 %5643, %v3823_v36   ;;  %v11197_v36 = vld [vmem:[#allocation184_spill] sm:$0xff] }
 0x2d4   :  { %3858 = vperm.xlu0 %5642, %v3800_v37   ;;  %v11194_v37 = vld [vmem:[#allocation152_spill] sm:$0xff] }
 0x2d7   :  { %3863 = vperm.xlu1 %5643, %v3801_v25  }
 0x2d8   :  { %3970 = vperm.xlu0 %5642, %v3824_v58   ;;  %v11198_v58 = vld [vmem:[#allocation188_spill] sm:$0xff] }
 0x2db   :  { %3975 = vperm.xlu1 %5643, %v3825_v20   ;;  %v11199_v20 = vld [vmem:[#allocation189_spill] sm:$0xff] }
 0x33a   :  { %v3839_v8 = vpop.permute.xlu1 %3838 }
 0x33b   :  { %v9353_v49 = vmul.f32 %v3839_v8, %v11175_v50  ;;  %v9356_v30 = vmul.f32 %v3839_v8, %v11176_v18  ;;  %v9359_v10 = vmul.f32 %v3839_v8, %v11177_v27  ;;  %v9362_v53 = vmul.f32 %v3839_v8, %v11178_v54  ;;  %v11200_v18 = vld [vmem:[#allocation190_spill] sm:$0xff]  ;;  %v11201_v54 = vld [vmem:[#allocation203_spill] sm:$0xff] }
 0x33c   :  { %v9365_v13 = vmul.f32 %v3839_v8, %v11179_v42  ;;  %v9368_v61 = vmul.f32 %v3839_v8, %v11180_v57  ;;  %v9371_v55 = vmul.f32 %v3839_v8, %v11181_v63  ;;  %v9374_v12 = vmul.f32 %v3839_v8, %v11182_v32  ;;  %v11202_v57 = vld [vmem:[#allocation220_spill] sm:$0xff] }
 0x33d   :  { %v9377_v23 = vmul.f32 %v3839_v8, %v11183_v52  ;;  %v9380_v7 = vmul.f32 %v3839_v8, %v11184_v59  ;;  %v9383_v14 = vmul.f32 %v3839_v8, %v11185_v11  ;;  %v9386_v29 = vmul.f32 %v3839_v8, %v11186_v9  ;;  %v11203_v52 = vld [vmem:[#allocation222_spill] sm:$0xff]  ;;  %v11204_v11 = vld [vmem:[#allocation236_spill] sm:$0xff] }
 0x33e   :  { %v9389_v39 = vmul.f32 %v3839_v8, %v11187_v51  ;;  %v9392_v6 = vmul.f32 %v3839_v8, %v11188_v34  ;;  %v9395_v1 = vmul.f32 %v3839_v8, %v11189_v33  ;;  %v9398_v16 = vmul.f32 %v3839_v8, %v11190_v0  ;;  %v3829_v32 = vpop.permute.xlu1 %3828  ;;  %v11205_v51 = vld [vmem:[#allocation240_spill] sm:$0xff]  ;;  %v11206_v33 = vld [vmem:[#allocation250_spill] sm:$0xff] }
 0x33f   :  { %v9401_v45 = vmul.f32 %v3839_v8, %v11191_v35  ;;  %v9404_v56 = vmul.f32 %v3839_v8, %v11192_v2  ;;  %v9407_v41 = vmul.f32 %v3839_v8, %v11193_v40  ;;  %v9410_v48 = vmul.f32 %v3839_v8, %v11194_v37  ;;  %v11207_v35 = vld [vmem:[#allocation255_spill] sm:$0xff] }
 0x340   :  { %v9413_v25 = vmul.f32 %v3839_v8, %v11195_v47  ;;  %v9416_v31 = vmul.f32 %v3839_v8, %v11196_v15  ;;  %v9419_v5 = vmul.f32 %v3839_v8, %v11197_v36  ;;  %v9422_v19 = vmul.f32 %v3839_v8, %v11198_v58  ;;  %v11208_v40 = vld [vmem:[#allocation267_spill] sm:$0xff]  ;;  %v11209_v47 = vld [vmem:[#allocation269_spill] sm:$0xff] }
 0x341   :  { %v9425_v50 = vmul.f32 %v3839_v8, %v11199_v20  ;;  %v9428_v27 = vmul.f32 %v3839_v8, %v11200_v18  ;;  %v9431_v42 = vmul.f32 %v3839_v8, %v11201_v54  ;;  %v9434_v63 = vmul.f32 %v3839_v8, %v11202_v57  ;;  %v11210_v36 = vld [vmem:[#allocation273_spill] sm:$0xff]  ;;  %v11211_v20 = vld [vmem:[#allocation2_spill] sm:$0xff]  ;;  %v11213_v54 = vld [vmem:[#allocation3_spill] sm:$0xff] }
 0x342   :  { %v9437_v59 = vmul.f32 %v3839_v8, %v11203_v52  ;;  %v9440_v9 = vmul.f32 %v3839_v8, %v11204_v11  ;;  %v9443_v34 = vmul.f32 %v3839_v8, %v11205_v51  ;;  %v9446_v0 = vmul.f32 %v3839_v8, %v11206_v33  ;;  %v11215_v52 = vld [vmem:[#allocation8_spill] sm:$0xff]  ;;  %v11217_v51 = vld [vmem:[#allocation9_spill] sm:$0xff] }
 0x343   :  { %v9449_v2 = vmul.f32 %v3839_v8, %v11207_v35  ;;  %v9452_v37 = vmul.f32 %v3839_v8, %v11208_v40  ;;  %v9455_v15 = vmul.f32 %v3839_v8, %v11209_v47  ;;  %v9458_v58 = vmul.f32 %v3839_v8, %v11210_v36  ;;  %v11219_v35 = vld [vmem:[#allocation32_spill] sm:$0xff]  ;;  %v11223_v8 = vld [vmem:[#allocation38_spill] sm:$0xff] }
 0x344   :  { %v9461_v18 = vmul.f32 %v3829_v32, %v11211_v20  ;;  %v9464_v57 = vmul.f32 %v3829_v32, %v11213_v54  ;;  %v9467_v11 = vmul.f32 %v3829_v32, %v11215_v52  ;;  %v9470_v33 = vmul.f32 %v3829_v32, %v11217_v51  ;;  %v11221_v47 = vld [vmem:[#allocation36_spill] sm:$0xff]  ;;  %v11227_v54 = vld [vmem:[#allocation65_spill] sm:$0xff]  ;;  %v11231_v51 = vld [vmem:[#allocation74_spill] sm:$0xff] }
 0x345   :  { %v9473_v40 = vmul.f32 %v3829_v32, %v11219_v35  ;;  %v9476_v26 = vmul.f32 %v3829_v32, %v11221_v47  ;;  %v9479_v36 = vmul.f32 %v3829_v32, %v11223_v8  ;;  %v11225_v20 = vld [vmem:[#allocation40_spill] sm:$0xff]  ;;  %v9485_v44 = vmul.f32 %v3829_v32, %v11227_v54  ;;  %v11233_v35 = vld [vmem:[#allocation85_spill] sm:$0xff]  ;;  %v11241_v54 = vld [vmem:[#allocation118_spill] sm:$0xff] }
 0x346   :  { %11212 = vst [vmem:[#allocation246_spill] sm:$0xff] %v9461_v18  ;;  %11214 = vst [vmem:[#allocation260_spill] sm:$0xff] %v9464_v57  ;;  %v9482_v46 = vmul.f32 %v3829_v32, %v11225_v20  ;;  %v11229_v52 = vld [vmem:[#allocation44_spill] sm:$0xff]  ;;  %v9491_v28 = vmul.f32 %v3829_v32, %v11231_v51  ;;  %v9494_v60 = vmul.f32 %v3829_v32, %v11233_v35  ;;  %v11235_v47 = vld [vmem:[#allocation89_spill] sm:$0xff] }
 0x347   :  { %11216 = vst [vmem:[#allocation6_spill] sm:$0xff] %v9467_v11  ;;  %11218 = vst [vmem:[#allocation7_spill] sm:$0xff] %v9470_v33  ;;  %v9488_v17 = vmul.f32 %v3829_v32, %v11229_v52  ;;  %v9497_v4 = vmul.f32 %v3829_v32, %v11235_v47  ;;  %v11237_v8 = vld [vmem:[#allocation97_spill] sm:$0xff]  ;;  %v9506_v22 = vmul.f32 %v3829_v32, %v11241_v54  ;;  %v11247_v35 = vld [vmem:[#allocation146_spill] sm:$0xff] }
 0x348   :  { %11220 = vst [vmem:[#allocation14_spill] sm:$0xff] %v9473_v40  ;;  %11222 = vst [vmem:[#allocation15_spill] sm:$0xff] %v9476_v26  ;;  %v9500_v21 = vmul.f32 %v3829_v32, %v11237_v8  ;;  %v11239_v20 = vld [vmem:[#allocation101_spill] sm:$0xff]  ;;  %v11249_v47 = vld [vmem:[#allocation147_spill] sm:$0xff] }
 0x349   :  { %11224 = vst [vmem:[#allocation39_spill] sm:$0xff] %v9479_v36  ;;  %11226 = vst [vmem:[#allocation42_spill] sm:$0xff] %v9482_v46  ;;  %v9503_v38 = vmul.f32 %v3829_v32, %v11239_v20  ;;  %v11243_v52 = vld [vmem:[#allocation121_spill] sm:$0xff]  ;;  %v11251_v8 = vld [vmem:[#allocation150_spill] sm:$0xff] }
 0x34a   :  { %11228 = vst [vmem:[#allocation47_spill] sm:$0xff] %v9485_v44  ;;  %11230 = vst [vmem:[#allocation48_spill] sm:$0xff] %v9488_v17  ;;  %v9509_v43 = vmul.f32 %v3829_v32, %v11243_v52  ;;  %v11245_v51 = vld [vmem:[#allocation129_spill] sm:$0xff]  ;;  %v11253_v20 = vld [vmem:[#allocation154_spill] sm:$0xff] }
 0x34b   :  { %11232 = vst [vmem:[#allocation62_spill] sm:$0xff] %v9491_v28  ;;  %11234 = vst [vmem:[#allocation78_spill] sm:$0xff] %v9494_v60  ;;  %v9512_v28 = vmul.f32 %v3829_v32, %v11245_v51  ;;  %v9515_v60 = vmul.f32 %v3829_v32, %v11247_v35  ;;  %v11255_v54 = vld [vmem:[#allocation175_spill] sm:$0xff]  ;;  %v11257_v52 = vld [vmem:[#allocation178_spill] sm:$0xff] }
 0x34c   :  { %11236 = vst [vmem:[#allocation79_spill] sm:$0xff] %v9497_v4  ;;  %11238 = vst [vmem:[#allocation90_spill] sm:$0xff] %v9500_v21  ;;  %v9518_v4 = vmul.f32 %v3829_v32, %v11249_v47  ;;  %v9521_v21 = vmul.f32 %v3829_v32, %v11251_v8  ;;  %v11259_v51 = vld [vmem:[#allocation181_spill] sm:$0xff]  ;;  %v11261_v35 = vld [vmem:[#allocation182_spill] sm:$0xff] }
 0x34d   :  { %11240 = vst [vmem:[#allocation96_spill] sm:$0xff] %v9503_v38  ;;  %11242 = vst [vmem:[#allocation105_spill] sm:$0xff] %v9506_v22  ;;  %v9524_v38 = vmul.f32 %v3829_v32, %v11253_v20  ;;  %v9527_v22 = vmul.f32 %v3829_v32, %v11255_v54  ;;  %v11263_v47 = vld [vmem:[#allocation205_spill] sm:$0xff]  ;;  %v11265_v8 = vld [vmem:[#allocation214_spill] sm:$0xff]  ;;  %v3834_v20 = vpop.permute.xlu0 %3833 }
 0x34e   :  { %11244 = vst [vmem:[#allocation110_spill] sm:$0xff] %v9509_v43  ;;  %11246 = vst [vmem:[#allocation119_spill] sm:$0xff] %v9512_v28  ;;  %v9530_v43 = vmul.f32 %v3829_v32, %v11257_v52  ;;  %v9533_v28 = vmul.f32 %v3829_v32, %v11259_v51  ;;  %v11269_v54 = vld [vmem:[#allocation226_spill] sm:$0xff]  ;;  %v11271_v52 = vld [vmem:[#allocation232_spill] sm:$0xff] }
 0x34f   :  { %11248 = vst [vmem:[#allocation120_spill] sm:$0xff] %v9515_v60  ;;  %11250 = vst [vmem:[#allocation125_spill] sm:$0xff] %v9518_v4  ;;  %v9536_v60 = vmul.f32 %v3829_v32, %v11261_v35  ;;  %v9539_v4 = vmul.f32 %v3829_v32, %v11263_v47  ;;  %v11273_v51 = vld [vmem:[#allocation241_spill] sm:$0xff]  ;;  %v11277_v47 = vld [vmem:[#allocation264_spill] sm:$0xff] }
 0x350   :  { %11252 = vst [vmem:[#allocation151_spill] sm:$0xff] %v9521_v21  ;;  %11254 = vst [vmem:[#allocation152_spill] sm:$0xff] %v9524_v38  ;;  %v9542_v21 = vmul.f32 %v3829_v32, %v11265_v8  ;;  %v11267_v38 = vld [vmem:[#allocation215_spill] sm:$0xff]  ;;  %v11275_v35 = vld [vmem:[#allocation245_spill] sm:$0xff] }
 0x351   :  { %11256 = vst [vmem:[#allocation158_spill] sm:$0xff] %v9527_v22  ;;  %11258 = vst [vmem:[#allocation159_spill] sm:$0xff] %v9530_v43  ;;  %v9545_v17 = vmul.f32 %v3829_v32, %v11267_v38  ;;  %v9548_v22 = vmul.f32 %v3829_v32, %v11269_v54  ;;  %v9551_v43 = vmul.f32 %v3829_v32, %v11271_v52  ;;  %v11279_v8 = vld [vmem:[#allocation265_spill] sm:$0xff]  ;;  %v11282_v54 = vld [vmem:[#allocation4_spill] sm:$0xff] }
 0x352   :  { %11260 = vst [vmem:[#allocation184_spill] sm:$0xff] %v9533_v28  ;;  %11262 = vst [vmem:[#allocation188_spill] sm:$0xff] %v9536_v60  ;;  %v9554_v28 = vmul.f32 %v3829_v32, %v11273_v51  ;;  %v9557_v60 = vmul.f32 %v3829_v32, %v11275_v35  ;;  %v9566_v38 = vmul.f32 %v3829_v32, %v9055_v3  ;;  %v11284_v52 = vld [vmem:[#allocation5_spill] sm:$0xff]  ;;  %v11286_v51 = vld [vmem:[#allocation10_spill] sm:$0xff] }
 0x353   :  { %11264 = vst [vmem:[#allocation189_spill] sm:$0xff] %v9539_v4  ;;  %11266 = vst [vmem:[#allocation190_spill] sm:$0xff] %v9542_v21  ;;  %v9560_v4 = vmul.f32 %v3829_v32, %v11277_v47  ;;  %v9563_v21 = vmul.f32 %v3829_v32, %v11279_v8  ;;  %v11288_v35 = vld [vmem:[#allocation13_spill] sm:$0xff]  ;;  %v11294_v3 = vld [vmem:[#allocation43_spill] sm:$0xff] }
 0x354   :  { %11268 = vst [vmem:[#allocation203_spill] sm:$0xff] %v9545_v17  ;;  %11270 = vst [vmem:[#allocation220_spill] sm:$0xff] %v9548_v22  ;;  %v9569_v22 = vmul.f32 %v3834_v20, %v11282_v54  ;;  %v11290_v47 = vld [vmem:[#allocation37_spill] sm:$0xff]  ;;  %v9587_v32 = vmul.f32 %v3834_v20, %v11294_v3  ;;  %v11296_v54 = vld [vmem:[#allocation46_spill] sm:$0xff] }
 0x355   :  { %11272 = vst [vmem:[#allocation222_spill] sm:$0xff] %v9551_v43  ;;  %11274 = vst [vmem:[#allocation236_spill] sm:$0xff] %v9554_v28  ;;  %v9572_v43 = vmul.f32 %v3834_v20, %v11284_v52  ;;  %v9575_v28 = vmul.f32 %v3834_v20, %v11286_v51  ;;  %v11292_v8 = vld [vmem:[#allocation41_spill] sm:$0xff]  ;;  %v11298_v52 = vld [vmem:[#allocation70_spill] sm:$0xff] }
 0x356   :  { %11276 = vst [vmem:[#allocation240_spill] sm:$0xff] %v9557_v60  ;;  %11278 = vst [vmem:[#allocation250_spill] sm:$0xff] %v9560_v4  ;;  %v9578_v60 = vmul.f32 %v3834_v20, %v11288_v35  ;;  %v9581_v4 = vmul.f32 %v3834_v20, %v11290_v47  ;;  %v11300_v51 = vld [vmem:[#allocation75_spill] sm:$0xff]  ;;  %v11302_v35 = vld [vmem:[#allocation76_spill] sm:$0xff] }
 0x357   :  { %11280 = vst [vmem:[#allocation255_spill] sm:$0xff] %v9563_v21  ;;  %11281 = vst [vmem:[#allocation267_spill] sm:$0xff] %v9566_v38  ;;  %v9584_v21 = vmul.f32 %v3834_v20, %v11292_v8  ;;  %v11304_v47 = vld [vmem:[#allocation88_spill] sm:$0xff]  ;;  %v11306_v8 = vld [vmem:[#allocation63_spill] sm:$0xff] }
 0x358   :  { %11283 = vst [vmem:[#allocation269_spill] sm:$0xff] %v9569_v22  ;;  %11285 = vst [vmem:[#allocation273_spill] sm:$0xff] %v9572_v43  ;;  %v9590_v22 = vmul.f32 %v3834_v20, %v11296_v54  ;;  %v9593_v43 = vmul.f32 %v3834_v20, %v11298_v52  ;;  %v11308_v3 = vld [vmem:[#allocation98_spill] sm:$0xff] }
 0x359   :  { %11287 = vst [vmem:[#allocation2_spill] sm:$0xff] %v9575_v28  ;;  %11289 = vst [vmem:[#allocation3_spill] sm:$0xff] %v9578_v60  ;;  %v9596_v28 = vmul.f32 %v3834_v20, %v11300_v51  ;;  %v9599_v60 = vmul.f32 %v3834_v20, %v11302_v35  ;;  %v11310_v54 = vld [vmem:[#allocation102_spill] sm:$0xff] }
 0x35a   :  { %11291 = vst [vmem:[#allocation8_spill] sm:$0xff] %v9581_v4  ;;  %11293 = vst [vmem:[#allocation9_spill] sm:$0xff] %v9584_v21  ;;  %v9602_v4 = vmul.f32 %v3834_v20, %v11304_v47  ;;  %v9605_v21 = vmul.f32 %v3834_v20, %v11306_v8  ;;  %v11312_v52 = vld [vmem:[#allocation122_spill] sm:$0xff]  ;;  %v11318_v47 = vld [vmem:[#allocation148_spill] sm:$0xff] }
 0x35b   :  { %11295 = vst [vmem:[#allocation32_spill] sm:$0xff] %v9587_v32  ;;  %11297 = vst [vmem:[#allocation36_spill] sm:$0xff] %v9590_v22  ;;  %v9608_v32 = vmul.f32 %v3834_v20, %v11308_v3  ;;  %v9611_v22 = vmul.f32 %v3834_v20, %v11310_v54  ;;  %v11314_v51 = vld [vmem:[#allocation126_spill] sm:$0xff]  ;;  %v11320_v8 = vld [vmem:[#allocation149_spill] sm:$0xff] }
 0x35c   :  { %11299 = vst [vmem:[#allocation38_spill] sm:$0xff] %v9593_v43  ;;  %11301 = vst [vmem:[#allocation40_spill] sm:$0xff] %v9596_v28  ;;  %v9614_v43 = vmul.f32 %v3834_v20, %v11312_v52  ;;  %v9617_v28 = vmul.f32 %v3834_v20, %v11314_v51  ;;  %v11316_v35 = vld [vmem:[#allocation130_spill] sm:$0xff]  ;;  %v11322_v3 = vld [vmem:[#allocation153_spill] sm:$0xff] }
 0x35d   :  { %11303 = vst [vmem:[#allocation65_spill] sm:$0xff] %v9599_v60  ;;  %11305 = vst [vmem:[#allocation44_spill] sm:$0xff] %v9602_v4  ;;  %v9620_v60 = vmul.f32 %v3834_v20, %v11316_v35  ;;  %v9623_v4 = vmul.f32 %v3834_v20, %v11318_v47  ;;  %v11324_v54 = vld [vmem:[#allocation155_spill] sm:$0xff]  ;;  %v11330_v35 = vld [vmem:[#allocation185_spill] sm:$0xff] }
 0x35e   :  { %11307 = vst [vmem:[#allocation74_spill] sm:$0xff] %v9605_v21  ;;  %11309 = vst [vmem:[#allocation85_spill] sm:$0xff] %v9608_v32  ;;  %v9626_v21 = vmul.f32 %v3834_v20, %v11320_v8  ;;  %v9629_v32 = vmul.f32 %v3834_v20, %v11322_v3  ;;  %v11326_v52 = vld [vmem:[#allocation179_spill] sm:$0xff]  ;;  %v11334_v8 = vld [vmem:[#allocation208_spill] sm:$0xff] }
 0x35f   :  { %11311 = vst [vmem:[#allocation89_spill] sm:$0xff] %v9611_v22  ;;  %11313 = vst [vmem:[#allocation97_spill] sm:$0xff] %v9614_v43  ;;  %v9632_v22 = vmul.f32 %v3834_v20, %v11324_v54  ;;  %v9635_v43 = vmul.f32 %v3834_v20, %v11326_v52  ;;  %v11328_v51 = vld [vmem:[#allocation183_spill] sm:$0xff]  ;;  %v11336_v3 = vld [vmem:[#allocation216_spill] sm:$0xff]  ;;  %v3844_v54 = vpop.permute.xlu1 %3843 }
 0x360   :  { %11315 = vst [vmem:[#allocation101_spill] sm:$0xff] %v9617_v28  ;;  %11317 = vst [vmem:[#allocation118_spill] sm:$0xff] %v9620_v60  ;;  %v9638_v28 = vmul.f32 %v3834_v20, %v11328_v51  ;;  %v9641_v60 = vmul.f32 %v3834_v20, %v11330_v35  ;;  %v11332_v47 = vld [vmem:[#allocation187_spill] sm:$0xff]  ;;  %v11340_v52 = vld [vmem:[#allocation229_spill] sm:$0xff] }
 0x361   :  { %11319 = vst [vmem:[#allocation121_spill] sm:$0xff] %v9623_v4  ;;  %11321 = vst [vmem:[#allocation129_spill] sm:$0xff] %v9626_v21  ;;  %v9644_v4 = vmul.f32 %v3834_v20, %v11332_v47  ;;  %v9647_v21 = vmul.f32 %v3834_v20, %v11334_v8  ;;  %v11342_v51 = vld [vmem:[#allocation233_spill] sm:$0xff]  ;;  %v11344_v35 = vld [vmem:[#allocation243_spill] sm:$0xff] }
 0x362   :  { %11323 = vst [vmem:[#allocation146_spill] sm:$0xff] %v9629_v32  ;;  %11325 = vst [vmem:[#allocation147_spill] sm:$0xff] %v9632_v22  ;;  %v9650_v32 = vmul.f32 %v3834_v20, %v11336_v3  ;;  %v11338_v22 = vld [vmem:[#allocation217_spill] sm:$0xff]  ;;  %v11346_v47 = vld [vmem:[#allocation247_spill] sm:$0xff] }
 0x363   :  { %11327 = vst [vmem:[#allocation150_spill] sm:$0xff] %v9635_v43  ;;  %11329 = vst [vmem:[#allocation154_spill] sm:$0xff] %v9638_v28  ;;  %v9653_v38 = vmul.f32 %v3834_v20, %v11338_v22  ;;  %v9656_v43 = vmul.f32 %v3834_v20, %v11340_v52  ;;  %v9659_v28 = vmul.f32 %v3834_v20, %v11342_v51  ;;  %v11348_v8 = vld [vmem:[#allocation266_spill] sm:$0xff]  ;;  %v11350_v3 = vld [vmem:[#allocation268_spill] sm:$0xff] }
 0x364   :  { %11331 = vst [vmem:[#allocation175_spill] sm:$0xff] %v9641_v60  ;;  %11333 = vst [vmem:[#allocation178_spill] sm:$0xff] %v9644_v4  ;;  %v9662_v60 = vmul.f32 %v3834_v20, %v11344_v35  ;;  %v9665_v4 = vmul.f32 %v3834_v20, %v11346_v47  ;;  %v9674_v22 = vmul.f32 %v3834_v20, %v9061_v62  ;;  %v11353_v52 = vld [vmem:[#allocation11_spill] sm:$0xff]  ;;  %v11354_v51 = vld [vmem:[#allocation12_spill] sm:$0xff] }
 0x365   :  { %11335 = vst [vmem:[#allocation181_spill] sm:$0xff] %v9647_v21  ;;  %11337 = vst [vmem:[#allocation182_spill] sm:$0xff] %v9650_v32  ;;  %v9668_v21 = vmul.f32 %v3834_v20, %v11348_v8  ;;  %v9671_v32 = vmul.f32 %v3834_v20, %v11350_v3  ;;  %v11355_v35 = vld [vmem:[#allocation18_spill] sm:$0xff]  ;;  %v11356_v47 = vld [vmem:[#allocation19_spill] sm:$0xff] }
 0x366   :  { %11339 = vst [vmem:[#allocation205_spill] sm:$0xff] %v9653_v38  ;;  %11341 = vst [vmem:[#allocation214_spill] sm:$0xff] %v9656_v43  ;;  %v9677_v43 = vmul.f32 %v3844_v54, %v11353_v52  ;;  %v11357_v8 = vld [vmem:[#allocation45_spill] sm:$0xff]  ;;  %v11358_v3 = vld [vmem:[#allocation51_spill] sm:$0xff] }
 0x367   :  { %11343 = vst [vmem:[#allocation215_spill] sm:$0xff] %v9659_v28  ;;  %11345 = vst [vmem:[#allocation226_spill] sm:$0xff] %v9662_v60  ;;  %v9680_v28 = vmul.f32 %v3844_v54, %v11354_v51  ;;  %v9683_v60 = vmul.f32 %v3844_v54, %v11355_v35  ;;  %v11359_v62 = vld [vmem:[#allocation49_spill] sm:$0xff]  ;;  %v11360_v52 = vld [vmem:[#allocation52_spill] sm:$0xff] }
 0x368   :  { %11347 = vst [vmem:[#allocation232_spill] sm:$0xff] %v9665_v4  ;;  %11349 = vst [vmem:[#allocation241_spill] sm:$0xff] %v9668_v21  ;;  %v9686_v4 = vmul.f32 %v3844_v54, %v11356_v47  ;;  %v9689_v21 = vmul.f32 %v3844_v54, %v11357_v8  ;;  %v9695_v20 = vmul.f32 %v3844_v54, %v11359_v62  ;;  %v11361_v51 = vld [vmem:[#allocation71_spill] sm:$0xff]  ;;  %v11362_v35 = vld [vmem:[#allocation82_spill] sm:$0xff] }
 0x369   :  { %11351 = vst [vmem:[#allocation245_spill] sm:$0xff] %v9671_v32  ;;  %11352 = vst [vmem:[#allocation264_spill] sm:$0xff] %v9674_v22  ;;  %v9692_v32 = vmul.f32 %v3844_v54, %v11358_v3  ;;  %v9698_v22 = vmul.f32 %v3844_v54, %v11360_v52  ;;  %v9701_v38 = vmul.f32 %v3844_v54, %v11361_v51  ;;  %v11363_v47 = vld [vmem:[#allocation83_spill] sm:$0xff]  ;;  %v11368_v62 = vld [vmem:[#allocation106_spill] sm:$0xff] }
 0x36a   :  { %v9704_v17 = vmul.f32 %v3844_v54, %v11362_v35  ;;  %v9707_v44 = vmul.f32 %v3844_v54, %v11363_v47  ;;  %v11364_v8 = vld [vmem:[#allocation95_spill] sm:$0xff]  ;;  %v9716_v26 = vmul.f32 %v3844_v54, %v11368_v62  ;;  %v11374_v35 = vld [vmem:[#allocation124_spill] sm:$0xff] }
 0x36b   :  { %v9710_v46 = vmul.f32 %v3844_v54, %v11364_v8  ;;  %v11366_v3 = vld [vmem:[#allocation99_spill] sm:$0xff]  ;;  %v9725_v11 = vmul.f32 %v3844_v54, %v11374_v35  ;;  %v11376_v47 = vld [vmem:[#allocation128_spill] sm:$0xff] }
 0x36c   :  { %v9713_v36 = vmul.f32 %v3844_v54, %v11366_v3  ;;  %11369 = vst [vmem:[#allocation5_spill] sm:$0xff] %v9716_v26  ;;  %v11370_v52 = vld [vmem:[#allocation111_spill] sm:$0xff]  ;;  %v9728_v57 = vmul.f32 %v3844_v54, %v11376_v47  ;;  %v11378_v8 = vld [vmem:[#allocation156_spill] sm:$0xff]  ;;  %v11380_v3 = vld [vmem:[#allocation157_spill] sm:$0xff] }
 0x36d   :  { %11365 = vst [vmem:[#allocation265_spill] sm:$0xff] %v9710_v46  ;;  %v9719_v40 = vmul.f32 %v3844_v54, %v11370_v52  ;;  %v11372_v51 = vld [vmem:[#allocation123_spill] sm:$0xff]  ;;  %11375 = vst [vmem:[#allocation37_spill] sm:$0xff] %v9725_v11  ;;  %v9731_v18 = vmul.f32 %v3844_v54, %v11378_v8  ;;  %v11382_v62 = vld [vmem:[#allocation160_spill] sm:$0xff] }
 0x36e   :  { %11367 = vst [vmem:[#allocation4_spill] sm:$0xff] %v9713_v36  ;;  %v9722_v33 = vmul.f32 %v3844_v54, %v11372_v51  ;;  %11377 = vst [vmem:[#allocation41_spill] sm:$0xff] %v9728_v57  ;;  %v9734_v36 = vmul.f32 %v3844_v54, %v11380_v3  ;;  %v9737_v26 = vmul.f32 %v3844_v54, %v11382_v62  ;;  %v11384_v52 = vld [vmem:[#allocation161_spill] sm:$0xff]  ;;  %v11386_v51 = vld [vmem:[#allocation186_spill] sm:$0xff] }
 0x36f   :  { %11371 = vst [vmem:[#allocation10_spill] sm:$0xff] %v9719_v40  ;;  %11379 = vst [vmem:[#allocation43_spill] sm:$0xff] %v9731_v18  ;;  %v9740_v40 = vmul.f32 %v3844_v54, %v11384_v52  ;;  %v11388_v35 = vld [vmem:[#allocation192_spill] sm:$0xff]  ;;  %v11390_v47 = vld [vmem:[#allocation191_spill] sm:$0xff]  ;;  %v3951_v52 = vpop.permute.xlu0 %3950 }
 0x370   :  { %11373 = vst [vmem:[#allocation13_spill] sm:$0xff] %v9722_v33  ;;  %11381 = vst [vmem:[#allocation46_spill] sm:$0xff] %v9734_v36  ;;  %v9743_v33 = vmul.f32 %v3844_v54, %v11386_v51  ;;  %v9746_v11 = vmul.f32 %v3844_v54, %v11388_v35  ;;  %v9749_v57 = vmul.f32 %v3844_v54, %v11390_v47  ;;  %v11392_v8 = vld [vmem:[#allocation194_spill] sm:$0xff]  ;;  %v11396_v62 = vld [vmem:[#allocation223_spill] sm:$0xff] }
 0x371   :  { %11383 = vst [vmem:[#allocation70_spill] sm:$0xff] %v9737_v26  ;;  %11385 = vst [vmem:[#allocation75_spill] sm:$0xff] %v9740_v40  ;;  %v9752_v18 = vmul.f32 %v3844_v54, %v11392_v8  ;;  %v11394_v3 = vld [vmem:[#allocation206_spill] sm:$0xff]  ;;  %v9758_v26 = vmul.f32 %v3844_v54, %v11396_v62  ;;  %v11398_v40 = vld [vmem:[#allocation224_spill] sm:$0xff] }
 0x372   :  { %11387 = vst [vmem:[#allocation76_spill] sm:$0xff] %v9743_v33  ;;  %11389 = vst [vmem:[#allocation88_spill] sm:$0xff] %v9746_v11  ;;  %v9755_v36 = vmul.f32 %v3844_v54, %v11394_v3  ;;  %v9761_v46 = vmul.f32 %v3844_v54, %v11398_v40  ;;  %v11399_v51 = vld [vmem:[#allocation237_spill] sm:$0xff]  ;;  %v11401_v35 = vld [vmem:[#allocation242_spill] sm:$0xff]  ;;  %v9782_v40 = vmul.f32 %v3844_v54, %v9048_v24 }
 0x373   :  { %11391 = vst [vmem:[#allocation63_spill] sm:$0xff] %v9749_v57  ;;  %11393 = vst [vmem:[#allocation98_spill] sm:$0xff] %v9752_v18  ;;  %v9764_v33 = vmul.f32 %v3844_v54, %v11399_v51  ;;  %v9767_v11 = vmul.f32 %v3844_v54, %v11401_v35  ;;  %v11403_v47 = vld [vmem:[#allocation252_spill] sm:$0xff]  ;;  %v11405_v8 = vld [vmem:[#allocation257_spill] sm:$0xff]  ;;  %v3996_v51 = vadd.f32 %v3951_v52, %v9353_v49 }
 0x374   :  { %11395 = vst [vmem:[#allocation102_spill] sm:$0xff] %v9755_v36  ;;  %11397 = vst [vmem:[#allocation122_spill] sm:$0xff] %v9758_v26  ;;  %v9770_v57 = vmul.f32 %v3844_v54, %v11403_v47  ;;  %v9773_v18 = vmul.f32 %v3844_v54, %v11405_v8  ;;  %v11407_v3 = vld [vmem:[#allocation270_spill] sm:$0xff]  ;;  %v11409_v62 = vld [vmem:[#allocation271_spill] sm:$0xff]  ;;  %v3997_v35 = vadd.f32 %v3951_v52, %v9356_v30 }
 0x375   :  { %11400 = vst [vmem:[#allocation126_spill] sm:$0xff] %v9764_v33  ;;  %11402 = vst [vmem:[#allocation130_spill] sm:$0xff] %v9767_v11  ;;  %v9776_v36 = vmul.f32 %v3844_v54, %v11407_v3  ;;  %v9779_v26 = vmul.f32 %v3844_v54, %v11409_v62  ;;  %v3998_v11 = vadd.f32 %v3951_v52, %v9359_v10 }
 0x376   :  { %11404 = vst [vmem:[#allocation148_spill] sm:$0xff] %v9770_v57  ;;  %11406 = vst [vmem:[#allocation149_spill] sm:$0xff] %v9773_v18  ;;  %v3999_v47 = vadd.f32 %v3951_v52, %v9362_v53  ;;  %v4000_v8 = vadd.f32 %v3951_v52, %v9365_v13  ;;  %v4001_v18 = vadd.f32 %v3951_v52, %v9368_v61 }
 0x377   :  { %11408 = vst [vmem:[#allocation153_spill] sm:$0xff] %v9776_v36  ;;  %11410 = vst [vmem:[#allocation155_spill] sm:$0xff] %v9779_v26  ;;  %v4002_v3 = vadd.f32 %v3951_v52, %v9371_v55  ;;  %v4003_v62 = vadd.f32 %v3951_v52, %v9374_v12  ;;  %v4004_v26 = vadd.f32 %v3951_v52, %v9377_v23 }
 0x378   :  { %11411 = vst [vmem:[#allocation179_spill] sm:$0xff] %v9782_v40  ;;  %v4140_v24 = vadd.f32 %v9380_v7, %v3951_v52  ;;  %v4141_v49 = vadd.f32 %v9383_v14, %v3951_v52  ;;  %v4142_v30 = vadd.f32 %v9386_v29, %v3951_v52  ;;  %v4143_v10 = vadd.f32 %v9389_v39, %v3951_v52 }
 0x379   :  { %v4144_v53 = vadd.f32 %v9392_v6, %v3951_v52  ;;  %v4145_v13 = vadd.f32 %v9395_v1, %v3951_v52  ;;  %v4146_v61 = vadd.f32 %v9398_v16, %v3951_v52  ;;  %v4147_v55 = vadd.f32 %v9401_v45, %v3951_v52 }
 0x37a   :  { %v4148_v12 = vadd.f32 %v9404_v56, %v3951_v52  ;;  %v4212_v54 = vmax.f32 %v3996_v51, %v4140_v24  ;;  %v4213_v23 = vmax.f32 %v3997_v35, %v4141_v49  ;;  %v4214_v40 = vmax.f32 %v3998_v11, %v4142_v30 }
 0x37b   :  { %v4215_v7 = vmax.f32 %v3999_v47, %v4143_v10  ;;  %v4216_v36 = vmax.f32 %v4000_v8, %v4144_v53  ;;  %v4217_v14 = vmax.f32 %v4001_v18, %v4145_v13  ;;  %v4218_v57 = vmax.f32 %v4002_v3, %v4146_v61 }
 0x37c   :  { %v4219_v29 = vmax.f32 %v4003_v62, %v4147_v55  ;;  %v4220_v33 = vmax.f32 %v4004_v26, %v4148_v12  ;;  %v4356_v39 = vadd.f32 %v9407_v41, %v3951_v52  ;;  %v4357_v6 = vadd.f32 %v9410_v48, %v3951_v52 }
 0x37d   :  { %v4358_v1 = vadd.f32 %v9413_v25, %v3951_v52  ;;  %v4359_v16 = vadd.f32 %v9416_v31, %v3951_v52  ;;  %v4360_v45 = vadd.f32 %v9419_v5, %v3951_v52  ;;  %v4361_v56 = vadd.f32 %v9422_v19, %v3951_v52 }
 0x37e   :  { %v4362_v11 = vadd.f32 %v9425_v50, %v3951_v52  ;;  %v4363_v51 = vadd.f32 %v9428_v27, %v3951_v52  ;;  %v4364_v18 = vadd.f32 %v9431_v42, %v3951_v52  ;;  %v4500_v26 = vadd.f32 %v9434_v63, %v3951_v52 }
 0x37f   :  { %v4501_v41 = vadd.f32 %v9437_v59, %v3951_v52  ;;  %v4502_v48 = vadd.f32 %v9440_v9, %v3951_v52  ;;  %v4503_v25 = vadd.f32 %v9443_v34, %v3951_v52  ;;  %v4504_v31 = vadd.f32 %v9446_v0, %v3951_v52 }
 0x380   :  { %v4505_v5 = vadd.f32 %v9449_v2, %v3951_v52  ;;  %v4506_v19 = vadd.f32 %v9452_v37, %v3951_v52  ;;  %v4507_v50 = vadd.f32 %v9455_v15, %v3951_v52  ;;  %v4508_v27 = vadd.f32 %v9458_v58, %v3951_v52  ;;  %v9820_v58 = vpop.permute.xlu1 %3955 }
 0x381   :  { %v4572_v35 = vmax.f32 %v4356_v39, %v4500_v26  ;;  %v4573_v42 = vmax.f32 %v4357_v6, %v4501_v41  ;;  %v4574_v47 = vmax.f32 %v4358_v1, %v4502_v48  ;;  %v4575_v63 = vmax.f32 %v4359_v16, %v4503_v25  ;;  %v11412_v16 = vld [vmem:[#allocation265_spill] sm:$0xff] }
 0x382   :  { %v4576_v8 = vmax.f32 %v4360_v45, %v4504_v31  ;;  %v4577_v59 = vmax.f32 %v4361_v56, %v4505_v5  ;;  %v4578_v3 = vmax.f32 %v4362_v11, %v4506_v19  ;;  %v4579_v9 = vmax.f32 %v4363_v51, %v4507_v50  ;;  %v11413_v56 = vld [vmem:[#allocation4_spill] sm:$0xff]  ;;  %v11414_v51 = vld [vmem:[#allocation5_spill] sm:$0xff] }
 0x383   :  { %v4580_v62 = vmax.f32 %v4364_v18, %v4508_v27  ;;  %v4644_v34 = vmax.f32 %v4212_v54, %v4572_v35  ;;  %v4645_v24 = vmax.f32 %v4213_v23, %v4573_v42  ;;  %v4646_v0 = vmax.f32 %v4214_v40, %v4574_v47 }
 0x384   :  { %v4647_v49 = vmax.f32 %v4215_v7, %v4575_v63  ;;  %v4648_v2 = vmax.f32 %v4216_v36, %v4576_v8  ;;  %v4649_v30 = vmax.f32 %v4217_v14, %v4577_v59  ;;  %v4650_v37 = vmax.f32 %v4218_v57, %v4578_v3  ;;  %v11419_v8 = vld [vmem:[#allocation43_spill] sm:$0xff]  ;;  %v11420_v3 = vld [vmem:[#allocation46_spill] sm:$0xff] }
 0x385   :  { %v4651_v10 = vmax.f32 %v4219_v29, %v4579_v9  ;;  %v4652_v15 = vmax.f32 %v4220_v33, %v4580_v62  ;;  %v4716_v53 = vmax.f32 %v4644_v34, 0.0  ;;  %v4717_v52 = vmax.f32 %v4645_v24, 0.0  ;;  %v11421_v62 = vld [vmem:[#allocation70_spill] sm:$0xff]  ;;  %v11422_v24 = vld [vmem:[#allocation75_spill] sm:$0xff] }
 0x386   :  { %v4718_v13 = vmax.f32 %v4646_v0, 0.0  ;;  %v4719_v61 = vmax.f32 %v4647_v49, 0.0  ;;  %v4720_v55 = vmax.f32 %v4648_v2, 0.0  ;;  %v4721_v12 = vmax.f32 %v4649_v30, 0.0  ;;  %v11423_v49 = vld [vmem:[#allocation76_spill] sm:$0xff] }
 0x387   :  { %v4722_v39 = vmax.f32 %v4650_v37, 0.0  ;;  %v4723_v6 = vmax.f32 %v4651_v10, 0.0  ;;  %v4724_v1 = vmax.f32 %v4652_v15, 0.0  ;;  %v5502_v54 = vpack.c.bf16 %v4717_v52, %v4716_v53  ;;  %v11424_v30 = vld [vmem:[#allocation88_spill] sm:$0xff]  ;;  %v11425_v10 = vld [vmem:[#allocation63_spill] sm:$0xff]  ;;  %v11426_v53 = vld [vmem:[#allocation98_spill] sm:$0xff] }
 0x388   :  { %v5503_v23 = vpack.c.bf16 %v4719_v61, %v4718_v13  ;;  %v9824_v36 = vadd.f32 %v9820_v58, %v9677_v43  ;;  %v9828_v57 = vadd.f32 %v9820_v58, %v9680_v28  ;;  %v5504_v33 = vpack.c.bf16 %v4721_v12, %v4720_v55  ;;  %v11427_v13 = vld [vmem:[#allocation102_spill] sm:$0xff] }
 0x389   :  { %v5505_v40 = vpack.c.bf16 %v4723_v6, %v4722_v39  ;;  %v5506_v7 = vpack.c.bf16 %v4724_v1, %v4724_v1  ;;  %v4007_v14 = vadd.f32 %v9820_v58, %v9683_v60  ;;  %5004 = vst [vmem:[%s10583_s5 + $0x48] sm:$0xff] %v5502_v54  ;;  %v4008_v43 = vadd.f32 %v9820_v58, %v9686_v4  ;;  %v11428_v55 = vld [vmem:[#allocation122_spill] sm:$0xff] }
 0x38a   :  { %5005 = vst [vmem:[%s10583_s5 + $0x50] sm:$0xff] %v5503_v23  ;;  %v4009_v28 = vadd.f32 %v9820_v58, %v9689_v21  ;;  %v4010_v29 = vadd.f32 %v9820_v58, %v9692_v32  ;;  %v4011_v60 = vadd.f32 %v9820_v58, %v9695_v20  ;;  %5006 = vst [vmem:[%s10583_s5 + $0x58] sm:$0xff] %v5504_v33  ;;  %v11429_v6 = vld [vmem:[#allocation126_spill] sm:$0xff]  ;;  %v11432_v33 = vld [vmem:[#allocation149_spill] sm:$0xff] }
 0x38b   :  { %5007 = vst [vmem:[%s10583_s5 + $0x60] sm:$0xff] %v5505_v40  ;;  %5008 = vst [vmem:[%s10583_s5 + $0x68] sm:$0xf] %v5506_v7  ;;  %v4012_v21 = vadd.f32 %v9820_v58, %v9698_v22  ;;  %v4013_v4 = vadd.f32 %v9820_v58, %v9701_v38  ;;  %v4149_v32 = vadd.f32 %v9704_v17, %v9820_v58  ;;  %v11415_v22 = vld [vmem:[#allocation10_spill] sm:$0xff]  ;;  %v11416_v38 = vld [vmem:[#allocation13_spill] sm:$0xff] }
 0x38c   :  { %v4150_v20 = vadd.f32 %v9707_v44, %v9820_v58  ;;  %v4151_v45 = vadd.f32 %v11412_v16, %v9820_v58  ;;  %v4152_v11 = vadd.f32 %v11413_v56, %v9820_v58  ;;  %v4153_v18 = vadd.f32 %v11414_v51, %v9820_v58  ;;  %v11417_v17 = vld [vmem:[#allocation37_spill] sm:$0xff]  ;;  %v11430_v54 = vld [vmem:[#allocation130_spill] sm:$0xff] }
 0x38d   :  { %v4154_v26 = vadd.f32 %v11415_v22, %v9820_v58  ;;  %v4155_v41 = vadd.f32 %v11416_v38, %v9820_v58  ;;  %v4156_v48 = vadd.f32 %v11417_v17, %v9820_v58  ;;  %v11418_v44 = vld [vmem:[#allocation41_spill] sm:$0xff]  ;;  %v4221_v31 = vmax.f32 %v9824_v36, %v4149_v32  ;;  %v11431_v36 = vld [vmem:[#allocation148_spill] sm:$0xff] }
 0x38e   :  { %v4157_v25 = vadd.f32 %v11418_v44, %v9820_v58  ;;  %v4222_v5 = vmax.f32 %v9828_v57, %v4150_v20  ;;  %v4223_v19 = vmax.f32 %v4007_v14, %v4151_v45  ;;  %v4224_v50 = vmax.f32 %v4008_v43, %v4152_v11  ;;  %v11433_v7 = vld [vmem:[#allocation153_spill] sm:$0xff]  ;;  %v11434_v43 = vld [vmem:[#allocation155_spill] sm:$0xff] }
 0x38f   :  { %v4225_v27 = vmax.f32 %v4009_v28, %v4153_v18  ;;  %v4226_v35 = vmax.f32 %v4010_v29, %v4154_v26  ;;  %v4227_v42 = vmax.f32 %v4011_v60, %v4155_v41  ;;  %v4228_v47 = vmax.f32 %v4012_v21, %v4156_v48 }
 0x390   :  { %v4229_v63 = vmax.f32 %v4013_v4, %v4157_v25  ;;  %v4365_v59 = vadd.f32 %v11419_v8, %v9820_v58  ;;  %v4366_v9 = vadd.f32 %v11420_v3, %v9820_v58  ;;  %v4367_v34 = vadd.f32 %v11421_v62, %v9820_v58  ;;  %v9915_v25 = vpop.permute.xlu0 %3940 }
 0x391   :  { %v4368_v0 = vadd.f32 %v11422_v24, %v9820_v58  ;;  %v4369_v2 = vadd.f32 %v11423_v49, %v9820_v58  ;;  %v4370_v37 = vadd.f32 %v11424_v30, %v9820_v58  ;;  %v4371_v15 = vadd.f32 %v11425_v10, %v9820_v58  ;;  %v11439_v30 = vld [vmem:[#allocation7_spill] sm:$0xff]  ;;  %v11440_v10 = vld [vmem:[#allocation14_spill] sm:$0xff] }
 0x392   :  { %v4372_v52 = vadd.f32 %v11426_v53, %v9820_v58  ;;  %v4373_v61 = vadd.f32 %v11427_v13, %v9820_v58  ;;  %v4509_v12 = vadd.f32 %v11428_v55, %v9820_v58  ;;  %v4510_v39 = vadd.f32 %v9761_v46, %v9820_v58  ;;  %v11435_v46 = vld [vmem:[#allocation179_spill] sm:$0xff]  ;;  %v11443_v55 = vld [vmem:[#allocation42_spill] sm:$0xff] }
 0x393   :  { %v4511_v1 = vadd.f32 %v11429_v6, %v9820_v58  ;;  %v4512_v23 = vadd.f32 %v11430_v54, %v9820_v58  ;;  %v4513_v57 = vadd.f32 %v11431_v36, %v9820_v58  ;;  %v4514_v40 = vadd.f32 %v11432_v33, %v9820_v58  ;;  %v11441_v53 = vld [vmem:[#allocation15_spill] sm:$0xff] }
 0x394   :  { %v4515_v14 = vadd.f32 %v11433_v7, %v9820_v58  ;;  %v4516_v28 = vadd.f32 %v11434_v43, %v9820_v58  ;;  %v4517_v29 = vadd.f32 %v11435_v46, %v9820_v58  ;;  %v4581_v60 = vmax.f32 %v4365_v59, %v4509_v12  ;;  %v11442_v13 = vld [vmem:[#allocation39_spill] sm:$0xff] }
 0x395   :  { %v4582_v21 = vmax.f32 %v4366_v9, %v4510_v39  ;;  %v4583_v4 = vmax.f32 %v4367_v34, %v4511_v1  ;;  %v4584_v32 = vmax.f32 %v4368_v0, %v4512_v23  ;;  %v4585_v20 = vmax.f32 %v4369_v2, %v4513_v57  ;;  %v11444_v39 = vld [vmem:[#allocation47_spill] sm:$0xff]  ;;  %v11445_v1 = vld [vmem:[#allocation48_spill] sm:$0xff]  ;;  %v11446_v23 = vld [vmem:[#allocation62_spill] sm:$0xff] }
 0x396   :  { %v4586_v16 = vmax.f32 %v4370_v37, %v4514_v40  ;;  %v4587_v45 = vmax.f32 %v4371_v15, %v4515_v14  ;;  %v4588_v56 = vmax.f32 %v4372_v52, %v4516_v28  ;;  %v4589_v11 = vmax.f32 %v4373_v61, %v4517_v29  ;;  %v11447_v57 = vld [vmem:[#allocation78_spill] sm:$0xff]  ;;  %v11448_v40 = vld [vmem:[#allocation79_spill] sm:$0xff]  ;;  %v11450_v28 = vld [vmem:[#allocation96_spill] sm:$0xff] }
 0x397   :  { %v4653_v51 = vmax.f32 %v4221_v31, %v4581_v60  ;;  %v4654_v18 = vmax.f32 %v4222_v5, %v4582_v21  ;;  %v4655_v22 = vmax.f32 %v4223_v19, %v4583_v4  ;;  %v4656_v26 = vmax.f32 %v4224_v50, %v4584_v32  ;;  %v11436_v19 = vld [vmem:[#allocation246_spill] sm:$0xff]  ;;  %v11451_v29 = vld [vmem:[#allocation105_spill] sm:$0xff]  ;;  %v11453_v32 = vld [vmem:[#allocation119_spill] sm:$0xff] }
 0x398   :  { %v4657_v38 = vmax.f32 %v4225_v27, %v4585_v20  ;;  %v4658_v41 = vmax.f32 %v4226_v35, %v4586_v16  ;;  %v4659_v17 = vmax.f32 %v4227_v42, %v4587_v45  ;;  %v4660_v48 = vmax.f32 %v4228_v47, %v4588_v56  ;;  %v11437_v42 = vld [vmem:[#allocation260_spill] sm:$0xff]  ;;  %v11449_v14 = vld [vmem:[#allocation90_spill] sm:$0xff] }
 0x399   :  { %v4661_v44 = vmax.f32 %v4229_v63, %v4589_v11  ;;  %v4725_v58 = vmax.f32 %v4653_v51, 0.0  ;;  %v4726_v8 = vmax.f32 %v4654_v18, 0.0  ;;  %v4727_v59 = vmax.f32 %v4655_v22, 0.0  ;;  %v11438_v63 = vld [vmem:[#allocation6_spill] sm:$0xff] }
 0x39a   :  { %v4728_v3 = vmax.f32 %v4656_v26, 0.0  ;;  %v4729_v9 = vmax.f32 %v4657_v38, 0.0  ;;  %v4730_v62 = vmax.f32 %v4658_v41, 0.0  ;;  %v4731_v34 = vmax.f32 %v4659_v17, 0.0  ;;  %v11452_v21 = vld [vmem:[#allocation110_spill] sm:$0xff]  ;;  %v11454_v41 = vld [vmem:[#allocation120_spill] sm:$0xff] }
 0x39b   :  { %v4732_v24 = vmax.f32 %v4660_v48, 0.0  ;;  %v4733_v0 = vmax.f32 %v4661_v44, 0.0  ;;  %v5507_v31 = vpack.c.bf16 %v4726_v8, %v4725_v58  ;;  %v9919_v50 = vadd.f32 %v9915_v25, %v11436_v19  ;;  %v11455_v48 = vld [vmem:[#allocation125_spill] sm:$0xff]  ;;  %v11456_v58 = vld [vmem:[#allocation151_spill] sm:$0xff] }
 0x39c   :  { %v5508_v5 = vpack.c.bf16 %v4728_v3, %v4727_v59  ;;  %v5509_v27 = vpack.c.bf16 %v4730_v62, %v4729_v9  ;;  %v3979_v47 = vadd.f32 %v9915_v25, %v11437_v42  ;;  %v3980_v49 = vadd.f32 %v9915_v25, %v11438_v63  ;;  %v11457_v59 = vld [vmem:[#allocation152_spill] sm:$0xff]  ;;  %v11458_v9 = vld [vmem:[#allocation158_spill] sm:$0xff] }
 0x39d   :  { %v5510_v35 = vpack.c.bf16 %v4732_v24, %v4731_v34  ;;  %v5511_v2 = vpack.c.bf16 %v4733_v0, %v4733_v0  ;;  %5009 = vst [vmem:[%s10583_s5 + $0x6c] sm:$0xff] %v5507_v31  ;;  %v3981_v37 = vadd.f32 %v9915_v25, %v11439_v30  ;;  %v3982_v15 = vadd.f32 %v9915_v25, %v11440_v10  ;;  %v11459_v34 = vld [vmem:[#allocation159_spill] sm:$0xff]  ;;  %v11460_v0 = vld [vmem:[#allocation184_spill] sm:$0xff]  ;;  %v11466_v30 = vld [vmem:[#allocation222_spill] sm:$0xff] }
 0x39e   :  { %5010 = vst [vmem:[%s10583_s5 + $0x74] sm:$0xff] %v5508_v5  ;;  %v3983_v52 = vadd.f32 %v9915_v25, %v11441_v53  ;;  %5011 = vst [vmem:[%s10583_s5 + $0x7c] sm:$0xff] %v5509_v27  ;;  %v3984_v61 = vadd.f32 %v9915_v25, %v11442_v13  ;;  %v3985_v12 = vadd.f32 %v9915_v25, %v11443_v55  ;;  %v11461_v5 = vld [vmem:[#allocation188_spill] sm:$0xff]  ;;  %v11469_v13 = vld [vmem:[#allocation250_spill] sm:$0xff] }
 0x39f   :  { %5012 = vst [vmem:[%s10583_s5 + $0x84] sm:$0xff] %v5510_v35  ;;  %v3986_v6 = vadd.f32 %v9915_v25, %v11444_v39  ;;  %v4122_v54 = vadd.f32 %v11445_v1, %v9915_v25  ;;  %5013 = vst [vmem:[%s10583_s5 + $0x8c] sm:$0xf] %v5511_v2  ;;  %v4123_v36 = vadd.f32 %v11446_v23, %v9915_v25  ;;  %v11463_v35 = vld [vmem:[#allocation190_spill] sm:$0xff]  ;;  %v11467_v10 = vld [vmem:[#allocation236_spill] sm:$0xff] }
 0x3a0   :  { %v4124_v33 = vadd.f32 %v11447_v57, %v9915_v25  ;;  %v4125_v7 = vadd.f32 %v11448_v40, %v9915_v25  ;;  %v4126_v43 = vadd.f32 %v11449_v14, %v9915_v25  ;;  %v4127_v46 = vadd.f32 %v11450_v28, %v9915_v25  ;;  %v11468_v53 = vld [vmem:[#allocation240_spill] sm:$0xff]  ;;  %v11470_v55 = vld [vmem:[#allocation255_spill] sm:$0xff] }
 0x3a1   :  { %v4128_v60 = vadd.f32 %v11451_v29, %v9915_v25  ;;  %v4129_v4 = vadd.f32 %v11452_v21, %v9915_v25  ;;  %v4130_v20 = vadd.f32 %v11453_v32, %v9915_v25  ;;  %v4194_v16 = vmax.f32 %v9919_v50, %v4122_v54  ;;  %v11462_v50 = vld [vmem:[#allocation189_spill] sm:$0xff]  ;;  %v11471_v39 = vld [vmem:[#allocation267_spill] sm:$0xff] }
 0x3a2   :  { %v4195_v45 = vmax.f32 %v3979_v47, %v4123_v36  ;;  %v4196_v56 = vmax.f32 %v3980_v49, %v4124_v33  ;;  %v4197_v11 = vmax.f32 %v3981_v37, %v4125_v7  ;;  %v4198_v51 = vmax.f32 %v3982_v15, %v4126_v43  ;;  %v11464_v47 = vld [vmem:[#allocation203_spill] sm:$0xff]  ;;  %v11465_v49 = vld [vmem:[#allocation220_spill] sm:$0xff] }
 0x3a3   :  { %v4199_v18 = vmax.f32 %v3983_v52, %v4127_v46  ;;  %v4200_v22 = vmax.f32 %v3984_v61, %v4128_v60  ;;  %v4201_v26 = vmax.f32 %v3985_v12, %v4129_v4  ;;  %v4202_v38 = vmax.f32 %v3986_v6, %v4130_v20  ;;  %v10007_v20 = vpop.permute.xlu1 %3945 }
 0x3a4   :  { %v4338_v17 = vadd.f32 %v11454_v41, %v9915_v25  ;;  %v4339_v44 = vadd.f32 %v11455_v48, %v9915_v25  ;;  %v4340_v8 = vadd.f32 %v11456_v58, %v9915_v25  ;;  %v4341_v3 = vadd.f32 %v11457_v59, %v9915_v25 }
 0x3a5   :  { %v4342_v62 = vadd.f32 %v11458_v9, %v9915_v25  ;;  %v4343_v24 = vadd.f32 %v11459_v34, %v9915_v25  ;;  %v4344_v31 = vadd.f32 %v11460_v0, %v9915_v25  ;;  %v4345_v19 = vadd.f32 %v11461_v5, %v9915_v25 }
 0x3a6   :  { %v4346_v27 = vadd.f32 %v11462_v50, %v9915_v25  ;;  %v4482_v42 = vadd.f32 %v11463_v35, %v9915_v25  ;;  %v4483_v63 = vadd.f32 %v11464_v47, %v9915_v25  ;;  %v4484_v2 = vadd.f32 %v11465_v49, %v9915_v25 }
 0x3a7   :  { %v4485_v37 = vadd.f32 %v11466_v30, %v9915_v25  ;;  %v4486_v15 = vadd.f32 %v11467_v10, %v9915_v25  ;;  %v4487_v52 = vadd.f32 %v11468_v53, %v9915_v25  ;;  %v4488_v61 = vadd.f32 %v11469_v13, %v9915_v25 }
 0x3a8   :  { %v4489_v12 = vadd.f32 %v11470_v55, %v9915_v25  ;;  %v4490_v6 = vadd.f32 %v11471_v39, %v9915_v25  ;;  %v4554_v1 = vmax.f32 %v4338_v17, %v4482_v42  ;;  %v4555_v54 = vmax.f32 %v4339_v44, %v4483_v63  ;;  %v11479_v42 = vld [vmem:[#allocation36_spill] sm:$0xff]  ;;  %v11480_v63 = vld [vmem:[#allocation38_spill] sm:$0xff] }
 0x3a9   :  { %v4556_v23 = vmax.f32 %v4340_v8, %v4484_v2  ;;  %v4557_v36 = vmax.f32 %v4341_v3, %v4485_v37  ;;  %v4558_v57 = vmax.f32 %v4342_v62, %v4486_v15  ;;  %v4559_v33 = vmax.f32 %v4343_v24, %v4487_v52  ;;  %v11475_v24 = vld [vmem:[#allocation3_spill] sm:$0xff]  ;;  %v11481_v2 = vld [vmem:[#allocation40_spill] sm:$0xff]  ;;  %v11482_v37 = vld [vmem:[#allocation65_spill] sm:$0xff] }
 0x3aa   :  { %v4560_v40 = vmax.f32 %v4344_v31, %v4488_v61  ;;  %v4561_v7 = vmax.f32 %v4345_v19, %v4489_v12  ;;  %v4562_v14 = vmax.f32 %v4346_v27, %v4490_v6  ;;  %v4626_v43 = vmax.f32 %v4194_v16, %v4554_v1  ;;  %v11476_v31 = vld [vmem:[#allocation8_spill] sm:$0xff]  ;;  %v11477_v19 = vld [vmem:[#allocation9_spill] sm:$0xff]  ;;  %v11484_v52 = vld [vmem:[#allocation74_spill] sm:$0xff] }
 0x3ab   :  { %v4627_v28 = vmax.f32 %v4195_v45, %v4555_v54  ;;  %v4628_v46 = vmax.f32 %v4196_v56, %v4556_v23  ;;  %v4629_v29 = vmax.f32 %v4197_v11, %v4557_v36  ;;  %v4630_v60 = vmax.f32 %v4198_v51, %v4558_v57  ;;  %v11472_v45 = vld [vmem:[#allocation269_spill] sm:$0xff]  ;;  %v11478_v27 = vld [vmem:[#allocation32_spill] sm:$0xff]  ;;  %v11489_v36 = vld [vmem:[#allocation118_spill] sm:$0xff] }
 0x3ac   :  { %v4631_v21 = vmax.f32 %v4199_v18, %v4559_v33  ;;  %v4632_v4 = vmax.f32 %v4200_v22, %v4560_v40  ;;  %v4633_v32 = vmax.f32 %v4201_v26, %v4561_v7  ;;  %v4634_v25 = vmax.f32 %v4202_v38, %v4562_v14  ;;  %v11473_v18 = vld [vmem:[#allocation273_spill] sm:$0xff]  ;;  %v11474_v26 = vld [vmem:[#allocation2_spill] sm:$0xff]  ;;  %v11483_v15 = vld [vmem:[#allocation44_spill] sm:$0xff] }
 0x3ad   :  { %v4698_v41 = vmax.f32 %v4626_v43, 0.0  ;;  %v4699_v17 = vmax.f32 %v4627_v28, 0.0  ;;  %v4700_v48 = vmax.f32 %v4628_v46, 0.0  ;;  %v4701_v44 = vmax.f32 %v4629_v29, 0.0  ;;  %v11485_v61 = vld [vmem:[#allocation85_spill] sm:$0xff] }
 0x3ae   :  { %v4702_v58 = vmax.f32 %v4630_v60, 0.0  ;;  %v4703_v8 = vmax.f32 %v4631_v21, 0.0  ;;  %v4704_v59 = vmax.f32 %v4632_v4, 0.0  ;;  %v4705_v3 = vmax.f32 %v4633_v32, 0.0  ;;  %v11486_v12 = vld [vmem:[#allocation89_spill] sm:$0xff] }
 0x3af   :  { %v4706_v9 = vmax.f32 %v4634_v25, 0.0  ;;  %v5492_v16 = vpack.c.bf16 %v4699_v17, %v4698_v41  ;;  %v10011_v56 = vadd.f32 %v10007_v20, %v11472_v45  ;;  %v5493_v11 = vpack.c.bf16 %v4701_v44, %v4700_v48  ;;  %v11487_v6 = vld [vmem:[#allocation97_spill] sm:$0xff]  ;;  %v11492_v41 = vld [vmem:[#allocation146_spill] sm:$0xff]  ;;  %v11493_v48 = vld [vmem:[#allocation147_spill] sm:$0xff] }
 0x3b0   :  { %v5494_v51 = vpack.c.bf16 %v4703_v8, %v4702_v58  ;;  %v3988_v22 = vadd.f32 %v10007_v20, %v11473_v18  ;;  %v3989_v38 = vadd.f32 %v10007_v20, %v11474_v26  ;;  %v5495_v62 = vpack.c.bf16 %v4705_v3, %v4704_v59  ;;  %v11488_v54 = vld [vmem:[#allocation101_spill] sm:$0xff]  ;;  %v11494_v58 = vld [vmem:[#allocation150_spill] sm:$0xff] }
 0x3b1   :  { %v5496_v34 = vpack.c.bf16 %v4706_v9, %v4706_v9  ;;  %4994 = vst [vmem:[%s10583_s5] sm:$0xff] %v5492_v16  ;;  %v3990_v0 = vadd.f32 %v10007_v20, %v11475_v24  ;;  %v3991_v5 = vadd.f32 %v10007_v20, %v11476_v31  ;;  %4995 = vst [vmem:[%s10583_s5 + $0x8] sm:$0xff] %v5493_v11  ;;  %v11490_v21 = vld [vmem:[#allocation121_spill] sm:$0xff]  ;;  %v11495_v59 = vld [vmem:[#allocation154_spill] sm:$0xff] }
 0x3b2   :  { %4996 = vst [vmem:[%s10583_s5 + $0x10] sm:$0xff] %v5494_v51  ;;  %v3992_v50 = vadd.f32 %v10007_v20, %v11477_v19  ;;  %v3993_v35 = vadd.f32 %v10007_v20, %v11478_v27  ;;  %v3994_v47 = vadd.f32 %v10007_v20, %v11479_v42  ;;  %v3995_v49 = vadd.f32 %v10007_v20, %v11480_v63  ;;  %v11491_v32 = vld [vmem:[#allocation129_spill] sm:$0xff]  ;;  %v11496_v9 = vld [vmem:[#allocation175_spill] sm:$0xff]  ;;  %v11497_v45 = vld [vmem:[#allocation178_spill] sm:$0xff] }
 0x3b3   :  { %4997 = vst [vmem:[%s10583_s5 + $0x18] sm:$0xff] %v5495_v62  ;;  %4998 = vst [vmem:[%s10583_s5 + $0x20] sm:$0xf] %v5496_v34  ;;  %v4131_v30 = vadd.f32 %v11481_v2, %v10007_v20  ;;  %v4132_v10 = vadd.f32 %v11482_v37, %v10007_v20  ;;  %v4133_v53 = vadd.f32 %v11483_v15, %v10007_v20  ;;  %v11498_v11 = vld [vmem:[#allocation181_spill] sm:$0xff]  ;;  %v11499_v18 = vld [vmem:[#allocation182_spill] sm:$0xff] }
 0x3b4   :  { %v4134_v13 = vadd.f32 %v11484_v52, %v10007_v20  ;;  %v4135_v55 = vadd.f32 %v11485_v61, %v10007_v20  ;;  %v4136_v39 = vadd.f32 %v11486_v12, %v10007_v20  ;;  %v4137_v1 = vadd.f32 %v11487_v6, %v10007_v20  ;;  %v11500_v26 = vld [vmem:[#allocation205_spill] sm:$0xff]  ;;  %v11501_v62 = vld [vmem:[#allocation214_spill] sm:$0xff]  ;;  %v11502_v24 = vld [vmem:[#allocation215_spill] sm:$0xff] }
 0x3b5   :  { %v4138_v23 = vadd.f32 %v11488_v54, %v10007_v20  ;;  %v4139_v57 = vadd.f32 %v11489_v36, %v10007_v20  ;;  %v4203_v33 = vmax.f32 %v10011_v56, %v4131_v30  ;;  %v4204_v40 = vmax.f32 %v3988_v22, %v4132_v10  ;;  %v11503_v31 = vld [vmem:[#allocation226_spill] sm:$0xff]  ;;  %v11504_v19 = vld [vmem:[#allocation232_spill] sm:$0xff]  ;;  %v11505_v27 = vld [vmem:[#allocation241_spill] sm:$0xff] }
 0x3b6   :  { %v4205_v7 = vmax.f32 %v3989_v38, %v4133_v53  ;;  %v4206_v14 = vmax.f32 %v3990_v0, %v4134_v13  ;;  %v4207_v43 = vmax.f32 %v3991_v5, %v4135_v55  ;;  %v4208_v28 = vmax.f32 %v3992_v50, %v4136_v39  ;;  %v11506_v42 = vld [vmem:[#allocation245_spill] sm:$0xff]  ;;  %v11507_v63 = vld [vmem:[#allocation264_spill] sm:$0xff] }
 0x3b7   :  { %v4209_v46 = vmax.f32 %v3993_v35, %v4137_v1  ;;  %v4210_v29 = vmax.f32 %v3994_v47, %v4138_v23  ;;  %v4211_v60 = vmax.f32 %v3995_v49, %v4139_v57  ;;  %v4347_v4 = vadd.f32 %v11490_v21, %v10007_v20 }
 0x3b8   :  { %v4348_v25 = vadd.f32 %v11491_v32, %v10007_v20  ;;  %v4349_v17 = vadd.f32 %v11492_v41, %v10007_v20  ;;  %v4350_v44 = vadd.f32 %v11493_v48, %v10007_v20  ;;  %v4351_v8 = vadd.f32 %v11494_v58, %v10007_v20 }
 0x3b9   :  { %v4352_v3 = vadd.f32 %v11495_v59, %v10007_v20  ;;  %v4353_v16 = vadd.f32 %v11496_v9, %v10007_v20  ;;  %v4354_v56 = vadd.f32 %v11497_v45, %v10007_v20  ;;  %v4355_v51 = vadd.f32 %v11498_v11, %v10007_v20 }
 0x3ba   :  { %v4491_v22 = vadd.f32 %v11499_v18, %v10007_v20  ;;  %v4492_v38 = vadd.f32 %v11500_v26, %v10007_v20  ;;  %v4493_v34 = vadd.f32 %v11501_v62, %v10007_v20  ;;  %v4494_v0 = vadd.f32 %v11502_v24, %v10007_v20 }
 0x3bb   :  { %v4495_v5 = vadd.f32 %v11503_v31, %v10007_v20  ;;  %v4496_v50 = vadd.f32 %v11504_v19, %v10007_v20  ;;  %v4497_v35 = vadd.f32 %v11505_v27, %v10007_v20  ;;  %v4498_v47 = vadd.f32 %v11506_v42, %v10007_v20 }
 0x3bc   :  { %v4499_v49 = vadd.f32 %v11507_v63, %v10007_v20  ;;  %v4563_v2 = vmax.f32 %v4347_v4, %v4491_v22  ;;  %v4564_v30 = vmax.f32 %v4348_v25, %v4492_v38  ;;  %v4565_v37 = vmax.f32 %v4349_v17, %v4493_v34  ;;  %v3849_v4 = vpop.permute.xlu0 %3848  ;;  %v11515_v22 = vld [vmem:[#allocation56_spill] sm:$0xff]  ;;  %v11517_v34 = vld [vmem:[#allocation86_spill] sm:$0xff] }
 0x3bd   :  { %v4566_v10 = vmax.f32 %v4350_v44, %v4494_v0  ;;  %v4567_v15 = vmax.f32 %v4351_v8, %v4495_v5  ;;  %v4568_v53 = vmax.f32 %v4352_v3, %v4496_v50  ;;  %v4569_v52 = vmax.f32 %v4353_v16, %v4497_v35  ;;  %v11511_v3 = vld [vmem:[#allocation26_spill] sm:$0xff]  ;;  %v11516_v38 = vld [vmem:[#allocation80_spill] sm:$0xff]  ;;  %v11520_v50 = vld [vmem:[#allocation103_spill] sm:$0xff] }
 0x3be   :  { %v4570_v13 = vmax.f32 %v4354_v56, %v4498_v47  ;;  %v4571_v61 = vmax.f32 %v4355_v51, %v4499_v49  ;;  %v4635_v55 = vmax.f32 %v4203_v33, %v4563_v2  ;;  %v4636_v12 = vmax.f32 %v4204_v40, %v4564_v30  ;;  %v11512_v16 = vld [vmem:[#allocation50_spill] sm:$0xff]  ;;  %v11513_v56 = vld [vmem:[#allocation53_spill] sm:$0xff]  ;;  %v11514_v51 = vld [vmem:[#allocation55_spill] sm:$0xff] }
 0x3bf   :  { %v4637_v39 = vmax.f32 %v4205_v7, %v4565_v37  ;;  %v4638_v6 = vmax.f32 %v4206_v14, %v4566_v10  ;;  %v4639_v1 = vmax.f32 %v4207_v43, %v4567_v15  ;;  %v4640_v54 = vmax.f32 %v4208_v28, %v4568_v53  ;;  %v11508_v7 = vld [vmem:[#allocation16_spill] sm:$0xff]  ;;  %v11509_v43 = vld [vmem:[#allocation17_spill] sm:$0xff]  ;;  %v11522_v47 = vld [vmem:[#allocation115_spill] sm:$0xff] }
 0x3c0   :  { %v4641_v23 = vmax.f32 %v4209_v46, %v4569_v52  ;;  %v4642_v36 = vmax.f32 %v4210_v29, %v4570_v13  ;;  %v4643_v57 = vmax.f32 %v4211_v60, %v4571_v61  ;;  %v4707_v21 = vmax.f32 %v4635_v55, 0.0  ;;  %v11510_v60 = vld [vmem:[#allocation25_spill] sm:$0xff]  ;;  %v11518_v0 = vld [vmem:[#allocation60_spill] sm:$0xff]  ;;  %v11525_v10 = vld [vmem:[#allocation138_spill] sm:$0xff] }
 0x3c1   :  { %v4708_v20 = vmax.f32 %v4636_v12, 0.0  ;;  %v4709_v32 = vmax.f32 %v4637_v39, 0.0  ;;  %v4710_v25 = vmax.f32 %v4638_v6, 0.0  ;;  %v4711_v41 = vmax.f32 %v4639_v1, 0.0  ;;  %v11519_v5 = vld [vmem:[#allocation100_spill] sm:$0xff]  ;;  %v11521_v35 = vld [vmem:[#allocation113_spill] sm:$0xff] }
 0x3c2   :  { %v4712_v17 = vmax.f32 %v4640_v54, 0.0  ;;  %v4713_v48 = vmax.f32 %v4641_v23, 0.0  ;;  %v4714_v44 = vmax.f32 %v4642_v36, 0.0  ;;  %v4715_v58 = vmax.f32 %v4643_v57, 0.0  ;;  %v11523_v49 = vld [vmem:[#allocation133_spill] sm:$0xff]  ;;  %v11524_v30 = vld [vmem:[#allocation136_spill] sm:$0xff] }
 0x3c3   :  { %v5497_v8 = vpack.c.bf16 %v4708_v20, %v4707_v21  ;;  %v5498_v33 = vpack.c.bf16 %v4710_v25, %v4709_v32  ;;  %v10100_v14 = vmul.f32 %v3849_v4, %v11508_v7  ;;  %v10103_v28 = vmul.f32 %v3849_v4, %v11509_v43  ;;  %v11526_v53 = vld [vmem:[#allocation162_spill] sm:$0xff]  ;;  %v11527_v13 = vld [vmem:[#allocation163_spill] sm:$0xff]  ;;  %v11529_v39 = vld [vmem:[#allocation169_spill] sm:$0xff] }
 0x3c4   :  { %v5499_v40 = vpack.c.bf16 %v4712_v17, %v4711_v41  ;;  %v5500_v46 = vpack.c.bf16 %v4714_v44, %v4713_v48  ;;  %v5501_v29 = vpack.c.bf16 %v4715_v58, %v4715_v58  ;;  %v10109_v59 = vmul.f32 %v3849_v4, %v11510_v60  ;;  %v11528_v55 = vld [vmem:[#allocation166_spill] sm:$0xff]  ;;  %v11530_v1 = vld [vmem:[#allocation193_spill] sm:$0xff]  ;;  %v11531_v23 = vld [vmem:[#allocation195_spill] sm:$0xff]  ;;  %v3854_v44 = vpop.permute.xlu1 %3853 }
 0x3c5   :  { %4999 = vst [vmem:[%s10583_s5 + $0x24] sm:$0xff] %v5497_v8  ;;  %v10112_v9 = vmul.f32 %v3849_v4, %v11511_v3  ;;  %5000 = vst [vmem:[%s10583_s5 + $0x2c] sm:$0xff] %v5498_v33  ;;  %v10121_v45 = vmul.f32 %v3849_v4, %v11512_v16  ;;  %v10124_v11 = vmul.f32 %v3849_v4, %v11513_v56  ;;  %v11532_v57 = vld [vmem:[#allocation197_spill] sm:$0xff]  ;;  %v11533_v20 = vld [vmem:[#allocation198_spill] sm:$0xff] }
 0x3c6   :  { %5001 = vst [vmem:[%s10583_s5 + $0x34] sm:$0xff] %v5499_v40  ;;  %v10127_v18 = vmul.f32 %v3849_v4, %v11514_v51  ;;  %v10130_v26 = vmul.f32 %v3849_v4, %v11515_v22  ;;  %5002 = vst [vmem:[%s10583_s5 + $0x3c] sm:$0xff] %v5500_v46  ;;  %v10139_v62 = vmul.f32 %v3849_v4, %v11516_v38  ;;  %v11534_v25 = vld [vmem:[#allocation221_spill] sm:$0xff]  ;;  %v11535_v17 = vld [vmem:[#allocation227_spill] sm:$0xff] }
 0x3c7   :  { %5003 = vst [vmem:[%s10583_s5 + $0x44] sm:$0xf] %v5501_v29  ;;  %v10142_v24 = vmul.f32 %v3849_v4, %v11517_v34  ;;  %v10145_v31 = vmul.f32 %v3849_v4, %v11518_v0  ;;  %v10148_v19 = vmul.f32 %v3849_v4, %v11519_v5  ;;  %v10151_v27 = vmul.f32 %v3849_v4, %v11520_v50  ;;  %v11536_v58 = vld [vmem:[#allocation228_spill] sm:$0xff]  ;;  %v11540_v60 = vld [vmem:[#allocation261_spill] sm:$0xff]  ;;  %v11542_v51 = vld [vmem:[#allocation279_spill] sm:$0xff] }
 0x3c8   :  { %v10154_v42 = vmul.f32 %v3849_v4, %v11521_v35  ;;  %v10157_v63 = vmul.f32 %v3849_v4, %v11522_v47  ;;  %v10160_v2 = vmul.f32 %v3849_v4, %v11523_v49  ;;  %v10163_v37 = vmul.f32 %v3849_v4, %v11524_v30  ;;  %v11537_v33 = vld [vmem:[#allocation244_spill] sm:$0xff]  ;;  %v11543_v38 = vld [vmem:[#allocation281_spill] sm:$0xff]  ;;  %v11545_v50 = vld [vmem:[#allocation22_spill] sm:$0xff] }
 0x3c9   :  { %v10166_v15 = vmul.f32 %v3849_v4, %v11525_v10  ;;  %v10169_v52 = vmul.f32 %v3849_v4, %v11526_v53  ;;  %v10172_v61 = vmul.f32 %v3849_v4, %v11527_v13  ;;  %v10175_v12 = vmul.f32 %v3849_v4, %v11528_v55  ;;  %v11538_v7 = vld [vmem:[#allocation248_spill] sm:$0xff]  ;;  %v11544_v0 = vld [vmem:[#allocation21_spill] sm:$0xff]  ;;  %v11546_v47 = vld [vmem:[#allocation27_spill] sm:$0xff] }
 0x3ca   :  { %v10178_v6 = vmul.f32 %v3849_v4, %v11529_v39  ;;  %v10181_v54 = vmul.f32 %v3849_v4, %v11530_v1  ;;  %v10184_v36 = vmul.f32 %v3849_v4, %v11531_v23  ;;  %v10187_v21 = vmul.f32 %v3849_v4, %v11532_v57  ;;  %v11539_v46 = vld [vmem:[#allocation256_spill] sm:$0xff]  ;;  %v11547_v30 = vld [vmem:[#allocation30_spill] sm:$0xff]  ;;  %v11551_v23 = vld [vmem:[#allocation59_spill] sm:$0xff] }
 0x3cb   :  { %v10190_v32 = vmul.f32 %v3849_v4, %v11533_v20  ;;  %v10193_v41 = vmul.f32 %v3849_v4, %v11534_v25  ;;  %v10196_v48 = vmul.f32 %v3849_v4, %v11535_v17  ;;  %v10199_v8 = vmul.f32 %v3849_v4, %v11536_v58  ;;  %v11541_v16 = vld [vmem:[#allocation276_spill] sm:$0xff]  ;;  %v11548_v53 = vld [vmem:[#allocation54_spill] sm:$0xff]  ;;  %v11553_v17 = vld [vmem:[#allocation61_spill] sm:$0xff] }
 0x3cc   :  { %v10202_v40 = vmul.f32 %v3849_v4, %v11537_v33  ;;  %v10205_v43 = vmul.f32 %v3849_v4, %v11538_v7  ;;  %v10208_v29 = vmul.f32 %v3849_v4, %v11539_v46  ;;  %v10211_v3 = vmul.f32 %v3849_v4, %v11540_v60  ;;  %v11549_v55 = vld [vmem:[#allocation58_spill] sm:$0xff]  ;;  %v11552_v20 = vld [vmem:[#allocation84_spill] sm:$0xff]  ;;  %v11554_v33 = vld [vmem:[#allocation87_spill] sm:$0xff] }
 0x3cd   :  { %v10214_v56 = vmul.f32 %v3849_v4, %v11541_v16  ;;  %v10217_v22 = vmul.f32 %v3849_v4, %v11542_v51  ;;  %v10220_v34 = vmul.f32 %v3849_v4, %v11543_v38  ;;  %v10223_v5 = vmul.f32 %v3854_v44, %v11544_v0  ;;  %v11550_v4 = vld [vmem:[#allocation57_spill] sm:$0xff]  ;;  %v11555_v46 = vld [vmem:[#allocation104_spill] sm:$0xff]  ;;  %v11556_v16 = vld [vmem:[#allocation107_spill] sm:$0xff] }
 0x3ce   :  { %v10226_v35 = vmul.f32 %v3854_v44, %v11545_v50  ;;  %v10229_v49 = vmul.f32 %v3854_v44, %v11546_v47  ;;  %v10232_v10 = vmul.f32 %v3854_v44, %v11547_v30  ;;  %v10235_v13 = vmul.f32 %v3854_v44, %v11548_v53  ;;  %v11558_v38 = vld [vmem:[#allocation116_spill] sm:$0xff]  ;;  %v11560_v50 = vld [vmem:[#allocation117_spill] sm:$0xff]  ;;  %v11562_v30 = vld [vmem:[#allocation134_spill] sm:$0xff] }
 0x3cf   :  { %v10238_v39 = vmul.f32 %v3854_v44, %v11549_v55  ;;  %v10241_v1 = vmul.f32 %v3854_v44, %v11550_v4  ;;  %v10244_v57 = vmul.f32 %v3854_v44, %v11551_v23  ;;  %v10247_v25 = vmul.f32 %v3854_v44, %v11552_v20  ;;  %v11564_v55 = vld [vmem:[#allocation137_spill] sm:$0xff]  ;;  %v11566_v23 = vld [vmem:[#allocation140_spill] sm:$0xff] }
 0x3d0   :  { %v10250_v58 = vmul.f32 %v3854_v44, %v11553_v17  ;;  %v10253_v7 = vmul.f32 %v3854_v44, %v11554_v33  ;;  %v10256_v60 = vmul.f32 %v3854_v44, %v11555_v46  ;;  %v10259_v51 = vmul.f32 %v3854_v44, %v11556_v16  ;;  %v11568_v17 = vld [vmem:[#allocation164_spill] sm:$0xff]  ;;  %v11570_v46 = vld [vmem:[#allocation165_spill] sm:$0xff] }
 0x3d1   :  { %v10262_v0 = vmul.f32 %v3854_v44, %v11558_v38  ;;  %v10265_v47 = vmul.f32 %v3854_v44, %v11560_v50  ;;  %v10268_v53 = vmul.f32 %v3854_v44, %v11562_v30  ;;  %v10271_v4 = vmul.f32 %v3854_v44, %v11564_v55  ;;  %v11572_v38 = vld [vmem:[#allocation172_spill] sm:$0xff]  ;;  %v11574_v50 = vld [vmem:[#allocation173_spill] sm:$0xff] }
 0x3d2   :  { %11557 = vst [vmem:[#allocation183_spill] sm:$0xff] %v10259_v51  ;;  %v10274_v20 = vmul.f32 %v3854_v44, %v11566_v23  ;;  %v10277_v33 = vmul.f32 %v3854_v44, %v11568_v17  ;;  %v10280_v16 = vmul.f32 %v3854_v44, %v11570_v46  ;;  %v11576_v30 = vld [vmem:[#allocation196_spill] sm:$0xff]  ;;  %v11580_v23 = vld [vmem:[#allocation199_spill] sm:$0xff]  ;;  %v11582_v17 = vld [vmem:[#allocation201_spill] sm:$0xff] }
 0x3d3   :  { %11559 = vst [vmem:[#allocation185_spill] sm:$0xff] %v10262_v0  ;;  %11561 = vst [vmem:[#allocation187_spill] sm:$0xff] %v10265_v47  ;;  %v10283_v0 = vmul.f32 %v3854_v44, %v11572_v38  ;;  %v10286_v47 = vmul.f32 %v3854_v44, %v11574_v50  ;;  %v11578_v55 = vld [vmem:[#allocation200_spill] sm:$0xff]  ;;  %v11584_v46 = vld [vmem:[#allocation225_spill] sm:$0xff]  ;;  %v3961_v50 = vpop.permute.xlu0 %3960 }
 0x3d4   :  { %11563 = vst [vmem:[#allocation208_spill] sm:$0xff] %v10268_v53  ;;  %11565 = vst [vmem:[#allocation216_spill] sm:$0xff] %v10271_v4  ;;  %v10289_v53 = vmul.f32 %v3854_v44, %v11576_v30  ;;  %v10292_v4 = vmul.f32 %v3854_v44, %v11578_v55  ;;  %v11586_v38 = vld [vmem:[#allocation230_spill] sm:$0xff]  ;;  %v11590_v30 = vld [vmem:[#allocation249_spill] sm:$0xff] }
 0x3d5   :  { %11567 = vst [vmem:[#allocation217_spill] sm:$0xff] %v10274_v20  ;;  %11569 = vst [vmem:[#allocation229_spill] sm:$0xff] %v10277_v33  ;;  %v10295_v20 = vmul.f32 %v3854_v44, %v11580_v23  ;;  %v10298_v33 = vmul.f32 %v3854_v44, %v11582_v17  ;;  %v11592_v55 = vld [vmem:[#allocation251_spill] sm:$0xff]  ;;  %v11594_v23 = vld [vmem:[#allocation262_spill] sm:$0xff] }
 0x3d6   :  { %11571 = vst [vmem:[#allocation233_spill] sm:$0xff] %v10280_v16  ;;  %11573 = vst [vmem:[#allocation243_spill] sm:$0xff] %v10283_v0  ;;  %v10301_v16 = vmul.f32 %v3854_v44, %v11584_v46  ;;  %v10304_v0 = vmul.f32 %v3854_v44, %v11586_v38  ;;  %v11596_v17 = vld [vmem:[#allocation263_spill] sm:$0xff]  ;;  %v11598_v46 = vld [vmem:[#allocation278_spill] sm:$0xff] }
 0x3d7   :  { %11575 = vst [vmem:[#allocation247_spill] sm:$0xff] %v10286_v47  ;;  %11577 = vst [vmem:[#allocation266_spill] sm:$0xff] %v10289_v53  ;;  %v11588_v47 = vld [vmem:[#allocation231_spill] sm:$0xff]  ;;  %v10310_v53 = vmul.f32 %v3854_v44, %v11590_v30  ;;  %v11600_v38 = vld [vmem:[#allocation280_spill] sm:$0xff]  ;;  %v4014_v30 = vadd.f32 %v3961_v50, %v10100_v14  ;;  %v4159_v14 = vadd.f32 %v10145_v31, %v3961_v50 }
 0x3d8   :  { %11579 = vst [vmem:[#allocation268_spill] sm:$0xff] %v10292_v4  ;;  %11581 = vst [vmem:[#allocation11_spill] sm:$0xff] %v10295_v20  ;;  %v10307_v51 = vmul.f32 %v3854_v44, %v11588_v47  ;;  %v10313_v4 = vmul.f32 %v3854_v44, %v11592_v55  ;;  %v10316_v20 = vmul.f32 %v3854_v44, %v11594_v23  ;;  %v11602_v47 = vld [vmem:[#allocation283_spill] sm:$0xff] }
 0x3d9   :  { %11583 = vst [vmem:[#allocation12_spill] sm:$0xff] %v10298_v33  ;;  %11585 = vst [vmem:[#allocation18_spill] sm:$0xff] %v10301_v16  ;;  %v10319_v33 = vmul.f32 %v3854_v44, %v11596_v17  ;;  %v10322_v16 = vmul.f32 %v3854_v44, %v11598_v46  ;;  %v4015_v55 = vadd.f32 %v3961_v50, %v10103_v28 }
 0x3da   :  { %11587 = vst [vmem:[#allocation19_spill] sm:$0xff] %v10304_v0  ;;  %11589 = vst [vmem:[#allocation45_spill] sm:$0xff] %v10307_v51  ;;  %v10325_v0 = vmul.f32 %v3854_v44, %v11600_v38  ;;  %v10328_v51 = vmul.f32 %v3854_v44, %v11602_v47  ;;  %v4017_v23 = vadd.f32 %v3961_v50, %v10112_v9 }
 0x3db   :  { %11591 = vst [vmem:[#allocation51_spill] sm:$0xff] %v10310_v53  ;;  %11593 = vst [vmem:[#allocation49_spill] sm:$0xff] %v10313_v4  ;;  %v4016_v4 = vadd.f32 %v3961_v50, %v10109_v59  ;;  %v4018_v17 = vadd.f32 %v3961_v50, %v10121_v45  ;;  %v4020_v46 = vadd.f32 %v3961_v50, %v10127_v18 }
 0x3dc   :  { %11595 = vst [vmem:[#allocation52_spill] sm:$0xff] %v10316_v20  ;;  %11597 = vst [vmem:[#allocation71_spill] sm:$0xff] %v10319_v33  ;;  %v4019_v33 = vadd.f32 %v3961_v50, %v10124_v11  ;;  %v4021_v38 = vadd.f32 %v3961_v50, %v10130_v26  ;;  %v4158_v44 = vadd.f32 %v10142_v24, %v3961_v50 }
 0x3dd   :  { %11599 = vst [vmem:[#allocation82_spill] sm:$0xff] %v10322_v16  ;;  %11601 = vst [vmem:[#allocation83_spill] sm:$0xff] %v10325_v0  ;;  %v4022_v0 = vadd.f32 %v3961_v50, %v10139_v62  ;;  %v4160_v28 = vadd.f32 %v10148_v19, %v3961_v50  ;;  %v4161_v59 = vadd.f32 %v10151_v27, %v3961_v50 }
 0x3de   :  { %11603 = vst [vmem:[#allocation95_spill] sm:$0xff] %v10328_v51  ;;  %v4162_v9 = vadd.f32 %v10154_v42, %v3961_v50  ;;  %v4163_v45 = vadd.f32 %v10157_v63, %v3961_v50  ;;  %v4164_v11 = vadd.f32 %v10160_v2, %v3961_v50  ;;  %v4165_v18 = vadd.f32 %v10163_v37, %v3961_v50 }
 0x3df   :  { %v4166_v26 = vadd.f32 %v10166_v15, %v3961_v50  ;;  %v4230_v47 = vmax.f32 %v4014_v30, %v4158_v44  ;;  %v4231_v62 = vmax.f32 %v4015_v55, %v4159_v14  ;;  %v4232_v51 = vmax.f32 %v4016_v4, %v4160_v28 }
 0x3e0   :  { %v4233_v24 = vmax.f32 %v4017_v23, %v4161_v59  ;;  %v4234_v16 = vmax.f32 %v4018_v17, %v4162_v9  ;;  %v4235_v31 = vmax.f32 %v4019_v33, %v4163_v45  ;;  %v4236_v20 = vmax.f32 %v4020_v46, %v4164_v11 }
 0x3e1   :  { %v4237_v19 = vmax.f32 %v4021_v38, %v4165_v18  ;;  %v4238_v53 = vmax.f32 %v4022_v0, %v4166_v26  ;;  %v4374_v27 = vadd.f32 %v10169_v52, %v3961_v50  ;;  %v4375_v42 = vadd.f32 %v10172_v61, %v3961_v50 }
 0x3e2   :  { %v4376_v63 = vadd.f32 %v10175_v12, %v3961_v50  ;;  %v4377_v2 = vadd.f32 %v10178_v6, %v3961_v50  ;;  %v4378_v37 = vadd.f32 %v10181_v54, %v3961_v50  ;;  %v4379_v15 = vadd.f32 %v10184_v36, %v3961_v50 }
 0x3e3   :  { %v4380_v4 = vadd.f32 %v10187_v21, %v3961_v50  ;;  %v4381_v30 = vadd.f32 %v10190_v32, %v3961_v50  ;;  %v4382_v33 = vadd.f32 %v10193_v41, %v3961_v50  ;;  %v4518_v0 = vadd.f32 %v10196_v48, %v3961_v50 }
 0x3e4   :  { %v4519_v52 = vadd.f32 %v10199_v8, %v3961_v50  ;;  %v4520_v61 = vadd.f32 %v10202_v40, %v3961_v50  ;;  %v4521_v12 = vadd.f32 %v10205_v43, %v3961_v50  ;;  %v4522_v6 = vadd.f32 %v10208_v29, %v3961_v50 }
 0x3e5   :  { %v4523_v54 = vadd.f32 %v10211_v3, %v3961_v50  ;;  %v4524_v36 = vadd.f32 %v10214_v56, %v3961_v50  ;;  %v4525_v21 = vadd.f32 %v10217_v22, %v3961_v50  ;;  %v4526_v32 = vadd.f32 %v10220_v34, %v3961_v50  ;;  %v10366_v34 = vpop.permute.xlu1 %3965 }
 0x3e6   :  { %v4590_v55 = vmax.f32 %v4374_v27, %v4518_v0  ;;  %v4591_v41 = vmax.f32 %v4375_v42, %v4519_v52  ;;  %v4592_v23 = vmax.f32 %v4376_v63, %v4520_v61  ;;  %v4593_v48 = vmax.f32 %v4377_v2, %v4521_v12 }
 0x3e7   :  { %v4594_v17 = vmax.f32 %v4378_v37, %v4522_v6  ;;  %v4595_v8 = vmax.f32 %v4379_v15, %v4523_v54  ;;  %v4596_v46 = vmax.f32 %v4380_v4, %v4524_v36  ;;  %v4597_v40 = vmax.f32 %v4381_v30, %v4525_v21  ;;  %v11604_v37 = vld [vmem:[#allocation183_spill] sm:$0xff]  ;;  %v11605_v4 = vld [vmem:[#allocation185_spill] sm:$0xff] }
 0x3e8   :  { %v4598_v38 = vmax.f32 %v4382_v33, %v4526_v32  ;;  %v4662_v43 = vmax.f32 %v4230_v47, %v4590_v55  ;;  %v4663_v44 = vmax.f32 %v4231_v62, %v4591_v41  ;;  %v4664_v29 = vmax.f32 %v4232_v51, %v4592_v23  ;;  %v11610_v23 = vld [vmem:[#allocation229_spill] sm:$0xff] }
 0x3e9   :  { %v4665_v14 = vmax.f32 %v4233_v24, %v4593_v48  ;;  %v4666_v3 = vmax.f32 %v4234_v16, %v4594_v17  ;;  %v4667_v28 = vmax.f32 %v4235_v31, %v4595_v8  ;;  %v4668_v56 = vmax.f32 %v4236_v20, %v4596_v46  ;;  %v11611_v17 = vld [vmem:[#allocation233_spill] sm:$0xff]  ;;  %v11612_v46 = vld [vmem:[#allocation243_spill] sm:$0xff] }
 0x3ea   :  { %v4669_v59 = vmax.f32 %v4237_v19, %v4597_v40  ;;  %v4670_v22 = vmax.f32 %v4238_v53, %v4598_v38  ;;  %v4734_v9 = vmax.f32 %v4662_v43, 0.0  ;;  %v4735_v50 = vmax.f32 %v4663_v44, 0.0  ;;  %v11613_v38 = vld [vmem:[#allocation247_spill] sm:$0xff]  ;;  %v11614_v44 = vld [vmem:[#allocation266_spill] sm:$0xff] }
 0x3eb   :  { %v4736_v45 = vmax.f32 %v4664_v29, 0.0  ;;  %v4737_v11 = vmax.f32 %v4665_v14, 0.0  ;;  %v4738_v18 = vmax.f32 %v4666_v3, 0.0  ;;  %v4739_v26 = vmax.f32 %v4667_v28, 0.0  ;;  %v11615_v14 = vld [vmem:[#allocation268_spill] sm:$0xff]  ;;  %v11616_v28 = vld [vmem:[#allocation11_spill] sm:$0xff] }
 0x3ec   :  { %v4740_v27 = vmax.f32 %v4668_v56, 0.0  ;;  %v4741_v42 = vmax.f32 %v4669_v59, 0.0  ;;  %v4742_v63 = vmax.f32 %v4670_v22, 0.0  ;;  %v5512_v47 = vpack.c.bf16 %v4735_v50, %v4734_v9  ;;  %v11617_v59 = vld [vmem:[#allocation12_spill] sm:$0xff]  ;;  %v11618_v9 = vld [vmem:[#allocation18_spill] sm:$0xff] }
 0x3ed   :  { %v5513_v62 = vpack.c.bf16 %v4737_v11, %v4736_v45  ;;  %v10370_v51 = vadd.f32 %v10366_v34, %v10223_v5  ;;  %v10374_v53 = vadd.f32 %v10366_v34, %v10226_v35  ;;  %v5514_v20 = vpack.c.bf16 %v4739_v26, %v4738_v18  ;;  %v11619_v45 = vld [vmem:[#allocation19_spill] sm:$0xff]  ;;  %v11620_v18 = vld [vmem:[#allocation45_spill] sm:$0xff] }
 0x3ee   :  { %v5515_v16 = vpack.c.bf16 %v4741_v42, %v4740_v27  ;;  %v5516_v24 = vpack.c.bf16 %v4742_v63, %v4742_v63  ;;  %v4025_v31 = vadd.f32 %v10366_v34, %v10229_v49  ;;  %5014 = vst [vmem:[%s10583_s5 + $0x90] sm:$0xff] %v5512_v47  ;;  %v4026_v5 = vadd.f32 %v10366_v34, %v10232_v10  ;;  %v11621_v27 = vld [vmem:[#allocation51_spill] sm:$0xff]  ;;  %v11622_v63 = vld [vmem:[#allocation49_spill] sm:$0xff] }
 0x3ef   :  { %5015 = vst [vmem:[%s10583_s5 + $0x98] sm:$0xff] %v5513_v62  ;;  %v4027_v35 = vadd.f32 %v10366_v34, %v10235_v13  ;;  %v4028_v19 = vadd.f32 %v10366_v34, %v10238_v39  ;;  %v4029_v49 = vadd.f32 %v10366_v34, %v10241_v1  ;;  %5016 = vst [vmem:[%s10583_s5 + $0xa0] sm:$0xff] %v5514_v20  ;;  %v11623_v62 = vld [vmem:[#allocation52_spill] sm:$0xff] }
 0x3f0   :  { %5017 = vst [vmem:[%s10583_s5 + $0xa8] sm:$0xff] %v5515_v16  ;;  %5018 = vst [vmem:[%s10583_s5 + $0xb0] sm:$0xf] %v5516_v24  ;;  %v4030_v10 = vadd.f32 %v10366_v34, %v10244_v57  ;;  %v4031_v13 = vadd.f32 %v10366_v34, %v10247_v25  ;;  %v4167_v39 = vadd.f32 %v10250_v58, %v10366_v34  ;;  %v11606_v57 = vld [vmem:[#allocation187_spill] sm:$0xff]  ;;  %v11607_v25 = vld [vmem:[#allocation208_spill] sm:$0xff] }
 0x3f1   :  { %v4168_v1 = vadd.f32 %v10253_v7, %v10366_v34  ;;  %v4169_v2 = vadd.f32 %v10256_v60, %v10366_v34  ;;  %v4170_v15 = vadd.f32 %v11604_v37, %v10366_v34  ;;  %v4171_v30 = vadd.f32 %v11605_v4, %v10366_v34  ;;  %v11608_v58 = vld [vmem:[#allocation216_spill] sm:$0xff]  ;;  %v11609_v7 = vld [vmem:[#allocation217_spill] sm:$0xff]  ;;  %v11625_v16 = vld [vmem:[#allocation82_spill] sm:$0xff] }
 0x3f2   :  { %v4172_v33 = vadd.f32 %v11606_v57, %v10366_v34  ;;  %v4173_v0 = vadd.f32 %v11607_v25, %v10366_v34  ;;  %v4174_v52 = vadd.f32 %v11608_v58, %v10366_v34  ;;  %v4175_v61 = vadd.f32 %v11609_v7, %v10366_v34 }
 0x3f3   :  { %v4239_v60 = vmax.f32 %v10370_v51, %v4167_v39  ;;  %v4240_v12 = vmax.f32 %v10374_v53, %v4168_v1  ;;  %v4241_v6 = vmax.f32 %v4025_v31, %v4169_v2  ;;  %v4242_v54 = vmax.f32 %v4026_v5, %v4170_v15  ;;  %v11624_v53 = vld [vmem:[#allocation71_spill] sm:$0xff] }
 0x3f4   :  { %v4243_v36 = vmax.f32 %v4027_v35, %v4171_v30  ;;  %v4244_v21 = vmax.f32 %v4028_v19, %v4172_v33  ;;  %v4245_v32 = vmax.f32 %v4029_v49, %v4173_v0  ;;  %v4246_v55 = vmax.f32 %v4030_v10, %v4174_v52  ;;  %v11626_v31 = vld [vmem:[#allocation83_spill] sm:$0xff] }
 0x3f5   :  { %v4247_v41 = vmax.f32 %v4031_v13, %v4175_v61  ;;  %v4383_v48 = vadd.f32 %v11610_v23, %v10366_v34  ;;  %v4384_v8 = vadd.f32 %v11611_v17, %v10366_v34  ;;  %v4385_v40 = vadd.f32 %v11612_v46, %v10366_v34  ;;  %v11627_v35 = vld [vmem:[#allocation95_spill] sm:$0xff]  ;;  %v3859_v23 = vpop.permute.xlu0 %3858 }
 0x3f6   :  { %v4386_v43 = vadd.f32 %v11613_v38, %v10366_v34  ;;  %v4387_v29 = vadd.f32 %v11614_v44, %v10366_v34  ;;  %v4388_v3 = vadd.f32 %v11615_v14, %v10366_v34  ;;  %v4389_v56 = vadd.f32 %v11616_v28, %v10366_v34 }
 0x3f7   :  { %v4390_v22 = vadd.f32 %v11617_v59, %v10366_v34  ;;  %v4391_v50 = vadd.f32 %v11618_v9, %v10366_v34  ;;  %v4527_v11 = vadd.f32 %v11619_v45, %v10366_v34  ;;  %v4528_v26 = vadd.f32 %v11620_v18, %v10366_v34 }
 0x3f8   :  { %v4529_v42 = vadd.f32 %v11621_v27, %v10366_v34  ;;  %v4530_v47 = vadd.f32 %v11622_v63, %v10366_v34  ;;  %v4531_v51 = vadd.f32 %v11623_v62, %v10366_v34  ;;  %v4532_v20 = vadd.f32 %v11624_v53, %v10366_v34 }
 0x3f9   :  { %v4533_v24 = vadd.f32 %v11625_v16, %v10366_v34  ;;  %v4534_v5 = vadd.f32 %v11626_v31, %v10366_v34  ;;  %v4535_v19 = vadd.f32 %v11627_v35, %v10366_v34  ;;  %v4599_v49 = vmax.f32 %v4383_v48, %v4527_v11  ;;  %v11635_v11 = vld [vmem:[#allocation68_spill] sm:$0xff] }
 0x3fa   :  { %v4600_v10 = vmax.f32 %v4384_v8, %v4528_v26  ;;  %v4601_v13 = vmax.f32 %v4385_v40, %v4529_v42  ;;  %v4602_v39 = vmax.f32 %v4386_v43, %v4530_v47  ;;  %v4603_v1 = vmax.f32 %v4387_v29, %v4531_v51  ;;  %v11636_v26 = vld [vmem:[#allocation77_spill] sm:$0xff]  ;;  %v11637_v42 = vld [vmem:[#allocation91_spill] sm:$0xff]  ;;  %v11638_v47 = vld [vmem:[#allocation92_spill] sm:$0xff] }
 0x3fb   :  { %v4604_v2 = vmax.f32 %v4388_v3, %v4532_v20  ;;  %v4605_v37 = vmax.f32 %v4389_v56, %v4533_v24  ;;  %v4606_v15 = vmax.f32 %v4390_v22, %v4534_v5  ;;  %v4607_v4 = vmax.f32 %v4391_v50, %v4535_v19  ;;  %v11631_v3 = vld [vmem:[#allocation33_spill] sm:$0xff]  ;;  %v11632_v56 = vld [vmem:[#allocation20_spill] sm:$0xff]  ;;  %v11634_v50 = vld [vmem:[#allocation66_spill] sm:$0xff] }
 0x3fc   :  { %v4671_v30 = vmax.f32 %v4239_v60, %v4599_v49  ;;  %v4672_v57 = vmax.f32 %v4240_v12, %v4600_v10  ;;  %v4673_v33 = vmax.f32 %v4241_v6, %v4601_v13  ;;  %v4674_v25 = vmax.f32 %v4242_v54, %v4602_v39  ;;  %v11628_v12 = vld [vmem:[#allocation23_spill] sm:$0xff]  ;;  %v11633_v22 = vld [vmem:[#allocation64_spill] sm:$0xff]  ;;  %v11644_v10 = vld [vmem:[#allocation142_spill] sm:$0xff] }
 0x3fd   :  { %v4675_v0 = vmax.f32 %v4243_v36, %v4603_v1  ;;  %v4676_v58 = vmax.f32 %v4244_v21, %v4604_v2  ;;  %v4677_v52 = vmax.f32 %v4245_v32, %v4605_v37  ;;  %v4678_v7 = vmax.f32 %v4246_v55, %v4606_v15  ;;  %v11629_v21 = vld [vmem:[#allocation24_spill] sm:$0xff]  ;;  %v11630_v55 = vld [vmem:[#allocation31_spill] sm:$0xff] }
 0x3fe   :  { %v4679_v61 = vmax.f32 %v4247_v41, %v4607_v4  ;;  %v4743_v34 = vmax.f32 %v4671_v30, 0.0  ;;  %v4744_v48 = vmax.f32 %v4672_v57, 0.0  ;;  %v4745_v17 = vmax.f32 %v4673_v33, 0.0  ;;  %v11639_v51 = vld [vmem:[#allocation108_spill] sm:$0xff]  ;;  %v11641_v24 = vld [vmem:[#allocation127_spill] sm:$0xff]  ;;  %v11648_v30 = vld [vmem:[#allocation174_spill] sm:$0xff] }
 0x3ff   :  { %v4746_v8 = vmax.f32 %v4674_v25, 0.0  ;;  %v4747_v46 = vmax.f32 %v4675_v0, 0.0  ;;  %v4748_v40 = vmax.f32 %v4676_v58, 0.0  ;;  %v4749_v38 = vmax.f32 %v4677_v52, 0.0  ;;  %v11640_v20 = vld [vmem:[#allocation112_spill] sm:$0xff]  ;;  %v11642_v5 = vld [vmem:[#allocation131_spill] sm:$0xff] }
 0x400   :  { %v4750_v43 = vmax.f32 %v4678_v7, 0.0  ;;  %v4751_v44 = vmax.f32 %v4679_v61, 0.0  ;;  %v5517_v29 = vpack.c.bf16 %v4744_v48, %v4743_v34  ;;  %v3920_v6 = vmul.f32 %v3859_v23, %v11628_v12  ;;  %v11643_v19 = vld [vmem:[#allocation139_spill] sm:$0xff]  ;;  %v11645_v39 = vld [vmem:[#allocation144_spill] sm:$0xff]  ;;  %v11650_v0 = vld [vmem:[#allocation202_spill] sm:$0xff] }
 0x401   :  { %v5518_v60 = vpack.c.bf16 %v4746_v8, %v4745_v17  ;;  %v5519_v54 = vpack.c.bf16 %v4748_v40, %v4747_v46  ;;  %v3921_v32 = vmul.f32 %v3859_v23, %v11629_v21  ;;  %v3922_v41 = vmul.f32 %v3859_v23, %v11630_v55  ;;  %v11646_v2 = vld [vmem:[#allocation167_spill] sm:$0xff]  ;;  %v11647_v15 = vld [vmem:[#allocation168_spill] sm:$0xff]  ;;  %v11652_v61 = vld [vmem:[#allocation210_spill] sm:$0xff]  ;;  %v3971_v8 = vpop.permute.xlu0 %3970 }
 0x402   :  { %v5520_v36 = vpack.c.bf16 %v4750_v43, %v4749_v38  ;;  %v5521_v14 = vpack.c.bf16 %v4751_v44, %v4751_v44  ;;  %5019 = vst [vmem:[%s10583_s5 + $0xb4] sm:$0xff] %v5517_v29  ;;  %v3923_v28 = vmul.f32 %v3859_v23, %v11631_v3  ;;  %v3924_v59 = vmul.f32 %v3859_v23, %v11632_v56  ;;  %v11649_v33 = vld [vmem:[#allocation176_spill] sm:$0xff]  ;;  %v11651_v52 = vld [vmem:[#allocation207_spill] sm:$0xff]  ;;  %v11654_v46 = vld [vmem:[#allocation218_spill] sm:$0xff] }
 0x403   :  { %5020 = vst [vmem:[%s10583_s5 + $0xbc] sm:$0xff] %v5518_v60  ;;  %v3925_v9 = vmul.f32 %v3859_v23, %v11633_v22  ;;  %5021 = vst [vmem:[%s10583_s5 + $0xc4] sm:$0xff] %v5519_v54  ;;  %v3926_v45 = vmul.f32 %v3859_v23, %v11634_v50  ;;  %v3927_v18 = vmul.f32 %v3859_v23, %v11635_v11  ;;  %v11653_v48 = vld [vmem:[#allocation211_spill] sm:$0xff]  ;;  %v11655_v38 = vld [vmem:[#allocation234_spill] sm:$0xff] }
 0x404   :  { %5022 = vst [vmem:[%s10583_s5 + $0xcc] sm:$0xff] %v5520_v36  ;;  %v3928_v27 = vmul.f32 %v3859_v23, %v11636_v26  ;;  %v4104_v63 = vmul.f32 %v3859_v23, %v11637_v42  ;;  %5023 = vst [vmem:[%s10583_s5 + $0xd4] sm:$0xf] %v5521_v14  ;;  %v4105_v62 = vmul.f32 %v3859_v23, %v11638_v47  ;;  %v11656_v44 = vld [vmem:[#allocation235_spill] sm:$0xff]  ;;  %v11657_v60 = vld [vmem:[#allocation253_spill] sm:$0xff] }
 0x405   :  { %v4106_v53 = vmul.f32 %v3859_v23, %v11639_v51  ;;  %v4107_v16 = vmul.f32 %v3859_v23, %v11640_v20  ;;  %v4108_v31 = vmul.f32 %v3859_v23, %v11641_v24  ;;  %v4109_v35 = vmul.f32 %v3859_v23, %v11642_v5  ;;  %v11658_v54 = vld [vmem:[#allocation258_spill] sm:$0xff]  ;;  %v11659_v21 = vld [vmem:[#allocation272_spill] sm:$0xff]  ;;  %v11662_v50 = vld [vmem:[#allocation285_spill] sm:$0xff] }
 0x406   :  { %v4110_v49 = vmul.f32 %v3859_v23, %v11643_v19  ;;  %v4111_v13 = vmul.f32 %v3859_v23, %v11644_v10  ;;  %v4112_v1 = vmul.f32 %v3859_v23, %v11645_v39  ;;  %v4320_v37 = vmul.f32 %v3859_v23, %v11646_v2  ;;  %v11660_v14 = vld [vmem:[#allocation274_spill] sm:$0xff]  ;;  %v11663_v26 = vld [vmem:[#allocation287_spill] sm:$0xff] }
 0x407   :  { %v4321_v4 = vmul.f32 %v3859_v23, %v11647_v15  ;;  %v4322_v57 = vmul.f32 %v3859_v23, %v11648_v30  ;;  %v4323_v25 = vmul.f32 %v3859_v23, %v11649_v33  ;;  %v4324_v58 = vmul.f32 %v3859_v23, %v11650_v0  ;;  %v11661_v56 = vld [vmem:[#allocation282_spill] sm:$0xff] }
 0x408   :  { %v4325_v7 = vmul.f32 %v3859_v23, %v11651_v52  ;;  %v4326_v34 = vmul.f32 %v3859_v23, %v11652_v61  ;;  %v4327_v17 = vmul.f32 %v3859_v23, %v11653_v48  ;;  %v4328_v40 = vmul.f32 %v3859_v23, %v11654_v46 }
 0x409   :  { %v4464_v43 = vmul.f32 %v3859_v23, %v11655_v38  ;;  %v4465_v29 = vmul.f32 %v3859_v23, %v11656_v44  ;;  %v4466_v12 = vmul.f32 %v3859_v23, %v11657_v60  ;;  %v4467_v36 = vmul.f32 %v3859_v23, %v11658_v54 }
 0x40a   :  { %v4468_v55 = vmul.f32 %v3859_v23, %v11659_v21  ;;  %v4469_v3 = vmul.f32 %v3859_v23, %v11660_v14  ;;  %v4470_v22 = vmul.f32 %v3859_v23, %v11661_v56  ;;  %v4471_v11 = vmul.f32 %v3859_v23, %v11662_v50 }
 0x40b   :  { %v4472_v42 = vmul.f32 %v3859_v23, %v11663_v26  ;;  %v4032_v47 = vadd.f32 %v3971_v8, %v3920_v6  ;;  %v4033_v51 = vadd.f32 %v3971_v8, %v3921_v32  ;;  %v4034_v20 = vadd.f32 %v3971_v8, %v3922_v41 }
 0x40c   :  { %v4035_v24 = vadd.f32 %v3971_v8, %v3923_v28  ;;  %v4036_v5 = vadd.f32 %v3971_v8, %v3924_v59  ;;  %v4037_v19 = vadd.f32 %v3971_v8, %v3925_v9  ;;  %v4038_v10 = vadd.f32 %v3971_v8, %v3926_v45 }
 0x40d   :  { %v4039_v39 = vadd.f32 %v3971_v8, %v3927_v18  ;;  %v4040_v2 = vadd.f32 %v3971_v8, %v3928_v27  ;;  %v4176_v15 = vadd.f32 %v4104_v63, %v3971_v8  ;;  %v4177_v30 = vadd.f32 %v4105_v62, %v3971_v8 }
 0x40e   :  { %v4178_v33 = vadd.f32 %v4106_v53, %v3971_v8  ;;  %v4179_v0 = vadd.f32 %v4107_v16, %v3971_v8  ;;  %v4180_v52 = vadd.f32 %v4108_v31, %v3971_v8  ;;  %v4181_v61 = vadd.f32 %v4109_v35, %v3971_v8 }
 0x40f   :  { %v4182_v48 = vadd.f32 %v4110_v49, %v3971_v8  ;;  %v4183_v46 = vadd.f32 %v4111_v13, %v3971_v8  ;;  %v4184_v38 = vadd.f32 %v4112_v1, %v3971_v8  ;;  %v4248_v44 = vmax.f32 %v4032_v47, %v4176_v15 }
 0x410   :  { %v4249_v23 = vmax.f32 %v4033_v51, %v4177_v30  ;;  %v4250_v6 = vmax.f32 %v4034_v20, %v4178_v33  ;;  %v4251_v32 = vmax.f32 %v4035_v24, %v4179_v0  ;;  %v4252_v41 = vmax.f32 %v4036_v5, %v4180_v52  ;;  %v11664_v30 = vld [vmem:[#allocation28_spill] sm:$0xff] }
 0x411   :  { %v4253_v28 = vmax.f32 %v4037_v19, %v4181_v61  ;;  %v4254_v59 = vmax.f32 %v4038_v10, %v4182_v48  ;;  %v4255_v9 = vmax.f32 %v4039_v39, %v4183_v46  ;;  %v4256_v45 = vmax.f32 %v4040_v2, %v4184_v38  ;;  %v11665_v61 = vld [vmem:[#allocation29_spill] sm:$0xff]  ;;  %v11666_v46 = vld [vmem:[#allocation34_spill] sm:$0xff] }
 0x412   :  { %v4392_v18 = vadd.f32 %v4320_v37, %v3971_v8  ;;  %v4393_v27 = vadd.f32 %v4321_v4, %v3971_v8  ;;  %v4394_v63 = vadd.f32 %v4322_v57, %v3971_v8  ;;  %v4395_v62 = vadd.f32 %v4323_v25, %v3971_v8 }
 0x413   :  { %v4396_v53 = vadd.f32 %v4324_v58, %v3971_v8  ;;  %v4397_v16 = vadd.f32 %v4325_v7, %v3971_v8  ;;  %v4398_v31 = vadd.f32 %v4326_v34, %v3971_v8  ;;  %v4399_v35 = vadd.f32 %v4327_v17, %v3971_v8 }
 0x414   :  { %v4400_v49 = vadd.f32 %v4328_v40, %v3971_v8  ;;  %v4536_v13 = vadd.f32 %v4464_v43, %v3971_v8  ;;  %v4537_v1 = vadd.f32 %v4465_v29, %v3971_v8  ;;  %v4538_v60 = vadd.f32 %v4466_v12, %v3971_v8  ;;  %v3864_v12 = vpop.permute.xlu1 %3863 }
 0x415   :  { %v4539_v54 = vadd.f32 %v4467_v36, %v3971_v8  ;;  %v4540_v21 = vadd.f32 %v4468_v55, %v3971_v8  ;;  %v4541_v14 = vadd.f32 %v4469_v3, %v3971_v8  ;;  %v4542_v56 = vadd.f32 %v4470_v22, %v3971_v8 }
 0x416   :  { %v4543_v50 = vadd.f32 %v4471_v11, %v3971_v8  ;;  %v4544_v26 = vadd.f32 %v4472_v42, %v3971_v8  ;;  %v4608_v47 = vmax.f32 %v4392_v18, %v4536_v13  ;;  %v4609_v51 = vmax.f32 %v4393_v27, %v4537_v1  ;;  %v11671_v27 = vld [vmem:[#allocation73_spill] sm:$0xff] }
 0x417   :  { %v4610_v37 = vmax.f32 %v4394_v63, %v4538_v60  ;;  %v4611_v4 = vmax.f32 %v4395_v62, %v4539_v54  ;;  %v4612_v57 = vmax.f32 %v4396_v53, %v4540_v21  ;;  %v4613_v25 = vmax.f32 %v4397_v16, %v4541_v14  ;;  %v11672_v62 = vld [vmem:[#allocation81_spill] sm:$0xff]  ;;  %v11676_v60 = vld [vmem:[#allocation114_spill] sm:$0xff]  ;;  %v11677_v21 = vld [vmem:[#allocation132_spill] sm:$0xff] }
 0x418   :  { %v4614_v58 = vmax.f32 %v4398_v31, %v4542_v56  ;;  %v4615_v7 = vmax.f32 %v4399_v35, %v4543_v50  ;;  %v4616_v34 = vmax.f32 %v4400_v49, %v4544_v26  ;;  %v4680_v17 = vmax.f32 %v4248_v44, %v4608_v47  ;;  %v11673_v16 = vld [vmem:[#allocation93_spill] sm:$0xff]  ;;  %v11674_v35 = vld [vmem:[#allocation94_spill] sm:$0xff]  ;;  %v11678_v56 = vld [vmem:[#allocation135_spill] sm:$0xff] }
 0x419   :  { %v4681_v40 = vmax.f32 %v4249_v23, %v4609_v51  ;;  %v4682_v43 = vmax.f32 %v4250_v6, %v4610_v37  ;;  %v4683_v29 = vmax.f32 %v4251_v32, %v4611_v4  ;;  %v4684_v36 = vmax.f32 %v4252_v41, %v4612_v57  ;;  %v11667_v6 = vld [vmem:[#allocation35_spill] sm:$0xff]  ;;  %v11675_v13 = vld [vmem:[#allocation109_spill] sm:$0xff] }
 0x41a   :  { %v4685_v55 = vmax.f32 %v4253_v28, %v4613_v25  ;;  %v4686_v3 = vmax.f32 %v4254_v59, %v4614_v58  ;;  %v4687_v22 = vmax.f32 %v4255_v9, %v4615_v7  ;;  %v4688_v11 = vmax.f32 %v4256_v45, %v4616_v34  ;;  %v11668_v41 = vld [vmem:[#allocation67_spill] sm:$0xff]  ;;  %v11669_v59 = vld [vmem:[#allocation72_spill] sm:$0xff]  ;;  %v11670_v45 = vld [vmem:[#allocation69_spill] sm:$0xff] }
 0x41b   :  { %v4752_v8 = vmax.f32 %v4680_v17, 0.0  ;;  %v4753_v42 = vmax.f32 %v4681_v40, 0.0  ;;  %v4754_v20 = vmax.f32 %v4682_v43, 0.0  ;;  %v4755_v24 = vmax.f32 %v4683_v29, 0.0  ;;  %v11679_v26 = vld [vmem:[#allocation141_spill] sm:$0xff]  ;;  %v11680_v51 = vld [vmem:[#allocation143_spill] sm:$0xff] }
 0x41c   :  { %v4756_v5 = vmax.f32 %v4684_v36, 0.0  ;;  %v4757_v19 = vmax.f32 %v4685_v55, 0.0  ;;  %v4758_v10 = vmax.f32 %v4686_v3, 0.0  ;;  %v4759_v39 = vmax.f32 %v4687_v22, 0.0  ;;  %v11681_v4 = vld [vmem:[#allocation145_spill] sm:$0xff]  ;;  %v11682_v25 = vld [vmem:[#allocation170_spill] sm:$0xff] }
 0x41d   :  { %v4760_v2 = vmax.f32 %v4688_v11, 0.0  ;;  %v5522_v15 = vpack.c.bf16 %v4753_v42, %v4752_v8  ;;  %v3929_v33 = vmul.f32 %v3864_v12, %v11664_v30  ;;  %v5523_v0 = vpack.c.bf16 %v4755_v24, %v4754_v20  ;;  %v11683_v7 = vld [vmem:[#allocation171_spill] sm:$0xff]  ;;  %v11684_v17 = vld [vmem:[#allocation177_spill] sm:$0xff]  ;;  %v11685_v43 = vld [vmem:[#allocation180_spill] sm:$0xff]  ;;  %v3976_v42 = vpop.permute.xlu1 %3975 }
 0x41e   :  { %v5524_v52 = vpack.c.bf16 %v4757_v19, %v4756_v5  ;;  %v3930_v48 = vmul.f32 %v3864_v12, %v11665_v61  ;;  %v3931_v38 = vmul.f32 %v3864_v12, %v11666_v46  ;;  %v5525_v44 = vpack.c.bf16 %v4759_v39, %v4758_v10  ;;  %v11686_v36 = vld [vmem:[#allocation204_spill] sm:$0xff]  ;;  %v11687_v3 = vld [vmem:[#allocation209_spill] sm:$0xff]  ;;  %v11690_v5 = vld [vmem:[#allocation219_spill] sm:$0xff] }
 0x41f   :  { %v5526_v23 = vpack.c.bf16 %v4760_v2, %v4760_v2  ;;  %5024 = vst [vmem:[%s10583_s5 + $0xd8] sm:$0xff] %v5522_v15  ;;  %v3932_v32 = vmul.f32 %v3864_v12, %v11667_v6  ;;  %v3933_v28 = vmul.f32 %v3864_v12, %v11668_v41  ;;  %5025 = vst [vmem:[%s10583_s5 + $0xe0] sm:$0xff] %v5523_v0  ;;  %v11688_v11 = vld [vmem:[#allocation212_spill] sm:$0xff]  ;;  %v11689_v20 = vld [vmem:[#allocation213_spill] sm:$0xff] }
 0x420   :  { %5026 = vst [vmem:[%s10583_s5 + $0xe8] sm:$0xff] %v5524_v52  ;;  %v3934_v9 = vmul.f32 %v3864_v12, %v11669_v59  ;;  %v3935_v18 = vmul.f32 %v3864_v12, %v11670_v45  ;;  %v3936_v63 = vmul.f32 %v3864_v12, %v11671_v27  ;;  %v3937_v53 = vmul.f32 %v3864_v12, %v11672_v62  ;;  %v11691_v10 = vld [vmem:[#allocation238_spill] sm:$0xff]  ;;  %v11692_v2 = vld [vmem:[#allocation239_spill] sm:$0xff]  ;;  %v11697_v41 = vld [vmem:[#allocation284_spill] sm:$0xff] }
 0x421   :  { %5027 = vst [vmem:[%s10583_s5 + $0xf0] sm:$0xff] %v5525_v44  ;;  %5028 = vst [vmem:[%s10583_s5 + $0xf8] sm:$0xf] %v5526_v23  ;;  %v4113_v31 = vmul.f32 %v3864_v12, %v11673_v16  ;;  %v4114_v49 = vmul.f32 %v3864_v12, %v11674_v35  ;;  %v4115_v1 = vmul.f32 %v3864_v12, %v11675_v13  ;;  %v11693_v30 = vld [vmem:[#allocation254_spill] sm:$0xff]  ;;  %v11694_v52 = vld [vmem:[#allocation259_spill] sm:$0xff] }
 0x422   :  { %v4116_v54 = vmul.f32 %v3864_v12, %v11676_v60  ;;  %v4117_v14 = vmul.f32 %v3864_v12, %v11677_v21  ;;  %v4118_v50 = vmul.f32 %v3864_v12, %v11678_v56  ;;  %v4119_v47 = vmul.f32 %v3864_v12, %v11679_v26  ;;  %v11695_v46 = vld [vmem:[#allocation275_spill] sm:$0xff]  ;;  %v11696_v23 = vld [vmem:[#allocation277_spill] sm:$0xff]  ;;  %v11698_v45 = vld [vmem:[#allocation286_spill] sm:$0xff] }
 0x423   :  { %v4120_v37 = vmul.f32 %v3864_v12, %v11680_v51  ;;  %v4121_v57 = vmul.f32 %v3864_v12, %v11681_v4  ;;  %v4329_v58 = vmul.f32 %v3864_v12, %v11682_v25  ;;  %v4330_v34 = vmul.f32 %v3864_v12, %v11683_v7  ;;  %v11699_v62 = vld [vmem:[#allocation288_spill] sm:$0xff] }
 0x424   :  { %v4331_v40 = vmul.f32 %v3864_v12, %v11684_v17  ;;  %v4332_v29 = vmul.f32 %v3864_v12, %v11685_v43  ;;  %v4333_v55 = vmul.f32 %v3864_v12, %v11686_v36  ;;  %v4334_v22 = vmul.f32 %v3864_v12, %v11687_v3 }
 0x425   :  { %v4335_v8 = vmul.f32 %v3864_v12, %v11688_v11  ;;  %v4336_v24 = vmul.f32 %v3864_v12, %v11689_v20  ;;  %v4337_v19 = vmul.f32 %v3864_v12, %v11690_v5  ;;  %v4473_v39 = vmul.f32 %v3864_v12, %v11691_v10 }
 0x426   :  { %v4474_v15 = vmul.f32 %v3864_v12, %v11692_v2  ;;  %v4475_v0 = vmul.f32 %v3864_v12, %v11693_v30  ;;  %v4476_v61 = vmul.f32 %v3864_v12, %v11694_v52  ;;  %v4477_v44 = vmul.f32 %v3864_v12, %v11695_v46 }
 0x427   :  { %v4478_v6 = vmul.f32 %v3864_v12, %v11696_v23  ;;  %v4479_v59 = vmul.f32 %v3864_v12, %v11697_v41  ;;  %v4480_v27 = vmul.f32 %v3864_v12, %v11698_v45  ;;  %v4481_v16 = vmul.f32 %v3864_v12, %v11699_v62 }
 0x428   :  { %v4041_v35 = vadd.f32 %v3976_v42, %v3929_v33  ;;  %v4042_v13 = vadd.f32 %v3976_v42, %v3930_v48  ;;  %v4043_v60 = vadd.f32 %v3976_v42, %v3931_v38  ;;  %v4044_v21 = vadd.f32 %v3976_v42, %v3932_v32 }
 0x429   :  { %v4045_v56 = vadd.f32 %v3976_v42, %v3933_v28  ;;  %v4046_v26 = vadd.f32 %v3976_v42, %v3934_v9  ;;  %v4047_v51 = vadd.f32 %v3976_v42, %v3935_v18  ;;  %v4048_v4 = vadd.f32 %v3976_v42, %v3936_v63 }
 0x42a   :  { %v4049_v25 = vadd.f32 %v3976_v42, %v3937_v53  ;;  %v4185_v7 = vadd.f32 %v4113_v31, %v3976_v42  ;;  %v4186_v17 = vadd.f32 %v4114_v49, %v3976_v42  ;;  %v4187_v43 = vadd.f32 %v4115_v1, %v3976_v42 }
 0x42b   :  { %v4188_v36 = vadd.f32 %v4116_v54, %v3976_v42  ;;  %v4189_v3 = vadd.f32 %v4117_v14, %v3976_v42  ;;  %v4190_v11 = vadd.f32 %v4118_v50, %v3976_v42  ;;  %v4191_v20 = vadd.f32 %v4119_v47, %v3976_v42 }
 0x42c   :  { %v4192_v5 = vadd.f32 %v4120_v37, %v3976_v42  ;;  %v4193_v10 = vadd.f32 %v4121_v57, %v3976_v42  ;;  %v4257_v2 = vmax.f32 %v4041_v35, %v4185_v7  ;;  %v4258_v12 = vmax.f32 %v4042_v13, %v4186_v17 }
 0x42d   :  { %v4259_v33 = vmax.f32 %v4043_v60, %v4187_v43  ;;  %v4260_v48 = vmax.f32 %v4044_v21, %v4188_v36  ;;  %v4261_v38 = vmax.f32 %v4045_v56, %v4189_v3  ;;  %v4262_v32 = vmax.f32 %v4046_v26, %v4190_v11 }
 0x42e   :  { %v4263_v28 = vmax.f32 %v4047_v51, %v4191_v20  ;;  %v4264_v9 = vmax.f32 %v4048_v4, %v4192_v5  ;;  %v4265_v18 = vmax.f32 %v4049_v25, %v4193_v10  ;;  %v4401_v63 = vadd.f32 %v4329_v58, %v3976_v42 }
 0x42f   :  { %v4402_v53 = vadd.f32 %v4330_v34, %v3976_v42  ;;  %v4403_v31 = vadd.f32 %v4331_v40, %v3976_v42  ;;  %v4404_v49 = vadd.f32 %v4332_v29, %v3976_v42  ;;  %v4405_v1 = vadd.f32 %v4333_v55, %v3976_v42 }
 0x430   :  { %v4406_v54 = vadd.f32 %v4334_v22, %v3976_v42  ;;  %v4407_v14 = vadd.f32 %v4335_v8, %v3976_v42  ;;  %v4408_v50 = vadd.f32 %v4336_v24, %v3976_v42  ;;  %v4409_v47 = vadd.f32 %v4337_v19, %v3976_v42 }
 0x431   :  { %v4545_v37 = vadd.f32 %v4473_v39, %v3976_v42  ;;  %v4546_v57 = vadd.f32 %v4474_v15, %v3976_v42  ;;  %v4547_v30 = vadd.f32 %v4475_v0, %v3976_v42  ;;  %v4548_v52 = vadd.f32 %v4476_v61, %v3976_v42 }
 0x432   :  { %v4549_v46 = vadd.f32 %v4477_v44, %v3976_v42  ;;  %v4550_v23 = vadd.f32 %v4478_v6, %v3976_v42  ;;  %v4551_v41 = vadd.f32 %v4479_v59, %v3976_v42  ;;  %v4552_v45 = vadd.f32 %v4480_v27, %v3976_v42 }
 0x433   :  { %v4553_v62 = vadd.f32 %v4481_v16, %v3976_v42  ;;  %v4617_v35 = vmax.f32 %v4401_v63, %v4545_v37  ;;  %v4618_v13 = vmax.f32 %v4402_v53, %v4546_v57  ;;  %v4619_v58 = vmax.f32 %v4403_v31, %v4547_v30 }
 0x434   :  { %v4620_v34 = vmax.f32 %v4404_v49, %v4548_v52  ;;  %v4621_v40 = vmax.f32 %v4405_v1, %v4549_v46  ;;  %v4622_v29 = vmax.f32 %v4406_v54, %v4550_v23  ;;  %v4623_v55 = vmax.f32 %v4407_v14, %v4551_v41 }
 0x435   :  { %v4624_v22 = vmax.f32 %v4408_v50, %v4552_v45  ;;  %v4625_v8 = vmax.f32 %v4409_v47, %v4553_v62  ;;  %v4689_v24 = vmax.f32 %v4257_v2, %v4617_v35  ;;  %v4690_v19 = vmax.f32 %v4258_v12, %v4618_v13 }
 0x436   :  { %v4691_v39 = vmax.f32 %v4259_v33, %v4619_v58  ;;  %v4692_v15 = vmax.f32 %v4260_v48, %v4620_v34  ;;  %v4693_v0 = vmax.f32 %v4261_v38, %v4621_v40  ;;  %v4694_v61 = vmax.f32 %v4262_v32, %v4622_v29 }
 0x437   :  { %v4695_v44 = vmax.f32 %v4263_v28, %v4623_v55  ;;  %v4696_v6 = vmax.f32 %v4264_v9, %v4624_v22  ;;  %v4697_v59 = vmax.f32 %v4265_v18, %v4625_v8  ;;  %v4761_v27 = vmax.f32 %v4689_v24, 0.0 }
 0x438   :  { %v4762_v42 = vmax.f32 %v4690_v19, 0.0  ;;  %v4763_v16 = vmax.f32 %v4691_v39, 0.0  ;;  %v4764_v60 = vmax.f32 %v4692_v15, 0.0  ;;  %v4765_v21 = vmax.f32 %v4693_v0, 0.0 }
 0x439   :  { %v4766_v56 = vmax.f32 %v4694_v61, 0.0  ;;  %v4767_v26 = vmax.f32 %v4695_v44, 0.0  ;;  %v4768_v51 = vmax.f32 %v4696_v6, 0.0  ;;  %v4769_v4 = vmax.f32 %v4697_v59, 0.0 }
 0x43a   :  { %v5527_v25 = vpack.c.bf16 %v4762_v42, %v4761_v27  ;;  %v5528_v7 = vpack.c.bf16 %v4764_v60, %v4763_v16 }
 0x43b   :  { %v5529_v17 = vpack.c.bf16 %v4766_v56, %v4765_v21  ;;  %v5530_v43 = vpack.c.bf16 %v4768_v51, %v4767_v26  ;;  %v5531_v36 = vpack.c.bf16 %v4769_v4, %v4769_v4 }
 0x43c   :  { %5029 = vst [vmem:[%s10583_s5 + $0xfc] sm:$0xff] %v5527_v25  ;;  %5030 = vst [vmem:[%s10583_s5 + $0x104] sm:$0xff] %v5528_v7 }
 0x43d   :  { %5031 = vst [vmem:[%s10583_s5 + $0x10c] sm:$0xff] %v5529_v17  ;;  %5032 = vst [vmem:[%s10583_s5 + $0x114] sm:$0xff] %v5530_v43 }
 0x43e   :  { %5033 = vst [vmem:[%s10583_s5 + $0x11c] sm:$0xf] %v5531_v36 }

// kernel: dann_mnist_forward.4
= control target key start
LH: loop header
LB: loop body
LE: loop exit
PB: predicated region body
PF: predicated region fallthrough
CT: control target
= control target key end

     0   :  { %v8518_v10 = vmov 0   ;;  %vm1152_vm0 = vcmask 523264   ;;  %vm5372_vm1 = vcmask 1041408   ;;  %s10893_s1 = inlined_call_operand.vmem [shape: bf16[4,1600,128], index: 1, kind: input, shape index: {}]   ;;  %s10894_s0 = inlined_call_operand.vmem [shape: bf16[50,1600], index: 0, kind: input, shape index: {}]   ;;  %s10895_s2 = inlined_call_operand.vmem [shape: f32[50,1], index: 2, kind: input, shape index: {}]   ;;  %s10896_s3 = inlined_call_operand.vmem [shape: f32[50,1], index: 3, kind: input, shape index: {}]   ;;  %s10897_s4 = inlined_call_operand.vmem [shape: f32[50,1], index: 4, kind: input, shape index: {}]   ;;  %s10898_s5 = inlined_call_operand.vmem [shape: f32[50,128], index: 5, kind: output, shape index: {}]  }
   0x1   :  { %v7942_v0 = vld [vmem:[%s10893_s1 + $0x40] sm:$0xff]   ;;  %v7946_v4 = vld [vmem:[%s10893_s1 + $0x48] sm:$0xff]   ;;  %v7950_v8 = vld [vmem:[%s10893_s1 + $0x50] sm:$0xff]   ;;  %7940 = vset.pattern.permute.xlu0 %v8518_v10  ;;  %7941 = vset.pattern.permute.xlu1 %v8518_v10 }
   0x2   :  { %v7943_v1 = vld [vmem:[%s10893_s1 + $0xc0] sm:$0xff]   ;;  %6883 = vmatprep.subr.bf16.mxu0 %v7942_v0  ;;  %v7947_v5 = vld [vmem:[%s10893_s1 + $0xc8] sm:$0xff]   ;;  %v7951_v9 = vld [vmem:[%s10893_s1 + $0xd0] sm:$0xff]  }
   0x3   :  { %v7944_v2 = vld [vmem:[%s10893_s1] sm:$0xff]   ;;  %6923 = vmatprep.subr.bf16.mxu1 %v7943_v1  ;;  %v7948_v6 = vld [vmem:[%s10893_s1 + $0x8] sm:$0xff]   ;;  %v7952_v11 = vld [vmem:[%s10893_s1 + $0x10] sm:$0xff]  }
   0x4   :  { %v7945_v3 = vld [vmem:[%s10893_s1 + $0x80] sm:$0xff]   ;;  %6884 = vmatpush3.bf16.msra.mxu0 %v7944_v2  ;;  %v7949_v7 = vld [vmem:[%s10893_s1 + $0x88] sm:$0xff]   ;;  %v7953_v12 = vld [vmem:[%s10893_s1 + $0x90] sm:$0xff]  }
   0x5   :  { %6924 = vmatpush3.bf16.msra.mxu1 %v7945_v3  ;;  %6885 = vmatprep.subr.bf16.mxu0 %v7946_v4  ;;  %v7954_v13 = vld [vmem:[%s10893_s1 + $0x58] sm:$0xff]   ;;  %v7958_v17 = vld [vmem:[%s10893_s1 + $0x60] sm:$0xff]   ;;  %v7962_v21 = vld [vmem:[%s10893_s1 + $0x68] sm:$0xff]  }
   0x6   :  { %6925 = vmatprep.subr.bf16.mxu1 %v7947_v5  ;;  %v7955_v14 = vld [vmem:[%s10893_s1 + $0xd8] sm:$0xff]   ;;  %v7959_v18 = vld [vmem:[%s10893_s1 + $0xe0] sm:$0xff]   ;;  %v7963_v22 = vld [vmem:[%s10893_s1 + $0xe8] sm:$0xff]  }
   0x7   :  { %v7956_v15 = vld [vmem:[%s10893_s1 + $0x18] sm:$0xff]   ;;  %v7960_v19 = vld [vmem:[%s10893_s1 + $0x20] sm:$0xff]   ;;  %v7964_v23 = vld [vmem:[%s10893_s1 + $0x28] sm:$0xff]  }
   0x8   :  { %6886 = vmatpush3.bf16.msra.mxu0 %v7948_v6  ;;  %v7957_v16 = vld [vmem:[%s10893_s1 + $0x98] sm:$0xff]   ;;  %v7961_v20 = vld [vmem:[%s10893_s1 + $0xa0] sm:$0xff]   ;;  %v7965_v24 = vld [vmem:[%s10893_s1 + $0xa8] sm:$0xff]  }
   0x9   :  { %6926 = vmatpush3.bf16.msra.mxu1 %v7949_v7  ;;  %6887 = vmatprep.subr.bf16.mxu0 %v7950_v8  ;;  %v7966_v25 = vld [vmem:[%s10893_s1 + $0x70] sm:$0xff]   ;;  %v7970_v29 = vld [vmem:[%s10893_s1 + $0x78] sm:$0xff]   ;;  %v7976_v34 = vld [vmem:[%s10894_s0 + $0xc] ss:$52 sps:$4 sm:$0xff]  }
   0xa   :  { %6927 = vmatprep.subr.bf16.mxu1 %v7951_v9  ;;  %v7967_v26 = vld [vmem:[%s10893_s1 + $0xf0] sm:$0xff]   ;;  %v7971_v30 = vld [vmem:[%s10893_s1 + $0xf8] sm:$0xff]   ;;  %1261 = vmatprep.mubr.bf16.mxu1 %v7976_v34  ;;  %v7980_v37 = vld [vmem:[%s10893_s1 + $0x140] sm:$0xff]  }
   0xb   :  { %v7968_v27 = vld [vmem:[%s10893_s1 + $0x30] sm:$0xff]   ;;  %v7972_v31 = vld [vmem:[%s10893_s1 + $0x38] sm:$0xff]   ;;  %v7981_v38 = vld [vmem:[%s10893_s1 + $0x1c0] sm:$0xff]  }
   0xc   :  { %6888 = vmatpush3.bf16.msra.mxu0 %v7952_v11  ;;  %v7969_v28 = vld [vmem:[%s10893_s1 + $0xb0] sm:$0xff]   ;;  %v7973_v32 = vld [vmem:[%s10893_s1 + $0xb8] sm:$0xff]   ;;  %v7982_v39 = vld [vmem:[%s10893_s1 + $0x100] sm:$0xff]  }
   0xd   :  { %6928 = vmatpush3.bf16.msra.mxu1 %v7953_v12  ;;  %6889 = vmatprep.subr.bf16.mxu0 %v7954_v13  ;;  %v8648_v33 = vld [vmem:[%s10894_s0 + $0x4] ss:$52 sps:$4 sm:$0xff]   ;;  %v7978_v35 = vld [vmem:[%s10894_s0] ss:$52 sps:$4 sm:$0xff]   ;;  %v7979_v36 = vld [vmem:[%s10894_s0 + $0x8] ss:$52 sps:$4 sm:$0xff]  }
   0xe   :  { %6929 = vmatprep.subr.bf16.mxu1 %v7955_v14  ;;  %1197 = vmatprep.mubr.bf16.mxu0 %v8648_v33  ;;  %v7983_v40 = vld [vmem:[%s10893_s1 + $0x180] sm:$0xff]   ;;  %v7984_v41 = vld [vmem:[%s10893_s1 + $0x148] sm:$0xff]   ;;  %v7994_v49 = vld [vmem:[%s10893_s1 + $0x150] sm:$0xff]  }
   0xf   :  { %v7985_v42 = vld [vmem:[%s10893_s1 + $0x1c8] sm:$0xff]   ;;  %v7993_v48 = vld [vmem:[%s10894_s0 + $0x70] ss:$52 sps:$4 sm:$0xff]   ;;  %v7998_v53 = vld [vmem:[%s10893_s1 + $0x158] sm:$0xff]  }
  0x10   :  { %6890 = vmatpush3.bf16.msra.mxu0 %v7956_v15  ;;  %v7986_v43 = vld [vmem:[%s10893_s1 + $0x108] sm:$0xff]   ;;  %v7995_v50 = vld [vmem:[%s10893_s1 + $0x1d0] sm:$0xff]   ;;  %v7999_v54 = vld [vmem:[%s10893_s1 + $0x1d8] sm:$0xff]  }
  0x11   :  { %6930 = vmatpush3.bf16.msra.mxu1 %v7957_v16  ;;  %6891 = vmatprep.subr.bf16.mxu0 %v7958_v17  ;;  %v7987_v44 = vld [vmem:[%s10893_s1 + $0x188] sm:$0xff]   ;;  %v7996_v51 = vld [vmem:[%s10893_s1 + $0x110] sm:$0xff]   ;;  %v8000_v55 = vld [vmem:[%s10893_s1 + $0x118] sm:$0xff]  }
  0x12   :  { %6931 = vmatprep.subr.bf16.mxu1 %v7959_v18  ;;  %v8687_v45 = vld [vmem:[%s10894_s0 + $0x6c] ss:$52 sps:$4 sm:$0xff]   ;;  %v7990_v46 = vld [vmem:[%s10894_s0 + $0x74] ss:$52 sps:$4 sm:$0xff]   ;;  %v8001_v56 = vld [vmem:[%s10893_s1 + $0x198] sm:$0xff]  }
  0x13   :  { %v8695_v47 = vld [vmem:[%s10894_s0 + $0x68] ss:$52 sps:$4 sm:$0xff]   ;;  %v7997_v52 = vld [vmem:[%s10893_s1 + $0x190] sm:$0xff]   ;;  %v8007_v60 = vld [vmem:[%s10894_s0 + $0xd8] ss:$52 sps:$4 sm:$0xff]  }
  0x14   :  { %6892 = vmatpush3.bf16.msra.mxu0 %v7960_v19  ;;  %v8729_v57 = vld [vmem:[%s10894_s0 + $0xd4] ss:$52 sps:$4 sm:$0xff]   ;;  %v8004_v58 = vld [vmem:[%s10894_s0 + $0xdc] ss:$52 sps:$4 sm:$0xff]   ;;  %v8008_v61 = vld [vmem:[%s10893_s1 + $0x160] sm:$0xff]  }
  0x15   :  { %6932 = vmatpush3.bf16.msra.mxu1 %v7961_v20  ;;  %6893 = vmatprep.subr.bf16.mxu0 %v7962_v21  ;;  %v8737_v59 = vld [vmem:[%s10894_s0 + $0xd0] ss:$52 sps:$4 sm:$0xff]   ;;  %v8012_v1 = vld [vmem:[%s10893_s1 + $0x168] sm:$0xff]   ;;  %v63_v5 = vld [vmem:[%s10894_s0 + $0x138] sm:$0x11] }
  0x16   :  { %6933 = vmatprep.subr.bf16.mxu1 %v7963_v22  ;;  %v8009_v62 = vld [vmem:[%s10893_s1 + $0x1e0] sm:$0xff]   ;;  %v8013_v2 = vld [vmem:[%s10893_s1 + $0x1e8] sm:$0xff]   ;;  %v8774_v7 = vcombine.high %v63_v5, %v63_v5  ;;  %v8778_v9 = vcombine.low %v63_v5, %v63_v5  ;;  %v8020_v11 = vld [vmem:[%s10893_s1 + $0x170] sm:$0xff]  }
  0x17   :  { %v8010_v63 = vld [vmem:[%s10893_s1 + $0x120] sm:$0xff]   ;;  %v8014_v3 = vld [vmem:[%s10893_s1 + $0x128] sm:$0xff]   ;;  %v8021_v12 = vld [vmem:[%s10893_s1 + $0x1f0] sm:$0xff]  }
  0x18   :  { %6894 = vmatpush3.bf16.msra.mxu0 %v7964_v23  ;;  %v8011_v0 = vld [vmem:[%s10893_s1 + $0x1a0] sm:$0xff]   ;;  %v8015_v4 = vld [vmem:[%s10893_s1 + $0x1a8] sm:$0xff]   ;;  %v8022_v13 = vld [vmem:[%s10893_s1 + $0x130] sm:$0xff]  }
  0x19   :  { %6934 = vmatpush3.bf16.msra.mxu1 %v7965_v24  ;;  %6895 = vmatprep.subr.bf16.mxu0 %v7966_v25  ;;  %v64_v6 = vld [vmem:[%s10894_s0 + $0x140] sm:$0x11]  ;;  %v8023_v14 = vld [vmem:[%s10893_s1 + $0x1b0] sm:$0xff]   ;;  %v8024_v15 = vld [vmem:[%s10893_s1 + $0x178] sm:$0xff]  }
  0x1a   :  { %6935 = vmatprep.subr.bf16.mxu1 %v7967_v26  ;;  %v8776_v8 = vcombine.high %v64_v6, %v64_v6  ;;  %v8780_v10 = vcombine.low %v64_v6, %v64_v6  ;;  %v8025_v16 = vld [vmem:[%s10893_s1 + $0x1f8] sm:$0xff]   ;;  %v8813_v19 = vld [vmem:[%s10894_s0 + $0x10] ss:$52 sps:$4 sm:$0xff]   ;;  %v8818_v20 = vld [vmem:[%s10894_s0 + $0x14] ss:$52 sps:$4 sm:$0xff]  }
  0x1b   :  { %v8026_v17 = vld [vmem:[%s10893_s1 + $0x138] sm:$0xff]   ;;  %v8034_v23 = vld [vmem:[%s10893_s1 + $0x240] sm:$0xff]   ;;  %v8077_v5 = vld [vmem:[%s10893_s1 + $0x2b0] sm:$0xff]  }
  0x1c   :  { %6896 = vmatpush3.bf16.msra.mxu0 %v7968_v27  ;;  %v8027_v18 = vld [vmem:[%s10893_s1 + $0x1b8] sm:$0xff]   ;;  %v8035_v24 = vld [vmem:[%s10893_s1 + $0x2c0] sm:$0xff]   ;;  %v8038_v27 = vld [vmem:[%s10893_s1 + $0x248] sm:$0xff]  }
  0x1d   :  { %6936 = vmatpush3.bf16.msra.mxu1 %v7969_v28  ;;  %6897 = vmatprep.subr.bf16.mxu0 %v7970_v29  ;;  %v8031_v21 = vld [vmem:[%s10894_s0 + $0x18] ss:$52 sps:$4 sm:$0xff]   ;;  %v8033_v22 = vld [vmem:[%s10894_s0 + $0x1c] ss:$52 sps:$4 sm:$0xff]   ;;  %v8036_v25 = vld [vmem:[%s10893_s1 + $0x200] sm:$0xff]  }
  0x1e   :  { %6937 = vmatprep.subr.bf16.mxu1 %v7971_v30  ;;  %v8037_v26 = vld [vmem:[%s10893_s1 + $0x280] sm:$0xff]   ;;  %v8039_v28 = vld [vmem:[%s10893_s1 + $0x2c8] sm:$0xff]   ;;  %v8078_v6 = vld [vmem:[%s10893_s1 + $0x278] sm:$0xff]  }
  0x1f   :  { %v8040_v29 = vld [vmem:[%s10893_s1 + $0x208] sm:$0xff]  }
  0x20   :  { %6898 = vmatpush3.bf16.msra.mxu0 %v7972_v31  ;;  %v8041_v30 = vld [vmem:[%s10893_s1 + $0x288] sm:$0xff]   ;;  %v8855_v31 = vld [vmem:[%s10894_s0 + $0x7c] ss:$52 sps:$4 sm:$0xff]  }
  0x21   :  { %6938 = vmatpush3.bf16.msra.mxu1 %v7973_v32  ;;  %6963 = vmatprep.subr.bf16.mxu0 %v7980_v37  ;;  %v8044_v32 = vld [vmem:[%s10894_s0 + $0x84] ss:$52 sps:$4 sm:$0xff]   ;;  %v8049_v37 = vld [vmem:[%s10893_s1 + $0x2d0] sm:$0xff]  }
  0x22   :  { %7003 = vmatprep.subr.bf16.mxu1 %v7981_v38  ;;  %v8863_v34 = vld [vmem:[%s10894_s0 + $0x78] ss:$52 sps:$4 sm:$0xff]   ;;  %v8050_v38 = vld [vmem:[%s10893_s1 + $0x210] sm:$0xff]  }
  0x23   :  { %1198 = vmatmul.mubr.bf16.vlgmr.msra.gmra.mrb[0].mxu0 %v7978_v35  ;;  %v8047_v35 = vld [vmem:[%s10894_s0 + $0x80] ss:$52 sps:$4 sm:$0xff]  }
  0x24   :  { %1262 = vmatmul.mubr.bf16.vlgmr.msra.gmra.mrb[0].mxu1 %v7979_v36  ;;  %6964 = vmatpush3.bf16.msra.mxu0 %v7982_v39  ;;  %v8048_v36 = vld [vmem:[%s10893_s1 + $0x250] sm:$0xff]  }
  0x25   :  { %7004 = vmatpush3.bf16.msra.mxu1 %v7983_v40  ;;  %6965 = vmatprep.subr.bf16.mxu0 %v7984_v41  ;;  %v8051_v39 = vld [vmem:[%s10893_s1 + $0x290] sm:$0xff]   ;;  %v8052_v40 = vld [vmem:[%s10893_s1 + $0x258] sm:$0xff]  }
  0x26   :  { %7005 = vmatprep.subr.bf16.mxu1 %v7985_v42  ;;  %1205 = vmatprep.mubr.bf16.mxu0 %v8687_v45  ;;  %v8053_v41 = vld [vmem:[%s10893_s1 + $0x2d8] sm:$0xff]  }
  0x27   :  { %1269 = vmatprep.mubr.bf16.mxu1 %v7990_v46  ;;  %v8054_v42 = vld [vmem:[%s10893_s1 + $0x218] sm:$0xff]   ;;  %v8058_v46 = vld [vmem:[%s10894_s0 + $0xec] ss:$52 sps:$4 sm:$0xff]  }
  0x28   :  { %6966 = vmatpush3.bf16.msra.mxu0 %v7986_v43  ;;  %v8055_v43 = vld [vmem:[%s10893_s1 + $0x298] sm:$0xff]  }
  0x29   :  { %7006 = vmatpush3.bf16.msra.mxu1 %v7987_v44  ;;  %6967 = vmatprep.subr.bf16.mxu0 %v7994_v49  ;;  %v8897_v44 = vld [vmem:[%s10894_s0 + $0xe4] ss:$52 sps:$4 sm:$0xff]   ;;  %v8061_v49 = vld [vmem:[%s10894_s0 + $0xe8] ss:$52 sps:$4 sm:$0xff]  }
  0x2a   :  { %7007 = vmatprep.subr.bf16.mxu1 %v7995_v50  ;;  %v8062_v50 = vld [vmem:[%s10893_s1 + $0x260] sm:$0xff]  }
  0x2b   :  { %1206 = vmatmul.mubr.bf16.gmra.mrb[4].mxu0 %v8695_v47 }
  0x2c   :  { %1270 = vmatmul.mubr.bf16.gmra.mrb[4].mxu1 %v7993_v48  ;;  %6968 = vmatpush3.bf16.msra.mxu0 %v7996_v51  ;;  %v8906_v48 = vld [vmem:[%s10894_s0 + $0xe0] ss:$52 sps:$4 sm:$0xff]  }
  0x2d   :  { %7008 = vmatpush3.bf16.msra.mxu1 %v7997_v52  ;;  %6969 = vmatprep.subr.bf16.mxu0 %v7998_v53  ;;  %v8063_v51 = vld [vmem:[%s10893_s1 + $0x2e0] sm:$0xff]  }
  0x2e   :  { %7009 = vmatprep.subr.bf16.mxu1 %v7999_v54  ;;  %1213 = vmatprep.mubr.bf16.mxu0 %v8729_v57  ;;  %v8064_v52 = vld [vmem:[%s10893_s1 + $0x220] sm:$0xff]   ;;  %v8066_v54 = vld [vmem:[%s10893_s1 + $0x268] sm:$0xff]  }
  0x2f   :  { %1277 = vmatprep.mubr.bf16.mxu1 %v8004_v58  ;;  %v8065_v53 = vld [vmem:[%s10893_s1 + $0x2a0] sm:$0xff]   ;;  %v8069_v58 = vld [vmem:[%s10893_s1 + $0x2a8] sm:$0xff]  }
  0x30   :  { %6970 = vmatpush3.bf16.msra.mxu0 %v8000_v55  ;;  %v8067_v55 = vld [vmem:[%s10893_s1 + $0x2e8] sm:$0xff]  }
  0x31   :  { %7010 = vmatpush3.bf16.msra.mxu1 %v8001_v56  ;;  %6971 = vmatprep.subr.bf16.mxu0 %v8008_v61  ;;  %v8068_v56 = vld [vmem:[%s10893_s1 + $0x228] sm:$0xff]  }
  0x32   :  { %7011 = vmatprep.subr.bf16.mxu1 %v8009_v62  ;;  %v66_v62 = vld [vmem:[%s10894_s0 + $0x150] sm:$0x11] }
  0x33   :  { %1214 = vmatmul.mubr.bf16.gmra.mrb[8].mxu0 %v8737_v59 }
  0x34   :  { %1278 = vmatmul.mubr.bf16.gmra.mrb[8].mxu1 %v8007_v60  ;;  %6972 = vmatpush3.bf16.msra.mxu0 %v8010_v63  ;;  %v65_v60 = vld [vmem:[%s10894_s0 + $0x148] sm:$0x11] }
  0x35   :  { %7012 = vmatpush3.bf16.msra.mxu1 %v8011_v0  ;;  %6973 = vmatprep.subr.bf16.mxu0 %v8012_v1  ;;  %v8939_v61 = vcombine.high %v65_v60, %v65_v60  ;;  %v8944_v63 = vcombine.low %v65_v60, %v65_v60  ;;  %v8946_v0 = vcombine.high %v66_v62, %v66_v62  ;;  %v8119_v60 = vld [vmem:[%s10893_s1 + $0x318] sm:$0xff]  }
  0x36   :  { %7013 = vmatprep.subr.bf16.mxu1 %v8013_v2  ;;  %1221 = vmatprep.mubr.bf16.mxu0 %v8774_v7  ;;  %v8948_v1 = vcombine.low %v66_v62, %v66_v62  ;;  %v8074_v2 = vld [vmem:[%s10893_s1 + $0x270] sm:$0xff]  }
  0x37   :  { %1285 = vmatprep.mubr.bf16.mxu1 %v8776_v8  ;;  %v8120_v62 = vld [vmem:[%s10893_s1 + $0x390] sm:$0xff]  }
  0x38   :  { %6974 = vmatpush3.bf16.msra.mxu0 %v8014_v3  ;;  %v8075_v3 = vld [vmem:[%s10893_s1 + $0x2f0] sm:$0xff]  }
  0x39   :  { %7014 = vmatpush3.bf16.msra.mxu1 %v8015_v4  ;;  %6975 = vmatprep.subr.bf16.mxu0 %v8020_v11  ;;  %v8076_v4 = vld [vmem:[%s10893_s1 + $0x230] sm:$0xff]   ;;  %v8079_v11 = vld [vmem:[%s10893_s1 + $0x2f8] sm:$0xff]  }
  0x3a   :  { %7015 = vmatprep.subr.bf16.mxu1 %v8021_v12  ;;  %v8080_v12 = vld [vmem:[%s10893_s1 + $0x238] sm:$0xff]  }
  0x3b   :  { %1222 = vmatmul.mubr.bf16.gmra.mrb[12].mxu0 %v8778_v9 }
  0x3c   :  { %1286 = vmatmul.mubr.bf16.gmra.mrb[12].mxu1 %v8780_v10  ;;  %6976 = vmatpush3.bf16.msra.mxu0 %v8022_v13  ;;  %v8081_v13 = vld [vmem:[%s10893_s1 + $0x2b8] sm:$0xff]  }
  0x3d   :  { %7016 = vmatpush3.bf16.msra.mxu1 %v8023_v14  ;;  %6977 = vmatprep.subr.bf16.mxu0 %v8024_v15  ;;  %v8981_v14 = vld [vmem:[%s10894_s0 + $0x20] ss:$52 sps:$4 sm:$0xff]   ;;  %v8986_v15 = vld [vmem:[%s10894_s0 + $0x24] ss:$52 sps:$4 sm:$0xff]  }
  0x3e   :  { %7017 = vmatprep.subr.bf16.mxu1 %v8025_v16  ;;  %1325 = vmatprep.mubr.bf16.mxu0 %v8818_v20  ;;  %v8085_v16 = vld [vmem:[%s10894_s0 + $0x28] ss:$52 sps:$4 sm:$0xff]  }
  0x3f   :  { %1389 = vmatprep.mubr.bf16.mxu1 %v8033_v22  ;;  %v8090_v22 = vld [vmem:[%s10893_s1 + $0x320] sm:$0xff]  }
  0x40   :  { %6978 = vmatpush3.bf16.msra.mxu0 %v8026_v17  ;;  %v8087_v17 = vld [vmem:[%s10894_s0 + $0x2c] ss:$52 sps:$4 sm:$0xff]  }
  0x41   :  { %7018 = vmatpush3.bf16.msra.mxu1 %v8027_v18  ;;  %7043 = vmatprep.subr.bf16.mxu0 %v8034_v23  ;;  %v8088_v18 = vld [vmem:[%s10893_s1 + $0x300] sm:$0xff]   ;;  %v8091_v23 = vld [vmem:[%s10893_s1 + $0x368] sm:$0xff]  }
  0x42   :  { %7083 = vmatprep.subr.bf16.mxu1 %v8035_v24  ;;  %v8092_v24 = vld [vmem:[%s10893_s1 + $0x328] sm:$0xff]  }
  0x43   :  { %1326 = vmatmul.mubr.bf16.vlgmr.msra.gmra.mrb[16].mxu0 %v8813_v19 }
  0x44   :  { %1390 = vmatmul.mubr.bf16.vlgmr.msra.gmra.mrb[16].mxu1 %v8031_v21  ;;  %7044 = vmatpush3.bf16.msra.mxu0 %v8036_v25  ;;  %v8089_v21 = vld [vmem:[%s10893_s1 + $0x360] sm:$0xff]  }
  0x45   :  { %7084 = vmatpush3.bf16.msra.mxu1 %v8037_v26  ;;  %7045 = vmatprep.subr.bf16.mxu0 %v8038_v27  ;;  %v9014_v25 = vld [vmem:[%s10894_s0 + $0x8c] ss:$52 sps:$4 sm:$0xff]   ;;  %v8095_v26 = vld [vmem:[%s10894_s0 + $0x94] ss:$52 sps:$4 sm:$0xff]  }
  0x46   :  { %7085 = vmatprep.subr.bf16.mxu1 %v8039_v28  ;;  %1333 = vmatprep.mubr.bf16.mxu0 %v8855_v31  ;;  %v9023_v27 = vld [vmem:[%s10894_s0 + $0x88] ss:$52 sps:$4 sm:$0xff]   ;;  %v8098_v28 = vld [vmem:[%s10894_s0 + $0x90] ss:$52 sps:$4 sm:$0xff]  }
  0x47   :  { %1397 = vmatprep.mubr.bf16.mxu1 %v8044_v32  ;;  %v8101_v32 = vld [vmem:[%s10893_s1 + $0x330] sm:$0xff]  }
  0x48   :  { %7046 = vmatpush3.bf16.msra.mxu0 %v8040_v29  ;;  %v8099_v29 = vld [vmem:[%s10893_s1 + $0x308] sm:$0xff]  }
  0x49   :  { %7086 = vmatpush3.bf16.msra.mxu1 %v8041_v30  ;;  %7047 = vmatprep.subr.bf16.mxu0 %v8048_v36  ;;  %v8100_v30 = vld [vmem:[%s10893_s1 + $0x370] sm:$0xff]   ;;  %v8103_v36 = vld [vmem:[%s10893_s1 + $0x338] sm:$0xff]  }
  0x4a   :  { %7087 = vmatprep.subr.bf16.mxu1 %v8049_v37  ;;  %v9047_v37 = vld [vmem:[%s10894_s0 + $0xf4] ss:$52 sps:$4 sm:$0xff]  }
  0x4b   :  { %1334 = vmatmul.mubr.bf16.gmra.mrb[20].mxu0 %v8863_v34 }
  0x4c   :  { %1398 = vmatmul.mubr.bf16.gmra.mrb[20].mxu1 %v8047_v35  ;;  %7048 = vmatpush3.bf16.msra.mxu0 %v8050_v38  ;;  %v8102_v35 = vld [vmem:[%s10893_s1 + $0x378] sm:$0xff]  }
  0x4d   :  { %7088 = vmatpush3.bf16.msra.mxu1 %v8051_v39  ;;  %7049 = vmatprep.subr.bf16.mxu0 %v8052_v40  ;;  %v8106_v38 = vld [vmem:[%s10894_s0 + $0xfc] ss:$52 sps:$4 sm:$0xff]   ;;  %v8109_v40 = vld [vmem:[%s10894_s0 + $0xf8] ss:$52 sps:$4 sm:$0xff]  }
  0x4e   :  { %7089 = vmatprep.subr.bf16.mxu1 %v8053_v41  ;;  %1341 = vmatprep.mubr.bf16.mxu0 %v8897_v44  ;;  %v9055_v39 = vld [vmem:[%s10894_s0 + $0xf0] ss:$52 sps:$4 sm:$0xff]  }
  0x4f   :  { %1405 = vmatprep.mubr.bf16.mxu1 %v8058_v46  ;;  %v8110_v41 = vld [vmem:[%s10893_s1 + $0x310] sm:$0xff]  }
  0x50   :  { %7050 = vmatpush3.bf16.msra.mxu0 %v8054_v42  ;;  %v8111_v42 = vld [vmem:[%s10893_s1 + $0x380] sm:$0xff]   ;;  %v76_v46 = vld [vmem:[%s10895_s2 + $0x30] sm:$0x3] }
  0x51   :  { %7090 = vmatpush3.bf16.msra.mxu1 %v8055_v43  ;;  %7051 = vmatprep.subr.bf16.mxu0 %v8062_v50  ;;  %v8112_v43 = vld [vmem:[%s10893_s1 + $0x340] sm:$0xff]   ;;  %v8114_v50 = vld [vmem:[%s10893_s1 + $0x348] sm:$0xff]  }
  0x52   :  { %7091 = vmatprep.subr.bf16.mxu1 %v8063_v51  ;;  %309 = vperm.xlu0 %7940, %v76_v46   ;;  %v70_v51 = vld [vmem:[%s10895_s2] sm:$0xff] }
  0x53   :  { %1342 = vmatmul.mubr.bf16.gmra.mrb[24].mxu0 %v8906_v48  ;;  %v8145_v46 = vld [vmem:[%s10893_s1 + $0x3c0] sm:$0xff]  }
  0x54   :  { %1406 = vmatmul.mubr.bf16.gmra.mrb[24].mxu1 %v8061_v49  ;;  %7052 = vmatpush3.bf16.msra.mxu0 %v8064_v52  ;;  %v8113_v49 = vld [vmem:[%s10893_s1 + $0x388] sm:$0xff]   ;;  %v67_v52 = vld [vmem:[%s10894_s0 + $0x158] sm:$0x11] }
  0x55   :  { %7092 = vmatpush3.bf16.msra.mxu1 %v8065_v53  ;;  %7053 = vmatprep.subr.bf16.mxu0 %v8066_v54  ;;  %v68_v53 = vld [vmem:[%s10894_s0 + $0x160] sm:$0x11]  ;;  %v9089_v54 = vcombine.high %v67_v52, %v67_v52 }
  0x56   :  { %7093 = vmatprep.subr.bf16.mxu1 %v8067_v55  ;;  %1349 = vmatprep.mubr.bf16.mxu0 %v8939_v61  ;;  %v9091_v55 = vcombine.high %v68_v53, %v68_v53 }
  0x57   :  { %1413 = vmatprep.mubr.bf16.mxu1 %v8946_v0  ;;  %279 = vperm.xlu0 %7940, %v70_v51   ;;  %v8148_v51 = vld [vmem:[%s10893_s1 + $0x408] sm:$0xff]  }
  0x58   :  { %7054 = vmatpush3.bf16.msra.mxu0 %v8068_v56  ;;  %v9093_v56 = vcombine.low %v67_v52, %v67_v52  ;;  %v8149_v52 = vld [vmem:[%s10893_s1 + $0x3c8] sm:$0xff]  }
  0x59   :  { %7094 = vmatpush3.bf16.msra.mxu1 %v8069_v58  ;;  %7055 = vmatprep.subr.bf16.mxu0 %v8074_v2  ;;  %v9095_v58 = vcombine.low %v68_v53, %v68_v53  ;;  %v71_v2 = vld [vmem:[%s10895_s2 + $0x8] sm:$0xff] }
  0x5a   :  { %7095 = vmatprep.subr.bf16.mxu1 %v8075_v3  ;;  %v8121_v3 = vld [vmem:[%s10893_s1 + $0x350] sm:$0xff]   ;;  %284 = vperm.xlu1 %7941, %v71_v2   ;;  %v8150_v53 = vld [vmem:[%s10893_s1 + $0x488] sm:$0xff]  }
  0x5b   :  { %1350 = vmatmul.mubr.bf16.gmra.mrb[28].mxu0 %v8944_v63  ;;  %v8154_v2 = vld [vmem:[%s10893_s1 + $0x490] sm:$0xff]  }
  0x5c   :  { %1414 = vmatmul.mubr.bf16.gmra.mrb[28].mxu1 %v8948_v1  ;;  %7056 = vmatpush3.bf16.msra.mxu0 %v8076_v4  ;;  %v8122_v4 = vld [vmem:[%s10893_s1 + $0x398] sm:$0xff]  }
  0x5d   :  { %7096 = vmatpush3.bf16.msra.mxu1 %v8077_v5  ;;  %7057 = vmatprep.subr.bf16.mxu0 %v8078_v6  ;;  %v8123_v5 = vld [vmem:[%s10893_s1 + $0x358] sm:$0xff]   ;;  %v72_v6 = vld [vmem:[%s10895_s2 + $0x10] sm:$0xff] }
  0x5e   :  { %7097 = vmatprep.subr.bf16.mxu1 %v8079_v11  ;;  %1453 = vmatprep.mubr.bf16.mxu0 %v8986_v15  ;;  %v9125_v11 = vld [vmem:[%s10894_s0 + $0x30] ss:$52 sps:$4 sm:$0xff]  }
  0x5f   :  { %1517 = vmatprep.mubr.bf16.mxu1 %v8087_v17  ;;  %289 = vperm.xlu1 %7941, %v72_v6   ;;  %v73_v17 = vld [vmem:[%s10895_s2 + $0x18] sm:$0xff] }
  0x60   :  { %7058 = vmatpush3.bf16.msra.mxu0 %v8080_v12  ;;  %v8125_v12 = vld [vmem:[%s10893_s1 + $0x3e0] sm:$0xff]   ;;  %294 = vperm.xlu0 %7940, %v73_v17   ;;  %v8158_v6 = vld [vmem:[%s10893_s1 + $0x498] sm:$0xff]  }
  0x61   :  { %7098 = vmatpush3.bf16.msra.mxu1 %v8081_v13  ;;  %7875 = vmatprep.subr.bf16.mxu0 %v8088_v18  ;;  %v9136_v13 = vld [vmem:[%s10894_s0 + $0x98] ss:$52 sps:$4 sm:$0xff]   ;;  %v8162_v17 = vld [vmem:[%s10893_s1 + $0x560] sm:$0xff]  }
  0x62   :  { %7131 = vmatprep.subr.bf16.mxu1 %v8089_v21  ;;  %v8130_v21 = vld [vmem:[%s10893_s1 + $0x3e8] sm:$0xff]  }
  0x63   :  { %1454 = vmatmul.mubr.bf16.vlgmr.msra.gmra.mrb[32].mxu0 %v8981_v14 }
  0x64   :  { %1518 = vmatmul.mubr.bf16.vlgmr.msra.gmra.mrb[32].mxu1 %v8085_v16  ;;  %7876 = vmatpush3.bf16.msra.mxu0 %v8088_v18  ;;  %v8127_v16 = vld [vmem:[%s10893_s1 + $0x3a0] sm:$0xff]  }
  0x65   :  { %7132 = vmatpush3.bf16.msra.mxu1 %v8090_v22  ;;  %1461 = vmatprep.mubr.bf16.mxu0 %v9014_v25  ;;  %v8129_v18 = vld [vmem:[%s10893_s1 + $0x420] sm:$0xff]   ;;  %v8131_v22 = vld [vmem:[%s10893_s1 + $0x3a8] sm:$0xff]  }
  0x66   :  { %7133 = vmatprep.subr.bf16.mxu1 %v8091_v23  ;;  %1525 = vmatprep.mubr.bf16.mxu1 %v8095_v26  ;;  %v8426_v23 = vld [vmem:[%s10894_s0] ss:$52 sps:$4 sm:$0xff]   ;;  %v8133_v26 = vld [vmem:[%s10893_s1 + $0x428] sm:$0xff]  }
  0x67   :  { %7877 = vmatprep.subr.bf16.mxu0 %v8099_v29 }
  0x68   :  { %7878 = vmatpush3.bf16.msra.mxu0 %v8099_v29  ;;  %v9174_v29 = vld [vmem:[%s10894_s0 + $0x100] ss:$52 sps:$4 sm:$0xff]  }
  0x69   :  { %7134 = vmatpush3.bf16.msra.mxu1 %v8092_v24  ;;  %7879 = vmatprep.subr.bf16.mxu0 %v8110_v41  ;;  %v8132_v24 = vld [vmem:[%s10893_s1 + $0x468] sm:$0xff]  }
  0x6a   :  { %7135 = vmatprep.subr.bf16.mxu1 %v8100_v30  ;;  %v8135_v30 = vld [vmem:[%s10893_s1 + $0x3f0] sm:$0xff]  }
  0x6b   :  { %1462 = vmatmul.mubr.bf16.gmra.mrb[36].mxu0 %v9023_v27 }
  0x6c   :  { %1526 = vmatmul.mubr.bf16.gmra.mrb[36].mxu1 %v8098_v28  ;;  %1469 = vmatprep.mubr.bf16.mxu0 %v9047_v37  ;;  %v74_v28 = vld [vmem:[%s10895_s2 + $0x20] sm:$0xff] }
  0x6d   :  { %7136 = vmatpush3.bf16.msra.mxu1 %v8101_v32  ;;  %1533 = vmatprep.mubr.bf16.mxu1 %v8106_v38  ;;  %v9184_v32 = vld [vmem:[%s10894_s0 + $0x168] ss:$0 sps:$4 sm:$0x11]   ;;  %v8139_v38 = vld [vmem:[%s10893_s1 + $0x430] sm:$0xff]  }
  0x6e   :  { %7137 = vmatprep.subr.bf16.mxu1 %v8102_v35  ;;  %7880 = vmatpush3.bf16.msra.mxu0 %v8110_v41  ;;  %v8138_v35 = vld [vmem:[%s10893_s1 + $0x470] sm:$0xff]   ;;  %v8141_v41 = vld [vmem:[%s10893_s1 + $0x3b8] sm:$0xff]  }
  0x6f   :  { %7881 = vmatprep.subr.bf16.mxu0 %v8119_v60  ;;  %299 = vperm.xlu1 %7941, %v74_v28   ;;  %v9319_v28 = vld [vmem:[%s10894_s0 + $0x70] ss:$52 sps:$4 sm:$0xff]  }
  0x71   :  { %7138 = vmatpush3.bf16.msra.mxu1 %v8103_v36  ;;  %v75_v36 = vld [vmem:[%s10895_s2 + $0x28] sm:$0xff] }
  0x72   :  { %7139 = vmatprep.subr.bf16.mxu1 %v8111_v42  ;;  %7882 = vmatpush3.bf16.msra.mxu0 %v8119_v60  ;;  %v8142_v42 = vld [vmem:[%s10893_s1 + $0x478] sm:$0xff]   ;;  %v8152_v60 = vld [vmem:[%s10893_s1 + $0x410] sm:$0xff]  }
  0x73   :  { %1470 = vmatmul.mubr.bf16.gmra.mrb[40].mxu0 %v9055_v39  ;;  %7171 = vmatprep.subr.bf16.mxu0 %v8125_v12  ;;  %v8159_v12 = vld [vmem:[%s10893_s1 + $0x458] sm:$0xff]  }
  0x74   :  { %1534 = vmatmul.mubr.bf16.gmra.mrb[40].mxu1 %v8109_v40  ;;  %1477 = vmatprep.mubr.bf16.mxu0 %v9089_v54  ;;  %v8140_v40 = vld [vmem:[%s10893_s1 + $0x3f8] sm:$0xff]  }
  0x75   :  { %7140 = vmatpush3.bf16.msra.mxu1 %v8112_v43  ;;  %1541 = vmatprep.mubr.bf16.mxu1 %v9091_v55  ;;  %v8143_v43 = vld [vmem:[%s10893_s1 + $0x438] sm:$0xff]  }
  0x76   :  { %7141 = vmatprep.subr.bf16.mxu1 %v8113_v49  ;;  %304 = vperm.xlu0 %7940, %v75_v36   ;;  %v8146_v49 = vld [vmem:[%s10893_s1 + $0x480] sm:$0xff]   ;;  %v8172_v36 = vld [vmem:[%s10893_s1 + $0x4f8] sm:$0xff]  }
  0x79   :  { %7142 = vmatpush3.bf16.msra.mxu1 %v8114_v50  ;;  %v8147_v50 = vld [vmem:[%s10893_s1 + $0x440] sm:$0xff]  }
  0x7a   :  { %7143 = vmatprep.subr.bf16.mxu1 %v8120_v62  ;;  %v8153_v62 = vld [vmem:[%s10893_s1 + $0x3d0] sm:$0xff]  }
  0x7b   :  { %1478 = vmatmul.mubr.bf16.gmra.mrb[44].mxu0 %v9093_v56 }
  0x7c   :  { %1542 = vmatmul.mubr.bf16.gmra.mrb[44].mxu1 %v9095_v58  ;;  %7883 = vmatprep.mubr.msk.bf16.mxu0 %vm1152_vm0, %v9125_v11 }
  0x7d   :  { %7144 = vmatpush3.bf16.msra.mxu1 %v8121_v3  ;;  %2446 = vmatprep.mubr.bf16.mxu1 %v8648_v33  ;;  %v8128_v33 = vld [vmem:[%s10893_s1 + $0x460] sm:$0xff]   ;;  %v8155_v3 = vld [vmem:[%s10893_s1 + $0x450] sm:$0xff]  }
  0x7e   :  { %7145 = vmatprep.subr.bf16.mxu1 %v8122_v4  ;;  %v8156_v4 = vld [vmem:[%s10893_s1 + $0x418] sm:$0xff]  }
  0x81   :  { %7146 = vmatpush3.bf16.msra.mxu1 %v8123_v5  ;;  %v8157_v5 = vld [vmem:[%s10893_s1 + $0x3d8] sm:$0xff]  }
  0x82   :  { %7211 = vmatprep.subr.bf16.mxu1 %v8128_v33  ;;  %v9281_v33 = vld [vmem:[%s10894_s0 + $0x8] ss:$52 sps:$4 sm:$0xff]  }
  0x83   :  { %7884 = vmatmul.mubr.msk.bf16.vlgmr.msra.gmra.mrb[48].mxu0 %vm1152_vm0, %v9136_v13 }
  0x84   :  { %7172 = vmatpush3.bf16.msra.mxu0 %v8127_v16  ;;  %2447 = vmatmul.mubr.bf16.vlgmr.msra.gmra.mrb[48].mxu1 %v8426_v23  ;;  %v8160_v16 = vld [vmem:[%s10893_s1 + $0x4e0] sm:$0xff]   ;;  %v8165_v23 = vld [vmem:[%s10893_s1 + $0x4a8] sm:$0xff]  }
  0x85   :  { %7173 = vmatprep.subr.bf16.mxu0 %v8130_v21  ;;  %7212 = vmatpush3.bf16.msra.mxu1 %v8129_v18  ;;  %v8163_v18 = vld [vmem:[%s10893_s1 + $0x520] sm:$0xff]   ;;  %v9293_v21 = vld [vmem:[%s10894_s0 + $0x74] ss:$52 sps:$4 sm:$0xff]  }
  0x86   :  { %2454 = vmatprep.mubr.bf16.mxu1 %v8687_v45  ;;  %7213 = vmatprep.subr.bf16.mxu1 %v8132_v24  ;;  %v8137_v45 = vld [vmem:[%s10893_s1 + $0x3b0] sm:$0xff]   ;;  %v8166_v24 = vld [vmem:[%s10893_s1 + $0x568] sm:$0xff]  }
  0x87   :  { %7887 = vmatprep.mubr.msk.bf16.mxu0 %vm1152_vm0, %v9174_v29 }
  0x88   :  { %7174 = vmatpush3.bf16.msra.mxu0 %v8131_v22  ;;  %v8164_v22 = vld [vmem:[%s10893_s1 + $0x4e8] sm:$0xff]  }
  0x89   :  { %7214 = vmatpush3.bf16.msra.mxu1 %v8133_v26  ;;  %7175 = vmatprep.subr.bf16.mxu0 %v8135_v30  ;;  %v8168_v26 = vld [vmem:[%s10893_s1 + $0x4f0] sm:$0xff]  }
  0x8a   :  { %7215 = vmatprep.subr.bf16.mxu1 %v8138_v35  ;;  %v8170_v30 = vld [vmem:[%s10893_s1 + $0x570] sm:$0xff]  }
  0x8b   :  { %7888 = vmatmul.mubr.msk.bf16.gmra.mrb[52].mxu0 %vm1152_vm0, %v9184_v32  ;;  %v9331_v35 = vld [vmem:[%s10894_s0 + $0xdc] ss:$52 sps:$4 sm:$0xff]  }
  0x8c   :  { %7176 = vmatpush3.bf16.msra.mxu0 %v8137_v45  ;;  %2455 = vmatmul.mubr.bf16.gmra.mrb[52].mxu1 %v8695_v47  ;;  %v9214_v47 = vld [vmem:[%s10894_s0 + $0xc] ss:$52 sps:$4 sm:$0xff]   ;;  %v8171_v45 = vld [vmem:[%s10893_s1 + $0x530] sm:$0xff]  }
  0x8d   :  { %7216 = vmatpush3.bf16.msra.mxu1 %v8139_v38  ;;  %2462 = vmatprep.mubr.bf16.mxu1 %v8729_v57  ;;  %v8144_v57 = vld [vmem:[%s10893_s1 + $0x400] sm:$0xff]   ;;  %v8173_v38 = vld [vmem:[%s10893_s1 + $0x4b8] sm:$0xff]  }
  0x8e   :  { %7177 = vmatprep.subr.bf16.mxu0 %v8140_v40  ;;  %2510 = vmatprep.mubr.bf16.mxu0 %v9214_v47  ;;  %v8174_v40 = vld [vmem:[%s10893_s1 + $0x578] sm:$0xff]  }
  0x8f   :  { %7217 = vmatprep.subr.bf16.mxu1 %v8142_v42  ;;  %v9357_v42 = vld [vmem:[%s10894_s0 + $0xd8] ss:$52 sps:$4 sm:$0xff]  }
  0x90   :  { %7178 = vmatpush3.bf16.msra.mxu0 %v8141_v41  ;;  %v8176_v41 = vld [vmem:[%s10893_s1 + $0x500] sm:$0xff]  }
  0x91   :  { %7218 = vmatpush3.bf16.msra.mxu1 %v8143_v43  ;;  %7179 = vmatprep.subr.bf16.mxu0 %v8144_v57  ;;  %v8178_v43 = vld [vmem:[%s10893_s1 + $0x580] sm:$0xff]  }
  0x92   :  { %7219 = vmatprep.subr.bf16.mxu1 %v8146_v49  ;;  %v8179_v57 = vld [vmem:[%s10893_s1 + $0x540] sm:$0xff]   ;;  %v8181_v49 = vld [vmem:[%s10893_s1 + $0x4c8] sm:$0xff]  }
  0x94   :  { %7180 = vmatpush3.bf16.msra.mxu0 %v8145_v46  ;;  %2463 = vmatmul.mubr.bf16.gmra.mrb[56].mxu1 %v8737_v59  ;;  %v8151_v59 = vld [vmem:[%s10893_s1 + $0x448] sm:$0xff]  }
  0x95   :  { %7220 = vmatpush3.bf16.msra.mxu1 %v8147_v50  ;;  %2470 = vmatprep.mubr.bf16.mxu1 %v8774_v7  ;;  %v8180_v46 = vld [vmem:[%s10893_s1 + $0x508] sm:$0xff]  }
  0x96   :  { %7181 = vmatprep.subr.bf16.mxu0 %v8148_v51  ;;  %7221 = vmatprep.subr.bf16.mxu1 %v8150_v53  ;;  %v8182_v50 = vld [vmem:[%s10893_s1 + $0x588] sm:$0xff]   ;;  %v8184_v51 = vld [vmem:[%s10893_s1 + $0x510] sm:$0xff]  }
  0x97   :  { %v8186_v53 = vld [vmem:[%s10893_s1 + $0x590] sm:$0xff]  }
  0x98   :  { %7182 = vmatpush3.bf16.msra.mxu0 %v8149_v52  ;;  %v8185_v52 = vld [vmem:[%s10893_s1 + $0x4d0] sm:$0xff]  }
  0x99   :  { %7222 = vmatpush3.bf16.msra.mxu1 %v8151_v59  ;;  %7183 = vmatprep.subr.bf16.mxu0 %v8152_v60  ;;  %v8187_v59 = vld [vmem:[%s10893_s1 + $0x550] sm:$0xff]  }
  0x9a   :  { %7223 = vmatprep.subr.bf16.mxu1 %v8154_v2  ;;  %v8433_v60 = vld [vmem:[%s10894_s0 + $0x1c] ss:$52 sps:$4 sm:$0xff]  }
  0x9b   :  { %v8189_v2 = vld [vmem:[%s10893_s1 + $0x4d8] sm:$0xff]  }
  0x9c   :  { %7184 = vmatpush3.bf16.msra.mxu0 %v8153_v62  ;;  %2471 = vmatmul.mubr.bf16.gmra.mrb[60].mxu1 %v8778_v9  ;;  %v8188_v62 = vld [vmem:[%s10893_s1 + $0x518] sm:$0xff]  }
  0x9d   :  { %7224 = vmatpush3.bf16.msra.mxu1 %v8155_v3  ;;  %2574 = vmatprep.mubr.bf16.mxu1 %v8818_v20  ;;  %v8161_v20 = vld [vmem:[%s10893_s1 + $0x4a0] sm:$0xff]   ;;  %v8190_v3 = vld [vmem:[%s10893_s1 + $0x598] sm:$0xff]  }
  0x9e   :  { %7185 = vmatprep.subr.bf16.mxu0 %v8156_v4  ;;  %7225 = vmatprep.subr.bf16.mxu1 %v8158_v6  ;;  %v8191_v4 = vld [vmem:[%s10893_s1 + $0x558] sm:$0xff]  }
  0x9f   :  { %v8434_v6 = vld [vmem:[%s10894_s0 + $0x18] ss:$52 sps:$4 sm:$0xff]  }
  0xa0   :  { %7186 = vmatpush3.bf16.msra.mxu0 %v8157_v5  ;;  %v8192_v5 = vld [vmem:[%s10893_s1 + $0x5e0] sm:$0xff]  }
  0xa1   :  { %7226 = vmatpush3.bf16.msra.mxu1 %v8159_v12  ;;  %7251 = vmatprep.subr.bf16.mxu0 %v8160_v16  ;;  %v8194_v12 = vld [vmem:[%s10893_s1 + $0x5e8] sm:$0xff]  }
  0xa2   :  { %7291 = vmatprep.subr.bf16.mxu1 %v8162_v17  ;;  %v8195_v16 = vld [vmem:[%s10893_s1 + $0x5a8] sm:$0xff]   ;;  %v8196_v17 = vld [vmem:[%s10893_s1 + $0x620] sm:$0xff]  }
  0xa3   :  { %2511 = vmatmul.mubr.bf16.vlgmr.msra.gmra.mrb[56].mxu0 %v9281_v33 }
  0xa4   :  { %7252 = vmatpush3.bf16.msra.mxu0 %v8161_v20  ;;  %2518 = vmatprep.mubr.bf16.mxu0 %v9293_v21  ;;  %v8435_v20 = vld [vmem:[%s10894_s0 + $0x84] ss:$52 sps:$4 sm:$0xff]  }
  0xa5   :  { %2575 = vmatmul.mubr.bf16.vlgmr.msra.gmra.mrb[64].mxu1 %v8813_v19  ;;  %7253 = vmatprep.subr.bf16.mxu0 %v8164_v22  ;;  %v8167_v19 = vld [vmem:[%s10893_s1 + $0x528] sm:$0xff]   ;;  %v8198_v22 = vld [vmem:[%s10893_s1 + $0x5b0] sm:$0xff]  }
  0xa6   :  { %7292 = vmatpush3.bf16.msra.mxu1 %v8163_v18  ;;  %2582 = vmatprep.mubr.bf16.mxu1 %v8855_v31  ;;  %v8169_v31 = vld [vmem:[%s10893_s1 + $0x4b0] sm:$0xff]  }
  0xa7   :  { %7293 = vmatprep.subr.bf16.mxu1 %v8166_v24  ;;  %v8197_v18 = vld [vmem:[%s10893_s1 + $0x5f0] sm:$0xff]   ;;  %v8200_v24 = vld [vmem:[%s10893_s1 + $0x5b8] sm:$0xff]  }
  0xa8   :  { %7254 = vmatpush3.bf16.msra.mxu0 %v8165_v23  ;;  %v8436_v23 = vld [vmem:[%s10894_s0 + $0x80] ss:$52 sps:$4 sm:$0xff]  }
  0xa9   :  { %7255 = vmatprep.subr.bf16.mxu0 %v8168_v26  ;;  %v8437_v26 = vld [vmem:[%s10894_s0 + $0xec] ss:$52 sps:$4 sm:$0xff]  }
  0xaa   :  { %7294 = vmatpush3.bf16.msra.mxu1 %v8167_v19  ;;  %v8202_v19 = vld [vmem:[%s10893_s1 + $0x600] sm:$0xff]  }
  0xab   :  { %2519 = vmatmul.mubr.bf16.gmra.mrb[60].mxu0 %v9319_v28  ;;  %7295 = vmatprep.subr.bf16.mxu1 %v8170_v30  ;;  %v8204_v30 = vld [vmem:[%s10893_s1 + $0x608] sm:$0xff]  }
  0xac   :  { %7256 = vmatpush3.bf16.msra.mxu0 %v8169_v31  ;;  %2526 = vmatprep.mubr.bf16.mxu0 %v9331_v35  ;;  %v8206_v31 = vld [vmem:[%s10893_s1 + $0x630] sm:$0xff]  }
  0xad   :  { %2583 = vmatmul.mubr.bf16.gmra.mrb[68].mxu1 %v8863_v34  ;;  %7257 = vmatprep.subr.bf16.mxu0 %v8172_v36  ;;  %v8175_v34 = vld [vmem:[%s10893_s1 + $0x538] sm:$0xff]   ;;  %v8205_v36 = vld [vmem:[%s10893_s1 + $0x5c8] sm:$0xff]  }
  0xae   :  { %7296 = vmatpush3.bf16.msra.mxu1 %v8171_v45  ;;  %2590 = vmatprep.mubr.bf16.mxu1 %v8897_v44  ;;  %v8177_v44 = vld [vmem:[%s10893_s1 + $0x4c0] sm:$0xff]   ;;  %v8210_v45 = vld [vmem:[%s10893_s1 + $0x638] sm:$0xff]  }
  0xaf   :  { %7297 = vmatprep.subr.bf16.mxu1 %v8174_v40  ;;  %v8213_v40 = vld [vmem:[%s10893_s1 + $0x700] sm:$0xff]  }
  0xb0   :  { %7258 = vmatpush3.bf16.msra.mxu0 %v8173_v38  ;;  %v8207_v38 = vld [vmem:[%s10893_s1 + $0x610] sm:$0xff]  }
  0xb1   :  { %7259 = vmatprep.subr.bf16.mxu0 %v8176_v41  ;;  %v8211_v41 = vld [vmem:[%s10893_s1 + $0x5d8] sm:$0xff]  }
  0xb2   :  { %7298 = vmatpush3.bf16.msra.mxu1 %v8175_v34  ;;  %v8208_v34 = vld [vmem:[%s10893_s1 + $0x5d0] sm:$0xff]  }
  0xb3   :  { %2527 = vmatmul.mubr.bf16.gmra.mrb[64].mxu0 %v9357_v42  ;;  %7299 = vmatprep.subr.bf16.mxu1 %v8178_v43  ;;  %v8212_v43 = vld [vmem:[%s10893_s1 + $0x680] sm:$0xff]  }
  0xb4   :  { %7260 = vmatpush3.bf16.msra.mxu0 %v8177_v44  ;;  %2534 = vmatprep.mubr.bf16.mxu0 %v8776_v8  ;;  %v8439_v44 = vld [vmem:[%s10894_s0 + $0x2c] ss:$52 sps:$4 sm:$0xff]  }
  0xb5   :  { %2591 = vmatmul.mubr.bf16.gmra.mrb[72].mxu1 %v8906_v48  ;;  %7261 = vmatprep.subr.bf16.mxu0 %v8180_v46  ;;  %v8183_v48 = vld [vmem:[%s10893_s1 + $0x548] sm:$0xff]   ;;  %v8215_v46 = vld [vmem:[%s10893_s1 + $0x6c0] sm:$0xff]  }
  0xb6   :  { %7300 = vmatpush3.bf16.msra.mxu1 %v8179_v57  ;;  %2598 = vmatprep.mubr.bf16.mxu1 %v8939_v61  ;;  %v8214_v57 = vld [vmem:[%s10893_s1 + $0x640] sm:$0xff]  }
  0xb7   :  { %7301 = vmatprep.subr.bf16.mxu1 %v8182_v50  ;;  %v8217_v50 = vld [vmem:[%s10893_s1 + $0x708] sm:$0xff]  }
  0xb8   :  { %7262 = vmatpush3.bf16.msra.mxu0 %v8181_v49  ;;  %v8216_v49 = vld [vmem:[%s10893_s1 + $0x688] sm:$0xff]  }
  0xb9   :  { %7263 = vmatprep.subr.bf16.mxu0 %v8184_v51  ;;  %v8219_v51 = vld [vmem:[%s10893_s1 + $0x6c8] sm:$0xff]  }
  0xba   :  { %7302 = vmatpush3.bf16.msra.mxu1 %v8183_v48  ;;  %v8218_v48 = vld [vmem:[%s10893_s1 + $0x648] sm:$0xff]  }
  0xbb   :  { %2535 = vmatmul.mubr.bf16.gmra.mrb[68].mxu0 %v8780_v10  ;;  %7303 = vmatprep.subr.bf16.mxu1 %v8186_v53 }
  0xbc   :  { %7264 = vmatpush3.bf16.msra.mxu0 %v8185_v52  ;;  %2638 = vmatprep.mubr.bf16.mxu0 %v8433_v60  ;;  %v8441_v52 = vld [vmem:[%s10894_s0 + $0x94] ss:$52 sps:$4 sm:$0xff]  }
  0xbd   :  { %2599 = vmatmul.mubr.bf16.gmra.mrb[76].mxu1 %v8944_v63  ;;  %7265 = vmatprep.subr.bf16.mxu0 %v8188_v62  ;;  %v8221_v62 = vld [vmem:[%s10893_s1 + $0x710] sm:$0xff]  }
  0xbe   :  { %7304 = vmatpush3.bf16.msra.mxu1 %v8187_v59  ;;  %2702 = vmatprep.mubr.bf16.mxu1 %v8986_v15  ;;  %v8193_v15 = vld [vmem:[%s10893_s1 + $0x5a0] sm:$0xff]   ;;  %v8220_v59 = vld [vmem:[%s10893_s1 + $0x690] sm:$0xff]  }
  0xbf   :  { %7305 = vmatprep.subr.bf16.mxu1 %v8190_v3 }
  0xc0   :  { %7266 = vmatpush3.bf16.msra.mxu0 %v8189_v2 }
  0xc1   :  { %7331 = vmatprep.subr.bf16.mxu0 %v8192_v5  ;;  %v8223_v5 = vld [vmem:[%s10893_s1 + $0x6d0] sm:$0xff]  }
  0xc2   :  { %7306 = vmatpush3.bf16.msra.mxu1 %v8191_v4 }
  0xc3   :  { %2639 = vmatmul.mubr.bf16.vlgmr.msra.gmra.mrb[72].mxu0 %v8434_v6  ;;  %7891 = vmatprep.subr.bf16.mxu1 %v8196_v17 }
  0xc4   :  { %7332 = vmatpush3.bf16.msra.mxu0 %v8193_v15  ;;  %2646 = vmatprep.mubr.bf16.mxu0 %v8435_v20 }
  0xc5   :  { %2703 = vmatmul.mubr.bf16.vlgmr.msra.gmra.mrb[80].mxu1 %v8981_v14  ;;  %7333 = vmatprep.subr.bf16.mxu0 %v8194_v12  ;;  %v8199_v14 = vld [vmem:[%s10893_s1 + $0x5f8] sm:$0xff]  }
  0xc6   :  { %2710 = vmatprep.mubr.bf16.mxu1 %v9014_v25  ;;  %7892 = vmatpush3.bf16.msra.mxu1 %v8196_v17  ;;  %v8201_v25 = vld [vmem:[%s10893_s1 + $0x628] sm:$0xff]  }
  0xc7   :  { %7893 = vmatprep.subr.bf16.mxu1 %v8201_v25 }
  0xc8   :  { %7334 = vmatpush3.bf16.msra.mxu0 %v8195_v16  ;;  %v8225_v16 = vld [vmem:[%s10893_s1 + $0x718] sm:$0xff]  }
  0xc9   :  { %7335 = vmatprep.subr.bf16.mxu0 %v8197_v18  ;;  %v8442_v18 = vld [vmem:[%s10894_s0 + $0x90] ss:$52 sps:$4 sm:$0xff]  }
  0xca   :  { %7894 = vmatpush3.bf16.msra.mxu1 %v8201_v25  ;;  %v8227_v25 = vld [vmem:[%s10893_s1 + $0x6d8] sm:$0xff]  }
  0xcb   :  { %2647 = vmatmul.mubr.bf16.gmra.mrb[76].mxu0 %v8436_v23  ;;  %7895 = vmatprep.subr.bf16.mxu1 %v8206_v31  ;;  %v8443_v23 = vld [vmem:[%s10894_s0 + $0xfc] ss:$52 sps:$4 sm:$0xff]  }
  0xcc   :  { %7336 = vmatpush3.bf16.msra.mxu0 %v8198_v22  ;;  %2654 = vmatprep.mubr.bf16.mxu0 %v8437_v26  ;;  %v8226_v22 = vld [vmem:[%s10893_s1 + $0x658] sm:$0xff]   ;;  %v8229_v26 = vld [vmem:[%s10893_s1 + $0x720] sm:$0xff]  }
  0xcd   :  { %2711 = vmatmul.mubr.bf16.gmra.mrb[84].mxu1 %v9023_v27  ;;  %7337 = vmatprep.subr.bf16.mxu0 %v8199_v14  ;;  %v8203_v27 = vld [vmem:[%s10893_s1 + $0x5c0] sm:$0xff]  }
  0xce   :  { %2718 = vmatprep.mubr.bf16.mxu1 %v9047_v37  ;;  %7896 = vmatpush3.bf16.msra.mxu1 %v8206_v31  ;;  %v8438_v37 = vld [vmem:[%s10894_s0 + $0xe8] ss:$52 sps:$4 sm:$0xff]  }
  0xcf   :  { %7897 = vmatprep.subr.bf16.mxu1 %v8210_v45 }
  0xd0   :  { %7338 = vmatpush3.bf16.msra.mxu0 %v8200_v24 }
  0xd1   :  { %7339 = vmatprep.subr.bf16.mxu0 %v8202_v19  ;;  %v8228_v19 = vld [vmem:[%s10893_s1 + $0x6a0] sm:$0xff]  }
  0xd2   :  { %7898 = vmatpush3.bf16.msra.mxu1 %v8210_v45 }
  0xd3   :  { %2655 = vmatmul.mubr.bf16.gmra.mrb[80].mxu0 %v8438_v37  ;;  %7419 = vmatprep.subr.bf16.mxu1 %v8213_v40  ;;  %v8231_v37 = vld [vmem:[%s10893_s1 + $0x6e0] sm:$0xff]  }
  0xd4   :  { %7340 = vmatpush3.bf16.msra.mxu0 %v8203_v27  ;;  %2662 = vmatprep.mubr.bf16.mxu0 %v8946_v0  ;;  %v8230_v27 = vld [vmem:[%s10893_s1 + $0x660] sm:$0xff]  }
  0xd5   :  { %2719 = vmatmul.mubr.bf16.gmra.mrb[88].mxu1 %v9055_v39  ;;  %7341 = vmatprep.subr.bf16.mxu0 %v8204_v30  ;;  %v8209_v39 = vld [vmem:[%s10893_s1 + $0x618] sm:$0xff]  }
  0xd6   :  { %2726 = vmatprep.mubr.bf16.mxu1 %v9089_v54 }
  0xd8   :  { %7342 = vmatpush3.bf16.msra.mxu0 %v8205_v36  ;;  %v8232_v36 = vld [vmem:[%s10893_s1 + $0x6a8] sm:$0xff]  }
  0xd9   :  { %7343 = vmatprep.subr.bf16.mxu0 %v8207_v38  ;;  %v8233_v38 = vld [vmem:[%s10893_s1 + $0x728] sm:$0xff]  }
  0xdb   :  { %2663 = vmatmul.mubr.bf16.gmra.mrb[84].mxu0 %v8948_v1 }
  0xdc   :  { %7344 = vmatpush3.bf16.msra.mxu0 %v8208_v34  ;;  %2766 = vmatprep.mubr.bf16.mxu0 %v8439_v44  ;;  %v8444_v34 = vld [vmem:[%s10894_s0 + $0xf8] ss:$52 sps:$4 sm:$0xff]  }
  0xdd   :  { %2727 = vmatmul.mubr.bf16.gmra.mrb[92].mxu1 %v9093_v56  ;;  %7345 = vmatprep.subr.bf16.mxu0 %v8209_v39  ;;  %v8234_v39 = vld [vmem:[%s10893_s1 + $0x668] sm:$0xff]  }
  0xde   :  { %7899 = vmatprep.mubr.msk.bf16.mxu1 %vm1152_vm0, %v9125_v11  ;;  %v8440_v11 = vld [vmem:[%s10894_s0 + $0x28] ss:$52 sps:$4 sm:$0xff]  }
  0xe0   :  { %7346 = vmatpush3.bf16.msra.mxu0 %v8211_v41 }
  0xe1   :  { %7379 = vmatprep.subr.bf16.mxu0 %v8212_v43  ;;  %v9603_v43 = vpop.permute.xlu0 %309 }
  0xe3   :  { %2767 = vmatmul.mubr.bf16.vlgmr.msra.gmra.mrb[88].mxu0 %v8440_v11 }
  0xe4   :  { %7380 = vmatpush3.bf16.msra.mxu0 %v8214_v57  ;;  %2774 = vmatprep.mubr.bf16.mxu0 %v8441_v52  ;;  %v8235_v57 = vld [vmem:[%s10893_s1 + $0x6e8] sm:$0xff]   ;;  %v8238_v52 = vld [vmem:[%s10893_s1 + $0x670] sm:$0xff]  }
  0xe5   :  { %7900 = vmatmul.mubr.msk.bf16.vlgmr.msra.gmra.mrb[96].mxu1 %vm1152_vm0, %v9136_v13  ;;  %7381 = vmatprep.subr.bf16.mxu0 %v8216_v49  ;;  %v8222_v13 = vld [vmem:[%s10893_s1 + $0x650] sm:$0xff]  }
  0xe6   :  { %7420 = vmatpush3.bf16.msra.mxu1 %v8215_v46  ;;  %7903 = vmatprep.mubr.msk.bf16.mxu1 %vm1152_vm0, %v9174_v29  ;;  %v8224_v29 = vld [vmem:[%s10893_s1 + $0x698] sm:$0xff]  }
  0xe7   :  { %7421 = vmatprep.subr.bf16.mxu1 %v8217_v50  ;;  %v8236_v50 = vld [vmem:[%s10893_s1 + $0x6b0] sm:$0xff]  }
  0xe8   :  { %7382 = vmatpush3.bf16.msra.mxu0 %v8218_v48  ;;  %v8237_v48 = vld [vmem:[%s10893_s1 + $0x730] sm:$0xff]  }
  0xe9   :  { %7383 = vmatprep.subr.bf16.mxu0 %v8220_v59  ;;  %v8239_v59 = vld [vmem:[%s10893_s1 + $0x6f0] sm:$0xff]  }
  0xea   :  { %7422 = vmatpush3.bf16.msra.mxu1 %v8219_v51 }
  0xeb   :  { %2775 = vmatmul.mubr.bf16.gmra.mrb[92].mxu0 %v8442_v18  ;;  %7423 = vmatprep.subr.bf16.mxu1 %v8221_v62  ;;  %v8240_v62 = vld [vmem:[%s10893_s1 + $0x6b8] sm:$0xff]  }
  0xec   :  { %7384 = vmatpush3.bf16.msra.mxu0 %v8222_v13  ;;  %2782 = vmatprep.mubr.bf16.mxu0 %v8443_v23  ;;  %v8241_v13 = vld [vmem:[%s10893_s1 + $0x738] sm:$0xff]  }
  0xed   :  { %7385 = vmatprep.subr.bf16.mxu0 %v8224_v29  ;;  %7904 = vmatmul.mubr.msk.bf16.gmra.mrb[100].mxu1 %vm1152_vm0, %v9184_v32 }
  0xee   :  { %7424 = vmatpush3.bf16.msra.mxu1 %v8223_v5  ;;  %3759 = vmatprep.mubr.bf16.mxu1 %v9214_v47  ;;  %v8242_v5 = vld [vmem:[%s10893_s1 + $0x678] sm:$0xff]  }
  0xef   :  { %7425 = vmatprep.subr.bf16.mxu1 %v8225_v16  ;;  %v8445_v16 = vld [vmem:[%s10894_s0 + $0x4] ss:$52 sps:$4 sm:$0xff]  }
  0xf0   :  { %7386 = vmatpush3.bf16.msra.mxu0 %v8226_v22 }
  0xf1   :  { %7387 = vmatprep.subr.bf16.mxu0 %v8228_v19 }
  0xf2   :  { %7426 = vmatpush3.bf16.msra.mxu1 %v8227_v25  ;;  %v8243_v25 = vld [vmem:[%s10893_s1 + $0x6f8] sm:$0xff]  }
  0xf3   :  { %2783 = vmatmul.mubr.bf16.gmra.mrb[96].mxu0 %v8444_v34  ;;  %7427 = vmatprep.subr.bf16.mxu1 %v8229_v26  ;;  %v8446_v34 = vld [vmem:[%s10894_s0] ss:$52 sps:$4 sm:$0xff]  }
  0xf4   :  { %7388 = vmatpush3.bf16.msra.mxu0 %v8230_v27  ;;  %2790 = vmatprep.mubr.bf16.mxu0 %v9091_v55 }
  0xf5   :  { %7389 = vmatprep.subr.bf16.mxu0 %v8232_v36 }
  0xf6   :  { %v6899_v53 = vpop.f32.mrb[0].mxu0  ;;  %7428 = vmatpush3.bf16.msra.mxu1 %v8231_v37  ;;  %v8246_v37 = vld [vmem:[%s10893_s1 + $0x740] sm:$0xff]  }
  0xf7   :  { %v6900_v60 = vpop.f32.mrb[1].mxu0  ;;  %v6939_v3 = vpop.f32.mrb[0].mxu1  ;;  %7429 = vmatprep.subr.bf16.mxu1 %v8233_v38 }
  0xf8   :  { %v9540_v2 = vadd.f32 %v6900_v60, %v6899_v53  ;;  %v6902_v4 = vpop.f32.mrb[2].mxu0  ;;  %v6940_v15 = vpop.f32.mrb[1].mxu1  ;;  %7390 = vmatpush3.bf16.msra.mxu0 %v8234_v39 }
  0xf9   :  { %v9551_v6 = vadd.f32 %v6940_v15, %v6939_v3  ;;  %v6903_v12 = vpop.f32.mrb[3].mxu0  ;;  %v6942_v17 = vpop.f32.mrb[2].mxu1  ;;  %7391 = vmatprep.subr.bf16.mxu0 %v8236_v50 }
  0xfa   :  { %v9556_v20 = vadd.f32 %v6903_v12, %v6902_v4  ;;  %v6943_v14 = vpop.f32.mrb[3].mxu1  ;;  %v9618_v53 = vpop.permute.xlu0 %279  ;;  %7430 = vmatpush3.bf16.msra.mxu1 %v8235_v57  ;;  %v8447_v57 = vld [vmem:[%s10894_s0 + $0x6c] ss:$52 sps:$4 sm:$0xff]  }
  0xfb   :  { %v9570_v24 = vadd.f32 %v6943_v14, %v6942_v17  ;;  %v1200_v60 = vadd.f32 %v9540_v2, %v9618_v53  ;;  %2791 = vmatmul.mubr.bf16.gmra.mrb[100].mxu0 %v9095_v58  ;;  %7431 = vmatprep.subr.bf16.mxu1 %v8237_v48  ;;  %v9638_v12 = vpop.permute.xlu1 %284  ;;  %v8244_v17 = vld [vmem:[%s10893_s1 + $0x780] sm:$0xff]  }
  0xfc   :  { %7392 = vmatpush3.bf16.msra.mxu0 %v8238_v52  ;;  %3695 = vmatprep.mubr.bf16.mxu0 %v8445_v16  ;;  %v1203_v22 = vadd.f32 %v9556_v20, %v9638_v12  ;;  %v8251_v52 = vld [vmem:[%s10893_s1 + $0x7c8] sm:$0xff]  }
  0xfd   :  { %v9636_v29 = vadd.f32 %v9551_v6, %v1200_v60  ;;  %7393 = vmatprep.subr.bf16.mxu0 %v8240_v62 }
  0xfe   :  { %v6905_v31 = vpop.f32.mrb[4].mxu0  ;;  %7432 = vmatpush3.bf16.msra.mxu1 %v8239_v59 }
  0xff   :  { %v6906_v30 = vpop.f32.mrb[5].mxu0  ;;  %v6945_v45 = vpop.f32.mrb[4].mxu1  ;;  %7433 = vmatprep.subr.bf16.mxu1 %v8241_v13  ;;  %v8254_v13 = vld [vmem:[%s10893_s1 + $0x750] sm:$0xff]  }
 0x100   :  { %v9587_v32 = vadd.f32 %v6906_v30, %v6905_v31  ;;  %v6908_v47 = vpop.f32.mrb[6].mxu0  ;;  %v6946_v40 = vpop.f32.mrb[5].mxu1  ;;  %v8245_v31 = vld [vmem:[%s10893_s1 + $0x800] sm:$0xff]   ;;  %v9655_v30 = vadd.f32 %v9570_v24, %v1203_v22  ;;  %7394 = vmatpush3.bf16.msra.mxu0 %v8242_v5  ;;  %v8248_v24 = vld [vmem:[%s10893_s1 + $0x788] sm:$0xff]  }
 0x101   :  { %v9601_v41 = vadd.f32 %v6946_v40, %v6945_v45  ;;  %v6909_v44 = vpop.f32.mrb[7].mxu0  ;;  %v6948_v49 = vpop.f32.mrb[6].mxu1  ;;  %7459 = vmatprep.subr.bf16.mxu0 %v8244_v17  ;;  %v8247_v40 = vld [vmem:[%s10893_s1 + $0x7c0] sm:$0xff]  }
 0x102   :  { %v6910_v46 = vadd.f32 %v6909_v44, %v6908_v47  ;;  %v6949_v11 = vpop.f32.mrb[7].mxu1  ;;  %v9657_v20 = vpop.permute.xlu1 %289  ;;  %7434 = vmatpush3.bf16.msra.mxu1 %v8243_v25  ;;  %v8250_v44 = vld [vmem:[%s10893_s1 + $0x748] sm:$0xff]   ;;  %v8258_v25 = vld [vmem:[%s10893_s1 + $0x758] sm:$0xff]  }
 0x103   :  { %v6950_v51 = vadd.f32 %v6949_v11, %v6948_v49  ;;  %v1208_v36 = vadd.f32 %v9587_v32, %v9657_v20  ;;  %v9666_v47 = vpop.permute.xlu0 %294  ;;  %3696 = vmatmul.mubr.bf16.vlgmr.msra.gmra.mrb[104].mxu0 %v8446_v34  ;;  %7499 = vmatprep.subr.bf16.mxu1 %v8245_v31  ;;  %v8249_v32 = vld [vmem:[%s10893_s1 + $0x808] sm:$0xff]  }
 0x104   :  { %v1211_v38 = vadd.f32 %v6910_v46, %v9666_v47  ;;  %7460 = vmatpush3.bf16.msra.mxu0 %v8246_v37  ;;  %3703 = vmatprep.mubr.bf16.mxu0 %v8447_v57  ;;  %v8252_v46 = vld [vmem:[%s10893_s1 + $0x790] sm:$0xff]  }
 0x105   :  { %v9682_v39 = vadd.f32 %v9601_v41, %v1208_v36  ;;  %3760 = vmatmul.mubr.bf16.vlgmr.msra.gmra.mrb[104].mxu1 %v9281_v33  ;;  %7461 = vmatprep.subr.bf16.mxu0 %v8248_v24  ;;  %v8253_v33 = vld [vmem:[%s10893_s1 + $0x810] sm:$0xff]   ;;  %v8262_v36 = vld [vmem:[%s10893_s1 + $0x760] sm:$0xff]  }
 0x106   :  { %v6911_v3 = vpop.f32.mrb[8].mxu0  ;;  %v9693_v11 = vadd.f32 %v6950_v51, %v1211_v38  ;;  %7500 = vmatpush3.bf16.msra.mxu1 %v8247_v40  ;;  %v9699_v59 = vpop.permute.xlu1 %299  ;;  %3767 = vmatprep.mubr.bf16.mxu1 %v9293_v21  ;;  %v8255_v21 = vld [vmem:[%s10893_s1 + $0x7d0] sm:$0xff]  }
 0x107   :  { %v6912_v4 = vpop.f32.mrb[9].mxu0  ;;  %v6951_v15 = vpop.f32.mrb[8].mxu1  ;;  %7501 = vmatprep.subr.bf16.mxu1 %v8249_v32  ;;  %v8449_v31 = vld [vmem:[%s10894_s0 + $0xd4] ss:$52 sps:$4 sm:$0xff]  }
 0x108   :  { %v6913_v2 = vadd.f32 %v6912_v4, %v6911_v3  ;;  %v6914_v18 = vpop.f32.mrb[10].mxu0  ;;  %v6952_v14 = vpop.f32.mrb[9].mxu1  ;;  %7462 = vmatpush3.bf16.msra.mxu0 %v8250_v44 }
 0x109   :  { %v6915_v6 = vpop.f32.mrb[11].mxu0  ;;  %v6953_v23 = vadd.f32 %v6952_v14, %v6951_v15  ;;  %v6954_v26 = vpop.f32.mrb[10].mxu1  ;;  %v8256_v15 = vld [vmem:[%s10893_s1 + $0x798] sm:$0xff]   ;;  %7463 = vmatprep.subr.bf16.mxu0 %v8252_v46  ;;  %v8264_v46 = vld [vmem:[%s10893_s1 + $0x7a8] sm:$0xff]  }
 0x10a   :  { %v6916_v19 = vadd.f32 %v6915_v6, %v6914_v18  ;;  %v6955_v27 = vpop.f32.mrb[11].mxu1  ;;  %v1216_v51 = vadd.f32 %v6913_v2, %v9699_v59  ;;  %7502 = vmatpush3.bf16.msra.mxu1 %v8251_v52  ;;  %v8257_v18 = vld [vmem:[%s10893_s1 + $0x818] sm:$0xff]   ;;  %v9726_v6 = vpop.permute.xlu0 %304  ;;  %v8450_v52 = vld [vmem:[%s10894_s0 + $0xd0] ss:$52 sps:$4 sm:$0xff]  }
 0x10b   :  { %v9662_v45 = vadd.f32 %v6955_v27, %v6954_v26  ;;  %v8448_v14 = vld [vmem:[%s10894_s0 + $0x68] ss:$52 sps:$4 sm:$0xff]   ;;  %7503 = vmatprep.subr.bf16.mxu1 %v8253_v33  ;;  %v8260_v27 = vld [vmem:[%s10893_s1 + $0x7a0] sm:$0xff]   ;;  %v8268_v33 = vld [vmem:[%s10893_s1 + $0x7b0] sm:$0xff]  }
 0x10c   :  { %v9716_v17 = vadd.f32 %v6953_v23, %v1216_v51  ;;  %3704 = vmatmul.mubr.bf16.gmra.mrb[108].mxu0 %v8448_v14  ;;  %v1219_v23 = vadd.f32 %v6916_v19, %v9726_v6  ;;  %v8259_v26 = vld [vmem:[%s10893_s1 + $0x7d8] sm:$0xff]   ;;  %v8261_v19 = vld [vmem:[%s10893_s1 + $0x820] sm:$0xff]   ;;  %v8271_v14 = vld [vmem:[%s10893_s1 + $0x7f0] sm:$0xff]  }
 0x10d   :  { %7464 = vmatpush3.bf16.msra.mxu0 %v8254_v13  ;;  %3711 = vmatprep.mubr.bf16.mxu0 %v8449_v31  ;;  %v8269_v13 = vld [vmem:[%s10893_s1 + $0x830] sm:$0xff]  }
 0x10e   :  { %v6917_v49 = vpop.f32.mrb[12].mxu0  ;;  %3768 = vmatmul.mubr.bf16.gmra.mrb[108].mxu1 %v9319_v28  ;;  %7465 = vmatprep.subr.bf16.mxu0 %v8256_v15  ;;  %v9750_v28 = vadd.f32 %v9662_v45, %v1219_v23  ;;  %v8263_v45 = vld [vmem:[%s10893_s1 + $0x7e0] sm:$0xff]  }
 0x10f   :  { %v6957_v50 = vpop.f32.mrb[12].mxu1  ;;  %v6918_v41 = vpop.f32.mrb[13].mxu0  ;;  %7504 = vmatpush3.bf16.msra.mxu1 %v8255_v21  ;;  %3775 = vmatprep.mubr.bf16.mxu1 %v9331_v35 }
 0x110   :  { %v6958_v48 = vpop.f32.mrb[13].mxu1  ;;  %v6919_v60 = vadd.f32 %v6918_v41, %v6917_v49  ;;  %v6920_v62 = vpop.f32.mrb[14].mxu0  ;;  %7505 = vmatprep.subr.bf16.mxu1 %v8257_v18 }
 0x111   :  { %v6959_v3 = vadd.f32 %v6958_v48, %v6957_v50  ;;  %v6921_v4 = vpop.f32.mrb[15].mxu0  ;;  %v6960_v5 = vpop.f32.mrb[14].mxu1  ;;  %7466 = vmatpush3.bf16.msra.mxu0 %v8258_v25  ;;  %v8273_v25 = vld [vmem:[%s10893_s1 + $0x838] sm:$0xff]  }
 0x112   :  { %v1224_v2 = vadd.f32 %v6919_v60, %v9603_v43  ;;  %v6961_v16 = vpop.f32.mrb[15].mxu1  ;;  %7467 = vmatprep.subr.bf16.mxu0 %v8260_v27  ;;  %v8265_v60 = vld [vmem:[%s10893_s1 + $0x828] sm:$0xff]   ;;  %v8270_v4 = vld [vmem:[%s10893_s1 + $0x770] sm:$0xff]   ;;  %v8272_v5 = vld [vmem:[%s10893_s1 + $0x7b8] sm:$0xff]  }
 0x113   :  { %7506 = vmatpush3.bf16.msra.mxu1 %v8259_v26 }
 0x114   :  { %v9721_v22 = vadd.f32 %v6959_v3, %v1224_v2  ;;  %3712 = vmatmul.mubr.bf16.gmra.mrb[112].mxu0 %v8450_v52  ;;  %7507 = vmatprep.subr.bf16.mxu1 %v8261_v19  ;;  %v8266_v3 = vld [vmem:[%s10893_s1 + $0x768] sm:$0xff]   ;;  %v8453_v52 = vld [vmem:[%s10894_s0 + $0x10] ss:$52 sps:$4 sm:$0xff]  }
 0x115   :  { %7468 = vmatpush3.bf16.msra.mxu0 %v8262_v36  ;;  %3719 = vmatprep.mubr.bf16.mxu0 %v8774_v7 }
 0x116   :  { %v6979_v37 = vpop.f32.mrb[16].mxu0  ;;  %3776 = vmatmul.mubr.bf16.gmra.mrb[112].mxu1 %v9357_v42  ;;  %7469 = vmatprep.subr.bf16.mxu0 %v8264_v46  ;;  %v8279_v46 = vld [vmem:[%s10893_s1 + $0x8c0] sm:$0xff]  }
 0x117   :  { %v6980_v24 = vpop.f32.mrb[17].mxu0  ;;  %v7019_v38 = vpop.f32.mrb[16].mxu1  ;;  %7508 = vmatpush3.bf16.msra.mxu1 %v8263_v45  ;;  %3783 = vmatprep.mubr.bf16.mxu1 %v8776_v8 }
 0x118   :  { %v6981_v40 = vadd.f32 %v6980_v24, %v6979_v37  ;;  %v6982_v34 = vpop.f32.mrb[18].mxu0  ;;  %v7020_v32 = vpop.f32.mrb[17].mxu1  ;;  %7509 = vmatprep.subr.bf16.mxu1 %v8265_v60  ;;  %v8274_v37 = vld [vmem:[%s10893_s1 + $0x778] sm:$0xff]  }
 0x119   :  { %v7021_v44 = vadd.f32 %v7020_v32, %v7019_v38  ;;  %v6983_v35 = vpop.f32.mrb[19].mxu0  ;;  %v7022_v57 = vpop.f32.mrb[18].mxu1  ;;  %7470 = vmatpush3.bf16.msra.mxu0 %v8266_v3  ;;  %v8275_v24 = vld [vmem:[%s10893_s1 + $0x7f8] sm:$0xff]   ;;  %v8451_v38 = vld [vmem:[%s10894_s0 + $0x14] ss:$52 sps:$4 sm:$0xff]   ;;  %v8276_v32 = vld [vmem:[%s10893_s1 + $0x880] sm:$0xff]  }
 0x11a   :  { %v1328_v49 = vadd.f32 %v6981_v40, %v9636_v29  ;;  %v6984_v50 = vadd.f32 %v6983_v35, %v6982_v34  ;;  %v7023_v41 = vpop.f32.mrb[19].mxu1  ;;  %7471 = vmatprep.subr.bf16.mxu0 %v8268_v33  ;;  %v8277_v35 = vld [vmem:[%s10893_s1 + $0x900] sm:$0xff]  }
 0x11b   :  { %v7024_v48 = vadd.f32 %v7023_v41, %v7022_v57  ;;  %v8281_v41 = vld [vmem:[%s10893_s1 + $0x908] sm:$0xff]  }
 0x11c   :  { %v9765_v62 = vadd.f32 %v7021_v44, %v1328_v49  ;;  %v1331_v29 = vadd.f32 %v6984_v50, %v9655_v30  ;;  %v8267_v30 = vld [vmem:[%s10893_s1 + $0x7e8] sm:$0xff]   ;;  %3720 = vmatmul.mubr.bf16.gmra.mrb[116].mxu0 %v8778_v9  ;;  %v8452_v44 = vld [vmem:[%s10894_s0 + $0x1c] ss:$52 sps:$4 sm:$0xff]  }
 0x11d   :  { %7510 = vmatpush3.bf16.msra.mxu1 %v8267_v30  ;;  %7472 = vmatpush3.bf16.msra.mxu0 %v8270_v4  ;;  %v8280_v49 = vld [vmem:[%s10893_s1 + $0x888] sm:$0xff]  }
 0x11e   :  { %v9773_v51 = vadd.f32 %v7024_v48, %v1331_v29  ;;  %v6985_v42 = vpop.f32.mrb[20].mxu0  ;;  %7511 = vmatprep.subr.bf16.mxu1 %v8269_v13  ;;  %3823 = vmatprep.mubr.bf16.mxu0 %v8451_v38  ;;  %v8282_v48 = vld [vmem:[%s10893_s1 + $0x848] sm:$0xff]   ;;  %v8290_v38 = vld [vmem:[%s10893_s1 + $0x858] sm:$0xff]  }
 0x11f   :  { %v6986_v21 = vpop.f32.mrb[21].mxu0  ;;  %v7025_v15 = vpop.f32.mrb[20].mxu1  ;;  %3784 = vmatmul.mubr.bf16.gmra.mrb[116].mxu1 %v8780_v10  ;;  %7473 = vmatprep.subr.bf16.mxu0 %v8272_v5  ;;  %v8455_v4 = vld [vmem:[%s10894_s0 + $0x18] ss:$52 sps:$4 sm:$0xff]  }
 0x120   :  { %v6987_v2 = vadd.f32 %v6986_v21, %v6985_v42  ;;  %v6988_v16 = vpop.f32.mrb[22].mxu0  ;;  %v7026_v18 = vpop.f32.mrb[21].mxu1  ;;  %3887 = vmatprep.mubr.bf16.mxu1 %v8452_v44  ;;  %v8454_v42 = vld [vmem:[%s10894_s0 + $0x7c] ss:$52 sps:$4 sm:$0xff]   ;;  %v8283_v5 = vld [vmem:[%s10893_s1 + $0x8c8] sm:$0xff]  }
 0x121   :  { %v7027_v23 = vadd.f32 %v7026_v18, %v7025_v15  ;;  %v6989_v26 = vpop.f32.mrb[23].mxu0  ;;  %v7028_v31 = vpop.f32.mrb[22].mxu1  ;;  %7512 = vmatpush3.bf16.msra.mxu1 %v8271_v14  ;;  %7474 = vmatpush3.bf16.msra.mxu0 %v8274_v37  ;;  %v8456_v14 = vld [vmem:[%s10894_s0 + $0x84] ss:$52 sps:$4 sm:$0xff]  }
 0x122   :  { %v1336_v27 = vadd.f32 %v6987_v2, %v9682_v39  ;;  %v6990_v19 = vadd.f32 %v6989_v26, %v6988_v16  ;;  %v7029_v36 = vpop.f32.mrb[23].mxu1  ;;  %7513 = vmatprep.subr.bf16.mxu1 %v8273_v25  ;;  %7539 = vmatprep.subr.bf16.mxu0 %v8276_v32  ;;  %v8284_v2 = vld [vmem:[%s10893_s1 + $0x890] sm:$0xff]  }
 0x123   :  { %v7030_v40 = vadd.f32 %v7029_v36, %v7028_v31  ;;  %v8289_v36 = vld [vmem:[%s10893_s1 + $0x918] sm:$0xff]  }
 0x124   :  { %v9809_v39 = vadd.f32 %v7027_v23, %v1336_v27  ;;  %v1339_v34 = vadd.f32 %v6990_v19, %v9693_v11  ;;  %v8278_v11 = vld [vmem:[%s10893_s1 + $0x840] sm:$0xff]   ;;  %3824 = vmatmul.mubr.bf16.vlgmr.msra.gmra.mrb[120].mxu0 %v8453_v52  ;;  %v8285_v23 = vld [vmem:[%s10893_s1 + $0x910] sm:$0xff]   ;;  %v8288_v27 = vld [vmem:[%s10893_s1 + $0x898] sm:$0xff]  }
 0x125   :  { %7514 = vmatpush3.bf16.msra.mxu1 %v8275_v24  ;;  %7540 = vmatpush3.bf16.msra.mxu0 %v8278_v11  ;;  %v8287_v19 = vld [vmem:[%s10893_s1 + $0x8d0] sm:$0xff]   ;;  %v8292_v11 = vld [vmem:[%s10893_s1 + $0x8a0] sm:$0xff]  }
 0x126   :  { %v9821_v57 = vadd.f32 %v7030_v40, %v1339_v34  ;;  %v6991_v50 = vpop.f32.mrb[24].mxu0  ;;  %7579 = vmatprep.subr.bf16.mxu1 %v8277_v35  ;;  %3831 = vmatprep.mubr.bf16.mxu0 %v8454_v42  ;;  %v8458_v40 = vld [vmem:[%s10894_s0 + $0xe4] ss:$52 sps:$4 sm:$0xff]   ;;  %v8459_v34 = vld [vmem:[%s10894_s0 + $0x80] ss:$52 sps:$4 sm:$0xff]  }
 0x127   :  { %v7031_v45 = vpop.f32.mrb[24].mxu1  ;;  %v6992_v60 = vpop.f32.mrb[25].mxu0  ;;  %7541 = vmatprep.subr.bf16.mxu0 %v8280_v49  ;;  %v8291_v35 = vld [vmem:[%s10893_s1 + $0x8d8] sm:$0xff]  }
 0x128   :  { %v7032_v29 = vpop.f32.mrb[25].mxu1  ;;  %v6993_v3 = vadd.f32 %v6992_v60, %v6991_v50  ;;  %v6994_v33 = vpop.f32.mrb[26].mxu0  ;;  %3888 = vmatmul.mubr.bf16.vlgmr.msra.gmra.mrb[120].mxu1 %v8455_v4  ;;  %v8293_v60 = vld [vmem:[%s10893_s1 + $0x920] sm:$0xff]   ;;  %v8297_v4 = vld [vmem:[%s10893_s1 + $0x928] sm:$0xff]  }
 0x129   :  { %v7033_v30 = vadd.f32 %v7032_v29, %v7031_v45  ;;  %v7034_v13 = vpop.f32.mrb[26].mxu1  ;;  %v6995_v21 = vpop.f32.mrb[27].mxu0  ;;  %7580 = vmatpush3.bf16.msra.mxu1 %v8279_v46  ;;  %3895 = vmatprep.mubr.bf16.mxu1 %v8456_v14  ;;  %v8294_v29 = vld [vmem:[%s10893_s1 + $0x860] sm:$0xff]  }
 0x12a   :  { %v7035_v15 = vpop.f32.mrb[27].mxu1  ;;  %v1344_v16 = vadd.f32 %v6993_v3, %v9716_v17  ;;  %v6996_v18 = vadd.f32 %v6995_v21, %v6994_v33  ;;  %7581 = vmatprep.subr.bf16.mxu1 %v8281_v41  ;;  %7542 = vmatpush3.bf16.msra.mxu0 %v8282_v48  ;;  %v8286_v17 = vld [vmem:[%s10893_s1 + $0x850] sm:$0xff]   ;;  %v8460_v41 = vld [vmem:[%s10894_s0 + $0xec] ss:$52 sps:$4 sm:$0xff]  }
 0x12b   :  { %v7036_v25 = vadd.f32 %v7035_v15, %v7034_v13  ;;  %7543 = vmatprep.subr.bf16.mxu0 %v8284_v2  ;;  %v8296_v13 = vld [vmem:[%s10893_s1 + $0x8a8] sm:$0xff]  }
 0x12c   :  { %v9860_v26 = vadd.f32 %v7033_v30, %v1344_v16  ;;  %v1347_v31 = vadd.f32 %v6996_v18, %v9750_v28  ;;  %v8457_v28 = vld [vmem:[%s10894_s0 + $0x78] ss:$52 sps:$4 sm:$0xff]   ;;  %v8295_v30 = vld [vmem:[%s10893_s1 + $0x8e0] sm:$0xff]   ;;  %v8462_v15 = vld [vmem:[%s10894_s0 + $0xe8] ss:$52 sps:$4 sm:$0xff]  }
 0x12d   :  { %7582 = vmatpush3.bf16.msra.mxu1 %v8283_v5  ;;  %3832 = vmatmul.mubr.bf16.gmra.mrb[124].mxu0 %v8457_v28  ;;  %v8298_v5 = vld [vmem:[%s10893_s1 + $0x868] sm:$0xff]   ;;  %v8300_v16 = vld [vmem:[%s10893_s1 + $0x8b0] sm:$0xff]  }
 0x12e   :  { %v9869_v37 = vadd.f32 %v7036_v25, %v1347_v31  ;;  %7583 = vmatprep.subr.bf16.mxu1 %v8285_v23  ;;  %7544 = vmatpush3.bf16.msra.mxu0 %v8286_v17  ;;  %v6997_v24 = vpop.f32.mrb[28].mxu0  ;;  %v8299_v21 = vld [vmem:[%s10893_s1 + $0x8e8] sm:$0xff]   ;;  %v8301_v25 = vld [vmem:[%s10893_s1 + $0x930] sm:$0xff]  }
 0x12f   :  { %3839 = vmatprep.mubr.bf16.mxu0 %v8458_v40  ;;  %7545 = vmatprep.subr.bf16.mxu0 %v8288_v27  ;;  %v6998_v32 = vpop.f32.mrb[29].mxu0  ;;  %v7037_v44 = vpop.f32.mrb[28].mxu1  ;;  %v8302_v23 = vld [vmem:[%s10893_s1 + $0x870] sm:$0xff]  }
 0x130   :  { %3896 = vmatmul.mubr.bf16.gmra.mrb[124].mxu1 %v8459_v34  ;;  %v6999_v46 = vadd.f32 %v6998_v32, %v6997_v24  ;;  %v7000_v49 = vpop.f32.mrb[30].mxu0  ;;  %v7038_v50 = vpop.f32.mrb[29].mxu1  ;;  %v8304_v34 = vld [vmem:[%s10893_s1 + $0x8b8] sm:$0xff]  }
 0x131   :  { %7584 = vmatpush3.bf16.msra.mxu1 %v8287_v19  ;;  %3903 = vmatprep.mubr.bf16.mxu1 %v8460_v41  ;;  %v7039_v45 = vadd.f32 %v7038_v50, %v7037_v44  ;;  %v7001_v48 = vpop.f32.mrb[31].mxu0  ;;  %v7040_v52 = vpop.f32.mrb[30].mxu1  ;;  %v8303_v44 = vld [vmem:[%s10893_s1 + $0x8f0] sm:$0xff]   ;;  %v8463_v49 = vld [vmem:[%s10894_s0 + $0x24] ss:$52 sps:$4 sm:$0xff]  }
 0x132   :  { %7585 = vmatprep.subr.bf16.mxu1 %v8289_v36  ;;  %v1352_v3 = vadd.f32 %v6999_v46, %v9721_v22  ;;  %7546 = vmatpush3.bf16.msra.mxu0 %v8290_v38  ;;  %v7041_v33 = vpop.f32.mrb[31].mxu1  ;;  %v8461_v22 = vld [vmem:[%s10894_s0 + $0xe0] ss:$52 sps:$4 sm:$0xff]   ;;  %v8306_v46 = vld [vmem:[%s10893_s1 + $0x878] sm:$0xff]  }
 0x133   :  { %7547 = vmatprep.subr.bf16.mxu0 %v8292_v11  ;;  %v8308_v50 = vld [vmem:[%s10893_s1 + $0x940] sm:$0xff]   ;;  %v8307_v52 = vld [vmem:[%s10893_s1 + $0x8f8] sm:$0xff]  }
 0x134   :  { %v9911_v42 = vadd.f32 %v7039_v45, %v1352_v3 }
 0x135   :  { %7586 = vmatpush3.bf16.msra.mxu1 %v8291_v35  ;;  %3840 = vmatmul.mubr.bf16.gmra.mrb[128].mxu0 %v8461_v22 }
 0x136   :  { %7587 = vmatprep.subr.bf16.mxu1 %v8293_v60  ;;  %7548 = vmatpush3.bf16.msra.mxu0 %v8294_v29  ;;  %v7059_v2 = vpop.f32.mrb[32].mxu0  ;;  %v8464_v60 = vld [vmem:[%s10894_s0 + $0x2c] ss:$52 sps:$4 sm:$0xff]  }
 0x137   :  { %3847 = vmatprep.mubr.bf16.mxu0 %v8939_v61  ;;  %7549 = vmatprep.subr.bf16.mxu0 %v8296_v13  ;;  %v7060_v18 = vpop.f32.mrb[33].mxu0  ;;  %v7099_v14 = vpop.f32.mrb[32].mxu1  ;;  %v8309_v29 = vld [vmem:[%s10893_s1 + $0x9a0] sm:$0xff]  }
 0x138   :  { %3904 = vmatmul.mubr.bf16.gmra.mrb[128].mxu1 %v8462_v15  ;;  %v7061_v31 = vadd.f32 %v7060_v18, %v7059_v2  ;;  %v7062_v17 = vpop.f32.mrb[34].mxu0  ;;  %v7100_v27 = vpop.f32.mrb[33].mxu1 }
 0x139   :  { %7588 = vmatpush3.bf16.msra.mxu1 %v8295_v30  ;;  %3911 = vmatprep.mubr.bf16.mxu1 %v8946_v0  ;;  %v7101_v19 = vadd.f32 %v7100_v27, %v7099_v14  ;;  %v7063_v28 = vpop.f32.mrb[35].mxu0  ;;  %v7102_v36 = vpop.f32.mrb[34].mxu1  ;;  %v8318_v27 = vld [vmem:[%s10893_s1 + $0x950] sm:$0xff]  }
 0x13a   :  { %7589 = vmatprep.subr.bf16.mxu1 %v8297_v4  ;;  %7550 = vmatpush3.bf16.msra.mxu0 %v8298_v5  ;;  %v1456_v24 = vadd.f32 %v7061_v31, %v9765_v62  ;;  %v7064_v38 = vadd.f32 %v7063_v28, %v7062_v17  ;;  %v7103_v40 = vpop.f32.mrb[35].mxu1  ;;  %v8305_v62 = vld [vmem:[%s10893_s1 + $0x938] sm:$0xff]   ;;  %v8310_v5 = vld [vmem:[%s10893_s1 + $0x960] sm:$0xff]  }
 0x13b   :  { %7551 = vmatprep.subr.bf16.mxu0 %v8300_v16  ;;  %v7104_v32 = vadd.f32 %v7103_v40, %v7102_v36  ;;  %v8313_v16 = vld [vmem:[%s10893_s1 + $0x948] sm:$0xff]   ;;  %v8314_v40 = vld [vmem:[%s10893_s1 + $0x9b0] sm:$0xff]  }
 0x13c   :  { %v1459_v35 = vadd.f32 %v7064_v38, %v9773_v51  ;;  %v9951_v11 = vadd.f32 %v7101_v19, %v1456_v24  ;;  %v8466_v31 = vld [vmem:[%s10894_s0 + $0x8c] ss:$52 sps:$4 sm:$0xff]   ;;  %v8468_v38 = vld [vmem:[%s10894_s0 + $0x94] ss:$52 sps:$4 sm:$0xff]  }
 0x13d   :  { %7590 = vmatpush3.bf16.msra.mxu1 %v8299_v21  ;;  %3848 = vmatmul.mubr.bf16.gmra.mrb[132].mxu0 %v8944_v63  ;;  %v8312_v24 = vld [vmem:[%s10893_s1 + $0x968] sm:$0xff]  }
 0x13e   :  { %7591 = vmatprep.subr.bf16.mxu1 %v8301_v25  ;;  %7552 = vmatpush3.bf16.msra.mxu0 %v8302_v23  ;;  %v7065_v51 = vpop.f32.mrb[36].mxu0  ;;  %v9963_v41 = vadd.f32 %v7104_v32, %v1459_v35  ;;  %v8465_v25 = vld [vmem:[%s10894_s0 + $0x20] ss:$52 sps:$4 sm:$0xff]  }
 0x13f   :  { %3951 = vmatprep.mubr.bf16.mxu0 %v8463_v49  ;;  %7553 = vmatprep.subr.bf16.mxu0 %v8304_v34  ;;  %v7066_v45 = vpop.f32.mrb[37].mxu0  ;;  %v7105_v48 = vpop.f32.mrb[36].mxu1 }
 0x140   :  { %3912 = vmatmul.mubr.bf16.gmra.mrb[132].mxu1 %v8948_v1  ;;  %v7067_v3 = vadd.f32 %v7066_v45, %v7065_v51  ;;  %v7068_v33 = vpop.f32.mrb[38].mxu0  ;;  %v7106_v30 = vpop.f32.mrb[37].mxu1  ;;  %v8323_v45 = vld [vmem:[%s10893_s1 + $0x958] sm:$0xff]  }
 0x141   :  { %7592 = vmatpush3.bf16.msra.mxu1 %v8303_v44  ;;  %4015 = vmatprep.mubr.bf16.mxu1 %v8464_v60  ;;  %v7107_v13 = vadd.f32 %v7106_v30, %v7105_v48  ;;  %v7069_v4 = vpop.f32.mrb[39].mxu0  ;;  %v7108_v22 = vpop.f32.mrb[38].mxu1  ;;  %v8317_v30 = vld [vmem:[%s10893_s1 + $0x978] sm:$0xff]  }
 0x142   :  { %7593 = vmatprep.subr.bf16.mxu1 %v8305_v62  ;;  %7554 = vmatpush3.bf16.msra.mxu0 %v8306_v46  ;;  %v1464_v21 = vadd.f32 %v7067_v3, %v9809_v39  ;;  %v7070_v15 = vadd.f32 %v7069_v4, %v7068_v33  ;;  %v7109_v2 = vpop.f32.mrb[39].mxu1  ;;  %v8311_v39 = vld [vmem:[%s10893_s1 + $0x9a8] sm:$0xff]  }
 0x143   :  { %7907 = vmatprep.subr.bf16.mxu0 %v8308_v50  ;;  %v7110_v18 = vadd.f32 %v7109_v2, %v7108_v22  ;;  %v8470_v33 = vld [vmem:[%s10894_s0 + $0xf4] ss:$52 sps:$4 sm:$0xff]  }
 0x144   :  { %v1467_v14 = vadd.f32 %v7070_v15, %v9821_v57  ;;  %v9988_v23 = vadd.f32 %v7107_v13, %v1464_v21  ;;  %v8467_v57 = vld [vmem:[%s10894_s0 + $0x28] ss:$52 sps:$4 sm:$0xff]   ;;  %v8319_v21 = vld [vmem:[%s10893_s1 + $0x9c0] sm:$0xff]  }
 0x145   :  { %7594 = vmatpush3.bf16.msra.mxu1 %v8307_v52  ;;  %3952 = vmatmul.mubr.bf16.vlgmr.msra.gmra.mrb[136].mxu0 %v8465_v25  ;;  %v8315_v52 = vld [vmem:[%s10893_s1 + $0x970] sm:$0xff]   ;;  %v8328_v15 = vld [vmem:[%s10893_s1 + $0xa20] sm:$0xff]  }
 0x146   :  { %7627 = vmatprep.subr.bf16.mxu1 %v8309_v29  ;;  %7908 = vmatpush3.bf16.msra.mxu0 %v8308_v50  ;;  %v7071_v17 = vpop.f32.mrb[40].mxu0  ;;  %v9999_v19 = vadd.f32 %v7110_v18, %v1467_v14  ;;  %v8469_v29 = vld [vmem:[%s10894_s0 + $0x88] ss:$52 sps:$4 sm:$0xff]  }
 0x147   :  { %3959 = vmatprep.mubr.bf16.mxu0 %v8466_v31  ;;  %7909 = vmatprep.subr.bf16.mxu0 %v8313_v16  ;;  %v7072_v28 = vpop.f32.mrb[41].mxu0  ;;  %v7111_v36 = vpop.f32.mrb[40].mxu1 }
 0x148   :  { %4016 = vmatmul.mubr.bf16.vlgmr.msra.gmra.mrb[136].mxu1 %v8467_v57  ;;  %v7073_v34 = vadd.f32 %v7072_v28, %v7071_v17  ;;  %v7074_v32 = vpop.f32.mrb[42].mxu0  ;;  %v7112_v44 = vpop.f32.mrb[41].mxu1  ;;  %v8473_v28 = vld [vmem:[%s10894_s0 + $0xf0] ss:$52 sps:$4 sm:$0xff]  }
 0x149   :  { %7628 = vmatpush3.bf16.msra.mxu1 %v8310_v5  ;;  %4023 = vmatprep.mubr.bf16.mxu1 %v8468_v38  ;;  %v7113_v35 = vadd.f32 %v7112_v44, %v7111_v36  ;;  %v7075_v62 = vpop.f32.mrb[43].mxu0  ;;  %v7114_v46 = vpop.f32.mrb[42].mxu1  ;;  %v8472_v5 = vld [vmem:[%s10894_s0 + $0xfc] ss:$52 sps:$4 sm:$0xff]   ;;  %v8321_v36 = vld [vmem:[%s10893_s1 + $0x9c8] sm:$0xff]  }
 0x14a   :  { %7629 = vmatprep.subr.bf16.mxu1 %v8311_v39  ;;  %7910 = vmatpush3.bf16.msra.mxu0 %v8313_v16  ;;  %v1472_v49 = vadd.f32 %v7073_v34, %v9860_v26  ;;  %v7076_v51 = vadd.f32 %v7075_v62, %v7074_v32  ;;  %v7115_v50 = vpop.f32.mrb[43].mxu1  ;;  %v8316_v26 = vld [vmem:[%s10893_s1 + $0x9b8] sm:$0xff]   ;;  %v8324_v44 = vld [vmem:[%s10893_s1 + $0x9d0] sm:$0xff]  }
 0x14b   :  { %7911 = vmatprep.subr.bf16.mxu0 %v8318_v27  ;;  %v7116_v48 = vadd.f32 %v7115_v50, %v7114_v46 }
 0x14c   :  { %v1475_v60 = vadd.f32 %v7076_v51, %v9869_v37  ;;  %v10024_v3 = vadd.f32 %v7113_v35, %v1472_v49  ;;  %v8471_v37 = vld [vmem:[%s10894_s0 + $0x90] ss:$52 sps:$4 sm:$0xff]  }
 0x14d   :  { %7630 = vmatpush3.bf16.msra.mxu1 %v8312_v24  ;;  %3960 = vmatmul.mubr.bf16.gmra.mrb[140].mxu0 %v8469_v29 }
 0x14e   :  { %7631 = vmatprep.subr.bf16.mxu1 %v8314_v40  ;;  %3967 = vmatprep.mubr.bf16.mxu0 %v8470_v33  ;;  %v10035_v13 = vadd.f32 %v7116_v48, %v1475_v60  ;;  %v7077_v4 = vpop.f32.mrb[44].mxu0  ;;  %v8322_v40 = vld [vmem:[%s10893_s1 + $0x988] sm:$0xff]  }
 0x14f   :  { %7912 = vmatpush3.bf16.msra.mxu0 %v8318_v27  ;;  %v7117_v22 = vpop.f32.mrb[44].mxu1  ;;  %v7078_v2 = vpop.f32.mrb[45].mxu0  ;;  %v8320_v27 = vld [vmem:[%s10893_s1 + $0x980] sm:$0xff]  }
 0x150   :  { %4024 = vmatmul.mubr.bf16.gmra.mrb[140].mxu1 %v8471_v37  ;;  %7913 = vmatprep.subr.bf16.mxu0 %v8323_v45  ;;  %v7118_v16 = vpop.f32.mrb[45].mxu1  ;;  %v7079_v18 = vadd.f32 %v7078_v2, %v7077_v4  ;;  %v7080_v14 = vpop.f32.mrb[46].mxu0  ;;  %v8329_v2 = vld [vmem:[%s10893_s1 + $0x9e0] sm:$0xff]  }
 0x151   :  { %7632 = vmatpush3.bf16.msra.mxu1 %v8315_v52  ;;  %4031 = vmatprep.mubr.bf16.mxu1 %v8472_v5  ;;  %v7119_v25 = vadd.f32 %v7118_v16, %v7117_v22  ;;  %v7120_v39 = vpop.f32.mrb[46].mxu1  ;;  %v7081_v31 = vpop.f32.mrb[47].mxu0  ;;  %v8330_v22 = vld [vmem:[%s10893_s1 + $0xaa0] sm:$0xff]  }
 0x152   :  { %7633 = vmatprep.subr.bf16.mxu1 %v8316_v26  ;;  %v7121_v57 = vpop.f32.mrb[47].mxu1  ;;  %v1480_v17 = vadd.f32 %v7079_v18, %v9911_v42  ;;  %v8474_v42 = vld [vmem:[%s10894_s0 + $0xf8] ss:$52 sps:$4 sm:$0xff]  }
 0x153   :  { %7914 = vmatpush3.bf16.msra.mxu0 %v8323_v45  ;;  %v8327_v26 = vld [vmem:[%s10893_s1 + $0x998] sm:$0xff]  }
 0x154   :  { %7667 = vmatprep.subr.bf16.mxu0 %v8328_v15  ;;  %v1544_v24 = vadd.f32 %v7119_v25, %v1480_v17  ;;  %v8331_v25 = vld [vmem:[%s10893_s1 + $0xa60] sm:$0xff]   ;;  %v8333_v17 = vld [vmem:[%s10893_s1 + $0x9e8] sm:$0xff]  }
 0x155   :  { %7634 = vmatpush3.bf16.msra.mxu1 %v8317_v30  ;;  %3968 = vmatmul.mubr.bf16.gmra.mrb[144].mxu0 %v8473_v28  ;;  %v8476_v30 = vld [vmem:[%s10894_s0 + $0x4] ss:$52 sps:$4 sm:$0xff]  }
 0x156   :  { %7635 = vmatprep.subr.bf16.mxu1 %v8319_v21  ;;  %3975 = vmatprep.mubr.bf16.mxu0 %v9089_v54  ;;  %v7885_v38 = vpop.f32.mrb[48].mxu0  ;;  %v8477_v28 = vld [vmem:[%s10894_s0 + $0x98] ss:$52 sps:$4 sm:$0xff]  }
 0x157   :  { %v10065_v34 = vadd.f32 %v7885_v38, %v9988_v23  ;;  %v1583_v32 = vpop.f32.mrb[49].mxu0  ;;  %v7147_v62 = vpop.f32.mrb[48].mxu1  ;;  %v8478_v38 = vld [vmem:[%s10894_s0 + $0x100] ss:$52 sps:$4 sm:$0xff]  }
 0x158   :  { %4032 = vmatmul.mubr.bf16.gmra.mrb[144].mxu1 %v8474_v42  ;;  %v10071_v35 = vadd.f32 %v1583_v32, %v9951_v11  ;;  %v7886_v46 = vpop.f32.mrb[50].mxu0  ;;  %v7148_v51 = vpop.f32.mrb[49].mxu1  ;;  %v8325_v11 = vld [vmem:[%s10893_s1 + $0x990] sm:$0xff]   ;;  %v8335_v42 = vld [vmem:[%s10893_s1 + $0xa68] sm:$0xff]  }
 0x159   :  { %7636 = vmatpush3.bf16.msra.mxu1 %v8320_v27  ;;  %4039 = vmatprep.mubr.bf16.mxu1 %v9091_v55  ;;  %10921 = vst [vmem:[#allocation2_spill] sm:$0xff] %v10065_v34  ;;  %v10074_v49 = vadd.f32 %v7886_v46, %v9999_v19  ;;  %v1586_v50 = vpop.f32.mrb[51].mxu0  ;;  %v10077_v23 = vadd.f32 %v7148_v51, %v7147_v62  ;;  %v7150_v48 = vpop.f32.mrb[50].mxu1  ;;  %v8326_v19 = vld [vmem:[%s10893_s1 + $0x9d8] sm:$0xff]   ;;  %v8337_v62 = vld [vmem:[%s10893_s1 + $0x9f0] sm:$0xff]  }
 0x15a   :  { %7637 = vmatprep.subr.bf16.mxu1 %v8321_v36  ;;  %5364 = vadd.xlane.f32.xlu0 %v10065_v34  ;;  %v10080_v45 = vadd.f32 %v1586_v50, %v9963_v41  ;;  %v7151_v52 = vpop.f32.mrb[51].mxu1  ;;  %v8475_v41 = vld [vmem:[%s10894_s0 + $0x30] ss:$52 sps:$4 sm:$0xff]   ;;  %v5451_v16 = vmul.f32 %v10065_v34, %v10065_v34  ;;  %v8334_v36 = vld [vmem:[%s10893_s1 + $0xaa8] sm:$0xff]   ;;  %v5449_v32 = vmul.f32 %v10071_v35, %v10071_v35 }
 0x15b   :  { %10922 = vst [vmem:[#allocation3_spill] sm:$0xff] %v10074_v49  ;;  %5360 = vadd.xlane.f32.xlu1 %v10071_v35  ;;  %v10090_v60 = vadd.f32 %v7151_v52, %v7150_v48  ;;  %v5452_v4 = vmul.f32 %v10074_v49, %v10074_v49  ;;  %v8338_v46 = vld [vmem:[%s10893_s1 + $0xab0] sm:$0xff]   ;;  %v8480_v50 = vld [vmem:[%s10894_s0 + $0x6c] ss:$52 sps:$4 sm:$0xff]   ;;  %v8340_v52 = vld [vmem:[%s10893_s1 + $0xa38] sm:$0xff]  }
 0x15c   :  { %v8339_v48 = vld [vmem:[%s10893_s1 + $0xa70] sm:$0xff]  }
 0x15d   :  { %7638 = vmatpush3.bf16.msra.mxu1 %v8322_v40  ;;  %3976 = vmatmul.mubr.bf16.gmra.mrb[148].mxu0 %v9093_v56  ;;  %v8479_v40 = vld [vmem:[%s10894_s0] ss:$52 sps:$4 sm:$0xff]  }
 0x15e   :  { %7639 = vmatprep.subr.bf16.mxu1 %v8324_v44  ;;  %7915 = vmatprep.mubr.msk.bf16.mxu0 %vm1152_vm0, %v8475_v41  ;;  %v7889_v29 = vpop.f32.mrb[52].mxu0  ;;  %v8336_v44 = vld [vmem:[%s10893_s1 + $0xa30] sm:$0xff]  }
 0x15f   :  { %5362 = vadd.xlane.f32.xlu0 %v10080_v45  ;;  %5366 = vadd.xlane.f32.xlu1 %v10074_v49  ;;  %v10102_v33 = vadd.f32 %v7889_v29, %v1544_v24  ;;  %v1599_v37 = vpop.f32.mrb[53].mxu0  ;;  %v7153_v21 = vpop.f32.mrb[52].mxu1  ;;  %v5450_v24 = vmul.f32 %v10080_v45, %v10080_v45  ;;  %v8341_v29 = vld [vmem:[%s10893_s1 + $0x9f8] sm:$0xff]  }
 0x160   :  { %4040 = vmatmul.mubr.bf16.gmra.mrb[148].mxu1 %v9095_v58  ;;  %v10113_v5 = vadd.f32 %v1599_v37, %v10024_v3  ;;  %v7890_v15 = vpop.f32.mrb[54].mxu0  ;;  %v7154_v18 = vpop.f32.mrb[53].mxu1  ;;  %v8332_v3 = vld [vmem:[%s10893_s1 + $0xa28] sm:$0xff]  }
 0x161   :  { %7640 = vmatpush3.bf16.msra.mxu1 %v8325_v11  ;;  %10923 = vst [vmem:[#allocation4_spill] sm:$0xff] %v10102_v33  ;;  %4944 = vmatprep.mubr.bf16.mxu1 %v8476_v30  ;;  %v1602_v14 = vpop.f32.mrb[55].mxu0  ;;  %v10126_v39 = vadd.f32 %v7154_v18, %v7153_v21  ;;  %v7156_v57 = vpop.f32.mrb[54].mxu1  ;;  %v10184_v37 = vld [vmem:[%s10894_s0 + $0x168] ss:$0 sps:$4 sm:$0x11]   ;;  %v5455_v18 = vmul.f32 %v10102_v33, %v10102_v33 }
 0x162   :  { %7641 = vmatprep.subr.bf16.mxu1 %v8326_v19  ;;  %10924 = vst [vmem:[#allocation5_spill] sm:$0xff] %v10113_v5  ;;  %v10129_v31 = vadd.f32 %v1602_v14, %v10035_v13  ;;  %v7157_v27 = vpop.f32.mrb[55].mxu1  ;;  %v8342_v30 = vld [vmem:[%s10893_s1 + $0xab8] sm:$0xff]   ;;  %v5373_v15 = vsel %vm5372_vm1, %v10102_v33, 0.0  ;;  %v8345_v14 = vld [vmem:[%s10893_s1 + $0xa00] sm:$0xff]  }
 0x163   :  { %5462 = vadd.xlane.f32.xlu0 %v5452_v4  ;;  %5460 = vadd.xlane.f32.xlu1 %v5451_v16  ;;  %v10141_v13 = vadd.f32 %v7157_v27, %v7156_v57  ;;  %v8482_v21 = vld [vmem:[%s10894_s0 + $0x68] ss:$52 sps:$4 sm:$0xff]   ;;  %v8344_v16 = vld [vmem:[%s10893_s1 + $0xa40] sm:$0xff]  }
 0x164   :  { %10925 = vst [vmem:[#allocation6_spill] sm:$0xff] %v10129_v31  ;;  %v8483_v57 = vld [vmem:[%s10894_s0 + $0xd4] ss:$52 sps:$4 sm:$0xff]   ;;  %v8347_v27 = vld [vmem:[%s10893_s1 + $0xa80] sm:$0xff]  }
 0x165   :  { %7642 = vmatpush3.bf16.msra.mxu1 %v8327_v26  ;;  %7916 = vmatmul.mubr.msk.bf16.vlgmr.msra.gmra.mrb[152].mxu0 %vm1152_vm0, %v8477_v28  ;;  %v8348_v28 = vld [vmem:[%s10893_s1 + $0xa48] sm:$0xff]  }
 0x166   :  { %7707 = vmatprep.subr.bf16.mxu1 %v8330_v22  ;;  %7668 = vmatpush3.bf16.msra.mxu0 %v8329_v2  ;;  %v8343_v22 = vld [vmem:[%s10893_s1 + $0xa78] sm:$0xff]   ;;  %v5453_v2 = vmul.f32 %v10113_v5, %v10113_v5 }
 0x167   :  { %7919 = vmatprep.mubr.msk.bf16.mxu0 %vm1152_vm0, %v8478_v38  ;;  %7669 = vmatprep.subr.bf16.mxu0 %v8332_v3  ;;  %v7159_v51 = vpop.f32.mrb[56].mxu1 }
 0x168   :  { %4945 = vmatmul.mubr.bf16.vlgmr.msra.gmra.mrb[152].mxu1 %v8479_v40  ;;  %5458 = vadd.xlane.f32.xlu0 %v5450_v24  ;;  %v7160_v11 = vpop.f32.mrb[57].mxu1  ;;  %v5468_v24 = vsel %vm5372_vm1, %v5455_v18, 0.0 }
 0x169   :  { %7708 = vmatpush3.bf16.msra.mxu1 %v8331_v25  ;;  %5456 = vadd.xlane.f32.xlu1 %v5449_v32  ;;  %v10175_v19 = vadd.f32 %v7160_v11, %v7159_v51  ;;  %v7162_v41 = vpop.f32.mrb[58].mxu1  ;;  %v8346_v25 = vld [vmem:[%s10893_s1 + $0xac0] sm:$0xff]   ;;  %v8349_v32 = vld [vmem:[%s10893_s1 + $0xa08] sm:$0xff]   ;;  %v8353_v11 = vld [vmem:[%s10893_s1 + $0xa10] sm:$0xff]  }
 0x16a   :  { %7709 = vmatprep.subr.bf16.mxu1 %v8334_v36  ;;  %7670 = vmatpush3.bf16.msra.mxu0 %v8333_v17  ;;  %v7163_v26 = vpop.f32.mrb[59].mxu1  ;;  %v5454_v17 = vmul.f32 %v10129_v31, %v10129_v31  ;;  %v8485_v51 = vld [vmem:[%s10894_s0 + $0xd0] ss:$52 sps:$4 sm:$0xff]  }
 0x16b   :  { %4952 = vmatprep.mubr.bf16.mxu1 %v8480_v50  ;;  %7671 = vmatprep.subr.bf16.mxu0 %v8336_v44  ;;  %v10192_v4 = vadd.f32 %v7163_v26, %v7162_v41  ;;  %v8352_v50 = vld [vmem:[%s10893_s1 + $0xa50] sm:$0xff]  }
 0x16c   :  { %5368 = vadd.xlane.f32.xlu0 %v10113_v5  ;;  %v8354_v41 = vld [vmem:[%s10893_s1 + $0xad0] sm:$0xff]  }
 0x16d   :  { %7710 = vmatpush3.bf16.msra.mxu1 %v8335_v42  ;;  %7920 = vmatmul.mubr.msk.bf16.gmra.mrb[156].mxu0 %vm1152_vm0, %v10184_v37  ;;  %v8484_v42 = vld [vmem:[%s10894_s0 + $0xc] ss:$52 sps:$4 sm:$0xff]  }
 0x16e   :  { %5370 = vadd.xlane.f32.xlu1 %v10129_v31  ;;  %7672 = vmatpush3.bf16.msra.mxu0 %v8337_v62  ;;  %v8350_v62 = vld [vmem:[%s10893_s1 + $0xac8] sm:$0xff]  }
 0x16f   :  { %7711 = vmatprep.subr.bf16.mxu1 %v8338_v46  ;;  %7673 = vmatprep.subr.bf16.mxu0 %v8340_v52  ;;  %v7165_v3 = vpop.f32.mrb[60].mxu1  ;;  %v8351_v46 = vld [vmem:[%s10893_s1 + $0xa88] sm:$0xff]  }
 0x170   :  { %4953 = vmatmul.mubr.bf16.gmra.mrb[156].mxu1 %v8482_v21  ;;  %5374 = vadd.xlane.f32.xlu0 %v5373_v15  ;;  %v7166_v36 = vpop.f32.mrb[61].mxu1 }
 0x171   :  { %7712 = vmatpush3.bf16.msra.mxu1 %v8339_v48  ;;  %4960 = vmatprep.mubr.bf16.mxu1 %v8483_v57  ;;  %v10230_v38 = vadd.f32 %v7166_v36, %v7165_v3  ;;  %v7168_v40 = vpop.f32.mrb[62].mxu1  ;;  %v8357_v3 = vld [vmem:[%s10893_s1 + $0xa18] sm:$0xff]  }
 0x172   :  { %5464 = vadd.xlane.f32.xlu1 %v5453_v2  ;;  %7713 = vmatprep.subr.bf16.mxu1 %v8342_v30  ;;  %v7169_v44 = vpop.f32.mrb[63].mxu1  ;;  %v8356_v2 = vld [vmem:[%s10893_s1 + $0xa58] sm:$0xff]  }
 0x173   :  { %7674 = vmatpush3.bf16.msra.mxu0 %v8341_v29  ;;  %5008 = vmatprep.mubr.bf16.mxu0 %v8484_v42  ;;  %v2449_v29 = vadd.f32 %v10077_v23, %v9618_v53  ;;  %v8361_v44 = vld [vmem:[%s10893_s1 + $0xae0] sm:$0xff]  }
 0x174   :  { %7675 = vmatprep.subr.bf16.mxu0 %v8344_v16  ;;  %5466 = vadd.xlane.f32.xlu0 %v5454_v17  ;;  %v2452_v16 = vadd.f32 %v10090_v60, %v9638_v12  ;;  %v8358_v17 = vld [vmem:[%s10893_s1 + $0xad8] sm:$0xff]  }
 0x175   :  { %7714 = vmatpush3.bf16.msra.mxu1 %v8343_v22  ;;  %v8359_v60 = vld [vmem:[%s10893_s1 + $0xa98] sm:$0xff]  }
 0x176   :  { %5469 = vadd.xlane.f32.xlu1 %v5468_v24  ;;  %7715 = vmatprep.subr.bf16.mxu1 %v8346_v25  ;;  %v7187_v48 = vpop.f32.mrb[56].mxu0  ;;  %v8360_v24 = vld [vmem:[%s10893_s1 + $0xb20] sm:$0xff]  }
 0x177   :  { %7676 = vmatpush3.bf16.msra.mxu0 %v8345_v14  ;;  %v7188_v52 = vpop.f32.mrb[57].mxu0 }
 0x178   :  { %4961 = vmatmul.mubr.bf16.gmra.mrb[160].mxu1 %v8485_v51  ;;  %7677 = vmatprep.subr.bf16.mxu0 %v8348_v28  ;;  %v7189_v26 = vadd.f32 %v7188_v52, %v7187_v48  ;;  %v7190_v30 = vpop.f32.mrb[58].mxu0  ;;  %v7227_v22 = vpop.f32.mrb[64].mxu1  ;;  %v8364_v52 = vld [vmem:[%s10893_s1 + $0xb28] sm:$0xff]  }
 0x179   :  { %7716 = vmatpush3.bf16.msra.mxu1 %v8347_v27  ;;  %4968 = vmatprep.mubr.bf16.mxu1 %v8774_v7  ;;  %v7191_v21 = vpop.f32.mrb[59].mxu0  ;;  %v7228_v15 = vpop.f32.mrb[65].mxu1  ;;  %v8355_v7 = vld [vmem:[%s10893_s1 + $0xa90] sm:$0xff]  }
 0x17a   :  { %7717 = vmatprep.subr.bf16.mxu1 %v8350_v62  ;;  %v2513_v18 = vadd.f32 %v7189_v26, %v2449_v29  ;;  %v7192_v23 = vadd.f32 %v7191_v21, %v7190_v30  ;;  %v7229_v14 = vadd.f32 %v7228_v15, %v7227_v22  ;;  %v7230_v25 = vpop.f32.mrb[66].mxu1  ;;  %v2460_v26 = vadd.f32 %v10141_v13, %v9666_v47  ;;  %v8365_v15 = vld [vmem:[%s10893_s1 + $0xae8] sm:$0xff]  }
 0x17b   :  { %7678 = vmatpush3.bf16.msra.mxu0 %v8349_v32  ;;  %v7231_v57 = vpop.f32.mrb[67].mxu1  ;;  %v8486_v32 = vld [vmem:[%s10894_s0 + $0x14] ss:$52 sps:$4 sm:$0xff]  }
 0x17c   :  { %7679 = vmatprep.subr.bf16.mxu0 %v8352_v50  ;;  %v2516_v27 = vadd.f32 %v7192_v23, %v2452_v16  ;;  %v10270_v28 = vadd.f32 %v7229_v14, %v2513_v18  ;;  %v7232_v36 = vadd.f32 %v7231_v57, %v7230_v25  ;;  %v8366_v13 = vld [vmem:[%s10893_s1 + $0xba8] sm:$0xff]   ;;  %v8368_v57 = vld [vmem:[%s10893_s1 + $0xb30] sm:$0xff]  }
 0x17d   :  { %7718 = vmatpush3.bf16.msra.mxu1 %v8351_v46  ;;  %v2457_v46 = vadd.f32 %v10126_v39, %v9657_v20  ;;  %v8488_v14 = vld [vmem:[%s10894_s0 + $0x74] ss:$52 sps:$4 sm:$0xff]  }
 0x17e   :  { %7719 = vmatprep.subr.bf16.mxu1 %v8354_v41  ;;  %v10279_v42 = vadd.f32 %v7232_v36, %v2516_v27  ;;  %v7193_v40 = vpop.f32.mrb[60].mxu0  ;;  %v8367_v25 = vld [vmem:[%s10893_s1 + $0xb68] sm:$0xff]   ;;  %v8490_v36 = vld [vmem:[%s10894_s0 + $0x7c] ss:$52 sps:$4 sm:$0xff]  }
 0x17f   :  { %7680 = vmatpush3.bf16.msra.mxu0 %v8353_v11  ;;  %v7194_v62 = vpop.f32.mrb[61].mxu0  ;;  %v8363_v11 = vld [vmem:[%s10893_s1 + $0xb60] sm:$0xff]  }
 0x180   :  { %4969 = vmatmul.mubr.bf16.gmra.mrb[164].mxu1 %v8778_v9  ;;  %7681 = vmatprep.subr.bf16.mxu0 %v8356_v2  ;;  %v8362_v9 = vld [vmem:[%s10893_s1 + $0xba0] sm:$0xff]   ;;  %v7195_v51 = vadd.f32 %v7194_v62, %v7193_v40  ;;  %v7196_v50 = vpop.f32.mrb[62].mxu0  ;;  %v7233_v48 = vpop.f32.mrb[68].mxu1  ;;  %v8370_v40 = vld [vmem:[%s10893_s1 + $0xbb0] sm:$0xff]  }
 0x181   :  { %7720 = vmatpush3.bf16.msra.mxu1 %v8355_v7  ;;  %5072 = vmatprep.mubr.bf16.mxu1 %v8486_v32  ;;  %v7197_v41 = vpop.f32.mrb[63].mxu0  ;;  %v7234_v29 = vpop.f32.mrb[69].mxu1  ;;  %v8487_v7 = vld [vmem:[%s10894_s0 + $0x8] ss:$52 sps:$4 sm:$0xff]   ;;  %v2465_v32 = vadd.f32 %v10175_v19, %v9699_v59 }
 0x182   :  { %7721 = vmatprep.subr.bf16.mxu1 %v8358_v17  ;;  %v2521_v30 = vadd.f32 %v7195_v51, %v2457_v46  ;;  %v7198_v39 = vadd.f32 %v7197_v41, %v7196_v50  ;;  %v7235_v22 = vadd.f32 %v7234_v29, %v7233_v48  ;;  %v7236_v21 = vpop.f32.mrb[70].mxu1  ;;  %v8371_v46 = vld [vmem:[%s10893_s1 + $0xb70] sm:$0xff]   ;;  %v8372_v51 = vld [vmem:[%s10893_s1 + $0xb38] sm:$0xff]  }
 0x183   :  { %7682 = vmatpush3.bf16.msra.mxu0 %v8357_v3  ;;  %v7237_v2 = vpop.f32.mrb[71].mxu1  ;;  %v8489_v3 = vld [vmem:[%s10894_s0 + $0x10] ss:$52 sps:$4 sm:$0xff]  }
 0x184   :  { %7747 = vmatprep.subr.bf16.mxu0 %v8360_v24  ;;  %v2524_v16 = vadd.f32 %v7198_v39, %v2460_v26  ;;  %v10309_v18 = vadd.f32 %v7235_v22, %v2521_v30  ;;  %v7238_v23 = vadd.f32 %v7237_v2, %v7236_v21  ;;  %v8373_v26 = vld [vmem:[%s10893_s1 + $0xaf8] sm:$0xff]   ;;  %v8491_v30 = vld [vmem:[%s10894_s0 + $0x70] ss:$52 sps:$4 sm:$0xff]  }
 0x185   :  { %7722 = vmatpush3.bf16.msra.mxu1 %v8359_v60  ;;  %v8369_v60 = vld [vmem:[%s10893_s1 + $0xaf0] sm:$0xff]   ;;  %v8375_v2 = vld [vmem:[%s10893_s1 + $0xb78] sm:$0xff]  }
 0x186   :  { %5009 = vmatmul.mubr.bf16.vlgmr.msra.gmra.mrb[160].mxu0 %v8487_v7  ;;  %7787 = vmatprep.subr.bf16.mxu1 %v8362_v9  ;;  %v10323_v17 = vadd.f32 %v7238_v23, %v2524_v16  ;;  %v7199_v27 = vpop.f32.mrb[64].mxu0  ;;  %v8492_v7 = vld [vmem:[%s10894_s0 + $0xdc] ss:$52 sps:$4 sm:$0xff]   ;;  %v8376_v16 = vld [vmem:[%s10893_s1 + $0xb40] sm:$0xff]  }
 0x187   :  { %7748 = vmatpush3.bf16.msra.mxu0 %v8361_v44  ;;  %5016 = vmatprep.mubr.bf16.mxu0 %v8488_v14  ;;  %v7200_v24 = vpop.f32.mrb[65].mxu0 }
 0x188   :  { %5073 = vmatmul.mubr.bf16.vlgmr.msra.gmra.mrb[168].mxu1 %v8489_v3  ;;  %7749 = vmatprep.subr.bf16.mxu0 %v8364_v52  ;;  %v7201_v44 = vadd.f32 %v7200_v24, %v7199_v27  ;;  %v7202_v62 = vpop.f32.mrb[66].mxu0  ;;  %v7239_v9 = vpop.f32.mrb[72].mxu1  ;;  %v8377_v3 = vld [vmem:[%s10893_s1 + $0xb00] sm:$0xff]  }
 0x189   :  { %7788 = vmatpush3.bf16.msra.mxu1 %v8363_v11  ;;  %5080 = vmatprep.mubr.bf16.mxu1 %v8490_v36  ;;  %v7203_v50 = vpop.f32.mrb[67].mxu0  ;;  %v7240_v48 = vpop.f32.mrb[73].mxu1  ;;  %v2468_v11 = vadd.f32 %v10192_v4, %v9726_v6  ;;  %v8374_v4 = vld [vmem:[%s10893_s1 + $0xbb8] sm:$0xff]   ;;  %v8378_v27 = vld [vmem:[%s10893_s1 + $0xbc0] sm:$0xff]   ;;  %v2473_v36 = vadd.f32 %v10230_v38, %v9603_v43  ;;  %v8381_v38 = vld [vmem:[%s10893_s1 + $0xb08] sm:$0xff]  }
 0x18a   :  { %7789 = vmatprep.subr.bf16.mxu1 %v8366_v13  ;;  %v2529_v52 = vadd.f32 %v7201_v44, %v2465_v32  ;;  %v7204_v19 = vadd.f32 %v7203_v50, %v7202_v62  ;;  %v7241_v41 = vadd.f32 %v7240_v48, %v7239_v9  ;;  %v7242_v29 = vpop.f32.mrb[74].mxu1  ;;  %v8493_v13 = vld [vmem:[%s10894_s0 + $0x78] ss:$52 sps:$4 sm:$0xff]   ;;  %v8379_v62 = vld [vmem:[%s10893_s1 + $0xb80] sm:$0xff]  }
 0x18b   :  { %7750 = vmatpush3.bf16.msra.mxu0 %v8365_v15  ;;  %v7243_v39 = vpop.f32.mrb[75].mxu1  ;;  %v8380_v9 = vld [vmem:[%s10893_s1 + $0xb48] sm:$0xff]  }
 0x18c   :  { %7751 = vmatprep.subr.bf16.mxu0 %v8368_v57  ;;  %v2532_v22 = vadd.f32 %v7204_v19, %v2468_v11  ;;  %v10353_v21 = vadd.f32 %v7241_v41, %v2529_v52  ;;  %v7244_v15 = vadd.f32 %v7243_v39, %v7242_v29  ;;  %v8495_v48 = vld [vmem:[%s10894_s0 + $0xd8] ss:$52 sps:$4 sm:$0xff]   ;;  %v8496_v41 = vld [vmem:[%s10894_s0 + $0xe0] ss:$52 sps:$4 sm:$0xff]  }
 0x18d   :  { %7790 = vmatpush3.bf16.msra.mxu1 %v8367_v25  ;;  %v8494_v25 = vld [vmem:[%s10894_s0 + $0xe4] ss:$52 sps:$4 sm:$0xff]   ;;  %v8382_v52 = vld [vmem:[%s10893_s1 + $0xbc8] sm:$0xff]   ;;  %v8384_v29 = vld [vmem:[%s10893_s1 + $0xb50] sm:$0xff]  }
 0x18e   :  { %5017 = vmatmul.mubr.bf16.gmra.mrb[164].mxu0 %v8491_v30  ;;  %7791 = vmatprep.subr.bf16.mxu1 %v8370_v40  ;;  %v10367_v23 = vadd.f32 %v7244_v15, %v2532_v22  ;;  %v7205_v14 = vpop.f32.mrb[68].mxu0  ;;  %v8383_v30 = vld [vmem:[%s10893_s1 + $0xb88] sm:$0xff]  }
 0x18f   :  { %7752 = vmatpush3.bf16.msra.mxu0 %v8369_v60  ;;  %5024 = vmatprep.mubr.bf16.mxu0 %v8492_v7  ;;  %v7206_v57 = vpop.f32.mrb[69].mxu0  ;;  %v8385_v7 = vld [vmem:[%s10893_s1 + $0xb10] sm:$0xff]  }
 0x190   :  { %5081 = vmatmul.mubr.bf16.gmra.mrb[172].mxu1 %v8493_v13  ;;  %7753 = vmatprep.subr.bf16.mxu0 %v8372_v51  ;;  %v7207_v60 = vadd.f32 %v7206_v57, %v7205_v14  ;;  %v7208_v24 = vpop.f32.mrb[70].mxu0  ;;  %v7245_v40 = vpop.f32.mrb[76].mxu1  ;;  %v8387_v57 = vld [vmem:[%s10893_s1 + $0xb90] sm:$0xff]  }
 0x191   :  { %7792 = vmatpush3.bf16.msra.mxu1 %v8371_v46  ;;  %5088 = vmatprep.mubr.bf16.mxu1 %v8494_v25  ;;  %v7209_v32 = vpop.f32.mrb[71].mxu0  ;;  %v7246_v44 = vpop.f32.mrb[77].mxu1 }
 0x192   :  { %7793 = vmatprep.subr.bf16.mxu1 %v8374_v4  ;;  %v2537_v46 = vadd.f32 %v7207_v60, %v2473_v36  ;;  %v7247_v51 = vadd.f32 %v7246_v44, %v7245_v40  ;;  %v7248_v50 = vpop.f32.mrb[78].mxu1  ;;  %v8390_v36 = vld [vmem:[%s10893_s1 + $0xbd8] sm:$0xff]  }
 0x193   :  { %7754 = vmatpush3.bf16.msra.mxu0 %v8373_v26  ;;  %v7249_v11 = vpop.f32.mrb[79].mxu1  ;;  %v8389_v40 = vld [vmem:[%s10893_s1 + $0xb18] sm:$0xff]  }
 0x194   :  { %7755 = vmatprep.subr.bf16.mxu0 %v8376_v16  ;;  %v10395_v19 = vadd.f32 %v7247_v51, %v2537_v46  ;;  %v8394_v11 = vld [vmem:[%s10893_s1 + $0xc28] sm:$0xff]  }
 0x195   :  { %7794 = vmatpush3.bf16.msra.mxu1 %v8375_v2  ;;  %v8388_v2 = vld [vmem:[%s10893_s1 + $0xb58] sm:$0xff]  }
 0x196   :  { %5025 = vmatmul.mubr.bf16.gmra.mrb[168].mxu0 %v8495_v48  ;;  %7795 = vmatprep.subr.bf16.mxu1 %v8378_v27  ;;  %v7267_v26 = vpop.f32.mrb[72].mxu0  ;;  %v8393_v48 = vld [vmem:[%s10893_s1 + $0xbe0] sm:$0xff]  }
 0x197   :  { %7756 = vmatpush3.bf16.msra.mxu0 %v8377_v3  ;;  %5032 = vmatprep.mubr.bf16.mxu0 %v8776_v8  ;;  %v7268_v39 = vpop.f32.mrb[73].mxu0  ;;  %v8386_v8 = vld [vmem:[%s10893_s1 + $0xbd0] sm:$0xff]  }
 0x198   :  { %5089 = vmatmul.mubr.bf16.gmra.mrb[176].mxu1 %v8496_v41  ;;  %7757 = vmatprep.subr.bf16.mxu0 %v8380_v9  ;;  %v7269_v4 = vadd.f32 %v7268_v39, %v7267_v26  ;;  %v7270_v22 = vpop.f32.mrb[74].mxu0  ;;  %v7307_v15 = vpop.f32.mrb[80].mxu1  ;;  %v8498_v9 = vld [vmem:[%s10894_s0 + $0x24] ss:$52 sps:$4 sm:$0xff]  }
 0x199   :  { %7796 = vmatpush3.bf16.msra.mxu1 %v8379_v62  ;;  %5096 = vmatprep.mubr.bf16.mxu1 %v8939_v61  ;;  %v7271_v13 = vpop.f32.mrb[75].mxu0  ;;  %v7308_v61 = vpop.f32.mrb[81].mxu1  ;;  %v8391_v62 = vld [vmem:[%s10893_s1 + $0xb98] sm:$0xff]  }
 0x19a   :  { %7797 = vmatprep.subr.bf16.mxu1 %v8382_v52  ;;  %v2641_v16 = vadd.f32 %v7269_v4, %v10270_v28  ;;  %v7272_v14 = vadd.f32 %v7271_v13, %v7270_v22  ;;  %v7309_v25 = vadd.f32 %v7308_v61, %v7307_v15  ;;  %v7310_v3 = vpop.f32.mrb[82].mxu1  ;;  %v8401_v22 = vld [vmem:[%s10893_s1 + $0xc68] sm:$0xff]   ;;  %v8500_v13 = vld [vmem:[%s10894_s0 + $0x84] ss:$52 sps:$4 sm:$0xff]   ;;  %v8501_v61 = vld [vmem:[%s10894_s0 + $0x20] ss:$52 sps:$4 sm:$0xff]  }
 0x19b   :  { %7758 = vmatpush3.bf16.msra.mxu0 %v8381_v38  ;;  %v7311_v27 = vpop.f32.mrb[83].mxu1 }
 0x19c   :  { %7759 = vmatprep.subr.bf16.mxu0 %v8384_v29  ;;  %v2644_v60 = vadd.f32 %v7272_v14, %v10279_v42  ;;  %v10426_v24 = vadd.f32 %v7309_v25, %v2641_v16  ;;  %v7312_v28 = vadd.f32 %v7311_v27, %v7310_v3  ;;  %v8392_v42 = vld [vmem:[%s10893_s1 + $0xc20] sm:$0xff]  }
 0x19d   :  { %7798 = vmatpush3.bf16.msra.mxu1 %v8383_v30  ;;  %v8502_v25 = vld [vmem:[%s10894_s0 + $0x8c] ss:$52 sps:$4 sm:$0xff]  }
 0x19e   :  { %5033 = vmatmul.mubr.bf16.gmra.mrb[172].mxu0 %v8780_v10  ;;  %7799 = vmatprep.subr.bf16.mxu1 %v8386_v8  ;;  %v8497_v10 = vld [vmem:[%s10894_s0 + $0x1c] ss:$52 sps:$4 sm:$0xff]   ;;  %v10438_v32 = vadd.f32 %v7312_v28, %v2644_v60  ;;  %v7273_v44 = vpop.f32.mrb[76].mxu0  ;;  %v8499_v8 = vld [vmem:[%s10894_s0 + $0x18] ss:$52 sps:$4 sm:$0xff]  }
 0x19f   :  { %7760 = vmatpush3.bf16.msra.mxu0 %v8385_v7  ;;  %5136 = vmatprep.mubr.bf16.mxu0 %v8497_v10  ;;  %v7274_v46 = vpop.f32.mrb[77].mxu0  ;;  %v8398_v28 = vld [vmem:[%s10893_s1 + $0xbf0] sm:$0xff]  }
 0x1a0   :  { %5097 = vmatmul.mubr.bf16.gmra.mrb[180].mxu1 %v8944_v63  ;;  %7761 = vmatprep.subr.bf16.mxu0 %v8388_v2  ;;  %v8396_v63 = vld [vmem:[%s10893_s1 + $0xc60] sm:$0xff]   ;;  %v7275_v51 = vadd.f32 %v7274_v46, %v7273_v44  ;;  %v7276_v50 = vpop.f32.mrb[78].mxu0  ;;  %v7313_v38 = vpop.f32.mrb[84].mxu1  ;;  %v8395_v2 = vld [vmem:[%s10893_s1 + $0xbe8] sm:$0xff]  }
 0x1a1   :  { %7800 = vmatpush3.bf16.msra.mxu1 %v8387_v57  ;;  %5200 = vmatprep.mubr.bf16.mxu1 %v8498_v9  ;;  %v7277_v52 = vpop.f32.mrb[79].mxu0  ;;  %v7314_v41 = vpop.f32.mrb[85].mxu1  ;;  %v8406_v57 = vld [vmem:[%s10893_s1 + $0xc70] sm:$0xff]  }
 0x1a2   :  { %7801 = vmatprep.subr.bf16.mxu1 %v8390_v36  ;;  %v2649_v29 = vadd.f32 %v7275_v51, %v10309_v18  ;;  %v7278_v26 = vadd.f32 %v7277_v52, %v7276_v50  ;;  %v7315_v30 = vadd.f32 %v7314_v41, %v7313_v38  ;;  %v7316_v39 = vpop.f32.mrb[86].mxu1  ;;  %v8411_v50 = vld [vmem:[%s10893_s1 + $0xc78] sm:$0xff]   ;;  %v8504_v52 = vld [vmem:[%s10894_s0 + $0xec] ss:$52 sps:$4 sm:$0xff]  }
 0x1a3   :  { %7762 = vmatpush3.bf16.msra.mxu0 %v8389_v40  ;;  %v7317_v4 = vpop.f32.mrb[87].mxu1  ;;  %v8505_v41 = vld [vmem:[%s10894_s0 + $0x88] ss:$52 sps:$4 sm:$0xff]  }
 0x1a4   :  { %7827 = vmatprep.subr.bf16.mxu0 %v8392_v42  ;;  %v2652_v15 = vadd.f32 %v7278_v26, %v10323_v17  ;;  %v10463_v7 = vadd.f32 %v7315_v30, %v2649_v29  ;;  %v7318_v18 = vadd.f32 %v7317_v4, %v7316_v39  ;;  %v8397_v17 = vld [vmem:[%s10893_s1 + $0xc30] sm:$0xff]   ;;  %v8399_v42 = vld [vmem:[%s10893_s1 + $0xc38] sm:$0xff]  }
 0x1a5   :  { %7802 = vmatpush3.bf16.msra.mxu1 %v8391_v62  ;;  %v8506_v30 = vld [vmem:[%s10894_s0 + $0xf4] ss:$52 sps:$4 sm:$0xff]  }
 0x1a6   :  { %5137 = vmatmul.mubr.bf16.vlgmr.msra.gmra.mrb[176].mxu0 %v8499_v8  ;;  %7923 = vmatprep.subr.bf16.mxu1 %v8396_v63  ;;  %v10477_v16 = vadd.f32 %v7318_v18, %v2652_v15  ;;  %v7279_v14 = vpop.f32.mrb[80].mxu0  ;;  %v8403_v15 = vld [vmem:[%s10893_s1 + $0xc00] sm:$0xff]  }
 0x1a7   :  { %7828 = vmatpush3.bf16.msra.mxu0 %v8393_v48  ;;  %5144 = vmatprep.mubr.bf16.mxu0 %v8500_v13  ;;  %v7280_v3 = vpop.f32.mrb[81].mxu0  ;;  %v8404_v13 = vld [vmem:[%s10893_s1 + $0xc48] sm:$0xff]  }
 0x1a8   :  { %5201 = vmatmul.mubr.bf16.vlgmr.msra.gmra.mrb[184].mxu1 %v8501_v61  ;;  %7829 = vmatprep.subr.bf16.mxu0 %v8394_v11  ;;  %v7281_v27 = vadd.f32 %v7280_v3, %v7279_v14  ;;  %v7282_v36 = vpop.f32.mrb[82].mxu0  ;;  %v7319_v60 = vpop.f32.mrb[88].mxu1  ;;  %v8400_v11 = vld [vmem:[%s10893_s1 + $0xbf8] sm:$0xff]  }
 0x1a9   :  { %7924 = vmatpush3.bf16.msra.mxu1 %v8396_v63  ;;  %5208 = vmatprep.mubr.bf16.mxu1 %v8502_v25  ;;  %v7283_v40 = vpop.f32.mrb[83].mxu0  ;;  %v7320_v10 = vpop.f32.mrb[89].mxu1  ;;  %v8503_v63 = vld [vmem:[%s10894_s0 + $0x80] ss:$52 sps:$4 sm:$0xff]   ;;  %v8507_v25 = vld [vmem:[%s10894_s0 + $0xe8] ss:$52 sps:$4 sm:$0xff]  }
 0x1aa   :  { %7925 = vmatprep.subr.bf16.mxu1 %v8401_v22  ;;  %v2657_v44 = vadd.f32 %v7281_v27, %v10353_v21  ;;  %v7284_v62 = vadd.f32 %v7283_v40, %v7282_v36  ;;  %v7321_v9 = vadd.f32 %v7320_v10, %v7319_v60  ;;  %v7322_v46 = vpop.f32.mrb[90].mxu1  ;;  %v8405_v27 = vld [vmem:[%s10893_s1 + $0xc08] sm:$0xff]   ;;  %v8407_v36 = vld [vmem:[%s10893_s1 + $0xc50] sm:$0xff]  }
 0x1ab   :  { %7830 = vmatpush3.bf16.msra.mxu0 %v8395_v2  ;;  %v7323_v51 = vpop.f32.mrb[91].mxu1 }
 0x1ac   :  { %7831 = vmatprep.subr.bf16.mxu0 %v8397_v17  ;;  %v2660_v38 = vadd.f32 %v7284_v62, %v10367_v23  ;;  %v10499_v48 = vadd.f32 %v7321_v9, %v2657_v44  ;;  %v7324_v21 = vadd.f32 %v7323_v51, %v7322_v46  ;;  %v8402_v23 = vld [vmem:[%s10893_s1 + $0xc40] sm:$0xff]   ;;  %v8409_v9 = vld [vmem:[%s10893_s1 + $0xc58] sm:$0xff]  }
 0x1ad   :  { %7926 = vmatpush3.bf16.msra.mxu1 %v8401_v22 }
 0x1ae   :  { %5145 = vmatmul.mubr.bf16.gmra.mrb[180].mxu0 %v8503_v63  ;;  %7927 = vmatprep.subr.bf16.mxu1 %v8406_v57  ;;  %v10513_v29 = vadd.f32 %v7324_v21, %v2660_v38  ;;  %v7285_v26 = vpop.f32.mrb[84].mxu0  ;;  %v8410_v21 = vld [vmem:[%s10893_s1 + $0xc18] sm:$0xff]  }
 0x1af   :  { %7832 = vmatpush3.bf16.msra.mxu0 %v8398_v28  ;;  %5152 = vmatprep.mubr.bf16.mxu0 %v8504_v52  ;;  %v7286_v39 = vpop.f32.mrb[85].mxu0 }
 0x1b0   :  { %5209 = vmatmul.mubr.bf16.gmra.mrb[188].mxu1 %v8505_v41  ;;  %7833 = vmatprep.subr.bf16.mxu0 %v8399_v42  ;;  %v7287_v8 = vadd.f32 %v7286_v39, %v7285_v26  ;;  %v7288_v4 = vpop.f32.mrb[86].mxu0  ;;  %v7325_v22 = vpop.f32.mrb[92].mxu1 }
 0x1b1   :  { %5216 = vmatprep.mubr.bf16.mxu1 %v8506_v30  ;;  %7928 = vmatpush3.bf16.msra.mxu1 %v8406_v57  ;;  %v7289_v18 = vpop.f32.mrb[87].mxu0  ;;  %v7326_v2 = vpop.f32.mrb[93].mxu1 }
 0x1b2   :  { %7929 = vmatprep.subr.bf16.mxu1 %v8411_v50  ;;  %v2665_v61 = vadd.f32 %v7287_v8, %v10395_v19  ;;  %v7327_v17 = vadd.f32 %v7326_v2, %v7325_v22  ;;  %v7328_v14 = vpop.f32.mrb[94].mxu1  ;;  %v8508_v19 = vld [vmem:[%s10894_s0 + $0xf0] ss:$52 sps:$4 sm:$0xff]   ;;  %v8511_v18 = vld [vmem:[%s10894_s0 + $0x28] ss:$52 sps:$4 sm:$0xff]  }
 0x1b3   :  { %7834 = vmatpush3.bf16.msra.mxu0 %v8400_v11  ;;  %v7329_v3 = vpop.f32.mrb[95].mxu1  ;;  %v8509_v11 = vld [vmem:[%s10894_s0 + $0x2c] ss:$52 sps:$4 sm:$0xff]  }
 0x1b4   :  { %7835 = vmatprep.subr.bf16.mxu0 %v8402_v23  ;;  %v10528_v57 = vadd.f32 %v7327_v17, %v2665_v61  ;;  %v8513_v17 = vld [vmem:[%s10894_s0 + $0x98] ss:$52 sps:$4 sm:$0xff]  }
 0x1b5   :  { %7930 = vmatpush3.bf16.msra.mxu1 %v8411_v50 }
 0x1b6   :  { %5153 = vmatmul.mubr.bf16.gmra.mrb[184].mxu0 %v8507_v25  ;;  %v7347_v60 = vpop.f32.mrb[88].mxu0 }
 0x1b7   :  { %7836 = vmatpush3.bf16.msra.mxu0 %v8403_v15  ;;  %5160 = vmatprep.mubr.bf16.mxu0 %v8946_v0  ;;  %v7348_v28 = vpop.f32.mrb[89].mxu0  ;;  %v8408_v0 = vld [vmem:[%s10893_s1 + $0xc10] sm:$0xff]  }
 0x1b8   :  { %5217 = vmatmul.mubr.bf16.gmra.mrb[192].mxu1 %v8508_v19  ;;  %7837 = vmatprep.subr.bf16.mxu0 %v8404_v13  ;;  %v7349_v40 = vadd.f32 %v7348_v28, %v7347_v60  ;;  %v7350_v10 = vpop.f32.mrb[90].mxu0  ;;  %v7901_v42 = vpop.f32.mrb[96].mxu1 }
 0x1b9   :  { %5224 = vmatprep.mubr.bf16.mxu1 %v9089_v54  ;;  %v7351_v44 = vpop.f32.mrb[91].mxu0  ;;  %v2832_v62 = vpop.f32.mrb[97].mxu1 }
 0x1ba   :  { %v7352_v46 = vadd.f32 %v7351_v44, %v7350_v10  ;;  %v2769_v63 = vadd.f32 %v7349_v40, %v10426_v24  ;;  %v7902_v54 = vpop.f32.mrb[98].mxu1 }
 0x1bb   :  { %7838 = vmatpush3.bf16.msra.mxu0 %v8405_v27  ;;  %v2835_v51 = vpop.f32.mrb[99].mxu1 }
 0x1bc   :  { %7839 = vmatprep.subr.bf16.mxu0 %v8407_v36  ;;  %v10549_v50 = vadd.f32 %v2832_v62, %v2769_v63  ;;  %v2772_v38 = vadd.f32 %v7352_v46, %v10438_v32  ;;  %v8510_v32 = vld [vmem:[%s10894_s0 + $0x30] ss:$52 sps:$4 sm:$0xff]  }
 0x1bd   :  { %v8516_v62 = vld [vmem:[%s10894_s0 + $0xfc] ss:$52 sps:$4 sm:$0xff]  }
 0x1be   :  { %5161 = vmatmul.mubr.bf16.gmra.mrb[188].mxu0 %v8948_v1  ;;  %v10559_v24 = vadd.f32 %v2835_v51, %v2772_v38  ;;  %v7353_v1 = vpop.f32.mrb[92].mxu0  ;;  %5383 = vadd.xlane.f32.xlu1 %v10549_v50  ;;  %v5478_v22 = vmul.f32 %v10549_v50, %v10549_v50 }
 0x1bf   :  { %7840 = vmatpush3.bf16.msra.mxu0 %v8408_v0  ;;  %5264 = vmatprep.mubr.bf16.mxu0 %v8509_v11  ;;  %v7354_v52 = vpop.f32.mrb[93].mxu0 }
 0x1c0   :  { %5225 = vmatmul.mubr.bf16.gmra.mrb[196].mxu1 %v9093_v56  ;;  %7841 = vmatprep.subr.bf16.mxu0 %v8409_v9  ;;  %v7355_v41 = vadd.f32 %v7354_v52, %v7353_v1  ;;  %v7356_v23 = vpop.f32.mrb[94].mxu0  ;;  %v5479_v56 = vmul.f32 %v10559_v24, %v10559_v24  ;;  %v7905_v26 = vpop.f32.mrb[100].mxu1 }
 0x1c1   :  { %7931 = vmatprep.mubr.msk.bf16.mxu1 %vm1152_vm0, %v8510_v32  ;;  %5385 = vadd.xlane.f32.xlu0 %v10559_v24  ;;  %v7357_v30 = vpop.f32.mrb[95].mxu0  ;;  %v2848_v39 = vpop.f32.mrb[101].mxu1 }
 0x1c2   :  { %v2777_v8 = vadd.f32 %v7355_v41, %v10463_v7  ;;  %v7358_v4 = vadd.f32 %v7357_v30, %v7356_v23  ;;  %5487 = vadd.xlane.f32.xlu1 %v5479_v56  ;;  %v7906_v15 = vpop.f32.mrb[102].mxu1  ;;  %v8512_v7 = vld [vmem:[%s10894_s0 + $0x94] ss:$52 sps:$4 sm:$0xff]  }
 0x1c3   :  { %7842 = vmatpush3.bf16.msra.mxu0 %v8410_v21  ;;  %v2851_v2 = vpop.f32.mrb[103].mxu1  ;;  %v8517_v21 = vld [vmem:[%s10894_s0 + $0xf8] ss:$52 sps:$4 sm:$0xff]  }
 0x1c4   :  { %v2780_v13 = vadd.f32 %v7358_v4, %v10477_v16  ;;  %v10576_v61 = vadd.f32 %v7901_v42, %v2777_v8  ;;  %v8514_v16 = vld [vmem:[%s10894_s0 + $0x100] ss:$52 sps:$4 sm:$0xff]   ;;  %v8515_v42 = vld [vmem:[%s10894_s0 + $0x90] ss:$52 sps:$4 sm:$0xff]  }
 0x1c5   :  { %5485 = vadd.xlane.f32.xlu0 %v5478_v22 }
 0x1c6   :  { %5265 = vmatmul.mubr.bf16.vlgmr.msra.gmra.mrb[192].mxu0 %v8511_v18  ;;  %10926 = vst [vmem:[#allocation7_spill] sm:$0xff] %v10576_v61  ;;  %v7359_v14 = vpop.f32.mrb[96].mxu0  ;;  %5387 = vadd.xlane.f32.xlu1 %v10576_v61  ;;  %v10586_v25 = vadd.f32 %v7902_v54, %v2780_v13  ;;  %v5480_v10 = vmul.f32 %v10576_v61, %v10576_v61 }
 0x1c7   :  { %5272 = vmatprep.mubr.bf16.mxu0 %v8512_v7  ;;  %v7360_v3 = vpop.f32.mrb[97].mxu0 }
 0x1c8   :  { %7932 = vmatmul.mubr.msk.bf16.vlgmr.msra.gmra.mrb[200].mxu1 %vm1152_vm0, %v8513_v17  ;;  %10927 = vst [vmem:[#allocation8_spill] sm:$0xff] %v10586_v25  ;;  %v7361_v27 = vadd.f32 %v7360_v3, %v7359_v14  ;;  %v7362_v19 = vpop.f32.mrb[98].mxu0  ;;  %v5481_v36 = vmul.f32 %v10586_v25, %v10586_v25 }
 0x1c9   :  { %7935 = vmatprep.mubr.msk.bf16.mxu1 %vm1152_vm0, %v8514_v16  ;;  %5389 = vadd.xlane.f32.xlu0 %v10586_v25  ;;  %v7363_v60 = vpop.f32.mrb[99].mxu0 }
 0x1ca   :  { %v7364_v28 = vadd.f32 %v7363_v60, %v7362_v19  ;;  %5491 = vadd.xlane.f32.xlu1 %v5481_v36  ;;  %v2785_v40 = vadd.f32 %v7361_v27, %v10499_v48 }
 0x1cc   :  { %v10601_v0 = vadd.f32 %v2848_v39, %v2785_v40  ;;  %v2788_v44 = vadd.f32 %v7364_v28, %v10513_v29 }
 0x1cd   :  { %5489 = vadd.xlane.f32.xlu0 %v5480_v10 }
 0x1ce   :  { %5273 = vmatmul.mubr.bf16.gmra.mrb[196].mxu0 %v8515_v42  ;;  %10928 = vst [vmem:[#allocation9_spill] sm:$0xff] %v10601_v0  ;;  %v10609_v48 = vadd.f32 %v2851_v2, %v2788_v44  ;;  %v7365_v9 = vpop.f32.mrb[100].mxu0  ;;  %5391 = vadd.xlane.f32.xlu1 %v10601_v0 }
 0x1cf   :  { %5280 = vmatprep.mubr.bf16.mxu0 %v8516_v62  ;;  %v7366_v46 = vpop.f32.mrb[101].mxu0 }
 0x1d0   :  { %7936 = vmatmul.mubr.msk.bf16.gmra.mrb[204].mxu1 %vm1152_vm0, %v10184_v37  ;;  %10929 = vst [vmem:[#allocation10_spill] sm:$0xff] %v10609_v48  ;;  %v7367_v63 = vadd.f32 %v7366_v46, %v7365_v9  ;;  %v7368_v54 = vpop.f32.mrb[102].mxu0  ;;  %v5483_v29 = vmul.f32 %v10609_v48, %v10609_v48  ;;  %v5482_v37 = vmul.f32 %v10601_v0, %v10601_v0 }
 0x1d1   :  { %5393 = vadd.xlane.f32.xlu0 %v10609_v48  ;;  %v7369_v51 = vpop.f32.mrb[103].mxu0 }
 0x1d2   :  { %v2793_v38 = vadd.f32 %v7367_v63, %v10528_v57  ;;  %5495 = vadd.xlane.f32.xlu1 %v5483_v29 }
 0x1d4   :  { %v10621_v11 = vadd.f32 %v7905_v26, %v2793_v38 }
 0x1d5   :  { %5493 = vadd.xlane.f32.xlu0 %v5482_v37 }
 0x1d6   :  { %5281 = vmatmul.mubr.bf16.gmra.mrb[200].mxu0 %v8517_v21  ;;  %10930 = vst [vmem:[#allocation11_spill] sm:$0xff] %v10621_v11  ;;  %v7395_v1 = vpop.f32.mrb[104].mxu0  ;;  %v5395_v32 = vsel %vm5372_vm1, %v10621_v11, 0.0  ;;  %v5484_v57 = vmul.f32 %v10621_v11, %v10621_v11 }
 0x1d7   :  { %5288 = vmatprep.mubr.bf16.mxu0 %v9091_v55  ;;  %v7396_v52 = vpop.f32.mrb[105].mxu0  ;;  %5396 = vadd.xlane.f32.xlu1 %v5395_v32 }
 0x1d8   :  { %v7397_v41 = vadd.f32 %v7396_v52, %v7395_v1  ;;  %v7398_v23 = vpop.f32.mrb[106].mxu0  ;;  %v7435_v56 = vpop.f32.mrb[104].mxu1  ;;  %v5497_v30 = vsel %vm5372_vm1, %v5484_v57, 0.0 }
 0x1d9   :  { %v7399_v39 = vpop.f32.mrb[107].mxu0  ;;  %v7436_v26 = vpop.f32.mrb[105].mxu1  ;;  %5498 = vadd.xlane.f32.xlu0 %v5497_v30 }
 0x1da   :  { %v3698_v8 = vadd.f32 %v7397_v41, %v9618_v53  ;;  %v7400_v55 = vadd.f32 %v7399_v39, %v7398_v23  ;;  %v7437_v4 = vadd.f32 %v7436_v26, %v7435_v56  ;;  %v7438_v22 = vpop.f32.mrb[106].mxu1 }
 0x1db   :  { %v7439_v15 = vpop.f32.mrb[107].mxu1 }
 0x1dc   :  { %v3701_v18 = vadd.f32 %v7400_v55, %v9638_v12  ;;  %v3762_v2 = vadd.f32 %v7437_v4, %v3698_v8  ;;  %v7440_v13 = vadd.f32 %v7439_v15, %v7438_v22 }
 0x1de   :  { %5289 = vmatmul.mubr.bf16.gmra.mrb[204].mxu0 %v9095_v58  ;;  %v3765_v7 = vadd.f32 %v7440_v13, %v3701_v18 }
 0x1df   :  { %v7401_v17 = vpop.f32.mrb[108].mxu0 }
 0x1e0   :  { %v7402_v14 = vpop.f32.mrb[109].mxu0 }
 0x1e1   :  { %v7403_v16 = vadd.f32 %v7402_v14, %v7401_v17  ;;  %v7404_v3 = vpop.f32.mrb[110].mxu0  ;;  %v7441_v27 = vpop.f32.mrb[108].mxu1 }
 0x1e2   :  { %v7405_v19 = vpop.f32.mrb[111].mxu0  ;;  %v7442_v36 = vpop.f32.mrb[109].mxu1 }
 0x1e3   :  { %v3706_v60 = vadd.f32 %v7403_v16, %v9657_v20  ;;  %v7406_v28 = vadd.f32 %v7405_v19, %v7404_v3  ;;  %v7443_v40 = vadd.f32 %v7442_v36, %v7441_v27  ;;  %v7444_v10 = vpop.f32.mrb[110].mxu1 }
 0x1e4   :  { %v7445_v42 = vpop.f32.mrb[111].mxu1 }
 0x1e5   :  { %v3709_v58 = vadd.f32 %v7406_v28, %v9666_v47  ;;  %v3770_v44 = vadd.f32 %v7443_v40, %v3706_v60  ;;  %v7446_v62 = vadd.f32 %v7445_v42, %v7444_v10 }
 0x1e7   :  { %v3773_v9 = vadd.f32 %v7446_v62, %v3709_v58  ;;  %v7407_v46 = vpop.f32.mrb[112].mxu0 }
 0x1e8   :  { %v7408_v63 = vpop.f32.mrb[113].mxu0 }
 0x1e9   :  { %v7409_v54 = vadd.f32 %v7408_v63, %v7407_v46  ;;  %v7410_v29 = vpop.f32.mrb[114].mxu0  ;;  %v7447_v51 = vpop.f32.mrb[112].mxu1 }
 0x1ea   :  { %v7411_v38 = vpop.f32.mrb[115].mxu0  ;;  %v7448_v37 = vpop.f32.mrb[113].mxu1 }
 0x1eb   :  { %v3714_v21 = vadd.f32 %v7409_v54, %v9699_v59  ;;  %v7412_v1 = vadd.f32 %v7411_v38, %v7410_v29  ;;  %v7449_v32 = vadd.f32 %v7448_v37, %v7447_v51  ;;  %v7450_v57 = vpop.f32.mrb[114].mxu1 }
 0x1ec   :  { %v7451_v52 = vpop.f32.mrb[115].mxu1 }
 0x1ed   :  { %v3717_v41 = vadd.f32 %v7412_v1, %v9726_v6  ;;  %v3778_v23 = vadd.f32 %v7449_v32, %v3714_v21  ;;  %v7452_v56 = vadd.f32 %v7451_v52, %v7450_v57 }
 0x1ef   :  { %v3781_v30 = vadd.f32 %v7452_v56, %v3717_v41  ;;  %v7413_v39 = vpop.f32.mrb[116].mxu0 }
 0x1f0   :  { %v7414_v26 = vpop.f32.mrb[117].mxu0 }
 0x1f1   :  { %v7415_v8 = vadd.f32 %v7414_v26, %v7413_v39  ;;  %v7416_v55 = vpop.f32.mrb[118].mxu0 }
 0x1f2   :  { %v7453_v4 = vpop.f32.mrb[116].mxu1  ;;  %v7417_v22 = vpop.f32.mrb[119].mxu0 }
 0x1f3   :  { %v7454_v15 = vpop.f32.mrb[117].mxu1  ;;  %v3722_v18 = vadd.f32 %v7415_v8, %v9603_v43 }
 0x1f4   :  { %v7455_v13 = vadd.f32 %v7454_v15, %v7453_v4  ;;  %v7456_v17 = vpop.f32.mrb[118].mxu1 }
 0x1f5   :  { %v7457_v14 = vpop.f32.mrb[119].mxu1 }
 0x1f6   :  { %v3786_v16 = vadd.f32 %v7455_v13, %v3722_v18 }
 0x1f7   :  { %v7475_v3 = vpop.f32.mrb[120].mxu0 }
 0x1f8   :  { %v7476_v27 = vpop.f32.mrb[121].mxu0 }
 0x1f9   :  { %v7477_v19 = vadd.f32 %v7476_v27, %v7475_v3  ;;  %v7478_v36 = vpop.f32.mrb[122].mxu0 }
 0x1fa   :  { %v7479_v28 = vpop.f32.mrb[123].mxu0 }
 0x1fb   :  { %v7515_v60 = vpop.f32.mrb[120].mxu1  ;;  %v3826_v40 = vadd.f32 %v7477_v19, %v3762_v2  ;;  %v7480_v10 = vadd.f32 %v7479_v28, %v7478_v36 }
 0x1fc   :  { %v7516_v42 = vpop.f32.mrb[121].mxu1 }
 0x1fd   :  { %v7517_v58 = vadd.f32 %v7516_v42, %v7515_v60  ;;  %v7518_v62 = vpop.f32.mrb[122].mxu1  ;;  %v3829_v46 = vadd.f32 %v7480_v10, %v3765_v7 }
 0x1fe   :  { %v7519_v63 = vpop.f32.mrb[123].mxu1 }
 0x1ff   :  { %v3890_v54 = vadd.f32 %v7517_v58, %v3826_v40  ;;  %v7520_v29 = vadd.f32 %v7519_v63, %v7518_v62 }
 0x200   :  { %v7481_v51 = vpop.f32.mrb[124].mxu0 }
 0x201   :  { %v3893_v38 = vadd.f32 %v7520_v29, %v3829_v46  ;;  %v7482_v37 = vpop.f32.mrb[125].mxu0 }
 0x202   :  { %v7483_v21 = vadd.f32 %v7482_v37, %v7481_v51  ;;  %v7484_v1 = vpop.f32.mrb[126].mxu0 }
 0x203   :  { %v7521_v32 = vpop.f32.mrb[124].mxu1  ;;  %v7485_v57 = vpop.f32.mrb[127].mxu0 }
 0x204   :  { %v3834_v52 = vadd.f32 %v7483_v21, %v3770_v44  ;;  %v7486_v41 = vadd.f32 %v7485_v57, %v7484_v1  ;;  %v7522_v56 = vpop.f32.mrb[125].mxu1 }
 0x205   :  { %v7523_v39 = vadd.f32 %v7522_v56, %v7521_v32  ;;  %v7524_v2 = vpop.f32.mrb[126].mxu1 }
 0x206   :  { %v3837_v26 = vadd.f32 %v7486_v41, %v3773_v9  ;;  %v7525_v8 = vpop.f32.mrb[127].mxu1 }
 0x207   :  { %v3898_v55 = vadd.f32 %v7523_v39, %v3834_v52  ;;  %v7526_v4 = vadd.f32 %v7525_v8, %v7524_v2 }
 0x208   :  { %v7487_v7 = vpop.f32.mrb[128].mxu0 }
 0x209   :  { %v3901_v22 = vadd.f32 %v7526_v4, %v3837_v26  ;;  %v7488_v15 = vpop.f32.mrb[129].mxu0 }
 0x20a   :  { %v7489_v18 = vadd.f32 %v7488_v15, %v7487_v7  ;;  %v7490_v13 = vpop.f32.mrb[130].mxu0 }
 0x20b   :  { %v7527_v17 = vpop.f32.mrb[128].mxu1  ;;  %v7491_v14 = vpop.f32.mrb[131].mxu0 }
 0x20c   :  { %v7528_v3 = vpop.f32.mrb[129].mxu1  ;;  %v3842_v27 = vadd.f32 %v7489_v18, %v3778_v23  ;;  %v7492_v19 = vadd.f32 %v7491_v14, %v7490_v13 }
 0x20d   :  { %v7529_v36 = vadd.f32 %v7528_v3, %v7527_v17  ;;  %v7530_v44 = vpop.f32.mrb[130].mxu1 }
 0x20e   :  { %v7531_v60 = vpop.f32.mrb[131].mxu1  ;;  %v3845_v28 = vadd.f32 %v7492_v19, %v3781_v30 }
 0x20f   :  { %v3906_v40 = vadd.f32 %v7529_v36, %v3842_v27  ;;  %v7532_v10 = vadd.f32 %v7531_v60, %v7530_v44 }
 0x210   :  { %v7493_v42 = vpop.f32.mrb[132].mxu0 }
 0x211   :  { %v3909_v9 = vadd.f32 %v7532_v10, %v3845_v28  ;;  %v7494_v58 = vpop.f32.mrb[133].mxu0 }
 0x212   :  { %v7495_v62 = vadd.f32 %v7494_v58, %v7493_v42  ;;  %v7496_v46 = vpop.f32.mrb[134].mxu0 }
 0x213   :  { %v7533_v63 = vpop.f32.mrb[132].mxu1  ;;  %v7497_v29 = vpop.f32.mrb[135].mxu0 }
 0x214   :  { %v7534_v51 = vpop.f32.mrb[133].mxu1  ;;  %v3850_v37 = vadd.f32 %v7495_v62, %v3786_v16 }
 0x215   :  { %v7535_v21 = vadd.f32 %v7534_v51, %v7533_v63  ;;  %v7536_v1 = vpop.f32.mrb[134].mxu1 }
 0x216   :  { %v7537_v32 = vpop.f32.mrb[135].mxu1 }
 0x217   :  { %v3914_v23 = vadd.f32 %v7535_v21, %v3850_v37 }
 0x218   :  { %v7555_v57 = vpop.f32.mrb[136].mxu0 }
 0x219   :  { %v7556_v52 = vpop.f32.mrb[137].mxu0 }
 0x21a   :  { %v7557_v41 = vadd.f32 %v7556_v52, %v7555_v57  ;;  %v7558_v56 = vpop.f32.mrb[138].mxu0 }
 0x21b   :  { %v7595_v30 = vpop.f32.mrb[136].mxu1  ;;  %v7559_v39 = vpop.f32.mrb[139].mxu0 }
 0x21c   :  { %v7596_v2 = vpop.f32.mrb[137].mxu1  ;;  %v3954_v26 = vadd.f32 %v7557_v41, %v3890_v54  ;;  %v7560_v8 = vadd.f32 %v7559_v39, %v7558_v56 }
 0x21d   :  { %v7597_v4 = vadd.f32 %v7596_v2, %v7595_v30  ;;  %v7598_v7 = vpop.f32.mrb[138].mxu1 }
 0x21e   :  { %v7599_v15 = vpop.f32.mrb[139].mxu1  ;;  %v3957_v18 = vadd.f32 %v7560_v8, %v3893_v38 }
 0x21f   :  { %v7600_v13 = vadd.f32 %v7599_v15, %v7598_v7  ;;  %v4018_v17 = vadd.f32 %v7597_v4, %v3954_v26 }
 0x220   :  { %v7561_v16 = vpop.f32.mrb[140].mxu0 }
 0x221   :  { %v4021_v14 = vadd.f32 %v7600_v13, %v3957_v18  ;;  %v7562_v3 = vpop.f32.mrb[141].mxu0 }
 0x222   :  { %v7563_v27 = vadd.f32 %v7562_v3, %v7561_v16  ;;  %v7564_v19 = vpop.f32.mrb[142].mxu0 }
 0x223   :  { %v7601_v36 = vpop.f32.mrb[140].mxu1  ;;  %v7565_v44 = vpop.f32.mrb[143].mxu0 }
 0x224   :  { %v7602_v60 = vpop.f32.mrb[141].mxu1  ;;  %v3962_v28 = vadd.f32 %v7563_v27, %v3898_v55  ;;  %v7566_v10 = vadd.f32 %v7565_v44, %v7564_v19 }
 0x225   :  { %v7603_v42 = vadd.f32 %v7602_v60, %v7601_v36  ;;  %v7604_v58 = vpop.f32.mrb[142].mxu1 }
 0x226   :  { %v7605_v54 = vpop.f32.mrb[143].mxu1  ;;  %v3965_v62 = vadd.f32 %v7566_v10, %v3901_v22 }
 0x227   :  { %v7606_v46 = vadd.f32 %v7605_v54, %v7604_v58  ;;  %v4026_v63 = vadd.f32 %v7603_v42, %v3962_v28 }
 0x228   :  { %v7567_v29 = vpop.f32.mrb[144].mxu0 }
 0x229   :  { %v4029_v38 = vadd.f32 %v7606_v46, %v3965_v62  ;;  %v7568_v51 = vpop.f32.mrb[145].mxu0 }
 0x22a   :  { %v7569_v37 = vadd.f32 %v7568_v51, %v7567_v29  ;;  %v7570_v21 = vpop.f32.mrb[146].mxu0 }
 0x22b   :  { %v7607_v1 = vpop.f32.mrb[144].mxu1  ;;  %v7571_v32 = vpop.f32.mrb[147].mxu0 }
 0x22c   :  { %v7608_v57 = vpop.f32.mrb[145].mxu1  ;;  %v3970_v52 = vadd.f32 %v7569_v37, %v3906_v40  ;;  %v7572_v41 = vadd.f32 %v7571_v32, %v7570_v21 }
 0x22d   :  { %v7609_v56 = vadd.f32 %v7608_v57, %v7607_v1  ;;  %v7610_v30 = vpop.f32.mrb[146].mxu1 }
 0x22e   :  { %v7611_v55 = vpop.f32.mrb[147].mxu1  ;;  %v3973_v39 = vadd.f32 %v7572_v41, %v3909_v9 }
 0x22f   :  { %v7612_v2 = vadd.f32 %v7611_v55, %v7610_v30  ;;  %v4034_v26 = vadd.f32 %v7609_v56, %v3970_v52 }
 0x230   :  { %v7573_v8 = vpop.f32.mrb[148].mxu0 }
 0x231   :  { %v4037_v22 = vadd.f32 %v7612_v2, %v3973_v39  ;;  %v7574_v4 = vpop.f32.mrb[149].mxu0 }
 0x232   :  { %v7575_v7 = vadd.f32 %v7574_v4, %v7573_v8  ;;  %v7576_v15 = vpop.f32.mrb[150].mxu0 }
 0x233   :  { %v7613_v18 = vpop.f32.mrb[148].mxu1  ;;  %v7577_v13 = vpop.f32.mrb[151].mxu0 }
 0x234   :  { %v7614_v16 = vpop.f32.mrb[149].mxu1  ;;  %v3978_v3 = vadd.f32 %v7575_v7, %v3914_v23 }
 0x235   :  { %v7615_v27 = vadd.f32 %v7614_v16, %v7613_v18  ;;  %v7616_v19 = vpop.f32.mrb[150].mxu1 }
 0x236   :  { %v7617_v36 = vpop.f32.mrb[151].mxu1 }
 0x237   :  { %v4042_v40 = vadd.f32 %v7615_v27, %v3978_v3 }
 0x238   :  { %v7917_v44 = vpop.f32.mrb[152].mxu0 }
 0x239   :  { %v10637_v60 = vadd.f32 %v7917_v44, %v4026_v63  ;;  %v4081_v28 = vpop.f32.mrb[153].mxu0 }
 0x23a   :  { %v10639_v10 = vadd.f32 %v4081_v28, %v4018_v17  ;;  %v7918_v42 = vpop.f32.mrb[154].mxu0 }
 0x23b   :  { %10931 = vst [vmem:[#allocation12_spill] sm:$0xff] %v10637_v60  ;;  %v7643_v9 = vpop.f32.mrb[152].mxu1  ;;  %v10641_v54 = vadd.f32 %v7918_v42, %v4029_v38  ;;  %v4084_v62 = vpop.f32.mrb[155].mxu0  ;;  %5409 = vadd.xlane.f32.xlu0 %v10637_v60  ;;  %v5509_v38 = vmul.f32 %v10637_v60, %v10637_v60 }
 0x23c   :  { %v7644_v58 = vpop.f32.mrb[153].mxu1  ;;  %v10644_v29 = vadd.f32 %v4084_v62, %v4021_v14  ;;  %v5507_v2 = vmul.f32 %v10639_v10, %v10639_v10 }
 0x23d   :  { %10932 = vst [vmem:[#allocation13_spill] sm:$0xff] %v10641_v54  ;;  %v7645_v46 = vadd.f32 %v7644_v58, %v7643_v9  ;;  %v7646_v23 = vpop.f32.mrb[154].mxu1  ;;  %5411 = vadd.xlane.f32.xlu1 %v10641_v54  ;;  %v5510_v41 = vmul.f32 %v10641_v54, %v10641_v54 }
 0x23e   :  { %10933 = vst [vmem:[#allocation14_spill] sm:$0xff] %v10644_v29  ;;  %v7647_v51 = vpop.f32.mrb[155].mxu1 }
 0x23f   :  { %v7648_v63 = vadd.f32 %v7647_v51, %v7646_v23  ;;  %5405 = vadd.xlane.f32.xlu0 %v10639_v10  ;;  %v4947_v23 = vadd.f32 %v7645_v46, %v9618_v53 }
 0x240   :  { %v7921_v37 = vpop.f32.mrb[156].mxu0 }
 0x241   :  { %v10648_v17 = vadd.f32 %v7921_v37, %v4042_v40  ;;  %v4097_v21 = vpop.f32.mrb[157].mxu0  ;;  %5407 = vadd.xlane.f32.xlu1 %v10644_v29 }
 0x242   :  { %v10653_v32 = vadd.f32 %v4097_v21, %v4034_v26  ;;  %v7922_v14 = vpop.f32.mrb[158].mxu0  ;;  %v5508_v26 = vmul.f32 %v10644_v29, %v10644_v29 }
 0x243   :  { %10934 = vst [vmem:[#allocation15_spill] sm:$0xff] %v10648_v17  ;;  %v7649_v1 = vpop.f32.mrb[156].mxu1  ;;  %v4100_v52 = vpop.f32.mrb[159].mxu0  ;;  %5518 = vadd.xlane.f32.xlu0 %v5509_v38  ;;  %v5417_v16 = vsel %vm5372_vm1, %v10648_v17, 0.0  ;;  %v5513_v36 = vmul.f32 %v10648_v17, %v10648_v17  ;;  %v4950_v14 = vadd.f32 %v7648_v63, %v9638_v12 }
 0x244   :  { %10935 = vst [vmem:[#allocation16_spill] sm:$0xff] %v10653_v32  ;;  %v7650_v57 = vpop.f32.mrb[157].mxu1  ;;  %v10657_v55 = vadd.f32 %v4100_v52, %v4037_v22  ;;  %v5511_v27 = vmul.f32 %v10653_v32, %v10653_v32 }
 0x245   :  { %v7651_v56 = vadd.f32 %v7650_v57, %v7649_v1  ;;  %v7652_v30 = vpop.f32.mrb[158].mxu1  ;;  %5520 = vadd.xlane.f32.xlu1 %v5510_v41  ;;  %v5526_v42 = vsel %vm5372_vm1, %v5513_v36, 0.0 }
 0x246   :  { %10936 = vst [vmem:[#allocation17_spill] sm:$0xff] %v10657_v55  ;;  %v7653_v39 = vpop.f32.mrb[159].mxu1  ;;  %v5512_v3 = vmul.f32 %v10657_v55, %v10657_v55 }
 0x247   :  { %v7654_v8 = vadd.f32 %v7653_v39, %v7652_v30  ;;  %5514 = vadd.xlane.f32.xlu0 %v5507_v2  ;;  %v4955_v53 = vadd.f32 %v7651_v56, %v9657_v20 }
 0x249   :  { %5516 = vadd.xlane.f32.xlu1 %v5508_v26  ;;  %v4958_v12 = vadd.f32 %v7654_v8, %v9666_v47 }
 0x24b   :  { %v7655_v4 = vpop.f32.mrb[160].mxu1  ;;  %5413 = vadd.xlane.f32.xlu0 %v10653_v32 }
 0x24c   :  { %v7656_v7 = vpop.f32.mrb[161].mxu1 }
 0x24d   :  { %v7657_v15 = vadd.f32 %v7656_v7, %v7655_v4  ;;  %v7658_v18 = vpop.f32.mrb[162].mxu1  ;;  %5415 = vadd.xlane.f32.xlu1 %v10657_v55 }
 0x24e   :  { %v7659_v13 = vpop.f32.mrb[163].mxu1 }
 0x24f   :  { %v7660_v22 = vadd.f32 %v7659_v13, %v7658_v18  ;;  %5418 = vadd.xlane.f32.xlu0 %v5417_v16  ;;  %v4963_v20 = vadd.f32 %v7657_v15, %v9699_v59 }
 0x251   :  { %5524 = vadd.xlane.f32.xlu1 %v5512_v3  ;;  %v4966_v47 = vadd.f32 %v7660_v22, %v9726_v6 }
 0x253   :  { %v7661_v19 = vpop.f32.mrb[164].mxu1  ;;  %5522 = vadd.xlane.f32.xlu0 %v5511_v27 }
 0x254   :  { %v7662_v40 = vpop.f32.mrb[165].mxu1 }
 0x255   :  { %v7663_v44 = vadd.f32 %v7662_v40, %v7661_v19  ;;  %v7664_v28 = vpop.f32.mrb[166].mxu1 }
 0x256   :  { %v7665_v9 = vpop.f32.mrb[167].mxu1 }
 0x257   :  { %5527 = vadd.xlane.f32.xlu0 %v5526_v42  ;;  %v4971_v59 = vadd.f32 %v7663_v44, %v9603_v43 }
 0x259   :  { %v7683_v58 = vpop.f32.mrb[160].mxu0 }
 0x25a   :  { %v7684_v62 = vpop.f32.mrb[161].mxu0 }
 0x25b   :  { %v7685_v51 = vadd.f32 %v7684_v62, %v7683_v58  ;;  %v7686_v37 = vpop.f32.mrb[162].mxu0  ;;  %v7723_v21 = vpop.f32.mrb[168].mxu1 }
 0x25c   :  { %v7687_v38 = vpop.f32.mrb[163].mxu0  ;;  %v7724_v1 = vpop.f32.mrb[169].mxu1 }
 0x25d   :  { %v5011_v57 = vadd.f32 %v7685_v51, %v4947_v23  ;;  %v7688_v52 = vadd.f32 %v7687_v38, %v7686_v37  ;;  %v7725_v41 = vadd.f32 %v7724_v1, %v7723_v21  ;;  %v7726_v30 = vpop.f32.mrb[170].mxu1 }
 0x25e   :  { %v7727_v39 = vpop.f32.mrb[171].mxu1 }
 0x25f   :  { %v5014_v2 = vadd.f32 %v7688_v52, %v4950_v14  ;;  %v5075_v26 = vadd.f32 %v7725_v41, %v5011_v57  ;;  %v7728_v4 = vadd.f32 %v7727_v39, %v7726_v30 }
 0x261   :  { %v5078_v7 = vadd.f32 %v7728_v4, %v5014_v2  ;;  %v7689_v18 = vpop.f32.mrb[164].mxu0 }
 0x262   :  { %v7690_v13 = vpop.f32.mrb[165].mxu0 }
 0x263   :  { %v7691_v46 = vadd.f32 %v7690_v13, %v7689_v18  ;;  %v7692_v16 = vpop.f32.mrb[166].mxu0  ;;  %v7729_v3 = vpop.f32.mrb[172].mxu1 }
 0x264   :  { %v7693_v27 = vpop.f32.mrb[167].mxu0  ;;  %v7730_v19 = vpop.f32.mrb[173].mxu1 }
 0x265   :  { %v5019_v63 = vadd.f32 %v7691_v46, %v4955_v53  ;;  %v7694_v36 = vadd.f32 %v7693_v27, %v7692_v16  ;;  %v7731_v40 = vadd.f32 %v7730_v19, %v7729_v3  ;;  %v7732_v28 = vpop.f32.mrb[174].mxu1 }
 0x266   :  { %v7733_v9 = vpop.f32.mrb[175].mxu1 }
 0x267   :  { %v5022_v42 = vadd.f32 %v7694_v36, %v4958_v12  ;;  %v5083_v58 = vadd.f32 %v7731_v40, %v5019_v63  ;;  %v7734_v62 = vadd.f32 %v7733_v9, %v7732_v28 }
 0x269   :  { %v5086_v23 = vadd.f32 %v7734_v62, %v5022_v42  ;;  %v7695_v51 = vpop.f32.mrb[168].mxu0 }
 0x26a   :  { %v7696_v37 = vpop.f32.mrb[169].mxu0 }
 0x26b   :  { %v7697_v56 = vadd.f32 %v7696_v37, %v7695_v51  ;;  %v7698_v21 = vpop.f32.mrb[170].mxu0  ;;  %v7735_v38 = vpop.f32.mrb[176].mxu1 }
 0x26c   :  { %v7699_v1 = vpop.f32.mrb[171].mxu0  ;;  %v7736_v14 = vpop.f32.mrb[177].mxu1 }
 0x26d   :  { %v5027_v8 = vadd.f32 %v7697_v56, %v4963_v20  ;;  %v7700_v57 = vadd.f32 %v7699_v1, %v7698_v21  ;;  %v7737_v52 = vadd.f32 %v7736_v14, %v7735_v38  ;;  %v7738_v41 = vpop.f32.mrb[178].mxu1 }
 0x26e   :  { %v7739_v30 = vpop.f32.mrb[179].mxu1 }
 0x26f   :  { %v5030_v39 = vadd.f32 %v7700_v57, %v4966_v47  ;;  %v5091_v2 = vadd.f32 %v7737_v52, %v5027_v8  ;;  %v7740_v4 = vadd.f32 %v7739_v30, %v7738_v41 }
 0x271   :  { %v5094_v18 = vadd.f32 %v7740_v4, %v5030_v39  ;;  %v7701_v13 = vpop.f32.mrb[172].mxu0 }
 0x272   :  { %v7702_v53 = vpop.f32.mrb[173].mxu0 }
 0x273   :  { %v7703_v15 = vadd.f32 %v7702_v53, %v7701_v13  ;;  %v7704_v46 = vpop.f32.mrb[174].mxu0  ;;  %v7741_v16 = vpop.f32.mrb[180].mxu1 }
 0x274   :  { %v7705_v3 = vpop.f32.mrb[175].mxu0  ;;  %v7742_v27 = vpop.f32.mrb[181].mxu1 }
 0x275   :  { %v5035_v19 = vadd.f32 %v7703_v15, %v4971_v59  ;;  %v7743_v6 = vadd.f32 %v7742_v27, %v7741_v16  ;;  %v7744_v22 = vpop.f32.mrb[182].mxu1 }
 0x276   :  { %v7745_v12 = vpop.f32.mrb[183].mxu1 }
 0x277   :  { %v5099_v63 = vadd.f32 %v7743_v6, %v5035_v19 }
 0x279   :  { %v7763_v36 = vpop.f32.mrb[176].mxu0 }
 0x27a   :  { %v7764_v40 = vpop.f32.mrb[177].mxu0 }
 0x27b   :  { %v7765_v28 = vadd.f32 %v7764_v40, %v7763_v36  ;;  %v7766_v9 = vpop.f32.mrb[178].mxu0  ;;  %v7803_v42 = vpop.f32.mrb[184].mxu1 }
 0x27c   :  { %v7767_v62 = vpop.f32.mrb[179].mxu0  ;;  %v7804_v51 = vpop.f32.mrb[185].mxu1 }
 0x27d   :  { %v5139_v37 = vadd.f32 %v7765_v28, %v5075_v26  ;;  %v7768_v20 = vadd.f32 %v7767_v62, %v7766_v9  ;;  %v7805_v43 = vadd.f32 %v7804_v51, %v7803_v42  ;;  %v7806_v44 = vpop.f32.mrb[186].mxu1 }
 0x27e   :  { %v7807_v56 = vpop.f32.mrb[187].mxu1 }
 0x27f   :  { %v5142_v21 = vadd.f32 %v7768_v20, %v5078_v7  ;;  %v5203_v38 = vadd.f32 %v7805_v43, %v5139_v37  ;;  %v7808_v1 = vadd.f32 %v7807_v56, %v7806_v44 }
 0x281   :  { %v5206_v14 = vadd.f32 %v7808_v1, %v5142_v21  ;;  %v7769_v47 = vpop.f32.mrb[180].mxu0 }
 0x282   :  { %v7770_v8 = vpop.f32.mrb[181].mxu0 }
 0x283   :  { %v7771_v57 = vadd.f32 %v7770_v8, %v7769_v47  ;;  %v7772_v52 = vpop.f32.mrb[182].mxu0  ;;  %v7809_v41 = vpop.f32.mrb[188].mxu1 }
 0x284   :  { %v7773_v30 = vpop.f32.mrb[183].mxu0  ;;  %v7810_v39 = vpop.f32.mrb[189].mxu1 }
 0x285   :  { %v5147_v4 = vadd.f32 %v7771_v57, %v5083_v58  ;;  %v7774_v13 = vadd.f32 %v7773_v30, %v7772_v52  ;;  %v7811_v53 = vadd.f32 %v7810_v39, %v7809_v41  ;;  %v7812_v59 = vpop.f32.mrb[190].mxu1 }
 0x286   :  { %v7813_v26 = vpop.f32.mrb[191].mxu1 }
 0x287   :  { %v5150_v15 = vadd.f32 %v7774_v13, %v5086_v23  ;;  %v5211_v46 = vadd.f32 %v7811_v53, %v5147_v4  ;;  %v7814_v16 = vadd.f32 %v7813_v26, %v7812_v59 }
 0x289   :  { %v5214_v3 = vadd.f32 %v7814_v16, %v5150_v15  ;;  %v7775_v7 = vpop.f32.mrb[184].mxu0 }
 0x28a   :  { %v7776_v27 = vpop.f32.mrb[185].mxu0 }
 0x28b   :  { %v7777_v19 = vadd.f32 %v7776_v27, %v7775_v7  ;;  %v7778_v6 = vpop.f32.mrb[186].mxu0  ;;  %v7815_v22 = vpop.f32.mrb[192].mxu1 }
 0x28c   :  { %v7779_v12 = vpop.f32.mrb[187].mxu0  ;;  %v7816_v36 = vpop.f32.mrb[193].mxu1 }
 0x28d   :  { %v5155_v40 = vadd.f32 %v7777_v19, %v5091_v2  ;;  %v7780_v28 = vadd.f32 %v7779_v12, %v7778_v6  ;;  %v7817_v9 = vadd.f32 %v7816_v36, %v7815_v22  ;;  %v7818_v42 = vpop.f32.mrb[194].mxu1 }
 0x28e   :  { %v7819_v58 = vpop.f32.mrb[195].mxu1 }
 0x28f   :  { %v5158_v62 = vadd.f32 %v7780_v28, %v5094_v18  ;;  %v5219_v51 = vadd.f32 %v7817_v9, %v5155_v40  ;;  %v7820_v37 = vadd.f32 %v7819_v58, %v7818_v42 }
 0x291   :  { %v5222_v20 = vadd.f32 %v7820_v37, %v5158_v62  ;;  %v7781_v23 = vpop.f32.mrb[188].mxu0 }
 0x292   :  { %v7782_v43 = vpop.f32.mrb[189].mxu0 }
 0x293   :  { %v7783_v44 = vadd.f32 %v7782_v43, %v7781_v23  ;;  %v7784_v56 = vpop.f32.mrb[190].mxu0  ;;  %v7821_v21 = vpop.f32.mrb[196].mxu1 }
 0x294   :  { %v7785_v1 = vpop.f32.mrb[191].mxu0  ;;  %v7822_v47 = vpop.f32.mrb[197].mxu1 }
 0x295   :  { %v5163_v8 = vadd.f32 %v7783_v44, %v5099_v63  ;;  %v7823_v57 = vadd.f32 %v7822_v47, %v7821_v21  ;;  %v7824_v52 = vpop.f32.mrb[198].mxu1 }
 0x296   :  { %v7825_v41 = vpop.f32.mrb[199].mxu1 }
 0x297   :  { %v5227_v2 = vadd.f32 %v7823_v57, %v5163_v8 }
 0x299   :  { %v7843_v30 = vpop.f32.mrb[192].mxu0 }
 0x29a   :  { %v7844_v39 = vpop.f32.mrb[193].mxu0 }
 0x29b   :  { %v7845_v4 = vadd.f32 %v7844_v39, %v7843_v30  ;;  %v7846_v13 = vpop.f32.mrb[194].mxu0  ;;  %v7933_v18 = vpop.f32.mrb[200].mxu1 }
 0x29c   :  { %v7847_v53 = vpop.f32.mrb[195].mxu0  ;;  %v5330_v59 = vpop.f32.mrb[201].mxu1 }
 0x29d   :  { %v7848_v26 = vadd.f32 %v7847_v53, %v7846_v13  ;;  %v5267_v15 = vadd.f32 %v7845_v4, %v5203_v38  ;;  %v7934_v16 = vpop.f32.mrb[202].mxu1  ;;  %v10706_v13 = vpop.xlane.xlu0 %5364 }
 0x29e   :  { %v5333_v7 = vpop.f32.mrb[203].mxu1 }
 0x29f   :  { %v10681_v27 = vadd.f32 %v5330_v59, %v5267_v15  ;;  %v5270_v19 = vadd.f32 %v7848_v26, %v5206_v14 }
 0x2a1   :  { %v10683_v6 = vadd.f32 %v5333_v7, %v5270_v19  ;;  %v7849_v63 = vpop.f32.mrb[196].mxu0  ;;  %5427 = vadd.xlane.f32.xlu1 %v10681_v27  ;;  %v5536_v40 = vmul.f32 %v10681_v27, %v10681_v27  ;;  %v5363_v7 = vpop.xlane.xlu0 %5362 }
 0x2a2   :  { %v7850_v22 = vpop.f32.mrb[197].mxu0 }
 0x2a3   :  { %10937 = vst [vmem:[#allocation18_spill] sm:$0xff] %v10683_v6  ;;  %v7851_v12 = vadd.f32 %v7850_v22, %v7849_v63  ;;  %v7852_v36 = vpop.f32.mrb[198].mxu0  ;;  %5429 = vadd.xlane.f32.xlu0 %v10683_v6  ;;  %v7937_v28 = vpop.f32.mrb[204].mxu1  ;;  %v5537_v14 = vmul.f32 %v10683_v6, %v10683_v6 }
 0x2a4   :  { %v7853_v38 = vpop.f32.mrb[199].mxu0  ;;  %v5346_v9 = vpop.f32.mrb[205].mxu1 }
 0x2a5   :  { %v5275_v42 = vadd.f32 %v7851_v12, %v5211_v46  ;;  %v7854_v58 = vadd.f32 %v7853_v38, %v7852_v36  ;;  %5543 = vadd.xlane.f32.xlu1 %v5536_v40  ;;  %v7938_v62 = vpop.f32.mrb[206].mxu1  ;;  %v5361_v22 = vpop.xlane.xlu1 %5360 }
 0x2a6   :  { %v5349_v37 = vpop.f32.mrb[207].mxu1  ;;  %v10720_v36 = vpop.xlane.xlu0 %5462 }
 0x2a7   :  { %v5278_v23 = vadd.f32 %v7854_v58, %v5214_v3  ;;  %5545 = vadd.xlane.f32.xlu0 %v5537_v14  ;;  %v10691_v43 = vadd.f32 %v7933_v18, %v5275_v42 }
 0x2a9   :  { %10938 = vst [vmem:[#allocation19_spill] sm:$0xff] %v10691_v43  ;;  %v7855_v44 = vpop.f32.mrb[200].mxu0  ;;  %5431 = vadd.xlane.f32.xlu1 %v10691_v43  ;;  %v10694_v56 = vadd.f32 %v7934_v16, %v5278_v23  ;;  %v5538_v46 = vmul.f32 %v10691_v43, %v10691_v43 }
 0x2aa   :  { %v7856_v21 = vpop.f32.mrb[201].mxu0  ;;  %v5459_v40 = vpop.xlane.xlu0 %5458 }
 0x2ab   :  { %10939 = vst [vmem:[#allocation20_spill] sm:$0xff] %v10694_v56  ;;  %v7857_v1 = vadd.f32 %v7856_v21, %v7855_v44  ;;  %v7858_v47 = vpop.f32.mrb[202].mxu0  ;;  %5433 = vadd.xlane.f32.xlu0 %v10694_v56  ;;  %v5539_v3 = vmul.f32 %v10694_v56, %v10694_v56 }
 0x2ac   :  { %v7859_v8 = vpop.f32.mrb[203].mxu0 }
 0x2ad   :  { %v7860_v57 = vadd.f32 %v7859_v8, %v7858_v47  ;;  %v5283_v52 = vadd.f32 %v7857_v1, %v5219_v51  ;;  %5547 = vadd.xlane.f32.xlu1 %v5538_v46 }
 0x2af   :  { %v10701_v41 = vadd.f32 %v5346_v9, %v5283_v52  ;;  %v5286_v30 = vadd.f32 %v7860_v57, %v5222_v20  ;;  %5549 = vadd.xlane.f32.xlu0 %v5539_v3 }
 0x2b1   :  { %10940 = vst [vmem:[#allocation21_spill] sm:$0xff] %v10701_v41  ;;  %v10703_v39 = vadd.f32 %v5349_v37, %v5286_v30  ;;  %v7861_v4 = vpop.f32.mrb[204].mxu0  ;;  %5435 = vadd.xlane.f32.xlu1 %v10701_v41  ;;  %v5540_v51 = vmul.f32 %v10701_v41, %v10701_v41 }
 0x2b2   :  { %v7862_v18 = vpop.f32.mrb[205].mxu0 }
 0x2b3   :  { %10941 = vst [vmem:[#allocation22_spill] sm:$0xff] %v10703_v39  ;;  %v7863_v53 = vadd.f32 %v7862_v18, %v7861_v4  ;;  %v7864_v59 = vpop.f32.mrb[206].mxu0  ;;  %5437 = vadd.xlane.f32.xlu0 %v10703_v39  ;;  %v5541_v20 = vmul.f32 %v10703_v39, %v10703_v39 }
 0x2b4   :  { %v7865_v26 = vpop.f32.mrb[207].mxu0 }
 0x2b5   :  { %v5291_v15 = vadd.f32 %v7863_v53, %v5227_v2  ;;  %5551 = vadd.xlane.f32.xlu1 %v5540_v51  ;;  %v5367_v2 = vpop.xlane.xlu1 %5366 }
 0x2b7   :  { %v10713_v16 = vadd.f32 %v7937_v28, %v5291_v15  ;;  %5553 = vadd.xlane.f32.xlu0 %v5541_v20  ;;  %v10724_v28 = vpop.xlane.xlu0 %5368 }
 0x2b9   :  { %10942 = vst [vmem:[#allocation23_spill] sm:$0xff] %v10713_v16  ;;  %v5439_v19 = vsel %vm5372_vm1, %v10713_v16, 0.0  ;;  %v5542_v63 = vmul.f32 %v10713_v16, %v10713_v16  ;;  %v10722_v38 = vpop.xlane.xlu1 %5460 }
 0x2ba   :  { %5440 = vadd.xlane.f32.xlu1 %v5439_v19 }
 0x2bb   :  { %v5555_v12 = vsel %vm5372_vm1, %v5542_v63, 0.0  ;;  %v10726_v42 = vpop.xlane.xlu0 %5374 }
 0x2bd   :  { %v5457_v9 = vpop.xlane.xlu1 %5456 }
 0x2be   :  { %5556 = vadd.xlane.f32.xlu1 %v5555_v12 }
 0x2bf   :  { %v10730_v14 = vpop.xlane.xlu0 %5466 }
 0x2c1   :  { %v10728_v58 = vpop.xlane.xlu1 %5370 }
 0x2c3   :  { %v5386_v37 = vpop.xlane.xlu0 %5385 }
 0x2c4   :  { %v5399_v31 = vadd.f32 %v5386_v37, %v5363_v7 }
 0x2c5   :  { %v10732_v62 = vpop.xlane.xlu1 %5464 }
 0x2c7   :  { %v5486_v44 = vpop.xlane.xlu0 %5485 }
 0x2c8   :  { %v5500_v0 = vadd.f32 %v5486_v44, %v5457_v9 }
 0x2c9   :  { %v10734_v23 = vpop.xlane.xlu1 %5469 }
 0x2cb   :  { %v5390_v1 = vpop.xlane.xlu0 %5389 }
 0x2cd   :  { %v5384_v21 = vpop.xlane.xlu1 %5383 }
 0x2ce   :  { %v5398_v11 = vadd.f32 %v5384_v21, %v5361_v22  ;;  %v5401_v21 = vadd.f32 %v5390_v1, %v5367_v2 }
 0x2cf   :  { %v5490_v46 = vpop.xlane.xlu0 %5489 }
 0x2d1   :  { %v5488_v47 = vpop.xlane.xlu1 %5487 }
 0x2d2   :  { %v5501_v25 = vadd.f32 %v5488_v47, %v5459_v40 }
 0x2d3   :  { %v10736_v57 = vpop.xlane.xlu0 %5393 }
 0x2d5   :  { %v5388_v8 = vpop.xlane.xlu1 %5387 }
 0x2d6   :  { %v5400_v49 = vadd.f32 %v5388_v8, %v10706_v13 }
 0x2d7   :  { %v10738_v3 = vpop.xlane.xlu0 %5493 }
 0x2d9   :  { %v5492_v52 = vpop.xlane.xlu1 %5491 }
 0x2db   :  { %v10740_v4 = vpop.xlane.xlu0 %5498 }
 0x2dd   :  { %v5392_v30 = vpop.xlane.xlu1 %5391 }
 0x2de   :  { %v5402_v2 = vadd.f32 %v5392_v30, %v10724_v28  ;;  %v5504_v28 = vadd.f32 %v10738_v3, %v10732_v62 }
 0x2df   :  { %v5410_v53 = vpop.xlane.xlu0 %5409 }
 0x2e1   :  { %v10742_v18 = vpop.xlane.xlu1 %5495 }
 0x2e3   :  { %v5406_v51 = vpop.xlane.xlu0 %5405 }
 0x2e4   :  { %v5420_v41 = vadd.f32 %v5406_v51, %v5398_v11  ;;  %v5422_v11 = vadd.f32 %v5410_v53, %v5400_v49 }
 0x2e5   :  { %v10744_v59 = vpop.xlane.xlu1 %5396 }
 0x2e7   :  { %v5519_v15 = vpop.xlane.xlu0 %5518 }
 0x2e9   :  { %v5412_v26 = vpop.xlane.xlu1 %5411 }
 0x2ea   :  { %v5423_v40 = vadd.f32 %v5412_v26, %v5401_v21 }
 0x2eb   :  { %v5515_v19 = vpop.xlane.xlu0 %5514 }
 0x2ec   :  { %v5529_v43 = vadd.f32 %v5515_v19, %v5500_v0 }
 0x2ed   :  { %v5408_v20 = vpop.xlane.xlu1 %5407 }
 0x2ee   :  { %v5421_v5 = vadd.f32 %v5408_v20, %v5399_v31 }
 0x2ef   :  { %v5414_v12 = vpop.xlane.xlu0 %5413 }
 0x2f1   :  { %v5521_v63 = vpop.xlane.xlu1 %5520 }
 0x2f3   :  { %v10746_v55 = vpop.xlane.xlu0 %5418 }
 0x2f5   :  { %v5517_v39 = vpop.xlane.xlu1 %5516 }
 0x2f6   :  { %v5530_v6 = vadd.f32 %v5517_v39, %v5501_v25 }
 0x2f7   :  { %v10748_v16 = vpop.xlane.xlu0 %5522 }
 0x2f8   :  { %v5533_v21 = vadd.f32 %v10748_v16, %v5504_v28 }
 0x2f9   :  { %v5416_v48 = vpop.xlane.xlu1 %5415 }
 0x2fb   :  { %v10752_v33 = vpop.xlane.xlu0 %5527 }
 0x2fd   :  { %v10750_v17 = vpop.xlane.xlu1 %5524 }
 0x32e   :  { %v5428_v32 = vpop.xlane.xlu1 %5427 }
 0x32f   :  { %v5442_v56 = vadd.f32 %v5428_v32, %v5420_v41 }
 0x330   :  { %v5430_v54 = vpop.xlane.xlu0 %5429 }
 0x331   :  { %v10754_v60 = vmul.f32 0.001953125, %v5442_v56  ;;  %v5443_v61 = vadd.f32 %v5430_v54, %v5421_v5 }
 0x332   :  { %v5544_v34 = vpop.xlane.xlu1 %5543 }
 0x333   :  { %v10757_v29 = vmul.f32 0.001953125, %v5443_v61  ;;  %v5558_v22 = vadd.f32 %v5544_v34, %v5529_v43  ;;  %v5580_v31 = vmul.f32 %v10754_v60, %v10754_v60  ;;  %v5502_v61 = vadd.f32 %v5490_v46, %v10722_v38 }
 0x334   :  { %v5546_v7 = vpop.xlane.xlu0 %5545  ;;  %v5503_v34 = vadd.f32 %v5492_v52, %v10720_v36  ;;  %v5403_v38 = vadd.f32 %v10736_v57, %v10728_v58  ;;  %v5424_v36 = vadd.f32 %v5414_v12, %v5402_v2 }
 0x335   :  { %v5573_v32 = vmul.f32 0.001953125, %v5558_v22  ;;  %v5559_v41 = vadd.f32 %v5546_v7, %v5530_v6  ;;  %v5581_v5 = vmul.f32 %v10757_v29, %v10757_v29  ;;  %v5531_v9 = vadd.f32 %v5519_v15, %v5502_v61 }
 0x336   :  { %v5432_v0 = vpop.xlane.xlu1 %5431  ;;  %v5532_v44 = vadd.f32 %v5521_v63, %v5503_v34  ;;  %v5425_v30 = vadd.f32 %v5416_v48, %v5403_v38  ;;  %v5505_v63 = vadd.f32 %v10742_v18, %v10730_v14 }
 0x337   :  { %v5587_v54 = vsub.f32 %v5573_v32, %v5580_v31  ;;  %v5574_v56 = vmul.f32 0.001953125, %v5559_v41  ;;  %v5444_v13 = vadd.f32 %v5432_v0, %v5422_v11  ;;  %v5404_v0 = vadd.f32 %v10744_v59, %v10726_v42 }
 0x338   :  { %v5434_v25 = vpop.xlane.xlu0 %5433  ;;  %v5534_v31 = vadd.f32 %v10750_v17, %v5505_v63 }
 0x339   :  { %v5594_v43 = vmax.f32 %v5587_v54, 0.0  ;;  %v5588_v49 = vsub.f32 %v5574_v56, %v5581_v5  ;;  %v5445_v39 = vadd.f32 %v5434_v25, %v5423_v40  ;;  %v10766_v6 = vmul.f32 0.001953125, %v5444_v13  ;;  %v5601_v13 = vld [vmem:[%s10896_s3] sm:$0xff] }
 0x33a   :  { %v5548_v37 = vpop.xlane.xlu1 %5547  ;;  %v5426_v17 = vadd.f32 %v10746_v55, %v5404_v0  ;;  %v5606_v0 = vld [vmem:[%s10896_s3 + $0x28] sm:$0xff] }
 0x33b   :  { %v5608_v1 = vadd.f32 1e-05, %v5594_v43  ;;  %v5595_v47 = vmax.f32 %v5588_v49, 0.0  ;;  %v10768_v8 = vmul.f32 0.001953125, %v5445_v39  ;;  %v5560_v46 = vadd.f32 %v5548_v37, %v5531_v9  ;;  %v5602_v43 = vld [vmem:[%s10896_s3 + $0x8] sm:$0xff] }
 0x33c   :  { %v5550_v53 = vpop.xlane.xlu0 %5549  ;;  %v5582_v26 = vmul.f32 %v10766_v6, %v10766_v6  ;;  %v5506_v49 = vadd.f32 %v10740_v4, %v10734_v23  ;;  %v5630_v23 = vld [vmem:[%s10897_s4 + $0x8] sm:$0xff] }
 0x33d   :  { %8412 = vrsqrt.f32 %v5608_v1  ;;  %v5609_v52 = vadd.f32 1e-05, %v5595_v47  ;;  %v5561_v51 = vadd.f32 %v5550_v53, %v5532_v44  ;;  %v5575_v15 = vmul.f32 0.001953125, %v5560_v46  ;;  %v5629_v44 = vld [vmem:[%s10897_s4] sm:$0xff] }
 0x33e   :  { %v5436_v20 = vpop.xlane.xlu1 %5435  ;;  %v5583_v19 = vmul.f32 %v10768_v8, %v10768_v8  ;;  %v5535_v1 = vadd.f32 %v10752_v33, %v5506_v49 }
 0x33f   :  { %8414 = vrsqrt.f32 %v5609_v52  ;;  %v5576_v58 = vmul.f32 0.001953125, %v5561_v51  ;;  %v5446_v57 = vadd.f32 %v5436_v20, %v5424_v36  ;;  %v5589_v12 = vsub.f32 %v5575_v15, %v5582_v26  ;;  %v5604_v20 = vld [vmem:[%s10896_s3 + $0x18] sm:$0xff] }
 0x340   :  { %v5438_v22 = vpop.xlane.xlu0 %5437 }
 0x341   :  { %v5590_v62 = vsub.f32 %v5576_v58, %v5583_v19  ;;  %v10781_v48 = vmul.f32 0.001953125, %v5446_v57  ;;  %v5447_v3 = vadd.f32 %v5438_v22, %v5425_v30  ;;  %v5596_v7 = vmax.f32 %v5589_v12, 0.0  ;;  %v5632_v22 = vld [vmem:[%s10897_s4 + $0x18] sm:$0xff] }
 0x342   :  { %v5552_v11 = vpop.xlane.xlu1 %5551 }
 0x343   :  { %v5597_v32 = vmax.f32 %v5590_v62, 0.0  ;;  %v10784_v41 = vmul.f32 0.001953125, %v5447_v3  ;;  %v5562_v40 = vadd.f32 %v5552_v11, %v5533_v21  ;;  %v5610_v14 = vadd.f32 1e-05, %v5596_v7  ;;  %v5631_v21 = vld [vmem:[%s10897_s4 + $0x10] sm:$0xff]  ;;  %v5605_v11 = vld [vmem:[%s10896_s3 + $0x20] sm:$0xff] }
 0x344   :  { %v5554_v18 = vpop.xlane.xlu0 %5553  ;;  %v5584_v16 = vmul.f32 %v10781_v48, %v10781_v48 }
 0x345   :  { %v5611_v5 = vadd.f32 1e-05, %v5597_v32  ;;  %v5577_v54 = vmul.f32 0.001953125, %v5562_v40  ;;  %v5563_v56 = vadd.f32 %v5554_v18, %v5534_v31  ;;  %8416 = vrsqrt.f32 %v5610_v14 }
 0x346   :  { %v5585_v42 = vmul.f32 %v10784_v41, %v10784_v41 }
 0x347   :  { %v8413_v61 = vpop.eup %8412  ;;  %8418 = vrsqrt.f32 %v5611_v5  ;;  %v5591_v59 = vsub.f32 %v5577_v54, %v5584_v16  ;;  %v5578_v25 = vmul.f32 0.001953125, %v5563_v56  ;;  %v5441_v34 = vpop.xlane.xlu1 %5440  ;;  %v5607_v54 = vld [vmem:[%s10896_s3 + $0x30] sm:$0x3] }
 0x348   :  { %v5448_v39 = vadd.f32 %v5441_v34, %v5426_v17  ;;  %v5622_v2 = vmul.f32 %v8413_v61, %v5601_v13  ;;  %v5635_v61 = vld [vmem:[%s10897_s4 + $0x30] sm:$0x3] }
 0x349   :  { %v8415_v9 = vpop.eup %8414  ;;  %v5598_v55 = vmax.f32 %v5591_v59, 0.0  ;;  %v5592_v37 = vsub.f32 %v5578_v25, %v5585_v42 }
 0x34a   :  { %v5572_v47 = vmul.f32 0.001953125, %v5448_v39  ;;  %5652 = vperm.xlu0 %7940, %v5622_v2   ;;  %v5623_v38 = vmul.f32 %v8415_v9, %v5602_v43  ;;  %v5636_v46 = vmul.f32 %v5622_v2, %v10754_v60  ;;  %v5603_v60 = vld [vmem:[%s10896_s3 + $0x10] sm:$0xff] }
 0x34b   :  { %v5612_v53 = vadd.f32 1e-05, %v5598_v55  ;;  %v5599_v36 = vmax.f32 %v5592_v37, 0.0  ;;  %v5557_v52 = vpop.xlane.xlu1 %5556 }
 0x34c   :  { %v5564_v4 = vadd.f32 %v5557_v52, %v5535_v1  ;;  %5657 = vperm.xlu1 %7941, %v5623_v38   ;;  %v5643_v51 = vsub.f32 %v5629_v44, %v5636_v46  ;;  %v5637_v28 = vmul.f32 %v5623_v38, %v10757_v29  ;;  %v5586_v33 = vmul.f32 %v5572_v47, %v5572_v47  ;;  %v10943_v46 = vld [vmem:[#allocation14_spill] sm:$0xff] }
 0x34d   :  { %8420 = vrsqrt.f32 %v5612_v53  ;;  %v5613_v30 = vadd.f32 1e-05, %v5599_v36  ;;  %v10944_v36 = vld [vmem:[#allocation18_spill] sm:$0xff] }
 0x34e   :  { %v5579_v26 = vmul.f32 0.001953125, %v5564_v4  ;;  %5694 = vperm.xlu0 %7940, %v5643_v51   ;;  %v5644_v15 = vsub.f32 %v5630_v23, %v5637_v28 }
 0x34f   :  { %8422 = vrsqrt.f32 %v5613_v30  ;;  %v8417_v19 = vpop.eup %8416 }
 0x350   :  { %v5593_v58 = vsub.f32 %v5579_v26, %v5586_v33  ;;  %5699 = vperm.xlu1 %7941, %v5644_v15   ;;  %v5624_v29 = vmul.f32 %v8417_v19, %v5603_v60  ;;  %v10945_v60 = vld [vmem:[#allocation3_spill] sm:$0xff]  ;;  %v10946_v19 = vld [vmem:[#allocation2_spill] sm:$0xff] }
 0x351   :  { %v8419_v57 = vpop.eup %8418 }
 0x352   :  { %v5600_v63 = vmax.f32 %v5593_v58, 0.0  ;;  %v5625_v12 = vmul.f32 %v8419_v57, %v5604_v20  ;;  %v5638_v62 = vmul.f32 %v5624_v29, %v10766_v6  ;;  %v10947_v57 = vld [vmem:[#allocation7_spill] sm:$0xff] }
 0x354   :  { %v5614_v3 = vadd.f32 1e-05, %v5600_v63  ;;  %5667 = vperm.xlu0 %7940, %v5625_v12   ;;  %5662 = vperm.xlu1 %7941, %v5624_v29   ;;  %v5639_v7 = vmul.f32 %v5625_v12, %v10768_v8  ;;  %v5645_v32 = vsub.f32 %v5631_v21, %v5638_v62  ;;  %v5633_v8 = vld [vmem:[%s10897_s4 + $0x20] sm:$0xff]  ;;  %v10948_v63 = vld [vmem:[#allocation12_spill] sm:$0xff] }
 0x356   :  { %8424 = vrsqrt.f32 %v5614_v3  ;;  %v5646_v31 = vsub.f32 %v5632_v22, %v5639_v7  ;;  %v10949_v22 = vld [vmem:[#allocation19_spill] sm:$0xff]  ;;  %v10950_v3 = vld [vmem:[#allocation8_spill] sm:$0xff] }
 0x357   :  { %v8421_v40 = vpop.eup %8420 }
 0x358   :  { %5709 = vperm.xlu1 %7941, %v5646_v31   ;;  %5704 = vperm.xlu0 %7940, %v5645_v32   ;;  %v5626_v6 = vmul.f32 %v8421_v40, %v5605_v11  ;;  %v10951_v11 = vld [vmem:[#allocation13_spill] sm:$0xff]  ;;  %v10952_v32 = vld [vmem:[#allocation20_spill] sm:$0xff] }
 0x359   :  { %v8423_v14 = vpop.eup %8422 }
 0x35a   :  { %v5627_v18 = vmul.f32 %v8423_v14, %v5606_v0  ;;  %v5640_v5 = vmul.f32 %v5626_v6, %v10781_v48  ;;  %v5634_v48 = vld [vmem:[%s10897_s4 + $0x28] sm:$0xff] }
 0x35c   :  { %5677 = vperm.xlu0 %7940, %v5627_v18   ;;  %5672 = vperm.xlu1 %7941, %v5626_v6   ;;  %v5647_v16 = vsub.f32 %v5633_v8, %v5640_v5  ;;  %v5641_v17 = vmul.f32 %v5627_v18, %v10784_v41 }
 0x35e   :  { %v5648_v59 = vsub.f32 %v5634_v48, %v5641_v17 }
 0x360   :  { %v8425_v56 = vpop.eup %8424  ;;  %5714 = vperm.xlu0 %7940, %v5647_v16  }
 0x361   :  { %v5628_v13 = vmul.f32 %v8425_v56, %v5607_v54 }
 0x363   :  { %5682 = vperm.xlu1 %7941, %v5628_v13   ;;  %v5642_v42 = vmul.f32 %v5628_v13, %v5572_v47 }
 0x365   :  { %v5649_v25 = vsub.f32 %v5635_v61, %v5642_v42 }
 0x367   :  { %5719 = vperm.xlu1 %7941, %v5648_v59   ;;  %5724 = vperm.xlu0 %7940, %v5649_v25  }
 0x3c9   :  { %v5653_v34 = vpop.permute.xlu0 %5652 }
 0x3ca   :  { %v5685_v49 = vmul.f32 %v5653_v34, %v10071_v35  ;;  %v5734_v41 = vmul.f32 %v5653_v34, %v10549_v50  ;;  %v5755_v39 = vmul.f32 %v5653_v34, %v10639_v10  ;;  %v5769_v2 = vmul.f32 %v5653_v34, %v10681_v27 }
 0x3cb   :  { %v5658_v43 = vpop.permute.xlu1 %5657 }
 0x3cc   :  { %v5686_v9 = vmul.f32 %v5658_v43, %v10080_v45  ;;  %v5735_v55 = vmul.f32 %v5658_v43, %v10559_v24  ;;  %v5756_v53 = vmul.f32 %v5658_v43, %v10943_v46  ;;  %v5770_v52 = vmul.f32 %v5658_v43, %v10944_v36 }
 0x3cd   :  { %v5695_v37 = vpop.permute.xlu0 %5694 }
 0x3ce   :  { %v5727_v44 = vadd.f32 %v5695_v37, %v5685_v49  ;;  %v5741_v1 = vadd.f32 %v5734_v41, %v5695_v37  ;;  %v5762_v47 = vadd.f32 %v5755_v39, %v5695_v37  ;;  %v5776_v38 = vadd.f32 %v5769_v2, %v5695_v37  ;;  %v10953_v49 = vld [vmem:[#allocation5_spill] sm:$0xff] }
 0x3cf   :  { %v5700_v35 = vpop.permute.xlu1 %5699  ;;  %v10954_v2 = vld [vmem:[#allocation9_spill] sm:$0xff] }
 0x3d0   :  { %v5748_v23 = vmax.f32 %v5727_v44, %v5741_v1  ;;  %v5783_v50 = vmax.f32 %v5762_v47, %v5776_v38  ;;  %v5728_v4 = vadd.f32 %v5700_v35, %v5686_v9  ;;  %v5742_v10 = vadd.f32 %v5735_v55, %v5700_v35  ;;  %v10955_v55 = vld [vmem:[#allocation16_spill] sm:$0xff]  ;;  %v10956_v44 = vld [vmem:[#allocation21_spill] sm:$0xff] }
 0x3d1   :  { %v5763_v51 = vadd.f32 %v5756_v53, %v5700_v35  ;;  %v5777_v27 = vadd.f32 %v5770_v52, %v5700_v35 }
 0x3d2   :  { %v5790_v28 = vmax.f32 %v5748_v23, %v5783_v50  ;;  %v5749_v45 = vmax.f32 %v5728_v4, %v5742_v10  ;;  %v10957_v10 = vld [vmem:[#allocation6_spill] sm:$0xff] }
 0x3d3   :  { %v5784_v30 = vmax.f32 %v5763_v51, %v5777_v27  ;;  %v5668_v24 = vpop.permute.xlu0 %5667  ;;  %v5663_v33 = vpop.permute.xlu1 %5662  ;;  %v10958_v27 = vld [vmem:[#allocation4_spill] sm:$0xff] }
 0x3d4   :  { %v5797_v26 = vmax.f32 %v5790_v28, 0.0  ;;  %v5688_v20 = vmul.f32 %v5668_v24, %v10945_v60  ;;  %v5687_v58 = vmul.f32 %v5663_v33, %v10946_v19  ;;  %v5736_v29 = vmul.f32 %v5663_v33, %v10947_v57  ;;  %v10962_v19 = vld [vmem:[#allocation10_spill] sm:$0xff]  ;;  %v10963_v57 = vld [vmem:[#allocation17_spill] sm:$0xff] }
 0x3d5   :  { %v5791_v15 = vmax.f32 %v5749_v45, %v5784_v30  ;;  %v5757_v12 = vmul.f32 %v5663_v33, %v10948_v63  ;;  %v5771_v21 = vmul.f32 %v5663_v33, %v10949_v22  ;;  %v5737_v7 = vmul.f32 %v5668_v24, %v10950_v3  ;;  %v10959_v45 = vld [vmem:[#allocation11_spill] sm:$0xff]  ;;  %v10964_v63 = vld [vmem:[#allocation22_spill] sm:$0xff] }
 0x3d6   :  { %5804 = vst [vmem:[%s10898_s5] sm:$0xff] %v5797_v26  ;;  %v5758_v31 = vmul.f32 %v5668_v24, %v10951_v11  ;;  %v5772_v40 = vmul.f32 %v5668_v24, %v10952_v32  ;;  %v10960_v24 = vld [vmem:[#allocation15_spill] sm:$0xff] }
 0x3d7   :  { %v5798_v62 = vmax.f32 %v5791_v15, 0.0  ;;  %v5705_v0 = vpop.permute.xlu0 %5704  ;;  %v5710_v6 = vpop.permute.xlu1 %5709  ;;  %v10961_v26 = vld [vmem:[#allocation23_spill] sm:$0xff] }
 0x3d8   :  { %v5729_v14 = vadd.f32 %v5705_v0, %v5687_v58  ;;  %v5743_v18 = vadd.f32 %v5736_v29, %v5705_v0  ;;  %v5764_v5 = vadd.f32 %v5757_v12, %v5705_v0  ;;  %v5778_v8 = vadd.f32 %v5771_v21, %v5705_v0 }
 0x3d9   :  { %5805 = vst [vmem:[%s10898_s5 + $0x8] sm:$0xff] %v5798_v62  ;;  %v5730_v16 = vadd.f32 %v5710_v6, %v5688_v20  ;;  %v5744_v54 = vadd.f32 %v5737_v7, %v5710_v6  ;;  %v5765_v56 = vadd.f32 %v5758_v31, %v5710_v6  ;;  %v5779_v13 = vadd.f32 %v5772_v40, %v5710_v6 }
 0x3da   :  { %v5750_v17 = vmax.f32 %v5729_v14, %v5743_v18  ;;  %v5785_v48 = vmax.f32 %v5764_v5, %v5778_v8 }
 0x3db   :  { %v5751_v61 = vmax.f32 %v5730_v16, %v5744_v54  ;;  %v5786_v42 = vmax.f32 %v5765_v56, %v5779_v13  ;;  %v5678_v59 = vpop.permute.xlu0 %5677  ;;  %v5673_v25 = vpop.permute.xlu1 %5672 }
 0x3dc   :  { %v5792_v34 = vmax.f32 %v5750_v17, %v5785_v48  ;;  %v5689_v41 = vmul.f32 %v5673_v25, %v10953_v49  ;;  %v5738_v9 = vmul.f32 %v5673_v25, %v10954_v2  ;;  %v5759_v37 = vmul.f32 %v5673_v25, %v10955_v55 }
 0x3dd   :  { %v5793_v43 = vmax.f32 %v5751_v61, %v5786_v42  ;;  %v5773_v1 = vmul.f32 %v5673_v25, %v10956_v44  ;;  %v5690_v51 = vmul.f32 %v5678_v59, %v10957_v10  ;;  %v5739_v58 = vmul.f32 %v5678_v59, %v10962_v19 }
 0x3de   :  { %v5799_v39 = vmax.f32 %v5792_v34, 0.0  ;;  %v5760_v29 = vmul.f32 %v5678_v59, %v10963_v57  ;;  %v5774_v12 = vmul.f32 %v5678_v59, %v10964_v63 }
 0x3df   :  { %v5800_v47 = vmax.f32 %v5793_v43, 0.0  ;;  %v5715_v38 = vpop.permute.xlu0 %5714 }
 0x3e0   :  { %5806 = vst [vmem:[%s10898_s5 + $0x10] sm:$0xff] %v5799_v39  ;;  %v5731_v46 = vadd.f32 %v5715_v38, %v5689_v41  ;;  %v5745_v53 = vadd.f32 %v5738_v9, %v5715_v38  ;;  %v5766_v36 = vadd.f32 %v5759_v37, %v5715_v38  ;;  %v5780_v52 = vadd.f32 %v5773_v1, %v5715_v38 }
 0x3e1   :  { %5807 = vst [vmem:[%s10898_s5 + $0x18] sm:$0xff] %v5800_v47 }
 0x3e2   :  { %v5752_v35 = vmax.f32 %v5731_v46, %v5745_v53  ;;  %v5787_v23 = vmax.f32 %v5766_v36, %v5780_v52  ;;  %v5683_v50 = vpop.permute.xlu1 %5682 }
 0x3e3   :  { %v5691_v28 = vmul.f32 %v5683_v50, %v10958_v27  ;;  %v5740_v30 = vmul.f32 %v5683_v50, %v10959_v45  ;;  %v5761_v33 = vmul.f32 %v5683_v50, %v10960_v24  ;;  %v5775_v15 = vmul.f32 %v5683_v50, %v10961_v26 }
 0x3e4   :  { %v5794_v4 = vmax.f32 %v5752_v35, %v5787_v23 }
 0x3e6   :  { %v5801_v60 = vmax.f32 %v5794_v4, 0.0  ;;  %v5725_v20 = vpop.permute.xlu0 %5724  ;;  %v5720_v22 = vpop.permute.xlu1 %5719 }
 0x3e7   :  { %v5733_v21 = vadd.f32 %v5725_v20, %v5691_v28  ;;  %v5747_v62 = vadd.f32 %v5740_v30, %v5725_v20  ;;  %v5768_v3 = vadd.f32 %v5761_v33, %v5725_v20  ;;  %v5782_v7 = vadd.f32 %v5775_v15, %v5725_v20 }
 0x3e8   :  { %5808 = vst [vmem:[%s10898_s5 + $0x20] sm:$0xff] %v5801_v60  ;;  %v5732_v11 = vadd.f32 %v5720_v22, %v5690_v51  ;;  %v5746_v31 = vadd.f32 %v5739_v58, %v5720_v22  ;;  %v5767_v32 = vadd.f32 %v5760_v29, %v5720_v22  ;;  %v5781_v40 = vadd.f32 %v5774_v12, %v5720_v22 }
 0x3e9   :  { %v5754_v0 = vmax.f32 %v5733_v21, %v5747_v62  ;;  %v5789_v6 = vmax.f32 %v5768_v3, %v5782_v7 }
 0x3ea   :  { %v5753_v14 = vmax.f32 %v5732_v11, %v5746_v31  ;;  %v5788_v18 = vmax.f32 %v5767_v32, %v5781_v40 }
 0x3eb   :  { %v5796_v5 = vmax.f32 %v5754_v0, %v5789_v6 }
 0x3ec   :  { %v5795_v8 = vmax.f32 %v5753_v14, %v5788_v18 }
 0x3ed   :  { %v5803_v16 = vmax.f32 %v5796_v5, 0.0 }
 0x3ee   :  { %v5802_v54 = vmax.f32 %v5795_v8, 0.0 }
 0x3ef   :  { %5810 = vst [vmem:[%s10898_s5 + $0x30] sm:$0x3] %v5803_v16 }
 0x3f0   :  { %5809 = vst [vmem:[%s10898_s5 + $0x28] sm:$0xff] %v5802_v54 }

// kernel: dann_mnist_forward.5
= control target key start
LH: loop header
LB: loop body
LE: loop exit
PB: predicated region body
PF: predicated region fallthrough
CT: control target
= control target key end

     0   :  { %s2406_s0 = inlined_call_operand.vmem [shape: f32[8,800], index: 0, kind: input, shape index: {}]   ;;  %s2407_s1 = inlined_call_operand.vmem [shape: f32[800,200], index: 1, kind: input, shape index: {}]   ;;  %s2408_s2 = inlined_call_operand.vmem [shape: f32[1,200], index: 2, kind: input, shape index: {}]   ;;  %s2409_s3 = inlined_call_operand.vmem [shape: f32[1,200], index: 3, kind: input, shape index: {}]   ;;  %s2410_s4 = inlined_call_operand.vmem [shape: f32[1,200], index: 4, kind: input, shape index: {}]   ;;  %s2411_s5 = inlined_call_operand.vmem [shape: f32[200,100], index: 5, kind: input, shape index: {}]   ;;  %s2412_s6 = inlined_call_operand.vmem [shape: f32[1,100], index: 6, kind: input, shape index: {}]   ;;  %s2413_s7 = inlined_call_operand.vmem [shape: f32[1,100], index: 7, kind: input, shape index: {}]   ;;  %s2414_s8 = inlined_call_operand.vmem [shape: f32[1,100], index: 8, kind: input, shape index: {}]   ;;  %s2415_s9 = inlined_call_operand.vmem [shape: f32[100,10], index: 9, kind: input, shape index: {}]   ;;  %s2416_s10 = inlined_call_operand.vmem [shape: f32[1,10], index: 10, kind: input, shape index: {}]   ;;  %s2417_s11 = inlined_call_operand.vmem [shape: f32[200,2], index: 11, kind: input, shape index: {}]   ;;  %s2418_s12 = inlined_call_operand.vmem [shape: f32[1,2], index: 12, kind: input, shape index: {}]   ;;  %s2419_s13 = inlined_call_operand.hbm [shape: f32[8,10], index: 13, kind: output, shape index: {0}]   ;;  %s2420_s14 = inlined_call_operand.vmem [shape: f32[8,2], index: 14, kind: output, shape index: {1}]  }
   0x1   :  { %v119_v0 = vld [vmem:[%s2407_s1 + $0x208] sm:$0xff]  ;;  %v121_v1 = vld [vmem:[%s2407_s1 + $0x218] sm:$0xff]  ;;  %v118_v2 = vld [vmem:[%s2407_s1 + $0x200] sm:$0xff] }
   0x2   :  { %v1141_v3 = vpack.c.bf16 %v121_v1, %v119_v0  ;;  %v120_v4 = vld [vmem:[%s2407_s1 + $0x210] sm:$0xff]  ;;  %v123_v5 = vld [vmem:[%s2407_s1 + $0x228] sm:$0xff]  ;;  %v125_v6 = vld [vmem:[%s2407_s1 + $0x238] sm:$0xff] }
   0x3   :  { %v1143_v7 = vpack.c.bf16 %v120_v4, %v118_v2  ;;  %v1145_v8 = vpack.c.bf16 %v125_v6, %v123_v5  ;;  %v122_v9 = vld [vmem:[%s2407_s1 + $0x220] sm:$0xff]  ;;  %v124_v10 = vld [vmem:[%s2407_s1 + $0x230] sm:$0xff]  ;;  %v127_v11 = vld [vmem:[%s2407_s1 + $0x248] sm:$0xff] }
   0x4   :  { %1142 = vmatprep.subr.bf16.mxu0 %v1141_v3  ;;  %v129_v12 = vld [vmem:[%s2407_s1 + $0x258] sm:$0xff]  ;;  %v1147_v13 = vpack.c.bf16 %v124_v10, %v122_v9  ;;  %v126_v15 = vld [vmem:[%s2407_s1 + $0x240] sm:$0xff]  ;;  %v128_v16 = vld [vmem:[%s2407_s1 + $0x250] sm:$0xff] }
   0x5   :  { %1144 = vmatpush1.bf16.msra.mxu0 %v1143_v7  ;;  %v1149_v14 = vpack.c.bf16 %v129_v12, %v127_v11  ;;  %v131_v17 = vld [vmem:[%s2407_s1 + $0x268] sm:$0xff]  ;;  %v133_v18 = vld [vmem:[%s2407_s1 + $0x278] sm:$0xff]  ;;  %v1151_v19 = vpack.c.bf16 %v128_v16, %v126_v15  ;;  %v130_v21 = vld [vmem:[%s2407_s1 + $0x260] sm:$0xff] }
   0x6   :  { %1146 = vmatprep.subr.bf16.mxu0 %v1145_v8  ;;  %v1153_v20 = vpack.c.bf16 %v133_v18, %v131_v17  ;;  %v132_v22 = vld [vmem:[%s2407_s1 + $0x270] sm:$0xff]  ;;  %v135_v23 = vld [vmem:[%s2407_s1 + $0x288] sm:$0xff]  ;;  %v137_v24 = vld [vmem:[%s2407_s1 + $0x298] sm:$0xff] }
   0x7   :  { %v1155_v25 = vpack.c.bf16 %v132_v22, %v130_v21  ;;  %v1157_v26 = vpack.c.bf16 %v137_v24, %v135_v23  ;;  %v134_v27 = vld [vmem:[%s2407_s1 + $0x280] sm:$0xff]  ;;  %v136_v28 = vld [vmem:[%s2407_s1 + $0x290] sm:$0xff]  ;;  %v139_v29 = vld [vmem:[%s2407_s1 + $0x2a8] sm:$0xff] }
   0x8   :  { %v141_v30 = vld [vmem:[%s2407_s1 + $0x2b8] sm:$0xff]  ;;  %v1159_v31 = vpack.c.bf16 %v136_v28, %v134_v27  ;;  %v138_v33 = vld [vmem:[%s2407_s1 + $0x2a0] sm:$0xff]  ;;  %v140_v34 = vld [vmem:[%s2407_s1 + $0x2b0] sm:$0xff] }
   0x9   :  { %1148 = vmatpush1.bf16.msra.mxu0 %v1147_v13  ;;  %v1161_v32 = vpack.c.bf16 %v141_v30, %v139_v29  ;;  %v143_v35 = vld [vmem:[%s2407_s1 + $0x2c8] sm:$0xff]  ;;  %v145_v36 = vld [vmem:[%s2407_s1 + $0x2d8] sm:$0xff]  ;;  %v1163_v37 = vpack.c.bf16 %v140_v34, %v138_v33  ;;  %v142_v39 = vld [vmem:[%s2407_s1 + $0x2c0] sm:$0xff] }
   0xa   :  { %1150 = vmatprep.subr.bf16.mxu0 %v1149_v14  ;;  %v1165_v38 = vpack.c.bf16 %v145_v36, %v143_v35  ;;  %v144_v40 = vld [vmem:[%s2407_s1 + $0x2d0] sm:$0xff]  ;;  %v50_v41 = vld [vmem:[%s2406_s0 + $0x18] sm:$0xff]  ;;  %v147_v42 = vld [vmem:[%s2407_s1 + $0x2e8] sm:$0xff] }
   0xb   :  { %v149_v43 = vld [vmem:[%s2407_s1 + $0x2f8] sm:$0xff]  ;;  %405 = vmatprep.mubr.f32.mxu0 %v50_v41  ;;  %v1167_v44 = vpack.c.bf16 %v144_v40, %v142_v39  ;;  %v146_v45 = vld [vmem:[%s2407_s1 + $0x2e0] sm:$0xff]  ;;  %v148_v46 = vld [vmem:[%s2407_s1 + $0x2f0] sm:$0xff] }
   0xc   :  { %v55_v47 = vld [vmem:[%s2407_s1 + $0x8] sm:$0xff]  ;;  %v1169_v48 = vpack.c.bf16 %v149_v43, %v147_v42  ;;  %v57_v49 = vld [vmem:[%s2407_s1 + $0x18] sm:$0xff]  ;;  %v54_v50 = vld [vmem:[%s2407_s1] sm:$0xff]  ;;  %v1171_v58 = vpack.c.bf16 %v148_v46, %v146_v45 }
   0xd   :  { %1152 = vmatpush1.bf16.msra.mxu0 %v1151_v19  ;;  %v56_v51 = vld [vmem:[%s2407_s1 + $0x10] sm:$0xff]  ;;  %v151_v52 = vld [vmem:[%s2407_s1 + $0x308] sm:$0xff]  ;;  %v153_v53 = vld [vmem:[%s2407_s1 + $0x318] sm:$0xff]  ;;  %v1077_v54 = vpack.c.bf16 %v57_v49, %v55_v47 }
   0xe   :  { %1154 = vmatprep.subr.bf16.mxu0 %v1153_v20  ;;  %v1079_v55 = vpack.c.bf16 %v56_v51, %v54_v50  ;;  %v59_v56 = vld [vmem:[%s2407_s1 + $0x28] sm:$0xff]  ;;  %v61_v57 = vld [vmem:[%s2407_s1 + $0x38] sm:$0xff]  ;;  %v150_v59 = vld [vmem:[%s2407_s1 + $0x300] sm:$0xff]  ;;  %v1173_v63 = vpack.c.bf16 %v153_v53, %v151_v52 }
   0xf   :  { %1078 = vmatprep.subr.bf16.mxu1 %v1077_v54  ;;  %v1081_v60 = vpack.c.bf16 %v61_v57, %v59_v56  ;;  %v58_v61 = vld [vmem:[%s2407_s1 + $0x20] sm:$0xff]  ;;  %v60_v62 = vld [vmem:[%s2407_s1 + $0x30] sm:$0xff]  ;;  %v155_v1 = vld [vmem:[%s2407_s1 + $0x328] sm:$0xff] }
  0x10   :  { %v152_v0 = vld [vmem:[%s2407_s1 + $0x310] sm:$0xff]  ;;  %v157_v2 = vld [vmem:[%s2407_s1 + $0x338] sm:$0xff]  ;;  %1080 = vmatpush1.bf16.msra.mxu1 %v1079_v55  ;;  %v1083_v3 = vpack.c.bf16 %v60_v62, %v58_v61  ;;  %v63_v4 = vld [vmem:[%s2407_s1 + $0x48] sm:$0xff] }
  0x11   :  { %1156 = vmatpush1.bf16.msra.mxu0 %v1155_v25  ;;  %1082 = vmatprep.subr.bf16.mxu1 %v1081_v60  ;;  %v65_v5 = vld [vmem:[%s2407_s1 + $0x58] sm:$0xff]  ;;  %v62_v6 = vld [vmem:[%s2407_s1 + $0x40] sm:$0xff]  ;;  %v64_v8 = vld [vmem:[%s2407_s1 + $0x50] sm:$0xff]  ;;  %v1175_v9 = vpack.c.bf16 %v152_v0, %v150_v59  ;;  %v1177_v12 = vpack.c.bf16 %v157_v2, %v155_v1 }
  0x12   :  { %1158 = vmatprep.subr.bf16.mxu0 %v1157_v26  ;;  %v1085_v7 = vpack.c.bf16 %v65_v5, %v63_v4  ;;  %v154_v10 = vld [vmem:[%s2407_s1 + $0x320] sm:$0xff]  ;;  %v67_v11 = vld [vmem:[%s2407_s1 + $0x68] sm:$0xff]  ;;  %v156_v13 = vld [vmem:[%s2407_s1 + $0x330] sm:$0xff]  ;;  %v1087_v15 = vpack.c.bf16 %v64_v8, %v62_v6 }
  0x13   :  { %v159_v14 = vld [vmem:[%s2407_s1 + $0x348] sm:$0xff]  ;;  %v69_v16 = vld [vmem:[%s2407_s1 + $0x78] sm:$0xff]  ;;  %v66_v19 = vld [vmem:[%s2407_s1 + $0x60] sm:$0xff]  ;;  %v1179_v23 = vpack.c.bf16 %v156_v13, %v154_v10 }
  0x14   :  { %1084 = vmatpush1.bf16.msra.mxu1 %v1083_v3  ;;  %v161_v17 = vld [vmem:[%s2407_s1 + $0x358] sm:$0xff]  ;;  %v1089_v18 = vpack.c.bf16 %v69_v16, %v67_v11  ;;  %v68_v20 = vld [vmem:[%s2407_s1 + $0x70] sm:$0xff]  ;;  %v71_v21 = vld [vmem:[%s2407_s1 + $0x88] sm:$0xff] }
  0x15   :  { %1160 = vmatpush1.bf16.msra.mxu0 %v1159_v31  ;;  %1086 = vmatprep.subr.bf16.mxu1 %v1085_v7  ;;  %v73_v22 = vld [vmem:[%s2407_s1 + $0x98] sm:$0xff]  ;;  %v1181_v24 = vpack.c.bf16 %v161_v17, %v159_v14  ;;  %v158_v25 = vld [vmem:[%s2407_s1 + $0x340] sm:$0xff]  ;;  %v160_v26 = vld [vmem:[%s2407_s1 + $0x350] sm:$0xff]  ;;  %v1091_v28 = vpack.c.bf16 %v68_v20, %v66_v19 }
  0x16   :  { %1162 = vmatprep.subr.bf16.mxu0 %v1161_v32  ;;  %v163_v27 = vld [vmem:[%s2407_s1 + $0x368] sm:$0xff]  ;;  %v165_v29 = vld [vmem:[%s2407_s1 + $0x378] sm:$0xff]  ;;  %v1093_v30 = vpack.c.bf16 %v73_v22, %v71_v21  ;;  %v70_v31 = vld [vmem:[%s2407_s1 + $0x80] sm:$0xff]  ;;  %v1183_v35 = vpack.c.bf16 %v160_v26, %v158_v25 }
  0x17   :  { %v72_v32 = vld [vmem:[%s2407_s1 + $0x90] sm:$0xff]  ;;  %v75_v33 = vld [vmem:[%s2407_s1 + $0xa8] sm:$0xff]  ;;  %v77_v34 = vld [vmem:[%s2407_s1 + $0xb8] sm:$0xff]  ;;  %v1185_v36 = vpack.c.bf16 %v165_v29, %v163_v27 }
  0x18   :  { %1088 = vmatpush1.bf16.msra.mxu1 %v1087_v15  ;;  %v167_v39 = vld [vmem:[%s2407_s1 + $0x388] sm:$0xff]  ;;  %v1095_v40 = vpack.c.bf16 %v72_v32, %v70_v31  ;;  %v169_v41 = vld [vmem:[%s2407_s1 + $0x398] sm:$0xff]  ;;  %v1097_v42 = vpack.c.bf16 %v77_v34, %v75_v33  ;;  %v74_v43 = vld [vmem:[%s2407_s1 + $0xa0] sm:$0xff] }
  0x19   :  { %1164 = vmatpush1.bf16.msra.mxu0 %v1163_v37  ;;  %1090 = vmatprep.subr.bf16.mxu1 %v1089_v18  ;;  %v162_v37 = vld [vmem:[%s2407_s1 + $0x360] sm:$0xff]  ;;  %v79_v45 = vld [vmem:[%s2407_s1 + $0xc8] sm:$0xff]  ;;  %v81_v46 = vld [vmem:[%s2407_s1 + $0xd8] sm:$0xff] }
  0x1a   :  { %1166 = vmatprep.subr.bf16.mxu0 %v1165_v38  ;;  %v164_v38 = vld [vmem:[%s2407_s1 + $0x370] sm:$0xff]  ;;  %v166_v49 = vld [vmem:[%s2407_s1 + $0x380] sm:$0xff]  ;;  %v171_v51 = vld [vmem:[%s2407_s1 + $0x3a8] sm:$0xff]  ;;  %v1101_v54 = vpack.c.bf16 %v81_v46, %v79_v45 }
  0x1b   :  { %v1187_v47 = vpack.c.bf16 %v164_v38, %v162_v37  ;;  %v168_v50 = vld [vmem:[%s2407_s1 + $0x390] sm:$0xff]  ;;  %v173_v53 = vld [vmem:[%s2407_s1 + $0x3b8] sm:$0xff]  ;;  %v78_v55 = vld [vmem:[%s2407_s1 + $0xc0] sm:$0xff] }
  0x1c   :  { %1092 = vmatpush1.bf16.msra.mxu1 %v1091_v28  ;;  %v80_v56 = vld [vmem:[%s2407_s1 + $0xd0] sm:$0xff]  ;;  %v83_v57 = vld [vmem:[%s2407_s1 + $0xe8] sm:$0xff]  ;;  %v1191_v59 = vpack.c.bf16 %v168_v50, %v166_v49  ;;  %v1193_v60 = vpack.c.bf16 %v173_v53, %v171_v51  ;;  %v170_v61 = vld [vmem:[%s2407_s1 + $0x3a0] sm:$0xff] }
  0x1d   :  { %1168 = vmatpush1.bf16.msra.mxu0 %v1167_v44  ;;  %1094 = vmatprep.subr.bf16.mxu1 %v1093_v30  ;;  %v76_v44 = vld [vmem:[%s2407_s1 + $0xb0] sm:$0xff]  ;;  %v1103_v0 = vpack.c.bf16 %v80_v56, %v78_v55  ;;  %v177_v1 = vld [vmem:[%s2407_s1 + $0x3d8] sm:$0xff]  ;;  %v82_v3 = vld [vmem:[%s2407_s1 + $0xe0] sm:$0xff] }
  0x1e   :  { %1170 = vmatprep.subr.bf16.mxu0 %v1169_v48  ;;  %v1189_v48 = vpack.c.bf16 %v169_v41, %v167_v39  ;;  %v1099_v52 = vpack.c.bf16 %v76_v44, %v74_v43  ;;  %v172_v62 = vld [vmem:[%s2407_s1 + $0x3b0] sm:$0xff]  ;;  %v87_v5 = vld [vmem:[%s2407_s1 + $0x108] sm:$0xff]  ;;  %v89_v6 = vld [vmem:[%s2407_s1 + $0x118] sm:$0xff] }
  0x1f   :  { %v84_v4 = vld [vmem:[%s2407_s1 + $0xf0] sm:$0xff]  ;;  %v1195_v7 = vpack.c.bf16 %v172_v62, %v170_v61  ;;  %v179_v11 = vld [vmem:[%s2407_s1 + $0x3e8] sm:$0xff]  ;;  %v181_v13 = vld [vmem:[%s2407_s1 + $0x3f8] sm:$0xff]  ;;  %v1109_v14 = vpack.c.bf16 %v89_v6, %v87_v5 }
  0x20   :  { %1096 = vmatpush1.bf16.msra.mxu1 %v1095_v40  ;;  %v176_v10 = vld [vmem:[%s2407_s1 + $0x3d0] sm:$0xff]  ;;  %v86_v15 = vld [vmem:[%s2407_s1 + $0x100] sm:$0xff]  ;;  %v91_v17 = vld [vmem:[%s2407_s1 + $0x128] sm:$0xff]  ;;  %v1201_v20 = vpack.c.bf16 %v181_v13, %v179_v11 }
  0x21   :  { %1172 = vmatpush1.bf16.msra.mxu0 %v1171_v58  ;;  %1098 = vmatprep.subr.bf16.mxu1 %v1097_v42  ;;  %v85_v58 = vld [vmem:[%s2407_s1 + $0xf8] sm:$0xff]  ;;  %v88_v16 = vld [vmem:[%s2407_s1 + $0x110] sm:$0xff]  ;;  %v178_v21 = vld [vmem:[%s2407_s1 + $0x3e0] sm:$0xff] }
  0x22   :  { %1174 = vmatprep.subr.bf16.mxu0 %v1173_v63  ;;  %v175_v63 = vld [vmem:[%s2407_s1 + $0x3c8] sm:$0xff]  ;;  %v1105_v2 = vpack.c.bf16 %v85_v58, %v83_v57  ;;  %v93_v18 = vld [vmem:[%s2407_s1 + $0x138] sm:$0xff]  ;;  %v180_v22 = vld [vmem:[%s2407_s1 + $0x3f0] sm:$0xff] }
  0x23   :  { %v1197_v8 = vpack.c.bf16 %v177_v1, %v175_v63  ;;  %v185_v25 = vld [vmem:[%s2407_s1 + $0x418] sm:$0xff]  ;;  %v1113_v26 = vpack.c.bf16 %v93_v18, %v91_v17  ;;  %v90_v27 = vld [vmem:[%s2407_s1 + $0x120] sm:$0xff]  ;;  %v92_v28 = vld [vmem:[%s2407_s1 + $0x130] sm:$0xff]  ;;  %v1203_v31 = vpack.c.bf16 %v180_v22, %v178_v21 }
  0x24   :  { %1100 = vmatpush1.bf16.msra.mxu1 %v1099_v52  ;;  %v95_v29 = vld [vmem:[%s2407_s1 + $0x148] sm:$0xff]  ;;  %v97_v30 = vld [vmem:[%s2407_s1 + $0x158] sm:$0xff]  ;;  %v182_v33 = vld [vmem:[%s2407_s1 + $0x400] sm:$0xff] }
  0x25   :  { %1176 = vmatpush1.bf16.msra.mxu0 %v1175_v9  ;;  %1102 = vmatprep.subr.bf16.mxu1 %v1101_v54  ;;  %v174_v9 = vld [vmem:[%s2407_s1 + $0x3c0] sm:$0xff]  ;;  %v184_v34 = vld [vmem:[%s2407_s1 + $0x410] sm:$0xff]  ;;  %v189_v37 = vld [vmem:[%s2407_s1 + $0x438] sm:$0xff]  ;;  %v1117_v38 = vpack.c.bf16 %v97_v30, %v95_v29 }
  0x26   :  { %1178 = vmatprep.subr.bf16.mxu0 %v1177_v12  ;;  %v1107_v12 = vpack.c.bf16 %v84_v4, %v82_v3  ;;  %v1199_v19 = vpack.c.bf16 %v176_v10, %v174_v9  ;;  %v94_v39 = vld [vmem:[%s2407_s1 + $0x140] sm:$0xff]  ;;  %v96_v40 = vld [vmem:[%s2407_s1 + $0x150] sm:$0xff]  ;;  %v99_v41 = vld [vmem:[%s2407_s1 + $0x168] sm:$0xff]  ;;  %v1207_v44 = vpack.c.bf16 %v184_v34, %v182_v33 }
  0x27   :  { %v101_v42 = vld [vmem:[%s2407_s1 + $0x178] sm:$0xff]  ;;  %v49_v43 = vld [vmem:[%s2406_s0 + $0x10] sm:$0xff]  ;;  %v186_v45 = vld [vmem:[%s2407_s1 + $0x420] sm:$0xff]  ;;  %v1119_v49 = vpack.c.bf16 %v96_v40, %v94_v39 }
  0x28   :  { %1104 = vmatpush1.bf16.msra.mxu1 %v1103_v0  ;;  %v52_v50 = vld [vmem:[%s2406_s0 + $0x28] sm:$0xff]  ;;  %v193_v51 = vld [vmem:[%s2407_s1 + $0x458] sm:$0xff]  ;;  %v1121_v52 = vpack.c.bf16 %v101_v42, %v99_v41  ;;  %v98_v53 = vld [vmem:[%s2407_s1 + $0x160] sm:$0xff] }
  0x29   :  { %1180 = vmatpush1.bf16.msra.mxu0 %v1179_v23  ;;  %1106 = vmatprep.subr.bf16.mxu1 %v1105_v2  ;;  %v183_v23 = vld [vmem:[%s2407_s1 + $0x408] sm:$0xff]  ;;  %v100_v54 = vld [vmem:[%s2407_s1 + $0x170] sm:$0xff]  ;;  %v105_v56 = vld [vmem:[%s2407_s1 + $0x198] sm:$0xff] }
  0x2a   :  { %1182 = vmatprep.subr.bf16.mxu0 %v1181_v24  ;;  %v1111_v24 = vpack.c.bf16 %v88_v16, %v86_v15  ;;  %v1205_v32 = vpack.c.bf16 %v185_v25, %v183_v23  ;;  %v103_v55 = vld [vmem:[%s2407_s1 + $0x188] sm:$0xff]  ;;  %v192_v61 = vld [vmem:[%s2407_s1 + $0x450] sm:$0xff]  ;;  %v197_v63 = vld [vmem:[%s2407_s1 + $0x478] sm:$0xff]  ;;  %v1123_v0 = vpack.c.bf16 %v100_v54, %v98_v53 }
  0x2b   :  { %v48_v57 = vld [vmem:[%s2406_s0 + $0x8] sm:$0xff]  ;;  %v1125_v1 = vpack.c.bf16 %v105_v56, %v103_v55  ;;  %v102_v2 = vld [vmem:[%s2407_s1 + $0x180] sm:$0xff]  ;;  %v104_v3 = vld [vmem:[%s2407_s1 + $0x190] sm:$0xff] }
  0x2c   :  { %1108 = vmatpush1.bf16.msra.mxu1 %v1107_v12  ;;  %v195_v62 = vld [vmem:[%s2407_s1 + $0x468] sm:$0xff]  ;;  %334 = vmatprep.mubr.f32.mxu1 %v48_v57 }
  0x2d   :  { %1184 = vmatpush1.bf16.msra.mxu0 %v1183_v35  ;;  %1110 = vmatprep.subr.bf16.mxu1 %v1109_v14  ;;  %v187_v35 = vld [vmem:[%s2407_s1 + $0x428] sm:$0xff] }
  0x2e   :  { %1186 = vmatprep.subr.bf16.mxu0 %v1185_v36  ;;  %v1115_v36 = vpack.c.bf16 %v92_v28, %v90_v27  ;;  %v1209_v46 = vpack.c.bf16 %v189_v37, %v187_v35 }
  0x30   :  { %1112 = vmatpush1.bf16.msra.mxu1 %v1111_v24 }
  0x31   :  { %1188 = vmatpush1.bf16.msra.mxu0 %v1187_v47  ;;  %1114 = vmatprep.subr.bf16.mxu1 %v1113_v26  ;;  %v188_v47 = vld [vmem:[%s2407_s1 + $0x430] sm:$0xff] }
  0x32   :  { %1190 = vmatprep.subr.bf16.mxu0 %v1189_v48  ;;  %v191_v48 = vld [vmem:[%s2407_s1 + $0x448] sm:$0xff]  ;;  %v1211_v58 = vpack.c.bf16 %v188_v47, %v186_v45 }
  0x34   :  { %1116 = vmatpush1.bf16.msra.mxu1 %v1115_v36 }
  0x35   :  { %1192 = vmatpush1.bf16.msra.mxu0 %v1191_v59  ;;  %1118 = vmatprep.subr.bf16.mxu1 %v1117_v38  ;;  %v190_v59 = vld [vmem:[%s2407_s1 + $0x440] sm:$0xff] }
  0x36   :  { %1194 = vmatprep.subr.bf16.mxu0 %v1193_v60  ;;  %v1213_v60 = vpack.c.bf16 %v193_v51, %v191_v48 }
  0x38   :  { %1120 = vmatpush1.bf16.msra.mxu1 %v1119_v49 }
  0x39   :  { %1196 = vmatpush1.bf16.msra.mxu0 %v1195_v7  ;;  %1122 = vmatprep.subr.bf16.mxu1 %v1121_v52 }
  0x3a   :  { %1198 = vmatprep.subr.bf16.mxu0 %v1197_v8 }
  0x3d   :  { %1200 = vmatpush1.bf16.msra.mxu0 %v1199_v19 }
  0x3e   :  { %1202 = vmatprep.subr.bf16.mxu0 %v1201_v20 }
  0x41   :  { %1204 = vmatpush1.bf16.msra.mxu0 %v1203_v31 }
  0x42   :  { %1206 = vmatprep.subr.bf16.mxu0 %v1205_v32 }
  0x44   :  { %406 = vmatmul.mubr.f32.vlgmr.msra.gmra.mrb[0].mxu0 %v49_v43 }
  0x45   :  { %1208 = vmatpush1.bf16.msra.mxu0 %v1207_v44  ;;  %476 = vmatprep.mubr.f32.mxu0 %v52_v50 }
  0x46   :  { %1210 = vmatprep.subr.bf16.mxu0 %v1209_v46 }
  0x47   :  { %20 = vsyncpa [#allocation3], 0  ;;  %v107_v4 = vld [vmem:[%s2407_s1 + $0x1a8] sm:$0xff]  ;;  %v109_v5 = vld [vmem:[%s2407_s1 + $0x1b8] sm:$0xff]  ;;  %v1215_v6 = vpack.c.bf16 %v192_v61, %v190_v59  ;;  %v1217_v7 = vpack.c.bf16 %v197_v63, %v195_v62  ;;  %1124 = vmatpush1.bf16.msra.mxu1 %v1123_v0  ;;  %v1127_v11 = vpack.c.bf16 %v104_v3, %v102_v2  ;;  %v1417_v57 = vmov 0.0|0.0  }
  0x48   :  { %v194_v8 = vld [vmem:[%s2407_s1 + $0x460] sm:$0xff]  ;;  %v196_v9 = vld [vmem:[%s2407_s1 + $0x470] sm:$0xff]  ;;  %v199_v10 = vld [vmem:[%s2407_s1 + $0x488] sm:$0xff]  ;;  %1126 = vmatprep.subr.bf16.mxu1 %v1125_v1  ;;  %v1129_v13 = vpack.c.bf16 %v109_v5, %v107_v4  ;;  %vm266_vm0 = vcmask 261120   ;;  %vm562_vm1 = vcmask 588800   ;;  %vm802_vm2 = vcmask 1043456  }
  0x49   :  { %1212 = vmatpush1.bf16.msra.mxu0 %v1211_v58  ;;  %v201_v12 = vld [vmem:[%s2407_s1 + $0x498] sm:$0xff]  ;;  %v106_v14 = vld [vmem:[%s2407_s1 + $0x1a0] sm:$0xff]  ;;  %v108_v15 = vld [vmem:[%s2407_s1 + $0x1b0] sm:$0xff]  ;;  %v1219_v18 = vpack.c.bf16 %v196_v9, %v194_v8  ;;  %vm1419_vm3 = vmmov 0   ;;  %vm739_vm4 = vcmask 818176   ;;  %vm876_vm5 = vcmask 80896  }
  0x4a   :  { %1214 = vmatprep.subr.bf16.mxu0 %v1213_v60  ;;  %v111_v16 = vld [vmem:[%s2407_s1 + $0x1c8] sm:$0xff]  ;;  %v113_v17 = vld [vmem:[%s2407_s1 + $0x1d8] sm:$0xff]  ;;  %v1221_v19 = vpack.c.bf16 %v201_v12, %v199_v10  ;;  %v198_v20 = vld [vmem:[%s2407_s1 + $0x480] sm:$0xff]  ;;  %v1131_v23 = vpack.c.bf16 %v108_v15, %v106_v14  ;;  %vm992_vm6 = vcmask 15360  }
  0x4b   :  { %v200_v21 = vld [vmem:[%s2407_s1 + $0x490] sm:$0xff]  ;;  %v203_v22 = vld [vmem:[%s2407_s1 + $0x4a8] sm:$0xff]  ;;  %1128 = vmatpush1.bf16.msra.mxu1 %v1127_v11  ;;  %v205_v24 = vld [vmem:[%s2407_s1 + $0x4b8] sm:$0xff]  ;;  %v1133_v25 = vpack.c.bf16 %v113_v17, %v111_v16 }
  0x4c   :  { %1130 = vmatprep.subr.bf16.mxu1 %v1129_v13  ;;  %v110_v26 = vld [vmem:[%s2407_s1 + $0x1c0] sm:$0xff]  ;;  %v112_v27 = vld [vmem:[%s2407_s1 + $0x1d0] sm:$0xff]  ;;  %v115_v28 = vld [vmem:[%s2407_s1 + $0x1e8] sm:$0xff]  ;;  %v1223_v30 = vpack.c.bf16 %v200_v21, %v198_v20  ;;  %v1225_v31 = vpack.c.bf16 %v205_v24, %v203_v22 }
  0x4d   :  { %1216 = vmatpush1.bf16.msra.mxu0 %v1215_v6  ;;  %v117_v29 = vld [vmem:[%s2407_s1 + $0x1f8] sm:$0xff]  ;;  %v202_v32 = vld [vmem:[%s2407_s1 + $0x4a0] sm:$0xff]  ;;  %v204_v33 = vld [vmem:[%s2407_s1 + $0x4b0] sm:$0xff]  ;;  %v1135_v35 = vpack.c.bf16 %v112_v27, %v110_v26 }
  0x4e   :  { %1218 = vmatprep.subr.bf16.mxu0 %v1217_v7  ;;  %v207_v34 = vld [vmem:[%s2407_s1 + $0x4c8] sm:$0xff]  ;;  %v209_v36 = vld [vmem:[%s2407_s1 + $0x4d8] sm:$0xff]  ;;  %v1137_v37 = vpack.c.bf16 %v117_v29, %v115_v28  ;;  %v114_v38 = vld [vmem:[%s2407_s1 + $0x1e0] sm:$0xff]  ;;  %v1227_v40 = vpack.c.bf16 %v204_v33, %v202_v32 }
  0x4f   :  { %1132 = vmatpush1.bf16.msra.mxu1 %v1131_v23  ;;  %v116_v39 = vld [vmem:[%s2407_s1 + $0x1f0] sm:$0xff]  ;;  %v1229_v41 = vpack.c.bf16 %v209_v36, %v207_v34  ;;  %v206_v42 = vld [vmem:[%s2407_s1 + $0x4c0] sm:$0xff]  ;;  %v211_v44 = vld [vmem:[%s2407_s1 + $0x4e8] sm:$0xff] }
  0x50   :  { %1134 = vmatprep.subr.bf16.mxu1 %v1133_v25  ;;  %v208_v43 = vld [vmem:[%s2407_s1 + $0x4d0] sm:$0xff]  ;;  %v1139_v45 = vpack.c.bf16 %v116_v39, %v114_v38  ;;  %v213_v46 = vld [vmem:[%s2407_s1 + $0x4f8] sm:$0xff]  ;;  %v632_v47 = vld [vmem:[%s2411_s5] sm:$0xff] }
  0x51   :  { %1220 = vmatpush1.bf16.msra.mxu0 %v1219_v18  ;;  %v633_v48 = vld [vmem:[%s2411_s5 + $0x8] sm:$0xff]  ;;  %v1231_v49 = vpack.c.bf16 %v208_v43, %v206_v42  ;;  %v1233_v50 = vpack.c.bf16 %v213_v46, %v211_v44  ;;  %v210_v51 = vld [vmem:[%s2407_s1 + $0x4e0] sm:$0xff]  ;;  %v212_v52 = vld [vmem:[%s2407_s1 + $0x4f0] sm:$0xff] }
  0x52   :  { %1222 = vmatprep.subr.bf16.mxu0 %v1221_v19  ;;  %v47_v53 = vld [vmem:[%s2406_s0] sm:$0xff]  ;;  %v1278_v54 = vpack.c.bf16 %v633_v48, %v632_v47  ;;  %v215_v55 = vld [vmem:[%s2407_s1 + $0x508] sm:$0xff]  ;;  %v217_v56 = vld [vmem:[%s2407_s1 + $0x518] sm:$0xff]  ;;  %v1235_v58 = vpack.c.bf16 %v212_v52, %v210_v51 }
  0x53   :  { %1136 = vmatpush1.bf16.msra.mxu1 %v1135_v35  ;;  %v1237_v59 = vpack.c.bf16 %v217_v56, %v215_v55  ;;  %v214_v60 = vld [vmem:[%s2407_s1 + $0x500] sm:$0xff]  ;;  %v216_v61 = vld [vmem:[%s2407_s1 + $0x510] sm:$0xff]  ;;  %v219_v62 = vld [vmem:[%s2407_s1 + $0x528] sm:$0xff] }
  0x54   :  { %1138 = vmatprep.subr.bf16.mxu1 %v1137_v37  ;;  %v221_v63 = vld [vmem:[%s2407_s1 + $0x538] sm:$0xff]  ;;  %v1239_v0 = vpack.c.bf16 %v216_v61, %v214_v60  ;;  %v218_v2 = vld [vmem:[%s2407_s1 + $0x520] sm:$0xff]  ;;  %v220_v3 = vld [vmem:[%s2407_s1 + $0x530] sm:$0xff] }
  0x55   :  { %1224 = vmatpush1.bf16.msra.mxu0 %v1223_v30  ;;  %v1241_v1 = vpack.c.bf16 %v221_v63, %v219_v62  ;;  %v223_v4 = vld [vmem:[%s2407_s1 + $0x548] sm:$0xff]  ;;  %v225_v5 = vld [vmem:[%s2407_s1 + $0x558] sm:$0xff]  ;;  %v1243_v6 = vpack.c.bf16 %v220_v3, %v218_v2  ;;  %v222_v8 = vld [vmem:[%s2407_s1 + $0x540] sm:$0xff] }
  0x56   :  { %1226 = vmatprep.subr.bf16.mxu0 %v1225_v31  ;;  %v1245_v7 = vpack.c.bf16 %v225_v5, %v223_v4  ;;  %v224_v9 = vld [vmem:[%s2407_s1 + $0x550] sm:$0xff]  ;;  %v227_v10 = vld [vmem:[%s2407_s1 + $0x568] sm:$0xff]  ;;  %v229_v11 = vld [vmem:[%s2407_s1 + $0x578] sm:$0xff] }
  0x57   :  { %1140 = vmatpush1.bf16.msra.mxu1 %v1139_v45  ;;  %v1247_v12 = vpack.c.bf16 %v224_v9, %v222_v8  ;;  %v1249_v13 = vpack.c.bf16 %v229_v11, %v227_v10  ;;  %v226_v14 = vld [vmem:[%s2407_s1 + $0x560] sm:$0xff]  ;;  %v228_v15 = vld [vmem:[%s2407_s1 + $0x570] sm:$0xff]  ;;  %v231_v16 = vld [vmem:[%s2407_s1 + $0x588] sm:$0xff] }
  0x58   :  { %1277 = vmatprep.subr.bf16.mxu1 %v1417_v57  ;;  %v233_v17 = vld [vmem:[%s2407_s1 + $0x598] sm:$0xff]  ;;  %v1251_v18 = vpack.c.bf16 %v228_v15, %v226_v14  ;;  %v230_v20 = vld [vmem:[%s2407_s1 + $0x580] sm:$0xff]  ;;  %v232_v21 = vld [vmem:[%s2407_s1 + $0x590] sm:$0xff] }
  0x59   :  { %1228 = vmatpush1.bf16.msra.mxu0 %v1227_v40  ;;  %v1253_v19 = vpack.c.bf16 %v233_v17, %v231_v16  ;;  %v235_v22 = vld [vmem:[%s2407_s1 + $0x5a8] sm:$0xff]  ;;  %v237_v23 = vld [vmem:[%s2407_s1 + $0x5b8] sm:$0xff]  ;;  %v1255_v24 = vpack.c.bf16 %v232_v21, %v230_v20  ;;  %v234_v26 = vld [vmem:[%s2407_s1 + $0x5a0] sm:$0xff] }
  0x5a   :  { %1230 = vmatprep.subr.bf16.mxu0 %v1229_v41  ;;  %335 = vmatmul.mubr.f32.vlgmr.msra.gmra.mrb[0].mxu1 %v47_v53  ;;  %v1257_v25 = vpack.c.bf16 %v237_v23, %v235_v22  ;;  %v236_v27 = vld [vmem:[%s2407_s1 + $0x5b0] sm:$0xff]  ;;  %v239_v28 = vld [vmem:[%s2407_s1 + $0x5c8] sm:$0xff]  ;;  %v241_v29 = vld [vmem:[%s2407_s1 + $0x5d8] sm:$0xff] }
  0x5b   :  { %1279 = vmatpush1.bf16.msra.mxu1 %v1278_v54  ;;  %v1259_v30 = vpack.c.bf16 %v236_v27, %v234_v26  ;;  %v1261_v31 = vpack.c.bf16 %v241_v29, %v239_v28  ;;  %v238_v32 = vld [vmem:[%s2407_s1 + $0x5c0] sm:$0xff]  ;;  %v240_v33 = vld [vmem:[%s2407_s1 + $0x5d0] sm:$0xff]  ;;  %v243_v34 = vld [vmem:[%s2407_s1 + $0x5e8] sm:$0xff]  ;;  %v1418_v54 = vmov 0.0   ;;  %v256_v29 = vlaneseq }
  0x5c   :  { %1280 = vmatprep.subr.bf16.mxu1 %v1417_v57  ;;  %v245_v35 = vld [vmem:[%s2407_s1 + $0x5f8] sm:$0xff]  ;;  %v1263_v36 = vpack.c.bf16 %v240_v33, %v238_v32  ;;  %v242_v38 = vld [vmem:[%s2407_s1 + $0x5e0] sm:$0xff]  ;;  %v244_v39 = vld [vmem:[%s2407_s1 + $0x5f0] sm:$0xff] }
  0x5d   :  { %1232 = vmatpush1.bf16.msra.mxu0 %v1231_v49  ;;  %v1265_v37 = vpack.c.bf16 %v245_v35, %v243_v34  ;;  %v247_v40 = vld [vmem:[%s2407_s1 + $0x608] sm:$0xff]  ;;  %v249_v41 = vld [vmem:[%s2407_s1 + $0x618] sm:$0xff]  ;;  %v1267_v42 = vpack.c.bf16 %v244_v39, %v242_v38  ;;  %v246_v44 = vld [vmem:[%s2407_s1 + $0x600] sm:$0xff] }
  0x5e   :  { %1234 = vmatprep.subr.bf16.mxu0 %v1233_v50  ;;  %v1269_v43 = vpack.c.bf16 %v249_v41, %v247_v40  ;;  %v248_v45 = vld [vmem:[%s2407_s1 + $0x610] sm:$0xff]  ;;  %v251_v46 = vld [vmem:[%s2407_s1 + $0x628] sm:$0xff]  ;;  %v253_v47 = vld [vmem:[%s2407_s1 + $0x638] sm:$0xff] }
  0x5f   :  { %v51_v48 = vld [vmem:[%s2406_s0 + $0x20] sm:$0xff]  ;;  %v1271_v49 = vpack.c.bf16 %v248_v45, %v246_v44  ;;  %v1273_v50 = vpack.c.bf16 %v253_v47, %v251_v46  ;;  %v252_v52 = vld [vmem:[%s2407_s1 + $0x630] sm:$0xff]  ;;  %v637_v61 = vld [vmem:[%s2411_s5 + $0x28] sm:$0xff] }
  0x60   :  { %v250_v51 = vld [vmem:[%s2407_s1 + $0x620] sm:$0xff]  ;;  %v53_v55 = vld [vmem:[%s2406_s0 + $0x30] sm:$0xff]  ;;  %v641_v3 = vld [vmem:[%s2411_s5 + $0x48] sm:$0xff] }
  0x61   :  { %1236 = vmatpush1.bf16.msra.mxu0 %v1235_v58  ;;  %v1275_v53 = vpack.c.bf16 %v252_v52, %v250_v51  ;;  %v634_v56 = vld [vmem:[%s2411_s5 + $0x10] sm:$0xff]  ;;  %v635_v58 = vld [vmem:[%s2411_s5 + $0x18] sm:$0xff]  ;;  %v636_v60 = vld [vmem:[%s2411_s5 + $0x20] sm:$0xff] }
  0x62   :  { %1238 = vmatprep.subr.bf16.mxu0 %v1237_v59  ;;  %v1281_v59 = vpack.c.bf16 %v635_v58, %v634_v56  ;;  %v1284_v62 = vpack.c.bf16 %v637_v61, %v636_v60  ;;  %v638_v63 = vld [vmem:[%s2411_s5 + $0x30] sm:$0xff]  ;;  %v640_v2 = vld [vmem:[%s2411_s5 + $0x40] sm:$0xff]  ;;  %v645_v9 = vld [vmem:[%s2411_s5 + $0x68] sm:$0xff] }
  0x63   :  { %v1290_v4 = vpack.c.bf16 %v641_v3, %v640_v2  ;;  %v642_v5 = vld [vmem:[%s2411_s5 + $0x50] sm:$0xff]  ;;  %v644_v8 = vld [vmem:[%s2411_s5 + $0x60] sm:$0xff]  ;;  %v649_v15 = vld [vmem:[%s2411_s5 + $0x88] sm:$0xff] }
  0x64   :  { %1282 = vmatpush1.bf16.msra.mxu1 %v1281_v59  ;;  %v1296_v10 = vpack.c.bf16 %v645_v9, %v644_v8  ;;  %v646_v11 = vld [vmem:[%s2411_s5 + $0x70] sm:$0xff]  ;;  %v648_v14 = vld [vmem:[%s2411_s5 + $0x80] sm:$0xff]  ;;  %v653_v21 = vld [vmem:[%s2411_s5 + $0xa8] sm:$0xff] }
  0x65   :  { %1240 = vmatpush1.bf16.msra.mxu0 %v1239_v0  ;;  %1283 = vmatprep.subr.bf16.mxu1 %v1417_v57  ;;  %v639_v0 = vld [vmem:[%s2411_s5 + $0x38] sm:$0xff]  ;;  %v1302_v16 = vpack.c.bf16 %v649_v15, %v648_v14  ;;  %v650_v17 = vld [vmem:[%s2411_s5 + $0x90] sm:$0xff]  ;;  %v652_v20 = vld [vmem:[%s2411_s5 + $0xa0] sm:$0xff] }
  0x66   :  { %1242 = vmatprep.subr.bf16.mxu0 %v1241_v1  ;;  %v1287_v1 = vpack.c.bf16 %v639_v0, %v638_v63  ;;  %v1308_v22 = vpack.c.bf16 %v653_v21, %v652_v20  ;;  %v654_v23 = vld [vmem:[%s2411_s5 + $0xb0] sm:$0xff]  ;;  %v656_v26 = vld [vmem:[%s2411_s5 + $0xc0] sm:$0xff] }
  0x67   :  { %v254_v32 = vld [vmem:[%s2408_s2] sm:$0x3] }
  0x68   :  { %1285 = vmatpush1.bf16.msra.mxu1 %v1284_v62  ;;  %v554_v20 = vld [vmem:[%s2409_s3] sm:$0x3] }
  0x69   :  { %1244 = vmatpush1.bf16.msra.mxu0 %v1243_v6  ;;  %1286 = vmatprep.subr.bf16.mxu1 %v1417_v57  ;;  %v643_v6 = vld [vmem:[%s2411_s5 + $0x58] sm:$0xff] }
  0x6a   :  { %1246 = vmatprep.subr.bf16.mxu0 %v1245_v7  ;;  %v1293_v7 = vpack.c.bf16 %v643_v6, %v642_v5 }
  0x6c   :  { %1288 = vmatpush1.bf16.msra.mxu1 %v1287_v1 }
  0x6d   :  { %1248 = vmatpush1.bf16.msra.mxu0 %v1247_v12  ;;  %1289 = vmatprep.subr.bf16.mxu1 %v1417_v57  ;;  %v647_v12 = vld [vmem:[%s2411_s5 + $0x78] sm:$0xff] }
  0x6e   :  { %1250 = vmatprep.subr.bf16.mxu0 %v1249_v13  ;;  %v1299_v13 = vpack.c.bf16 %v647_v12, %v646_v11 }
  0x70   :  { %1291 = vmatpush1.bf16.msra.mxu1 %v1290_v4 }
  0x71   :  { %1252 = vmatpush1.bf16.msra.mxu0 %v1251_v18  ;;  %1292 = vmatprep.subr.bf16.mxu1 %v1417_v57  ;;  %v651_v18 = vld [vmem:[%s2411_s5 + $0x98] sm:$0xff] }
  0x72   :  { %1254 = vmatprep.subr.bf16.mxu0 %v1253_v19  ;;  %v1305_v19 = vpack.c.bf16 %v651_v18, %v650_v17 }
  0x74   :  { %1294 = vmatpush1.bf16.msra.mxu1 %v1293_v7 }
  0x75   :  { %1256 = vmatpush1.bf16.msra.mxu0 %v1255_v24  ;;  %1295 = vmatprep.subr.bf16.mxu1 %v1417_v57  ;;  %v655_v24 = vld [vmem:[%s2411_s5 + $0xb8] sm:$0xff] }
  0x76   :  { %1258 = vmatprep.subr.bf16.mxu0 %v1257_v25  ;;  %v1311_v25 = vpack.c.bf16 %v655_v24, %v654_v23  ;;  %v555_v24 = vld [vmem:[%s2410_s4] sm:$0x3] }
  0x78   :  { %1297 = vmatpush1.bf16.msra.mxu1 %v1296_v10 }
  0x79   :  { %1260 = vmatpush1.bf16.msra.mxu0 %v1259_v30  ;;  %1298 = vmatprep.subr.bf16.mxu1 %v1417_v57  ;;  %v257_v30 = vshrl.u32 %v256_v29, 7 }
  0x7a   :  { %1262 = vmatprep.subr.bf16.mxu0 %v1261_v31 }
  0x7b   :  { %v2208_v31 = vsub.s32 0, %v257_v30  ;;  %v2213_v33 = vsub.s32 1, %v257_v30 }
  0x7c   :  { %1300 = vmatpush1.bf16.msra.mxu1 %v1299_v13 }
  0x7d   :  { %1264 = vmatpush1.bf16.msra.mxu0 %v1263_v36  ;;  %1301 = vmatprep.subr.bf16.mxu1 %v1417_v57  ;;  %v259_v34 = vrot.slane %v254_v32, %v2208_v31  ;;  %v263_v35 = vrot.slane %v254_v32, %v2213_v33  ;;  %v608_v21 = vrot.slane %v554_v20, %v2208_v31 }
  0x7e   :  { %1266 = vmatprep.subr.bf16.mxu0 %v1265_v37  ;;  %v621_v30 = vrot.slane %v555_v24, %v2208_v31  ;;  %v892_v31 = vld [vmem:[%s2417_s11 + $0x10] sm:$0xff] }
  0x80   :  { %1303 = vmatpush1.bf16.msra.mxu1 %v1302_v16 }
  0x81   :  { %1268 = vmatpush1.bf16.msra.mxu0 %v1267_v42  ;;  %1304 = vmatprep.subr.bf16.mxu1 %v1417_v57 }
  0x82   :  { %1270 = vmatprep.subr.bf16.mxu0 %v1269_v43 }
  0x84   :  { %477 = vmatmul.mubr.f32.vlgmr.msra.gmra.mrb[0].mxu0 %v51_v48  ;;  %1306 = vmatpush1.bf16.msra.mxu1 %v1305_v19 }
  0x85   :  { %1272 = vmatpush1.bf16.msra.mxu0 %v1271_v49  ;;  %547 = vmatprep.mubr.f32.mxu0 %v1418_v54 }
  0x86   :  { %1274 = vmatprep.subr.bf16.mxu0 %v1273_v50  ;;  %1307 = vmatprep.subr.bf16.mxu1 %v1417_v57 }
  0x88   :  { %1309 = vmatpush1.bf16.msra.mxu1 %v1308_v22 }
  0x89   :  { %1276 = vmatpush1.bf16.msra.mxu0 %v1275_v53  ;;  %1310 = vmatprep.subr.bf16.mxu1 %v1417_v57 }
  0x8a   :  { %1313 = vmatprep.subr.bf16.mxu0 %v1417_v57 }
  0x8c   :  { %1024 = vmatmul.mubr.msk.f32.vlgmr.msra.gmra.mrb[0].mxu0 %vm266_vm0, %v53_v55  ;;  %1312 = vmatpush1.bf16.msra.mxu1 %v1311_v25 }
  0x8d   :  { %715 = vmatprep.subr.mxu1 %v1418_v54  ;;  %1074 = vmatprep.mubr.msk.f32.mxu0 %vm1419_vm3, %v1418_v54 }
  0x90   :  { %716 = vmatpush1.msra.mxu1 %v656_v26  ;;  %v612_v26 = vrot.slane %v554_v20, %v2213_v33  ;;  %v784_v20 = vld [vmem:[%s2415_s9 + $0x28] sm:$0xff] }
  0x91   :  { %1331 = vmatprep.subr.bf16.mxu1 %v1417_v57 }
 0x12d   :  { %v336_v27 = vpop.f32.mrb[0].mxu1 }
 0x12e   :  { %v338_v28 = vpop.f32.mrb[1].mxu1  ;;  %v337_v36 = vadd.f32 %v336_v27, %v259_v34  ;;  %v625_v34 = vrot.slane %v555_v24, %v2213_v33  ;;  %v893_v33 = vld [vmem:[%s2417_s11 + $0x18] sm:$0xff] }
 0x12f   :  { %v339_v37 = vadd.f32 %v338_v28, %v263_v35 }
 0x15f   :  { %v549_v38 = vpop.f32.mrb[0].mxu0 }
 0x160   :  { %v1368_v39 = vadd.f32 %v549_v38, %v337_v36  ;;  %v551_v40 = vpop.f32.mrb[1].mxu0  ;;  %v891_v38 = vld [vmem:[%s2417_s11 + $0x8] sm:$0xff] }
 0x161   :  { %v1370_v41 = vadd.f32 %v551_v40, %v339_v37  ;;  %v890_v37 = vld [vmem:[%s2417_s11] sm:$0xff] }
 0x162   :  { %v556_v42 = vrot.slane %v1368_v39, 4  ;;  %v573_v43 = vmul.f32 %v1368_v39, %v1368_v39 }
 0x163   :  { %v574_v44 = vmul.f32 %v1370_v41, %v1370_v41  ;;  %v563_v45 = vsel %vm562_vm1, %v1370_v41, 0.0 }
 0x164   :  { %v557_v46 = vadd.f32 %v1368_v39, %v556_v42  ;;  %v575_v47 = vrot.slane %v573_v43, 4  ;;  %v564_v48 = vrot.slane %v563_v45, 4 }
 0x165   :  { %v581_v49 = vsel %vm562_vm1, %v574_v44, 0.0  ;;  %v894_v44 = vld [vmem:[%s2417_s11 + $0x20] sm:$0xff] }
 0x166   :  { %v558_v50 = vrot.slane %v557_v46, 2  ;;  %v576_v51 = vadd.f32 %v575_v47, %v573_v43  ;;  %v565_v52 = vadd.f32 %v564_v48, %v563_v45  ;;  %v582_v53 = vrot.slane %v581_v49, 4  ;;  %v895_v45 = vld [vmem:[%s2417_s11 + $0x28] sm:$0xff]  ;;  %v896_v47 = vld [vmem:[%s2417_s11 + $0x30] sm:$0xff]  ;;  %v897_v48 = vld [vmem:[%s2417_s11 + $0x38] sm:$0xff] }
 0x167   :  { %v1335_v43 = vpack.c.bf16 %v893_v33, %v892_v31 }
 0x168   :  { %v559_v55 = vadd.f32 %v558_v50, %v557_v46  ;;  %v577_v56 = vrot.slane %v576_v51, 2  ;;  %v566_v58 = vrot.slane %v565_v52, 2  ;;  %v583_v59 = vadd.f32 %v582_v53, %v581_v49  ;;  %v898_v50 = vld [vmem:[%s2417_s11 + $0x40] sm:$0xff]  ;;  %v900_v53 = vld [vmem:[%s2417_s11 + $0x50] sm:$0xff] }
 0x169   :  { %v1338_v46 = vpack.c.bf16 %v895_v45, %v894_v44  ;;  %v1341_v49 = vpack.c.bf16 %v897_v48, %v896_v47 }
 0x16a   :  { %v560_v60 = vrot.slane %v559_v55, 1  ;;  %v578_v61 = vadd.f32 %v577_v56, %v576_v51  ;;  %v567_v62 = vadd.f32 %v566_v58, %v565_v52  ;;  %v584_v63 = vrot.slane %v583_v59, 2  ;;  %v899_v51 = vld [vmem:[%s2417_s11 + $0x48] sm:$0xff]  ;;  %v902_v58 = vld [vmem:[%s2417_s11 + $0x60] sm:$0xff] }
 0x16b   :  { %v1344_v52 = vpack.c.bf16 %v899_v51, %v898_v50 }
 0x16c   :  { %v561_v0 = vadd.f32 %v560_v60, %v559_v55  ;;  %v579_v1 = vrot.slane %v578_v61, 1  ;;  %v568_v2 = vrot.slane %v567_v62, 1  ;;  %v585_v3 = vadd.f32 %v584_v63, %v583_v59  ;;  %v901_v55 = vld [vmem:[%s2417_s11 + $0x58] sm:$0xff]  ;;  %v903_v59 = vld [vmem:[%s2417_s11 + $0x68] sm:$0xff] }
 0x16d   :  { %v1347_v56 = vpack.c.bf16 %v901_v55, %v900_v53  ;;  %v1350_v60 = vpack.c.bf16 %v903_v59, %v902_v58  ;;  %v1027_v59 = vld [vmem:[%s2413_s7] ss:$0 sm:$0xff]  ;;  %s1420_s7 = smov [#allocation2]  }
 0x16e   :  { %v571_v4 = vmul.f32 0.125, %v561_v0  ;;  %v580_v5 = vadd.f32 %v579_v1, %v578_v61  ;;  %v569_v6 = vadd.f32 %v568_v2, %v567_v62  ;;  %v586_v7 = vrot.slane %v585_v3, 1  ;;  %v904_v61 = vld [vmem:[%s2417_s11 + $0x70] sm:$0xff]  ;;  %v905_v62 = vld [vmem:[%s2417_s11 + $0x78] sm:$0xff]  ;;  %v906_v0 = vld [vmem:[%s2417_s11 + $0x80] sm:$0xff] }
 0x16f   :  { %v1353_v63 = vpack.c.bf16 %v905_v62, %v904_v61  ;;  %v907_v1 = vld [vmem:[%s2417_s11 + $0x88] sm:$0xff]  ;;  %v1028_v61 = vld [vmem:[%s2414_s8] ss:$0 sm:$0xff]  ;;  %s1012_s8 = sshll.u32 %s1420_s7, 4  ;;  %s1013_s8 = int_to_ptr.vmem [resolvable:$true] %s1012_s8 }
 0x170   :  { %v588_v8 = vmul.f32 0.125, %v580_v5  ;;  %v590_v9 = vmul.f32 %v571_v4, %v571_v4  ;;  %v572_v10 = vmul.f32 0.125, %v569_v6  ;;  %v587_v11 = vadd.f32 %v586_v7, %v585_v3  ;;  %v908_v3 = vld [vmem:[%s2417_s11 + $0x90] sm:$0xff]  ;;  %v910_v6 = vld [vmem:[%s2417_s11 + $0xa0] sm:$0xff]  ;;  %v911_v7 = vld [vmem:[%s2417_s11 + $0xa8] sm:$0xff]  ;;  %p1398_p1 = scmp.lt.s32.totalorder %s1013_s8, %s1013_s8 }
 0x171   :  { %v596_v22 = vsub.f32 %v1368_v39, %v571_v4  ;;  %v1356_v2 = vpack.c.bf16 %v907_v1, %v906_v0  ;;  %v909_v4 = vld [vmem:[%s2417_s11 + $0x98] sm:$0xff] }
 0x172   :  { %v592_v12 = vsub.f32 %v588_v8, %v590_v9  ;;  %v591_v13 = vmul.f32 %v572_v10, %v572_v10  ;;  %v589_v14 = vmul.f32 0.125, %v587_v11  ;;  %v597_v27 = vsub.f32 %v1370_v41, %v572_v10  ;;  %v912_v9 = vld [vmem:[%s2417_s11 + $0xb0] sm:$0xff]  ;;  %v913_v10 = vld [vmem:[%s2417_s11 + $0xb8] sm:$0xff] }
 0x173   :  { %v1332_v41 = vpack.c.bf16 %v891_v38, %v890_v37  ;;  %v1359_v5 = vpack.c.bf16 %v909_v4, %v908_v3  ;;  %v1362_v8 = vpack.c.bf16 %v911_v7, %v910_v6  ;;  %v1365_v11 = vpack.c.bf16 %v913_v10, %v912_v9  ;;  %v1029_v3 = vld [vmem:[%s2416_s10] ss:$0 sm:$0xff]  ;;  %s1393_s10 = scalar_lea.vmem %s1013_s8, 128 }
 0x174   :  { %v594_v15 = vmax.f32 %v592_v12, 0.0  ;;  %v593_v16 = vsub.f32 %v589_v14, %v591_v13  ;;  %v914_v12 = vld [vmem:[%s2417_s11 + $0xc0] sm:$0xff]  ;;  %v780_v14 = vld [vmem:[%s2415_s9 + $0x8] sm:$0xff]  ;;  %p1394_p0 = scmp.ne.s32.totalorder %s1013_s8, %s1393_s10  ;;  %p1399_p2 = scmp.lt.s32.totalorder %s1393_s10, %s1393_s10 }
 0x175   :  { %v779_v13 = vld [vmem:[%s2415_s9] sm:$0xff] }
 0x176   :  { %v598_v17 = vadd.f32 1e-05, %v594_v15  ;;  %v595_v18 = vmax.f32 %v593_v16, 0.0  ;;  %v1314_v15 = vpack.c.bf16 %v780_v14, %v779_v13  ;;  %v781_v16 = vld [vmem:[%s2415_s9 + $0x10] sm:$0xff]  ;;  %v1032_v4 = vld [vmem:[%s2418_s12] ss:$0 sm:$0xff]  ;;  %p1400_p3 = por %p1399_p2, %p1398_p1 }
 0x178   :  { %1379 = vrsqrt.f32 %v598_v17  ;;  %v599_v19 = vadd.f32 1e-05, %v595_v18  ;;  %1315 = vmatpush3.bf16.msra.mxu0 %v1314_v15  ;;  %v782_v17 = vld [vmem:[%s2415_s9 + $0x18] sm:$0xff]  ;;  %p1401_p4 = pnand %p1400_p3, %p1394_p0 }
 0x179   :  { %1316 = vmatprep.subr.bf16.mxu0 %v1417_v57  ;;  %v1317_v18 = vpack.c.bf16 %v782_v17, %v781_v16 }
 0x17a   :  { %1381 = vrsqrt.f32 %v599_v19  ;;  %v783_v19 = vld [vmem:[%s2415_s9 + $0x20] sm:$0xff] }
 0x17c   :  { %1318 = vmatpush3.bf16.msra.mxu0 %v1317_v18 }
 0x17d   :  { %1319 = vmatprep.subr.bf16.mxu0 %v1417_v57 }
 0x182   :  { %v1380_v23 = vpop.eup %1379 }
 0x183   :  { %v602_v25 = vmul.f32 %v1380_v23, %v596_v22  ;;  %v785_v22 = vld [vmem:[%s2415_s9 + $0x30] sm:$0xff]  ;;  %v786_v23 = vld [vmem:[%s2415_s9 + $0x38] sm:$0xff] }
 0x184   :  { %v1382_v28 = vpop.eup %1381  ;;  %v1323_v24 = vpack.c.bf16 %v786_v23, %v785_v22 }
 0x185   :  { %v615_v29 = vmul.f32 %v608_v21, %v602_v25  ;;  %v603_v32 = vmul.f32 %v1382_v28, %v597_v27  ;;  %v1320_v21 = vpack.c.bf16 %v784_v20, %v783_v19  ;;  %v787_v25 = vld [vmem:[%s2415_s9 + $0x40] sm:$0xff]  ;;  %v789_v28 = vld [vmem:[%s2415_s9 + $0x50] sm:$0xff] }
 0x187   :  { %v616_v35 = vmul.f32 %v612_v26, %v603_v32  ;;  %v2229_v36 = vadd.f32 %v621_v30, %v615_v29  ;;  %1321 = vmatpush3.bf16.msra.mxu0 %v1320_v21  ;;  %v788_v26 = vld [vmem:[%s2415_s9 + $0x48] sm:$0xff]  ;;  %v790_v29 = vld [vmem:[%s2415_s9 + $0x58] sm:$0xff]  ;;  %v791_v32 = vld [vmem:[%s2415_s9 + $0x60] sm:$0xf] }
 0x188   :  { %1322 = vmatprep.subr.bf16.mxu0 %v1417_v57  ;;  %v1326_v27 = vpack.c.bf16 %v788_v26, %v787_v25  ;;  %v1329_v30 = vpack.c.bf16 %v790_v29, %v789_v28 }
 0x189   :  { %v629_v39 = vadd.f32 %v625_v34, %v616_v35  ;;  %v630_v42 = vmax.f32 %v2229_v36, 0.0 }
 0x18b   :  { %v631_v40 = vmax.f32 %v629_v39, 0.0  ;;  %1324 = vmatpush3.bf16.msra.mxu0 %v1323_v24 }
 0x18c   :  { %1325 = vmatprep.subr.bf16.mxu0 %v1417_v57 }
 0x18d   :  { %1026 = vmatprep.mubr.msk.f32.mxu1 %vm562_vm1, %v631_v40 }
 0x18e   :  { %732 = vmatmul.mubr.f32.vlgmr.msra.gmra.mrb[2].mxu1 %v630_v42 }
 0x18f   :  { %1333 = vmatpush1.bf16.msra.mxu1 %v1332_v41  ;;  %1033 = vmatprep.mubr.msk.f32.mxu1 %vm562_vm1, %v631_v40 }
 0x190   :  { %1334 = vmatprep.subr.bf16.mxu1 %v1417_v57  ;;  %1327 = vmatpush3.bf16.msra.mxu0 %v1326_v27 }
 0x191   :  { %1328 = vmatprep.subr.bf16.mxu0 %v1417_v57 }
 0x193   :  { %1336 = vmatpush1.bf16.msra.mxu1 %v1335_v43 }
 0x194   :  { %1337 = vmatprep.subr.bf16.mxu1 %v1417_v57  ;;  %1330 = vmatpush3.bf16.msra.mxu0 %v1329_v30 }
 0x195   :  { %1072 = vmatprep.subr.mxu0 %v1418_v54 }
 0x197   :  { %1339 = vmatpush1.bf16.msra.mxu1 %v1338_v46 }
 0x198   :  { %1340 = vmatprep.subr.bf16.mxu1 %v1417_v57  ;;  %1073 = vmatpush3.msk.msra.mxu0 %vm802_vm2, %v791_v32 }
 0x19b   :  { %1342 = vmatpush1.bf16.msra.mxu1 %v1341_v49 }
 0x19c   :  { %1343 = vmatprep.subr.bf16.mxu1 %v1417_v57 }
 0x19f   :  { %1345 = vmatpush1.bf16.msra.mxu1 %v1344_v52 }
 0x1a0   :  { %1346 = vmatprep.subr.bf16.mxu1 %v1417_v57 }
 0x1a3   :  { %1348 = vmatpush1.bf16.msra.mxu1 %v1347_v56 }
 0x1a4   :  { %1349 = vmatprep.subr.bf16.mxu1 %v1417_v57 }
 0x1a7   :  { %1351 = vmatpush1.bf16.msra.mxu1 %v1350_v60 }
 0x1a8   :  { %1352 = vmatprep.subr.bf16.mxu1 %v1417_v57 }
 0x1ab   :  { %1354 = vmatpush1.bf16.msra.mxu1 %v1353_v63 }
 0x1ac   :  { %1355 = vmatprep.subr.bf16.mxu1 %v1417_v57 }
 0x1af   :  { %1357 = vmatpush1.bf16.msra.mxu1 %v1356_v2 }
 0x1b0   :  { %1358 = vmatprep.subr.bf16.mxu1 %v1417_v57 }
 0x1b3   :  { %1360 = vmatpush1.bf16.msra.mxu1 %v1359_v5 }
 0x1b4   :  { %1361 = vmatprep.subr.bf16.mxu1 %v1417_v57 }
 0x1b7   :  { %1363 = vmatpush1.bf16.msra.mxu1 %v1362_v8 }
 0x1b8   :  { %1364 = vmatprep.subr.bf16.mxu1 %v1417_v57  ;;  %v1025_v57 = vld [vmem:[%s2412_s6] ss:$0 sm:$0xff] }
 0x1bb   :  { %1366 = vmatpush1.bf16.msra.mxu1 %v1365_v11 }
 0x1bc   :  { %970 = vmatprep.subr.mxu1 %v1418_v54 }
 0x1bf   :  { %971 = vmatpush1.msra.mxu1 %v914_v12 }
 0x1c0   :  { %987 = vmatmul.mubr.f32.vlgmr.msra.gmra.mrb[4].mxu1 %v630_v42 }
 0x261   :  { %v733_v34 = vpop.f32.mrb[2].mxu1 }
 0x262   :  { %v734_v35 = vadd.f32 %v1025_v57, %v733_v34  ;;  %v735_v36 = vpop.f32.mrb[3].mxu1 }
 0x264   :  { %v740_v37 = vsel %vm739_vm4, %v734_v35, 0.0  ;;  %v748_v38 = vmul.f32 %v734_v35, %v734_v35 }
 0x265   :  { %v741_v39 = vrot.slane %v740_v37, 4 }
 0x266   :  { %v749_v40 = vsel %vm739_vm4, %v748_v38, 0.0 }
 0x267   :  { %v742_v41 = vadd.f32 %v741_v39, %v740_v37  ;;  %v750_v42 = vrot.slane %v749_v40, 4 }
 0x269   :  { %v743_v31 = vrot.slane %v742_v41, 2  ;;  %v751_v33 = vadd.f32 %v750_v42, %v749_v40 }
 0x26b   :  { %v744_v54 = vadd.f32 %v743_v31, %v742_v41  ;;  %v752_v43 = vrot.slane %v751_v33, 2 }
 0x26d   :  { %v745_v44 = vrot.slane %v744_v54, 1  ;;  %v753_v45 = vadd.f32 %v752_v43, %v751_v33 }
 0x26f   :  { %v746_v46 = vadd.f32 %v745_v44, %v744_v54  ;;  %v754_v47 = vrot.slane %v753_v45, 1 }
 0x271   :  { %v747_v48 = vmul.f32 0.125, %v746_v46  ;;  %v755_v49 = vadd.f32 %v754_v47, %v753_v45 }
 0x273   :  { %v756_v50 = vmul.f32 0.125, %v755_v49  ;;  %v757_v51 = vmul.f32 %v747_v48, %v747_v48  ;;  %v760_v56 = vsub.f32 %v734_v35, %v747_v48 }
 0x275   :  { %v758_v52 = vsub.f32 %v756_v50, %v757_v51 }
 0x277   :  { %v759_v53 = vmax.f32 %v758_v52, 0.0 }
 0x279   :  { %v761_v55 = vadd.f32 1e-05, %v759_v53 }
 0x27b   :  { %1383 = vrsqrt.f32 %v761_v55 }
 0x285   :  { %v1384_v58 = vpop.eup %1383 }
 0x286   :  { %v763_v60 = vmul.f32 %v1384_v58, %v760_v56 }
 0x288   :  { %v770_v62 = vmul.f32 %v1027_v59, %v763_v60 }
 0x28a   :  { %v777_v63 = vadd.f32 %v1028_v61, %v770_v62 }
 0x28c   :  { %v778_v0 = vmax.f32 %v777_v63, 0.0 }
 0x28e   :  { %1075 = vmatmul.mubr.msk.f32.vlgmr.msra.gmra.mrb[2].mxu0 %vm739_vm4, %v778_v0 }
 0x293   :  { %v988_v1 = vpop.f32.mrb[4].mxu1 }
 0x294   :  { %v990_v2 = vpop.f32.mrb[5].mxu1  ;;  %v989_v8 = vadd.f32 %v1032_v4, %v988_v1 }
 0x296   :  { %v993_v10 = vsel %vm992_vm6, %v989_v8, -inf }
 0x361   :  { %v872_v5 = vpop.f32.mrb[2].mxu0 }
 0x362   :  { %v873_v6 = vadd.f32 %v1029_v3, %v872_v5  ;;  %v1076_v7 = vpop.f32.mrb[3].mxu0 }
 0x364   :  { %v877_v9 = vsel %vm876_vm5, %v873_v6, -inf }
 0x365   :  { %878 = vmax.xlane.f32.xlu0 %v877_v9 }
 0x369   :  { %994 = vmax.xlane.f32.xlu0 %v993_v10 }
 0x3f2   :  { %v879_v11 = vpop.xlane.xlu0 %878 }
 0x3f3   :  { %v880_v12 = vsub.f32 %v873_v6, %v879_v11 }
 0x3f5   :  { %v881_v13 = vmul.f32 1.442695, %v880_v12 }
 0x3f6   :  { %v995_v14 = vpop.xlane.xlu0 %994 }
 0x3f7   :  { %1385 = vpow2.f32 %v881_v13  ;;  %v996_v15 = vsub.f32 %v989_v8, %v995_v14 }
 0x3f9   :  { %v997_v16 = vmul.f32 1.442695, %v996_v15 }
 0x3fb   :  { %1387 = vpow2.f32 %v997_v16 }
 0x401   :  { %v1386_v17 = vpop.eup %1385 }
 0x402   :  { %v883_v18 = vsel %vm876_vm5, %v1386_v17, 0.0 }
 0x403   :  { %884 = vadd.xlane.f32.xlu1 %v883_v18 }
 0x405   :  { %v1388_v19 = vpop.eup %1387 }
 0x406   :  { %v999_v20 = vsel %vm992_vm6, %v1388_v19, 0.0 }
 0x407   :  { %1000 = vadd.xlane.f32.xlu1 %v999_v20 }
 0x490   :  { %v885_v21 = vpop.xlane.xlu1 %884 }
 0x491   :  { %1389 = vlog2.f32 %v885_v21 }
 0x494   :  { %v1001_v22 = vpop.xlane.xlu1 %1000 }
 0x495   :  { %1391 = vlog2.f32 %v1001_v22 }
 0x49b   :  { %v1390_v23 = vpop.eup %1389 }
 0x49c   :  { %v887_v24 = vmul.f32 0.6931472, %v1390_v23 }
 0x49e   :  { %v888_v25 = vsub.f32 %v880_v12, %v887_v24 }
 0x49f   :  { %v1392_v26 = vpop.eup %1391 }
 0x4a0   :  { %v1003_v27 = vmul.f32 0.6931472, %v1392_v26  ;;  %889 = vst.msk [vmem:[#allocation2] sm:$0xff] %vm876_vm5, %v888_v25 }
 0x4a1   :  { %1404 = shalt.err (!%p1401_p4)
}
 0x4a2   :  { %s1405_s24 = scalar_lea.hbm %s2419_s13, 128 }
 0x4a3   :  { %p1406_p5 = scmp.ne.s32.totalorder %s2419_s13, %s1405_s24  ;;  %p1409_p6 = scmp.lt.u32.totalorder %s1405_s24, %s2419_s13 }
 0x4a5   :  { %p1411_p7 = pnand %p1409_p6, %p1406_p5 }
 0x4a7   :  { %1414 = shalt.err (!%p1411_p7)
}
 0x4a8   :  { %1015 = dma.vmem_to_hbm [thread:$0]  %s1013_s8, 128, %s2419_s13, [#allocation3]   ;;  %v1004_v28 = vsub.f32 %v996_v15, %v1003_v27 }
 0x4aa   :  { %1005 = vst.msk [vmem:[%s2420_s14] sm:$0xff] %vm992_vm6, %v1004_v28 }
 0x4ab   :  { %1415 = dma.done.wait [#allocation3], 128  }
 0x4ac   :  { %1416 = vsyncadd [#allocation3], 4294967168 }
 0x4ad   :  { %1023 = vsyncpa [#allocation3], 1 }

</bundles_post_ra>
